<compile_context>
chip_gen: v6e
topology: v6e:2x2x1
jax: 0.10.0
libtpu: 0.0.40
codegen_flags: <defaults>
</compile_context>

<pallas_src>
import functools

import jax
import jax.numpy as jnp
from jax.experimental import pallas as pl
from jax.experimental.pallas import tpu as pltpu

LEAKY_SLOPE = 0.01
VMEM_LIMIT = 32 * 1024 * 1024


def _round_up(x, m):
    return (x + m - 1) // m * m


# --------------------------------------------------------------------------
# Pallas kernel 1: stride-1 2x2x2 conv, taps accumulated in-kernel.
# Each grid step computes one flattened (y,x) output plane for one (batch, z).
# --------------------------------------------------------------------------
def _conv2_kernel(x0_ref, x1_ref, w_ref, b_ref, o_ref, *, wp, neg_slope, apply_act):
    """x0_ref/x1_ref: [RIN, C] bf16  input planes z and z+1, row = y*wp + x
       w_ref:         [8, C, N] bf16 per-tap weights, tap = ((az*2+ay)*2+ax)
       b_ref:         [1, N] f32
       o_ref:         [RO, N] f32    output plane, row = y*wp + x
    """
    ro = o_ref.shape[0]
    offs = (0, 1, wp, wp + 1)            # (ay, ax) = (0,0),(0,1),(1,0),(1,1)
    planes = (x0_ref, x1_ref)
    first = True
    for az in range(2):
        for i, off in enumerate(offs):
            contrib = jnp.dot(planes[az][off:off + ro, :],
                              w_ref[4 * az + i],
                              preferred_element_type=jnp.float32)
            if first:
                o_ref[...] = contrib
                first = False
            else:
                o_ref[...] += contrib
    y = o_ref[...] + b_ref[...]
    if apply_act:
        y = jnp.where(y >= 0, y, neg_slope * y)
    o_ref[...] = y


def conv2x2x2_s1(xs, w2, b2, *, apply_act, neg_slope=LEAKY_SLOPE):
    """'Valid' stride-1 2x2x2 conv: xs [B,DP,HP,WP,C] -> [B,DP-1,HP-1,WP-1,N]."""
    B, DP, HP, WP, C = xs.shape
    N = w2.shape[-1]
    DO, HO, WO = DP - 1, HP - 1, WP - 1
    RO = _round_up(HO * WP, 8)                 # output rows (junk at x == WO)
    RIN = _round_up(RO + WP + 1, 8)            # padded input rows per plane

    xf = xs.astype(jnp.bfloat16).reshape(B, DP, HP * WP, C)
    xf = jnp.pad(xf, ((0, 0), (0, 0), (0, RIN - HP * WP), (0, 0)))

    kernel = functools.partial(_conv2_kernel, wp=WP, neg_slope=neg_slope,
                               apply_act=apply_act)
    out = pl.pallas_call(
        kernel,
        out_shape=jax.ShapeDtypeStruct((B, DO, RO, N), jnp.float32),
        grid_spec=pltpu.PrefetchScalarGridSpec(
            num_scalar_prefetch=0,
            grid=(B, DO),
            in_specs=[
                pl.BlockSpec((None, None, RIN, C), lambda b, z: (b, z, 0, 0)),
                pl.BlockSpec((None, None, RIN, C), lambda b, z: (b, z + 1, 0, 0)),
                pl.BlockSpec((8, C, N), lambda b, z: (0, 0, 0)),
                pl.BlockSpec((1, N), lambda b, z: (0, 0)),
            ],
            out_specs=pl.BlockSpec((None, None, RO, N), lambda b, z: (b, z, 0, 0)),
        ),
        compiler_params=pltpu.CompilerParams(
            dimension_semantics=("parallel", "parallel"),
            vmem_limit_bytes=VMEM_LIMIT,
        ),
    )(xf, xf, w2, b2)
    # un-flatten the (y, x) plane and drop the junk x == WO column
    out = out[:, :, : HO * WP, :].reshape(B, DO, HO, WP, N)[:, :, :, :WO, :]
    return out


# --------------------------------------------------------------------------
# Pallas kernel 2: M/N/K-tiled matmul + bias (+LeakyReLU) (+fused row L2 norm)
# Accumulates in f32 directly in the output block (resident across K).
# --------------------------------------------------------------------------
def _mm_kernel(x_ref, w_ref, b_ref, o_ref, *, neg_slope, apply_act, l2norm):
    k = pl.program_id(2)

    @pl.when(k == 0)
    def _():
        o_ref[...] = jnp.zeros_like(o_ref)

    o_ref[...] += jnp.dot(x_ref[...], w_ref[...],
                          preferred_element_type=jnp.float32)

    @pl.when(k == pl.num_programs(2) - 1)
    def _():
        y = o_ref[...] + b_ref[...]
        if apply_act:
            y = jnp.where(y >= 0, y, neg_slope * y)
        if l2norm:
            # padded channels are exactly 0, so the sum equals the true norm
            ssq = jnp.sum(y * y, axis=-1, keepdims=True)
            y = y * jax.lax.rsqrt(jnp.maximum(ssq, 1e-24))
        o_ref[...] = y


def matmul_bias_act(x, w, b, *, apply_act, l2norm=False, neg_slope=LEAKY_SLOPE):
    """x: [M,K] float, w: [Kp,Np] bf16 (pre-padded), b: [1,Np] f32 -> [M,Np] f32."""
    M, K = x.shape
    Kp, Np = w.shape
    x = x.astype(jnp.bfloat16)
    if Kp > K:
        x = jnp.pad(x, ((0, 0), (0, Kp - K)))
    TM = min(512, _round_up(M, 8))
    Mp = _round_up(M, TM)
    if Mp > M:
        x = jnp.pad(x, ((0, Mp - M), (0, 0)))
    TK = 256 if Kp % 256 == 0 else 128
    TN = Np if l2norm else (256 if Np % 256 == 0 else 128)

    kernel = functools.partial(_mm_kernel, neg_slope=neg_slope,
                               apply_act=apply_act, l2norm=l2norm)
    out = pl.pallas_call(
        kernel,
        out_shape=jax.ShapeDtypeStruct((Mp, Np), jnp.float32),
        grid_spec=pltpu.PrefetchScalarGridSpec(
            num_scalar_prefetch=0,
            grid=(Mp // TM, Np // TN, Kp // TK),
            in_specs=[
                pl.BlockSpec((TM, TK), lambda i, j, k: (i, k)),
                pl.BlockSpec((TK, TN), lambda i, j, k: (k, j)),
                pl.BlockSpec((1, TN), lambda i, j, k: (0, j)),
            ],
            out_specs=pl.BlockSpec((TM, TN), lambda i, j, k: (i, j)),
        ),
        compiler_params=pltpu.CompilerParams(
            dimension_semantics=("parallel", "parallel", "arbitrary"),
            vmem_limit_bytes=VMEM_LIMIT,
        ),
    )(x, w, b)
    return out[:M, :]


# --------------------------------------------------------------------------
# Conv3d(k=4,s=2,p=1) / ConvTranspose3d(k=4,s=2,p=1) on top of the 2x2x2 kernel
# --------------------------------------------------------------------------
def down_conv3d_s2(x, w2, b2, cout):
    """Conv3d(k=4, s=2, p=1) + LeakyReLU via space-to-depth + 2x2x2 conv."""
    B, D, H, W, cin = x.shape
    xp = jnp.pad(x, ((0, 0), (1, 1), (1, 1), (1, 1), (0, 0)))
    dq, hq, wq = (D + 2) // 2, (H + 2) // 2, (W + 2) // 2
    xs = xp.reshape(B, dq, 2, hq, 2, wq, 2, cin)
    xs = xs.transpose(0, 1, 3, 5, 2, 4, 6, 7).reshape(B, dq, hq, wq, 8 * cin)
    y = conv2x2x2_s1(xs, w2, b2, apply_act=True)       # [B, D/2, H/2, W/2, Npad]
    return y[..., :cout]


def up_convtranspose3d_s2(x, wu, bu, cout):
    """ConvTranspose3d(k=4,s=2,p=1) + LeakyReLU via sub-pixel decomposition:
    one 2x2x2 stride-1 conv producing 8*cout parity channels, then
    depth-to-space (no dilated zero tensor, 8x fewer MXU FLOPs)."""
    B, d, h, w, cin = x.shape
    xp = jnp.pad(x, ((0, 0), (1, 1), (1, 1), (1, 1), (0, 0)))
    y = conv2x2x2_s1(xp, wu, bu, apply_act=True)       # [B, d+1, h+1, w+1, 8*cout]
    y = y.reshape(B, d + 1, h + 1, w + 1, 2, 2, 2, cout)
    y = y.transpose(0, 1, 4, 2, 5, 3, 6, 7).reshape(
        B, 2 * (d + 1), 2 * (h + 1), 2 * (w + 1), cout)
    return y[:, 1:2 * d + 1, 1:2 * h + 1, 1:2 * w + 1, :]


# --------------------------------------------------------------------------
# Parameters: synthetic init in PyTorch conv layout, pre-reordered / padded /
# cast to bf16 ONCE (no per-forward weight reshaping or padding).
# --------------------------------------------------------------------------
def _prep_down(w, b):
    """Conv weight [4,4,4,cin,cout] -> per-tap [8, 8*cin, Npad] bf16 (+ bias)."""
    cin, cout = w.shape[3], w.shape[4]
    w6 = w.reshape(2, 2, 2, 2, 2, 2, cin, cout)        # (ad, rd, ah, rh, aw, rw, ci, co)
    w2 = w6.transpose(0, 2, 4, 1, 3, 5, 6, 7).reshape(8, 8 * cin, cout)
    npad = _round_up(cout, 128)
    w2 = jnp.pad(w2, ((0, 0), (0, 0), (0, npad - cout))).astype(jnp.bfloat16)
    b2 = jnp.pad(b, (0, npad - cout)).reshape(1, npad).astype(jnp.float32)
    return {"w": w2, "b": b2}


def _prep_up(wf, b):
    """Equivalent-conv ConvTranspose3d weight [4,4,4,cin,cout] (spatially flipped,
    channel-swapped) -> sub-pixel weight [8, cin, 8*cout] bf16 (+ tiled bias)."""
    cin, cout = wf.shape[3], wf.shape[4]
    assert (8 * cout) % 128 == 0
    w6 = wf.reshape(2, 2, 2, 2, 2, 2, cin, cout)       # (ad, rd, ah, rh, aw, rw, ci, co)
    w6 = w6[:, ::-1, :, ::-1, :, ::-1, :, :]           # tap parity r -> output parity q
    wu = w6.transpose(0, 2, 4, 6, 1, 3, 5, 7).reshape(8, cin, 8 * cout)
    wu = wu.astype(jnp.bfloat16)
    bu = jnp.tile(b, 8).reshape(1, 8 * cout).astype(jnp.float32)
    return {"w": wu, "b": bu}


def _prep_final(w, b):
    """1x1x1 conv weight [1,1,1,cin,cout] -> padded [Kp, Np] bf16 matmul weight."""
    cin, cout = w.shape[3], w.shape[4]
    kp, npad = _round_up(cin, 128), _round_up(cout, 128)
    w2 = jnp.pad(w.reshape(cin, cout),
                 ((0, kp - cin), (0, npad - cout))).astype(jnp.bfloat16)
    b2 = jnp.pad(b, (0, npad - cout)).reshape(1, npad).astype(jnp.float32)
    return {"w": w2, "b": b2}


def init_params(key, in_channel=4, pred_dim=32, chans=16):
    # original encoder3D default is chans=32; we use 16 to keep the demo small
    k = 4
    down_dims = [(in_channel, chans), (chans, 2 * chans), (2 * chans, 4 * chans)]
    up_dims = [(4 * chans, 4 * chans), (6 * chans, 2 * chans)]
    final_dims = (3 * chans, pred_dim)

    def _conv_init(key, kk, cin, cout):
        fan_in = cin * kk ** 3
        w = jax.random.normal(key, (kk, kk, kk, cin, cout), jnp.float32)
        return w * (2.0 / fan_in) ** 0.5, jnp.zeros((cout,), jnp.float32)

    params = {"down": [], "up": []}
    for cin, cout in down_dims:
        key, sub = jax.random.split(key)
        params["down"].append(_prep_down(*_conv_init(sub, k, cin, cout)))
    for cin, cout in up_dims:
        key, sub = jax.random.split(key)
        params["up"].append(_prep_up(*_conv_init(sub, k, cin, cout)))
    key, sub = jax.random.split(key)
    params["final"] = _prep_final(*_conv_init(sub, 1, *final_dims))
    return params


# --------------------------------------------------------------------------
# FeatNet.forward
# --------------------------------------------------------------------------
def featnet_forward(params, feat_ncdhw, *, chans, pred_dim):
    """feat: [B, 4, D, H, W] f32 -> (l2-normalized feat [B, pred_dim, D/2, H/2, W/2], 0)."""
    total_loss = jnp.float32(0.0)

    x = jnp.transpose(feat_ncdhw, (0, 2, 3, 4, 1)).astype(jnp.float32)  # NCDHW -> NDHWC

    down_couts = (chans, 2 * chans, 4 * chans)
    up_couts = (4 * chans, 2 * chans)

    skips = []
    for layer, cout in zip(params["down"], down_couts):
        x = down_conv3d_s2(x, layer["w"], layer["b"], cout)
        skips.append(x)
    skips.pop()  # innermost layer is not used as a skip connection

    for layer, cout in zip(params["up"], up_couts):
        x = up_convtranspose3d_s2(x, layer["w"], layer["b"], cout)
        x = jnp.concatenate([x, skips.pop()], axis=-1)

    # final 1x1x1 conv (no activation) with the channel-wise L2 normalization
    # fused into the matmul epilogue.
    fin = params["final"]
    B, D, H, W, C = x.shape
    y = matmul_bias_act(x.reshape(B * D * H * W, C), fin["w"], fin["b"],
                        apply_act=False, l2norm=True)
    y = y[:, :pred_dim].reshape(B, D, H, W, pred_dim)
    out = jnp.transpose(y, (0, 4, 1, 2, 3))  # back to NCDHW
    return out, total_loss


if __name__ == "__main__":
    FEAT_DIM = 32   # hyp.feat_dim
    CHANS = 16

    key = jax.random.PRNGKey(0)
    pkey, xkey = jax.random.split(key)
    params = init_params(pkey, in_channel=4, pred_dim=FEAT_DIM, chans=CHANS)

    # NCDHW input: B=2, C=4, D=H=W=16 (spatial must be divisible by 8)
    feat = jax.random.normal(xkey, (2, 4, 16, 16, 16), jnp.float32)

    fwd = jax.jit(functools.partial(featnet_forward, chans=CHANS, pred_dim=FEAT_DIM))
    out, loss = fwd(params, feat)
    jax.block_until_ready(out)
    jax.block_until_ready(loss)

    assert out.shape == (2, FEAT_DIM, 8, 8, 8), out.shape
    assert out.dtype == jnp.float32
    # channel-wise L2 norm should be ~1 everywhere
    norms = jnp.sqrt(jnp.sum(out * out, axis=1))
    assert bool(jnp.allclose(norms, 1.0, atol=1e-4)), float(jnp.max(jnp.abs(norms - 1.0)))
    assert float(loss) == 0.0

    print("KERNEL_OK")
</pallas_src>

<mosaic_0001>
module attributes {stable_mosaic.version = 11 : i64} {
  func.func @_conv2_kernel(%arg0: i32, %arg1: i32, %arg2: memref<1x1x88x32xbf16, #tpu.memory_space<vmem>>, %arg3: memref<1x1x88x32xbf16, #tpu.memory_space<vmem>>, %arg4: memref<8x32x128xbf16, #tpu.memory_space<vmem>>, %arg5: memref<1x128xf32, #tpu.memory_space<vmem>>, %arg6: memref<1x1x72x128xf32, #tpu.memory_space<vmem>>) attributes {dimension_semantics = [#tpu.dimension_semantics<parallel>, #tpu.dimension_semantics<parallel>], iteration_bounds = array<i64: 2, 8>, scalar_prefetch = 0 : i64, scratch_operands = 0 : i64, tpu.core_type = #tpu.core_type<tc>, window_params = [{transform_indices = @transform_0, window_bounds = array<i64: 1, 1, 88, 32>}, {transform_indices = @transform_1, window_bounds = array<i64: 1, 1, 88, 32>}, {pipeline_mode = #tpu.pipeline_mode<synchronous>, transform_indices = @transform_2, window_bounds = array<i64: 8, 32, 128>}, {pipeline_mode = #tpu.pipeline_mode<synchronous>, transform_indices = @transform_3, window_bounds = array<i64: 1, 128>}, {transform_indices = @transform_4, window_bounds = array<i64: 1, 1, 72, 128>}]} {
    %c0 = arith.constant 0 : index
    %c0_0 = arith.constant 0 : index
    %c0_1 = arith.constant 0 : index
    %c0_2 = arith.constant 0 : index
    %0 = vector.load %arg2[%c0, %c0_0, %c0_1, %c0_2] : memref<1x1x88x32xbf16, #tpu.memory_space<vmem>>, vector<1x1x72x32xbf16>
    %1 = vector.shape_cast %0 : vector<1x1x72x32xbf16> to vector<72x32xbf16>
    %c0_3 = arith.constant 0 : index
    %c0_4 = arith.constant 0 : index
    %c0_5 = arith.constant 0 : index
    %2 = vector.load %arg4[%c0_3, %c0_4, %c0_5] : memref<8x32x128xbf16, #tpu.memory_space<vmem>>, vector<1x32x128xbf16>
    %3 = vector.shape_cast %2 : vector<1x32x128xbf16> to vector<32x128xbf16>
    %cst = arith.constant dense<0.000000e+00> : vector<72x128xf32>
    %4 = tpu.matmul %1, %3, %cst {dimension_numbers = #tpu.dot_dimension_numbers<[1], [0], [0], [1], [0, 0, 1, 1], [], []>} : vector<72x32xbf16>, vector<32x128xbf16>, vector<72x128xf32> -> vector<72x128xf32>
    %c0_6 = arith.constant 0 : index
    %c0_7 = arith.constant 0 : index
    %c0_8 = arith.constant 0 : index
    %c0_9 = arith.constant 0 : index
    %5 = vector.load %arg6[%c0_6, %c0_7, %c0_8, %c0_9] : memref<1x1x72x128xf32, #tpu.memory_space<vmem>>, vector<1x1x72x128xf32>
    %6 = vector.shape_cast %5 : vector<1x1x72x128xf32> to vector<72x128xf32>
    %7 = vector.shape_cast %4 : vector<72x128xf32> to vector<1x1x72x128xf32>
    tpu.vector_store %arg6[%c0_6, %c0_7, %c0_8, %c0_9], %7 {strides = array<i32>} : memref<1x1x72x128xf32, #tpu.memory_space<vmem>>, vector<1x1x72x128xf32>,
    %c0_10 = arith.constant 0 : index
    %c0_11 = arith.constant 0 : index
    %c1 = arith.constant 1 : index
    %c0_12 = arith.constant 0 : index
    %8 = vector.load %arg2[%c0_10, %c0_11, %c1, %c0_12] : memref<1x1x88x32xbf16, #tpu.memory_space<vmem>>, vector<1x1x72x32xbf16>
    %9 = vector.shape_cast %8 : vector<1x1x72x32xbf16> to vector<72x32xbf16>
    %c1_13 = arith.constant 1 : index
    %c0_14 = arith.constant 0 : index
    %c0_15 = arith.constant 0 : index
    %10 = vector.load %arg4[%c1_13, %c0_14, %c0_15] : memref<8x32x128xbf16, #tpu.memory_space<vmem>>, vector<1x32x128xbf16>
    %11 = vector.shape_cast %10 : vector<1x32x128xbf16> to vector<32x128xbf16>
    %cst_16 = arith.constant dense<0.000000e+00> : vector<72x128xf32>
    %12 = tpu.matmul %9, %11, %cst_16 {dimension_numbers = #tpu.dot_dimension_numbers<[1], [0], [0], [1], [0, 0, 1, 1], [], []>} : vector<72x32xbf16>, vector<32x128xbf16>, vector<72x128xf32> -> vector<72x128xf32>
    %c0_17 = arith.constant 0 : index
    %c0_18 = arith.constant 0 : index
    %c0_19 = arith.constant 0 : index
    %c0_20 = arith.constant 0 : index
    %13 = vector.load %arg6[%c0_17, %c0_18, %c0_19, %c0_20] : memref<1x1x72x128xf32, #tpu.memory_space<vmem>>, vector<1x1x72x128xf32>
    %14 = vector.shape_cast %13 : vector<1x1x72x128xf32> to vector<72x128xf32>
    %15 = arith.addf %14, %12 : vector<72x128xf32>
    %c0_21 = arith.constant 0 : index
    %c0_22 = arith.constant 0 : index
    %c0_23 = arith.constant 0 : index
    %c0_24 = arith.constant 0 : index
    %16 = vector.load %arg6[%c0_21, %c0_22, %c0_23, %c0_24] : memref<1x1x72x128xf32, #tpu.memory_space<vmem>>, vector<1x1x72x128xf32>
    %17 = vector.shape_cast %16 : vector<1x1x72x128xf32> to vector<72x128xf32>
    %18 = vector.shape_cast %15 : vector<72x128xf32> to vector<1x1x72x128xf32>
    tpu.vector_store %arg6[%c0_21, %c0_22, %c0_23, %c0_24], %18 {strides = array<i32>} : memref<1x1x72x128xf32, #tpu.memory_space<vmem>>, vector<1x1x72x128xf32>,
    %c0_25 = arith.constant 0 : index
    %c0_26 = arith.constant 0 : index
    %c9 = arith.constant 9 : index
    %c0_27 = arith.constant 0 : index
    %19 = vector.load %arg2[%c0_25, %c0_26, %c9, %c0_27] : memref<1x1x88x32xbf16, #tpu.memory_space<vmem>>, vector<1x1x72x32xbf16>
    %20 = vector.shape_cast %19 : vector<1x1x72x32xbf16> to vector<72x32xbf16>
    %c2 = arith.constant 2 : index
    %c0_28 = arith.constant 0 : index
    %c0_29 = arith.constant 0 : index
    %21 = vector.load %arg4[%c2, %c0_28, %c0_29] : memref<8x32x128xbf16, #tpu.memory_space<vmem>>, vector<1x32x128xbf16>
    %22 = vector.shape_cast %21 : vector<1x32x128xbf16> to vector<32x128xbf16>
    %cst_30 = arith.constant dense<0.000000e+00> : vector<72x128xf32>
    %23 = tpu.matmul %20, %22, %cst_30 {dimension_numbers = #tpu.dot_dimension_numbers<[1], [0], [0], [1], [0, 0, 1, 1], [], []>} : vector<72x32xbf16>, vector<32x128xbf16>, vector<72x128xf32> -> vector<72x128xf32>
    %c0_31 = arith.constant 0 : index
    %c0_32 = arith.constant 0 : index
    %c0_33 = arith.constant 0 : index
    %c0_34 = arith.constant 0 : index
    %24 = vector.load %arg6[%c0_31, %c0_32, %c0_33, %c0_34] : memref<1x1x72x128xf32, #tpu.memory_space<vmem>>, vector<1x1x72x128xf32>
    %25 = vector.shape_cast %24 : vector<1x1x72x128xf32> to vector<72x128xf32>
    %26 = arith.addf %25, %23 : vector<72x128xf32>
    %c0_35 = arith.constant 0 : index
    %c0_36 = arith.constant 0 : index
    %c0_37 = arith.constant 0 : index
    %c0_38 = arith.constant 0 : index
    %27 = vector.load %arg6[%c0_35, %c0_36, %c0_37, %c0_38] : memref<1x1x72x128xf32, #tpu.memory_space<vmem>>, vector<1x1x72x128xf32>
    %28 = vector.shape_cast %27 : vector<1x1x72x128xf32> to vector<72x128xf32>
    %29 = vector.shape_cast %26 : vector<72x128xf32> to vector<1x1x72x128xf32>
    tpu.vector_store %arg6[%c0_35, %c0_36, %c0_37, %c0_38], %29 {strides = array<i32>} : memref<1x1x72x128xf32, #tpu.memory_space<vmem>>, vector<1x1x72x128xf32>,
    %c0_39 = arith.constant 0 : index
    %c0_40 = arith.constant 0 : index
    %c10 = arith.constant 10 : index
    %c0_41 = arith.constant 0 : index
    %30 = vector.load %arg2[%c0_39, %c0_40, %c10, %c0_41] : memref<1x1x88x32xbf16, #tpu.memory_space<vmem>>, vector<1x1x72x32xbf16>
    %31 = vector.shape_cast %30 : vector<1x1x72x32xbf16> to vector<72x32xbf16>
    %c3 = arith.constant 3 : index
    %c0_42 = arith.constant 0 : index
    %c0_43 = arith.constant 0 : index
    %32 = vector.load %arg4[%c3, %c0_42, %c0_43] : memref<8x32x128xbf16, #tpu.memory_space<vmem>>, vector<1x32x128xbf16>
    %33 = vector.shape_cast %32 : vector<1x32x128xbf16> to vector<32x128xbf16>
    %cst_44 = arith.constant dense<0.000000e+00> : vector<72x128xf32>
    %34 = tpu.matmul %31, %33, %cst_44 {dimension_numbers = #tpu.dot_dimension_numbers<[1], [0], [0], [1], [0, 0, 1, 1], [], []>} : vector<72x32xbf16>, vector<32x128xbf16>, vector<72x128xf32> -> vector<72x128xf32>
    %c0_45 = arith.constant 0 : index
    %c0_46 = arith.constant 0 : index
    %c0_47 = arith.constant 0 : index
    %c0_48 = arith.constant 0 : index
    %35 = vector.load %arg6[%c0_45, %c0_46, %c0_47, %c0_48] : memref<1x1x72x128xf32, #tpu.memory_space<vmem>>, vector<1x1x72x128xf32>
    %36 = vector.shape_cast %35 : vector<1x1x72x128xf32> to vector<72x128xf32>
    %37 = arith.addf %36, %34 : vector<72x128xf32>
    %c0_49 = arith.constant 0 : index
    %c0_50 = arith.constant 0 : index
    %c0_51 = arith.constant 0 : index
    %c0_52 = arith.constant 0 : index
    %38 = vector.load %arg6[%c0_49, %c0_50, %c0_51, %c0_52] : memref<1x1x72x128xf32, #tpu.memory_space<vmem>>, vector<1x1x72x128xf32>
    %39 = vector.shape_cast %38 : vector<1x1x72x128xf32> to vector<72x128xf32>
    %40 = vector.shape_cast %37 : vector<72x128xf32> to vector<1x1x72x128xf32>
    tpu.vector_store %arg6[%c0_49, %c0_50, %c0_51, %c0_52], %40 {strides = array<i32>} : memref<1x1x72x128xf32, #tpu.memory_space<vmem>>, vector<1x1x72x128xf32>,
    %c0_53 = arith.constant 0 : index
    %c0_54 = arith.constant 0 : index
    %c0_55 = arith.constant 0 : index
    %c0_56 = arith.constant 0 : index
    %41 = vector.load %arg3[%c0_53, %c0_54, %c0_55, %c0_56] : memref<1x1x88x32xbf16, #tpu.memory_space<vmem>>, vector<1x1x72x32xbf16>
    %42 = vector.shape_cast %41 : vector<1x1x72x32xbf16> to vector<72x32xbf16>
    %c4 = arith.constant 4 : index
    %c0_57 = arith.constant 0 : index
    %c0_58 = arith.constant 0 : index
    %43 = vector.load %arg4[%c4, %c0_57, %c0_58] : memref<8x32x128xbf16, #tpu.memory_space<vmem>>, vector<1x32x128xbf16>
    %44 = vector.shape_cast %43 : vector<1x32x128xbf16> to vector<32x128xbf16>
    %cst_59 = arith.constant dense<0.000000e+00> : vector<72x128xf32>
    %45 = tpu.matmul %42, %44, %cst_59 {dimension_numbers = #tpu.dot_dimension_numbers<[1], [0], [0], [1], [0, 0, 1, 1], [], []>} : vector<72x32xbf16>, vector<32x128xbf16>, vector<72x128xf32> -> vector<72x128xf32>
    %c0_60 = arith.constant 0 : index
    %c0_61 = arith.constant 0 : index
    %c0_62 = arith.constant 0 : index
    %c0_63 = arith.constant 0 : index
    %46 = vector.load %arg6[%c0_60, %c0_61, %c0_62, %c0_63] : memref<1x1x72x128xf32, #tpu.memory_space<vmem>>, vector<1x1x72x128xf32>
    %47 = vector.shape_cast %46 : vector<1x1x72x128xf32> to vector<72x128xf32>
    %48 = arith.addf %47, %45 : vector<72x128xf32>
    %c0_64 = arith.constant 0 : index
    %c0_65 = arith.constant 0 : index
    %c0_66 = arith.constant 0 : index
    %c0_67 = arith.constant 0 : index
    %49 = vector.load %arg6[%c0_64, %c0_65, %c0_66, %c0_67] : memref<1x1x72x128xf32, #tpu.memory_space<vmem>>, vector<1x1x72x128xf32>
    %50 = vector.shape_cast %49 : vector<1x1x72x128xf32> to vector<72x128xf32>
    %51 = vector.shape_cast %48 : vector<72x128xf32> to vector<1x1x72x128xf32>
    tpu.vector_store %arg6[%c0_64, %c0_65, %c0_66, %c0_67], %51 {strides = array<i32>} : memref<1x1x72x128xf32, #tpu.memory_space<vmem>>, vector<1x1x72x128xf32>,
    %c0_68 = arith.constant 0 : index
    %c0_69 = arith.constant 0 : index
    %c1_70 = arith.constant 1 : index
    %c0_71 = arith.constant 0 : index
    %52 = vector.load %arg3[%c0_68, %c0_69, %c1_70, %c0_71] : memref<1x1x88x32xbf16, #tpu.memory_space<vmem>>, vector<1x1x72x32xbf16>
    %53 = vector.shape_cast %52 : vector<1x1x72x32xbf16> to vector<72x32xbf16>
    %c5 = arith.constant 5 : index
    %c0_72 = arith.constant 0 : index
    %c0_73 = arith.constant 0 : index
    %54 = vector.load %arg4[%c5, %c0_72, %c0_73] : memref<8x32x128xbf16, #tpu.memory_space<vmem>>, vector<1x32x128xbf16>
    %55 = vector.shape_cast %54 : vector<1x32x128xbf16> to vector<32x128xbf16>
    %cst_74 = arith.constant dense<0.000000e+00> : vector<72x128xf32>
    %56 = tpu.matmul %53, %55, %cst_74 {dimension_numbers = #tpu.dot_dimension_numbers<[1], [0], [0], [1], [0, 0, 1, 1], [], []>} : vector<72x32xbf16>, vector<32x128xbf16>, vector<72x128xf32> -> vector<72x128xf32>
    %c0_75 = arith.constant 0 : index
    %c0_76 = arith.constant 0 : index
    %c0_77 = arith.constant 0 : index
    %c0_78 = arith.constant 0 : index
    %57 = vector.load %arg6[%c0_75, %c0_76, %c0_77, %c0_78] : memref<1x1x72x128xf32, #tpu.memory_space<vmem>>, vector<1x1x72x128xf32>
    %58 = vector.shape_cast %57 : vector<1x1x72x128xf32> to vector<72x128xf32>
    %59 = arith.addf %58, %56 : vector<72x128xf32>
    %c0_79 = arith.constant 0 : index
    %c0_80 = arith.constant 0 : index
    %c0_81 = arith.constant 0 : index
    %c0_82 = arith.constant 0 : index
    %60 = vector.load %arg6[%c0_79, %c0_80, %c0_81, %c0_82] : memref<1x1x72x128xf32, #tpu.memory_space<vmem>>, vector<1x1x72x128xf32>
    %61 = vector.shape_cast %60 : vector<1x1x72x128xf32> to vector<72x128xf32>
    %62 = vector.shape_cast %59 : vector<72x128xf32> to vector<1x1x72x128xf32>
    tpu.vector_store %arg6[%c0_79, %c0_80, %c0_81, %c0_82], %62 {strides = array<i32>} : memref<1x1x72x128xf32, #tpu.memory_space<vmem>>, vector<1x1x72x128xf32>,
    %c0_83 = arith.constant 0 : index
    %c0_84 = arith.constant 0 : index
    %c9_85 = arith.constant 9 : index
    %c0_86 = arith.constant 0 : index
    %63 = vector.load %arg3[%c0_83, %c0_84, %c9_85, %c0_86] : memref<1x1x88x32xbf16, #tpu.memory_space<vmem>>, vector<1x1x72x32xbf16>
    %64 = vector.shape_cast %63 : vector<1x1x72x32xbf16> to vector<72x32xbf16>
    %c6 = arith.constant 6 : index
    %c0_87 = arith.constant 0 : index
    %c0_88 = arith.constant 0 : index
    %65 = vector.load %arg4[%c6, %c0_87, %c0_88] : memref<8x32x128xbf16, #tpu.memory_space<vmem>>, vector<1x32x128xbf16>
    %66 = vector.shape_cast %65 : vector<1x32x128xbf16> to vector<32x128xbf16>
    %cst_89 = arith.constant dense<0.000000e+00> : vector<72x128xf32>
    %67 = tpu.matmul %64, %66, %cst_89 {dimension_numbers = #tpu.dot_dimension_numbers<[1], [0], [0], [1], [0, 0, 1, 1], [], []>} : vector<72x32xbf16>, vector<32x128xbf16>, vector<72x128xf32> -> vector<72x128xf32>
    %c0_90 = arith.constant 0 : index
    %c0_91 = arith.constant 0 : index
    %c0_92 = arith.constant 0 : index
    %c0_93 = arith.constant 0 : index
    %68 = vector.load %arg6[%c0_90, %c0_91, %c0_92, %c0_93] : memref<1x1x72x128xf32, #tpu.memory_space<vmem>>, vector<1x1x72x128xf32>
    %69 = vector.shape_cast %68 : vector<1x1x72x128xf32> to vector<72x128xf32>
    %70 = arith.addf %69, %67 : vector<72x128xf32>
    %c0_94 = arith.constant 0 : index
    %c0_95 = arith.constant 0 : index
    %c0_96 = arith.constant 0 : index
    %c0_97 = arith.constant 0 : index
    %71 = vector.load %arg6[%c0_94, %c0_95, %c0_96, %c0_97] : memref<1x1x72x128xf32, #tpu.memory_space<vmem>>, vector<1x1x72x128xf32>
    %72 = vector.shape_cast %71 : vector<1x1x72x128xf32> to vector<72x128xf32>
    %73 = vector.shape_cast %70 : vector<72x128xf32> to vector<1x1x72x128xf32>
    tpu.vector_store %arg6[%c0_94, %c0_95, %c0_96, %c0_97], %73 {strides = array<i32>} : memref<1x1x72x128xf32, #tpu.memory_space<vmem>>, vector<1x1x72x128xf32>,
    %c0_98 = arith.constant 0 : index
    %c0_99 = arith.constant 0 : index
    %c10_100 = arith.constant 10 : index
    %c0_101 = arith.constant 0 : index
    %74 = vector.load %arg3[%c0_98, %c0_99, %c10_100, %c0_101] : memref<1x1x88x32xbf16, #tpu.memory_space<vmem>>, vector<1x1x72x32xbf16>
    %75 = vector.shape_cast %74 : vector<1x1x72x32xbf16> to vector<72x32xbf16>
    %c7 = arith.constant 7 : index
    %c0_102 = arith.constant 0 : index
    %c0_103 = arith.constant 0 : index
    %76 = vector.load %arg4[%c7, %c0_102, %c0_103] : memref<8x32x128xbf16, #tpu.memory_space<vmem>>, vector<1x32x128xbf16>
    %77 = vector.shape_cast %76 : vector<1x32x128xbf16> to vector<32x128xbf16>
    %cst_104 = arith.constant dense<0.000000e+00> : vector<72x128xf32>
    %78 = tpu.matmul %75, %77, %cst_104 {dimension_numbers = #tpu.dot_dimension_numbers<[1], [0], [0], [1], [0, 0, 1, 1], [], []>} : vector<72x32xbf16>, vector<32x128xbf16>, vector<72x128xf32> -> vector<72x128xf32>
    %c0_105 = arith.constant 0 : index
    %c0_106 = arith.constant 0 : index
    %c0_107 = arith.constant 0 : index
    %c0_108 = arith.constant 0 : index
    %79 = vector.load %arg6[%c0_105, %c0_106, %c0_107, %c0_108] : memref<1x1x72x128xf32, #tpu.memory_space<vmem>>, vector<1x1x72x128xf32>
    %80 = vector.shape_cast %79 : vector<1x1x72x128xf32> to vector<72x128xf32>
    %81 = arith.addf %80, %78 : vector<72x128xf32>
    %c0_109 = arith.constant 0 : index
    %c0_110 = arith.constant 0 : index
    %c0_111 = arith.constant 0 : index
    %c0_112 = arith.constant 0 : index
    %82 = vector.load %arg6[%c0_109, %c0_110, %c0_111, %c0_112] : memref<1x1x72x128xf32, #tpu.memory_space<vmem>>, vector<1x1x72x128xf32>
    %83 = vector.shape_cast %82 : vector<1x1x72x128xf32> to vector<72x128xf32>
    %84 = vector.shape_cast %81 : vector<72x128xf32> to vector<1x1x72x128xf32>
    tpu.vector_store %arg6[%c0_109, %c0_110, %c0_111, %c0_112], %84 {strides = array<i32>} : memref<1x1x72x128xf32, #tpu.memory_space<vmem>>, vector<1x1x72x128xf32>,
    %c0_113 = arith.constant 0 : index
    %c0_114 = arith.constant 0 : index
    %c0_115 = arith.constant 0 : index
    %c0_116 = arith.constant 0 : index
    %85 = vector.load %arg6[%c0_113, %c0_114, %c0_115, %c0_116] : memref<1x1x72x128xf32, #tpu.memory_space<vmem>>, vector<1x1x72x128xf32>
    %86 = vector.shape_cast %85 : vector<1x1x72x128xf32> to vector<72x128xf32>
    %c0_117 = arith.constant 0 : index
    %c0_118 = arith.constant 0 : index
    %87 = vector.load %arg5[%c0_117, %c0_118] : memref<1x128xf32, #tpu.memory_space<vmem>>, vector<1x128xf32>
    %88 = vector.broadcast %87 : vector<1x128xf32> to vector<72x128xf32>
    %89 = arith.addf %86, %88 : vector<72x128xf32>
    %cst_119 = arith.constant 0.000000e+00 : f32
    %90 = vector.broadcast %cst_119 : f32 to vector<72x128xf32>
    %91 = arith.cmpf oge, %89, %90 : vector<72x128xf32>
    %cst_120 = arith.constant 0.00999999977 : f32
    %92 = vector.broadcast %cst_120 : f32 to vector<72x128xf32>
    %93 = arith.mulf %92, %89 : vector<72x128xf32>
    %94 = arith.select %91, %89, %93 : vector<72x128xi1>, vector<72x128xf32>
    %c0_121 = arith.constant 0 : index
    %c0_122 = arith.constant 0 : index
    %c0_123 = arith.constant 0 : index
    %c0_124 = arith.constant 0 : index
    %95 = vector.load %arg6[%c0_121, %c0_122, %c0_123, %c0_124] : memref<1x1x72x128xf32, #tpu.memory_space<vmem>>, vector<1x1x72x128xf32>
    %96 = vector.shape_cast %95 : vector<1x1x72x128xf32> to vector<72x128xf32>
    %97 = vector.shape_cast %94 : vector<72x128xf32> to vector<1x1x72x128xf32>
    tpu.vector_store %arg6[%c0_121, %c0_122, %c0_123, %c0_124], %97 {strides = array<i32>} : memref<1x1x72x128xf32, #tpu.memory_space<vmem>>, vector<1x1x72x128xf32>,
    return
  }
  func.func @transform_0(%arg0: i32, %arg1: i32) -> (i32, i32, i32, i32) {
    %c0_i32 = arith.constant 0 : i32
    %c0_i32_0 = arith.constant 0 : i32
    %c0_i32_1 = arith.constant 0 : i32
    return %arg0, %arg1, %c0_i32, %c0_i32_0 : i32, i32, i32, i32
  }
  func.func @transform_1(%arg0: i32, %arg1: i32) -> (i32, i32, i32, i32) {
    %c1_i32 = arith.constant 1 : i32
    %0 = arith.addi %arg1, %c1_i32 : i32
    %c0_i32 = arith.constant 0 : i32
    %c0_i32_0 = arith.constant 0 : i32
    %c0_i32_1 = arith.constant 0 : i32
    return %arg0, %0, %c0_i32, %c0_i32_0 : i32, i32, i32, i32
  }
  func.func @transform_2(%arg0: i32, %arg1: i32) -> (i32, i32, i32) {
    %c0_i32 = arith.constant 0 : i32
    %c0_i32_0 = arith.constant 0 : i32
    %c0_i32_1 = arith.constant 0 : i32
    %c0_i32_2 = arith.constant 0 : i32
    return %c0_i32, %c0_i32_0, %c0_i32_1 : i32, i32, i32
  }
  func.func @transform_3(%arg0: i32, %arg1: i32) -> (i32, i32) {
    %c0_i32 = arith.constant 0 : i32
    %c0_i32_0 = arith.constant 0 : i32
    %c0_i32_1 = arith.constant 0 : i32
    return %c0_i32, %c0_i32_0 : i32, i32
  }
  func.func @transform_4(%arg0: i32, %arg1: i32) -> (i32, i32, i32, i32) {
    %c0_i32 = arith.constant 0 : i32
    %c0_i32_0 = arith.constant 0 : i32
    %c0_i32_1 = arith.constant 0 : i32
    return %arg0, %arg1, %c0_i32, %c0_i32_0 : i32, i32, i32, i32
  }
}

module attributes {stable_mosaic.version = 11 : i64} {
  func.func @_conv2_kernel(%arg0: i32, %arg1: i32, %arg2: memref<1x1x32x128xbf16, #tpu.memory_space<vmem>>, %arg3: memref<1x1x32x128xbf16, #tpu.memory_space<vmem>>, %arg4: memref<8x128x128xbf16, #tpu.memory_space<vmem>>, %arg5: memref<1x128xf32, #tpu.memory_space<vmem>>, %arg6: memref<1x1x24x128xf32, #tpu.memory_space<vmem>>) attributes {dimension_semantics = [#tpu.dimension_semantics<parallel>, #tpu.dimension_semantics<parallel>], iteration_bounds = array<i64: 2, 4>, scalar_prefetch = 0 : i64, scratch_operands = 0 : i64, tpu.core_type = #tpu.core_type<tc>, window_params = [{transform_indices = @transform_0, window_bounds = array<i64: 1, 1, 32, 128>}, {transform_indices = @transform_1, window_bounds = array<i64: 1, 1, 32, 128>}, {pipeline_mode = #tpu.pipeline_mode<synchronous>, transform_indices = @transform_2, window_bounds = array<i64: 8, 128, 128>}, {pipeline_mode = #tpu.pipeline_mode<synchronous>, transform_indices = @transform_3, window_bounds = array<i64: 1, 128>}, {transform_indices = @transform_4, window_bounds = array<i64: 1, 1, 24, 128>}]} {
    %c0 = arith.constant 0 : index
    %c0_0 = arith.constant 0 : index
    %c0_1 = arith.constant 0 : index
    %c0_2 = arith.constant 0 : index
    %0 = vector.load %arg2[%c0, %c0_0, %c0_1, %c0_2] : memref<1x1x32x128xbf16, #tpu.memory_space<vmem>>, vector<1x1x24x128xbf16>
    %1 = vector.shape_cast %0 : vector<1x1x24x128xbf16> to vector<24x128xbf16>
    %c0_3 = arith.constant 0 : index
    %c0_4 = arith.constant 0 : index
    %c0_5 = arith.constant 0 : index
    %2 = vector.load %arg4[%c0_3, %c0_4, %c0_5] : memref<8x128x128xbf16, #tpu.memory_space<vmem>>, vector<1x128x128xbf16>
    %3 = vector.shape_cast %2 : vector<1x128x128xbf16> to vector<128x128xbf16>
    %cst = arith.constant dense<0.000000e+00> : vector<24x128xf32>
    %4 = tpu.matmul %1, %3, %cst {dimension_numbers = #tpu.dot_dimension_numbers<[1], [0], [0], [1], [0, 0, 1, 1], [], []>} : vector<24x128xbf16>, vector<128x128xbf16>, vector<24x128xf32> -> vector<24x128xf32>
    %c0_6 = arith.constant 0 : index
    %c0_7 = arith.constant 0 : index
    %c0_8 = arith.constant 0 : index
    %c0_9 = arith.constant 0 : index
    %5 = vector.load %arg6[%c0_6, %c0_7, %c0_8, %c0_9] : memref<1x1x24x128xf32, #tpu.memory_space<vmem>>, vector<1x1x24x128xf32>
    %6 = vector.shape_cast %5 : vector<1x1x24x128xf32> to vector<24x128xf32>
    %7 = vector.shape_cast %4 : vector<24x128xf32> to vector<1x1x24x128xf32>
    tpu.vector_store %arg6[%c0_6, %c0_7, %c0_8, %c0_9], %7 {strides = array<i32>} : memref<1x1x24x128xf32, #tpu.memory_space<vmem>>, vector<1x1x24x128xf32>,
    %c0_10 = arith.constant 0 : index
    %c0_11 = arith.constant 0 : index
    %c1 = arith.constant 1 : index
    %c0_12 = arith.constant 0 : index
    %8 = vector.load %arg2[%c0_10, %c0_11, %c1, %c0_12] : memref<1x1x32x128xbf16, #tpu.memory_space<vmem>>, vector<1x1x24x128xbf16>
    %9 = vector.shape_cast %8 : vector<1x1x24x128xbf16> to vector<24x128xbf16>
    %c1_13 = arith.constant 1 : index
    %c0_14 = arith.constant 0 : index
    %c0_15 = arith.constant 0 : index
    %10 = vector.load %arg4[%c1_13, %c0_14, %c0_15] : memref<8x128x128xbf16, #tpu.memory_space<vmem>>, vector<1x128x128xbf16>
    %11 = vector.shape_cast %10 : vector<1x128x128xbf16> to vector<128x128xbf16>
    %cst_16 = arith.constant dense<0.000000e+00> : vector<24x128xf32>
    %12 = tpu.matmul %9, %11, %cst_16 {dimension_numbers = #tpu.dot_dimension_numbers<[1], [0], [0], [1], [0, 0, 1, 1], [], []>} : vector<24x128xbf16>, vector<128x128xbf16>, vector<24x128xf32> -> vector<24x128xf32>
    %c0_17 = arith.constant 0 : index
    %c0_18 = arith.constant 0 : index
    %c0_19 = arith.constant 0 : index
    %c0_20 = arith.constant 0 : index
    %13 = vector.load %arg6[%c0_17, %c0_18, %c0_19, %c0_20] : memref<1x1x24x128xf32, #tpu.memory_space<vmem>>, vector<1x1x24x128xf32>
    %14 = vector.shape_cast %13 : vector<1x1x24x128xf32> to vector<24x128xf32>
    %15 = arith.addf %14, %12 : vector<24x128xf32>
    %c0_21 = arith.constant 0 : index
    %c0_22 = arith.constant 0 : index
    %c0_23 = arith.constant 0 : index
    %c0_24 = arith.constant 0 : index
    %16 = vector.load %arg6[%c0_21, %c0_22, %c0_23, %c0_24] : memref<1x1x24x128xf32, #tpu.memory_space<vmem>>, vector<1x1x24x128xf32>
    %17 = vector.shape_cast %16 : vector<1x1x24x128xf32> to vector<24x128xf32>
    %18 = vector.shape_cast %15 : vector<24x128xf32> to vector<1x1x24x128xf32>
    tpu.vector_store %arg6[%c0_21, %c0_22, %c0_23, %c0_24], %18 {strides = array<i32>} : memref<1x1x24x128xf32, #tpu.memory_space<vmem>>, vector<1x1x24x128xf32>,
    %c0_25 = arith.constant 0 : index
    %c0_26 = arith.constant 0 : index
    %c5 = arith.constant 5 : index
    %c0_27 = arith.constant 0 : index
    %19 = vector.load %arg2[%c0_25, %c0_26, %c5, %c0_27] : memref<1x1x32x128xbf16, #tpu.memory_space<vmem>>, vector<1x1x24x128xbf16>
    %20 = vector.shape_cast %19 : vector<1x1x24x128xbf16> to vector<24x128xbf16>
    %c2 = arith.constant 2 : index
    %c0_28 = arith.constant 0 : index
    %c0_29 = arith.constant 0 : index
    %21 = vector.load %arg4[%c2, %c0_28, %c0_29] : memref<8x128x128xbf16, #tpu.memory_space<vmem>>, vector<1x128x128xbf16>
    %22 = vector.shape_cast %21 : vector<1x128x128xbf16> to vector<128x128xbf16>
    %cst_30 = arith.constant dense<0.000000e+00> : vector<24x128xf32>
    %23 = tpu.matmul %20, %22, %cst_30 {dimension_numbers = #tpu.dot_dimension_numbers<[1], [0], [0], [1], [0, 0, 1, 1], [], []>} : vector<24x128xbf16>, vector<128x128xbf16>, vector<24x128xf32> -> vector<24x128xf32>
    %c0_31 = arith.constant 0 : index
    %c0_32 = arith.constant 0 : index
    %c0_33 = arith.constant 0 : index
    %c0_34 = arith.constant 0 : index
    %24 = vector.load %arg6[%c0_31, %c0_32, %c0_33, %c0_34] : memref<1x1x24x128xf32, #tpu.memory_space<vmem>>, vector<1x1x24x128xf32>
    %25 = vector.shape_cast %24 : vector<1x1x24x128xf32> to vector<24x128xf32>
    %26 = arith.addf %25, %23 : vector<24x128xf32>
    %c0_35 = arith.constant 0 : index
    %c0_36 = arith.constant 0 : index
    %c0_37 = arith.constant 0 : index
    %c0_38 = arith.constant 0 : index
    %27 = vector.load %arg6[%c0_35, %c0_36, %c0_37, %c0_38] : memref<1x1x24x128xf32, #tpu.memory_space<vmem>>, vector<1x1x24x128xf32>
    %28 = vector.shape_cast %27 : vector<1x1x24x128xf32> to vector<24x128xf32>
    %29 = vector.shape_cast %26 : vector<24x128xf32> to vector<1x1x24x128xf32>
    tpu.vector_store %arg6[%c0_35, %c0_36, %c0_37, %c0_38], %29 {strides = array<i32>} : memref<1x1x24x128xf32, #tpu.memory_space<vmem>>, vector<1x1x24x128xf32>,
    %c0_39 = arith.constant 0 : index
    %c0_40 = arith.constant 0 : index
    %c6 = arith.constant 6 : index
    %c0_41 = arith.constant 0 : index
    %30 = vector.load %arg2[%c0_39, %c0_40, %c6, %c0_41] : memref<1x1x32x128xbf16, #tpu.memory_space<vmem>>, vector<1x1x24x128xbf16>
    %31 = vector.shape_cast %30 : vector<1x1x24x128xbf16> to vector<24x128xbf16>
    %c3 = arith.constant 3 : index
    %c0_42 = arith.constant 0 : index
    %c0_43 = arith.constant 0 : index
    %32 = vector.load %arg4[%c3, %c0_42, %c0_43] : memref<8x128x128xbf16, #tpu.memory_space<vmem>>, vector<1x128x128xbf16>
    %33 = vector.shape_cast %32 : vector<1x128x128xbf16> to vector<128x128xbf16>
    %cst_44 = arith.constant dense<0.000000e+00> : vector<24x128xf32>
    %34 = tpu.matmul %31, %33, %cst_44 {dimension_numbers = #tpu.dot_dimension_numbers<[1], [0], [0], [1], [0, 0, 1, 1], [], []>} : vector<24x128xbf16>, vector<128x128xbf16>, vector<24x128xf32> -> vector<24x128xf32>
    %c0_45 = arith.constant 0 : index
    %c0_46 = arith.constant 0 : index
    %c0_47 = arith.constant 0 : index
    %c0_48 = arith.constant 0 : index
    %35 = vector.load %arg6[%c0_45, %c0_46, %c0_47, %c0_48] : memref<1x1x24x128xf32, #tpu.memory_space<vmem>>, vector<1x1x24x128xf32>
    %36 = vector.shape_cast %35 : vector<1x1x24x128xf32> to vector<24x128xf32>
    %37 = arith.addf %36, %34 : vector<24x128xf32>
    %c0_49 = arith.constant 0 : index
    %c0_50 = arith.constant 0 : index
    %c0_51 = arith.constant 0 : index
    %c0_52 = arith.constant 0 : index
    %38 = vector.load %arg6[%c0_49, %c0_50, %c0_51, %c0_52] : memref<1x1x24x128xf32, #tpu.memory_space<vmem>>, vector<1x1x24x128xf32>
    %39 = vector.shape_cast %38 : vector<1x1x24x128xf32> to vector<24x128xf32>
    %40 = vector.shape_cast %37 : vector<24x128xf32> to vector<1x1x24x128xf32>
    tpu.vector_store %arg6[%c0_49, %c0_50, %c0_51, %c0_52], %40 {strides = array<i32>} : memref<1x1x24x128xf32, #tpu.memory_space<vmem>>, vector<1x1x24x128xf32>,
    %c0_53 = arith.constant 0 : index
    %c0_54 = arith.constant 0 : index
    %c0_55 = arith.constant 0 : index
    %c0_56 = arith.constant 0 : index
    %41 = vector.load %arg3[%c0_53, %c0_54, %c0_55, %c0_56] : memref<1x1x32x128xbf16, #tpu.memory_space<vmem>>, vector<1x1x24x128xbf16>
    %42 = vector.shape_cast %41 : vector<1x1x24x128xbf16> to vector<24x128xbf16>
    %c4 = arith.constant 4 : index
    %c0_57 = arith.constant 0 : index
    %c0_58 = arith.constant 0 : index
    %43 = vector.load %arg4[%c4, %c0_57, %c0_58] : memref<8x128x128xbf16, #tpu.memory_space<vmem>>, vector<1x128x128xbf16>
    %44 = vector.shape_cast %43 : vector<1x128x128xbf16> to vector<128x128xbf16>
    %cst_59 = arith.constant dense<0.000000e+00> : vector<24x128xf32>
    %45 = tpu.matmul %42, %44, %cst_59 {dimension_numbers = #tpu.dot_dimension_numbers<[1], [0], [0], [1], [0, 0, 1, 1], [], []>} : vector<24x128xbf16>, vector<128x128xbf16>, vector<24x128xf32> -> vector<24x128xf32>
    %c0_60 = arith.constant 0 : index
    %c0_61 = arith.constant 0 : index
    %c0_62 = arith.constant 0 : index
    %c0_63 = arith.constant 0 : index
    %46 = vector.load %arg6[%c0_60, %c0_61, %c0_62, %c0_63] : memref<1x1x24x128xf32, #tpu.memory_space<vmem>>, vector<1x1x24x128xf32>
    %47 = vector.shape_cast %46 : vector<1x1x24x128xf32> to vector<24x128xf32>
    %48 = arith.addf %47, %45 : vector<24x128xf32>
    %c0_64 = arith.constant 0 : index
    %c0_65 = arith.constant 0 : index
    %c0_66 = arith.constant 0 : index
    %c0_67 = arith.constant 0 : index
    %49 = vector.load %arg6[%c0_64, %c0_65, %c0_66, %c0_67] : memref<1x1x24x128xf32, #tpu.memory_space<vmem>>, vector<1x1x24x128xf32>
    %50 = vector.shape_cast %49 : vector<1x1x24x128xf32> to vector<24x128xf32>
    %51 = vector.shape_cast %48 : vector<24x128xf32> to vector<1x1x24x128xf32>
    tpu.vector_store %arg6[%c0_64, %c0_65, %c0_66, %c0_67], %51 {strides = array<i32>} : memref<1x1x24x128xf32, #tpu.memory_space<vmem>>, vector<1x1x24x128xf32>,
    %c0_68 = arith.constant 0 : index
    %c0_69 = arith.constant 0 : index
    %c1_70 = arith.constant 1 : index
    %c0_71 = arith.constant 0 : index
    %52 = vector.load %arg3[%c0_68, %c0_69, %c1_70, %c0_71] : memref<1x1x32x128xbf16, #tpu.memory_space<vmem>>, vector<1x1x24x128xbf16>
    %53 = vector.shape_cast %52 : vector<1x1x24x128xbf16> to vector<24x128xbf16>
    %c5_72 = arith.constant 5 : index
    %c0_73 = arith.constant 0 : index
    %c0_74 = arith.constant 0 : index
    %54 = vector.load %arg4[%c5_72, %c0_73, %c0_74] : memref<8x128x128xbf16, #tpu.memory_space<vmem>>, vector<1x128x128xbf16>
    %55 = vector.shape_cast %54 : vector<1x128x128xbf16> to vector<128x128xbf16>
    %cst_75 = arith.constant dense<0.000000e+00> : vector<24x128xf32>
    %56 = tpu.matmul %53, %55, %cst_75 {dimension_numbers = #tpu.dot_dimension_numbers<[1], [0], [0], [1], [0, 0, 1, 1], [], []>} : vector<24x128xbf16>, vector<128x128xbf16>, vector<24x128xf32> -> vector<24x128xf32>
    %c0_76 = arith.constant 0 : index
    %c0_77 = arith.constant 0 : index
    %c0_78 = arith.constant 0 : index
    %c0_79 = arith.constant 0 : index
    %57 = vector.load %arg6[%c0_76, %c0_77, %c0_78, %c0_79] : memref<1x1x24x128xf32, #tpu.memory_space<vmem>>, vector<1x1x24x128xf32>
    %58 = vector.shape_cast %57 : vector<1x1x24x128xf32> to vector<24x128xf32>
    %59 = arith.addf %58, %56 : vector<24x128xf32>
    %c0_80 = arith.constant 0 : index
    %c0_81 = arith.constant 0 : index
    %c0_82 = arith.constant 0 : index
    %c0_83 = arith.constant 0 : index
    %60 = vector.load %arg6[%c0_80, %c0_81, %c0_82, %c0_83] : memref<1x1x24x128xf32, #tpu.memory_space<vmem>>, vector<1x1x24x128xf32>
    %61 = vector.shape_cast %60 : vector<1x1x24x128xf32> to vector<24x128xf32>
    %62 = vector.shape_cast %59 : vector<24x128xf32> to vector<1x1x24x128xf32>
    tpu.vector_store %arg6[%c0_80, %c0_81, %c0_82, %c0_83], %62 {strides = array<i32>} : memref<1x1x24x128xf32, #tpu.memory_space<vmem>>, vector<1x1x24x128xf32>,
    %c0_84 = arith.constant 0 : index
    %c0_85 = arith.constant 0 : index
    %c5_86 = arith.constant 5 : index
    %c0_87 = arith.constant 0 : index
    %63 = vector.load %arg3[%c0_84, %c0_85, %c5_86, %c0_87] : memref<1x1x32x128xbf16, #tpu.memory_space<vmem>>, vector<1x1x24x128xbf16>
    %64 = vector.shape_cast %63 : vector<1x1x24x128xbf16> to vector<24x128xbf16>
    %c6_88 = arith.constant 6 : index
    %c0_89 = arith.constant 0 : index
    %c0_90 = arith.constant 0 : index
    %65 = vector.load %arg4[%c6_88, %c0_89, %c0_90] : memref<8x128x128xbf16, #tpu.memory_space<vmem>>, vector<1x128x128xbf16>
    %66 = vector.shape_cast %65 : vector<1x128x128xbf16> to vector<128x128xbf16>
    %cst_91 = arith.constant dense<0.000000e+00> : vector<24x128xf32>
    %67 = tpu.matmul %64, %66, %cst_91 {dimension_numbers = #tpu.dot_dimension_numbers<[1], [0], [0], [1], [0, 0, 1, 1], [], []>} : vector<24x128xbf16>, vector<128x128xbf16>, vector<24x128xf32> -> vector<24x128xf32>
    %c0_92 = arith.constant 0 : index
    %c0_93 = arith.constant 0 : index
    %c0_94 = arith.constant 0 : index
    %c0_95 = arith.constant 0 : index
    %68 = vector.load %arg6[%c0_92, %c0_93, %c0_94, %c0_95] : memref<1x1x24x128xf32, #tpu.memory_space<vmem>>, vector<1x1x24x128xf32>
    %69 = vector.shape_cast %68 : vector<1x1x24x128xf32> to vector<24x128xf32>
    %70 = arith.addf %69, %67 : vector<24x128xf32>
    %c0_96 = arith.constant 0 : index
    %c0_97 = arith.constant 0 : index
    %c0_98 = arith.constant 0 : index
    %c0_99 = arith.constant 0 : index
    %71 = vector.load %arg6[%c0_96, %c0_97, %c0_98, %c0_99] : memref<1x1x24x128xf32, #tpu.memory_space<vmem>>, vector<1x1x24x128xf32>
    %72 = vector.shape_cast %71 : vector<1x1x24x128xf32> to vector<24x128xf32>
    %73 = vector.shape_cast %70 : vector<24x128xf32> to vector<1x1x24x128xf32>
    tpu.vector_store %arg6[%c0_96, %c0_97, %c0_98, %c0_99], %73 {strides = array<i32>} : memref<1x1x24x128xf32, #tpu.memory_space<vmem>>, vector<1x1x24x128xf32>,
    %c0_100 = arith.constant 0 : index
    %c0_101 = arith.constant 0 : index
    %c6_102 = arith.constant 6 : index
    %c0_103 = arith.constant 0 : index
    %74 = vector.load %arg3[%c0_100, %c0_101, %c6_102, %c0_103] : memref<1x1x32x128xbf16, #tpu.memory_space<vmem>>, vector<1x1x24x128xbf16>
    %75 = vector.shape_cast %74 : vector<1x1x24x128xbf16> to vector<24x128xbf16>
    %c7 = arith.constant 7 : index
    %c0_104 = arith.constant 0 : index
    %c0_105 = arith.constant 0 : index
    %76 = vector.load %arg4[%c7, %c0_104, %c0_105] : memref<8x128x128xbf16, #tpu.memory_space<vmem>>, vector<1x128x128xbf16>
    %77 = vector.shape_cast %76 : vector<1x128x128xbf16> to vector<128x128xbf16>
    %cst_106 = arith.constant dense<0.000000e+00> : vector<24x128xf32>
    %78 = tpu.matmul %75, %77, %cst_106 {dimension_numbers = #tpu.dot_dimension_numbers<[1], [0], [0], [1], [0, 0, 1, 1], [], []>} : vector<24x128xbf16>, vector<128x128xbf16>, vector<24x128xf32> -> vector<24x128xf32>
    %c0_107 = arith.constant 0 : index
    %c0_108 = arith.constant 0 : index
    %c0_109 = arith.constant 0 : index
    %c0_110 = arith.constant 0 : index
    %79 = vector.load %arg6[%c0_107, %c0_108, %c0_109, %c0_110] : memref<1x1x24x128xf32, #tpu.memory_space<vmem>>, vector<1x1x24x128xf32>
    %80 = vector.shape_cast %79 : vector<1x1x24x128xf32> to vector<24x128xf32>
    %81 = arith.addf %80, %78 : vector<24x128xf32>
    %c0_111 = arith.constant 0 : index
    %c0_112 = arith.constant 0 : index
    %c0_113 = arith.constant 0 : index
    %c0_114 = arith.constant 0 : index
    %82 = vector.load %arg6[%c0_111, %c0_112, %c0_113, %c0_114] : memref<1x1x24x128xf32, #tpu.memory_space<vmem>>, vector<1x1x24x128xf32>
    %83 = vector.shape_cast %82 : vector<1x1x24x128xf32> to vector<24x128xf32>
    %84 = vector.shape_cast %81 : vector<24x128xf32> to vector<1x1x24x128xf32>
    tpu.vector_store %arg6[%c0_111, %c0_112, %c0_113, %c0_114], %84 {strides = array<i32>} : memref<1x1x24x128xf32, #tpu.memory_space<vmem>>, vector<1x1x24x128xf32>,
    %c0_115 = arith.constant 0 : index
    %c0_116 = arith.constant 0 : index
    %c0_117 = arith.constant 0 : index
    %c0_118 = arith.constant 0 : index
    %85 = vector.load %arg6[%c0_115, %c0_116, %c0_117, %c0_118] : memref<1x1x24x128xf32, #tpu.memory_space<vmem>>, vector<1x1x24x128xf32>
    %86 = vector.shape_cast %85 : vector<1x1x24x128xf32> to vector<24x128xf32>
    %c0_119 = arith.constant 0 : index
    %c0_120 = arith.constant 0 : index
    %87 = vector.load %arg5[%c0_119, %c0_120] : memref<1x128xf32, #tpu.memory_space<vmem>>, vector<1x128xf32>
    %88 = vector.broadcast %87 : vector<1x128xf32> to vector<24x128xf32>
    %89 = arith.addf %86, %88 : vector<24x128xf32>
    %cst_121 = arith.constant 0.000000e+00 : f32
    %90 = vector.broadcast %cst_121 : f32 to vector<24x128xf32>
    %91 = arith.cmpf oge, %89, %90 : vector<24x128xf32>
    %cst_122 = arith.constant 0.00999999977 : f32
    %92 = vector.broadcast %cst_122 : f32 to vector<24x128xf32>
    %93 = arith.mulf %92, %89 : vector<24x128xf32>
    %94 = arith.select %91, %89, %93 : vector<24x128xi1>, vector<24x128xf32>
    %c0_123 = arith.constant 0 : index
    %c0_124 = arith.constant 0 : index
    %c0_125 = arith.constant 0 : index
    %c0_126 = arith.constant 0 : index
    %95 = vector.load %arg6[%c0_123, %c0_124, %c0_125, %c0_126] : memref<1x1x24x128xf32, #tpu.memory_space<vmem>>, vector<1x1x24x128xf32>
    %96 = vector.shape_cast %95 : vector<1x1x24x128xf32> to vector<24x128xf32>
    %97 = vector.shape_cast %94 : vector<24x128xf32> to vector<1x1x24x128xf32>
    tpu.vector_store %arg6[%c0_123, %c0_124, %c0_125, %c0_126], %97 {strides = array<i32>} : memref<1x1x24x128xf32, #tpu.memory_space<vmem>>, vector<1x1x24x128xf32>,
    return
  }
  func.func @transform_0(%arg0: i32, %arg1: i32) -> (i32, i32, i32, i32) {
    %c0_i32 = arith.constant 0 : i32
    %c0_i32_0 = arith.constant 0 : i32
    %c0_i32_1 = arith.constant 0 : i32
    return %arg0, %arg1, %c0_i32, %c0_i32_0 : i32, i32, i32, i32
  }
  func.func @transform_1(%arg0: i32, %arg1: i32) -> (i32, i32, i32, i32) {
    %c1_i32 = arith.constant 1 : i32
    %0 = arith.addi %arg1, %c1_i32 : i32
    %c0_i32 = arith.constant 0 : i32
    %c0_i32_0 = arith.constant 0 : i32
    %c0_i32_1 = arith.constant 0 : i32
    return %arg0, %0, %c0_i32, %c0_i32_0 : i32, i32, i32, i32
  }
  func.func @transform_2(%arg0: i32, %arg1: i32) -> (i32, i32, i32) {
    %c0_i32 = arith.constant 0 : i32
    %c0_i32_0 = arith.constant 0 : i32
    %c0_i32_1 = arith.constant 0 : i32
    %c0_i32_2 = arith.constant 0 : i32
    return %c0_i32, %c0_i32_0, %c0_i32_1 : i32, i32, i32
  }
  func.func @transform_3(%arg0: i32, %arg1: i32) -> (i32, i32) {
    %c0_i32 = arith.constant 0 : i32
    %c0_i32_0 = arith.constant 0 : i32
    %c0_i32_1 = arith.constant 0 : i32
    return %c0_i32, %c0_i32_0 : i32, i32
  }
  func.func @transform_4(%arg0: i32, %arg1: i32) -> (i32, i32, i32, i32) {
    %c0_i32 = arith.constant 0 : i32
    %c0_i32_0 = arith.constant 0 : i32
    %c0_i32_1 = arith.constant 0 : i32
    return %arg0, %arg1, %c0_i32, %c0_i32_0 : i32, i32, i32, i32
  }
}

module attributes {stable_mosaic.version = 11 : i64} {
  func.func @_conv2_kernel(%arg0: i32, %arg1: i32, %arg2: memref<1x1x16x256xbf16, #tpu.memory_space<vmem>>, %arg3: memref<1x1x16x256xbf16, #tpu.memory_space<vmem>>, %arg4: memref<8x256x128xbf16, #tpu.memory_space<vmem>>, %arg5: memref<1x128xf32, #tpu.memory_space<vmem>>, %arg6: memref<1x1x8x128xf32, #tpu.memory_space<vmem>>) attributes {dimension_semantics = [#tpu.dimension_semantics<parallel>, #tpu.dimension_semantics<parallel>], iteration_bounds = array<i64: 2, 2>, scalar_prefetch = 0 : i64, scratch_operands = 0 : i64, tpu.core_type = #tpu.core_type<tc>, window_params = [{transform_indices = @transform_0, window_bounds = array<i64: 1, 1, 16, 256>}, {transform_indices = @transform_1, window_bounds = array<i64: 1, 1, 16, 256>}, {pipeline_mode = #tpu.pipeline_mode<synchronous>, transform_indices = @transform_2, window_bounds = array<i64: 8, 256, 128>}, {pipeline_mode = #tpu.pipeline_mode<synchronous>, transform_indices = @transform_3, window_bounds = array<i64: 1, 128>}, {transform_indices = @transform_4, window_bounds = array<i64: 1, 1, 8, 128>}]} {
    %c0 = arith.constant 0 : index
    %c0_0 = arith.constant 0 : index
    %c0_1 = arith.constant 0 : index
    %c0_2 = arith.constant 0 : index
    %0 = vector.load %arg2[%c0, %c0_0, %c0_1, %c0_2] : memref<1x1x16x256xbf16, #tpu.memory_space<vmem>>, vector<1x1x8x256xbf16>
    %1 = vector.shape_cast %0 : vector<1x1x8x256xbf16> to vector<8x256xbf16>
    %c0_3 = arith.constant 0 : index
    %c0_4 = arith.constant 0 : index
    %c0_5 = arith.constant 0 : index
    %2 = vector.load %arg4[%c0_3, %c0_4, %c0_5] : memref<8x256x128xbf16, #tpu.memory_space<vmem>>, vector<1x256x128xbf16>
    %3 = vector.shape_cast %2 : vector<1x256x128xbf16> to vector<256x128xbf16>
    %cst = arith.constant dense<0.000000e+00> : vector<8x128xf32>
    %4 = tpu.matmul %1, %3, %cst {dimension_numbers = #tpu.dot_dimension_numbers<[1], [0], [0], [1], [0, 0, 1, 1], [], []>} : vector<8x256xbf16>, vector<256x128xbf16>, vector<8x128xf32> -> vector<8x128xf32>
    %c0_6 = arith.constant 0 : index
    %c0_7 = arith.constant 0 : index
    %c0_8 = arith.constant 0 : index
    %c0_9 = arith.constant 0 : index
    %5 = vector.load %arg6[%c0_6, %c0_7, %c0_8, %c0_9] : memref<1x1x8x128xf32, #tpu.memory_space<vmem>>, vector<1x1x8x128xf32>
    %6 = vector.shape_cast %5 : vector<1x1x8x128xf32> to vector<8x128xf32>
    %7 = vector.shape_cast %4 : vector<8x128xf32> to vector<1x1x8x128xf32>
    tpu.vector_store %arg6[%c0_6, %c0_7, %c0_8, %c0_9], %7 {strides = array<i32>} : memref<1x1x8x128xf32, #tpu.memory_space<vmem>>, vector<1x1x8x128xf32>,
    %c0_10 = arith.constant 0 : index
    %c0_11 = arith.constant 0 : index
    %c1 = arith.constant 1 : index
    %c0_12 = arith.constant 0 : index
    %8 = vector.load %arg2[%c0_10, %c0_11, %c1, %c0_12] : memref<1x1x16x256xbf16, #tpu.memory_space<vmem>>, vector<1x1x8x256xbf16>
    %9 = vector.shape_cast %8 : vector<1x1x8x256xbf16> to vector<8x256xbf16>
    %c1_13 = arith.constant 1 : index
    %c0_14 = arith.constant 0 : index
    %c0_15 = arith.constant 0 : index
    %10 = vector.load %arg4[%c1_13, %c0_14, %c0_15] : memref<8x256x128xbf16, #tpu.memory_space<vmem>>, vector<1x256x128xbf16>
    %11 = vector.shape_cast %10 : vector<1x256x128xbf16> to vector<256x128xbf16>
    %cst_16 = arith.constant dense<0.000000e+00> : vector<8x128xf32>
    %12 = tpu.matmul %9, %11, %cst_16 {dimension_numbers = #tpu.dot_dimension_numbers<[1], [0], [0], [1], [0, 0, 1, 1], [], []>} : vector<8x256xbf16>, vector<256x128xbf16>, vector<8x128xf32> -> vector<8x128xf32>
    %c0_17 = arith.constant 0 : index
    %c0_18 = arith.constant 0 : index
    %c0_19 = arith.constant 0 : index
    %c0_20 = arith.constant 0 : index
    %13 = vector.load %arg6[%c0_17, %c0_18, %c0_19, %c0_20] : memref<1x1x8x128xf32, #tpu.memory_space<vmem>>, vector<1x1x8x128xf32>
    %14 = vector.shape_cast %13 : vector<1x1x8x128xf32> to vector<8x128xf32>
    %15 = arith.addf %14, %12 : vector<8x128xf32>
    %c0_21 = arith.constant 0 : index
    %c0_22 = arith.constant 0 : index
    %c0_23 = arith.constant 0 : index
    %c0_24 = arith.constant 0 : index
    %16 = vector.load %arg6[%c0_21, %c0_22, %c0_23, %c0_24] : memref<1x1x8x128xf32, #tpu.memory_space<vmem>>, vector<1x1x8x128xf32>
    %17 = vector.shape_cast %16 : vector<1x1x8x128xf32> to vector<8x128xf32>
    %18 = vector.shape_cast %15 : vector<8x128xf32> to vector<1x1x8x128xf32>
    tpu.vector_store %arg6[%c0_21, %c0_22, %c0_23, %c0_24], %18 {strides = array<i32>} : memref<1x1x8x128xf32, #tpu.memory_space<vmem>>, vector<1x1x8x128xf32>,
    %c0_25 = arith.constant 0 : index
    %c0_26 = arith.constant 0 : index
    %c3 = arith.constant 3 : index
    %c0_27 = arith.constant 0 : index
    %19 = vector.load %arg2[%c0_25, %c0_26, %c3, %c0_27] : memref<1x1x16x256xbf16, #tpu.memory_space<vmem>>, vector<1x1x8x256xbf16>
    %20 = vector.shape_cast %19 : vector<1x1x8x256xbf16> to vector<8x256xbf16>
    %c2 = arith.constant 2 : index
    %c0_28 = arith.constant 0 : index
    %c0_29 = arith.constant 0 : index
    %21 = vector.load %arg4[%c2, %c0_28, %c0_29] : memref<8x256x128xbf16, #tpu.memory_space<vmem>>, vector<1x256x128xbf16>
    %22 = vector.shape_cast %21 : vector<1x256x128xbf16> to vector<256x128xbf16>
    %cst_30 = arith.constant dense<0.000000e+00> : vector<8x128xf32>
    %23 = tpu.matmul %20, %22, %cst_30 {dimension_numbers = #tpu.dot_dimension_numbers<[1], [0], [0], [1], [0, 0, 1, 1], [], []>} : vector<8x256xbf16>, vector<256x128xbf16>, vector<8x128xf32> -> vector<8x128xf32>
    %c0_31 = arith.constant 0 : index
    %c0_32 = arith.constant 0 : index
    %c0_33 = arith.constant 0 : index
    %c0_34 = arith.constant 0 : index
    %24 = vector.load %arg6[%c0_31, %c0_32, %c0_33, %c0_34] : memref<1x1x8x128xf32, #tpu.memory_space<vmem>>, vector<1x1x8x128xf32>
    %25 = vector.shape_cast %24 : vector<1x1x8x128xf32> to vector<8x128xf32>
    %26 = arith.addf %25, %23 : vector<8x128xf32>
    %c0_35 = arith.constant 0 : index
    %c0_36 = arith.constant 0 : index
    %c0_37 = arith.constant 0 : index
    %c0_38 = arith.constant 0 : index
    %27 = vector.load %arg6[%c0_35, %c0_36, %c0_37, %c0_38] : memref<1x1x8x128xf32, #tpu.memory_space<vmem>>, vector<1x1x8x128xf32>
    %28 = vector.shape_cast %27 : vector<1x1x8x128xf32> to vector<8x128xf32>
    %29 = vector.shape_cast %26 : vector<8x128xf32> to vector<1x1x8x128xf32>
    tpu.vector_store %arg6[%c0_35, %c0_36, %c0_37, %c0_38], %29 {strides = array<i32>} : memref<1x1x8x128xf32, #tpu.memory_space<vmem>>, vector<1x1x8x128xf32>,
    %c0_39 = arith.constant 0 : index
    %c0_40 = arith.constant 0 : index
    %c4 = arith.constant 4 : index
    %c0_41 = arith.constant 0 : index
    %30 = vector.load %arg2[%c0_39, %c0_40, %c4, %c0_41] : memref<1x1x16x256xbf16, #tpu.memory_space<vmem>>, vector<1x1x8x256xbf16>
    %31 = vector.shape_cast %30 : vector<1x1x8x256xbf16> to vector<8x256xbf16>
    %c3_42 = arith.constant 3 : index
    %c0_43 = arith.constant 0 : index
    %c0_44 = arith.constant 0 : index
    %32 = vector.load %arg4[%c3_42, %c0_43, %c0_44] : memref<8x256x128xbf16, #tpu.memory_space<vmem>>, vector<1x256x128xbf16>
    %33 = vector.shape_cast %32 : vector<1x256x128xbf16> to vector<256x128xbf16>
    %cst_45 = arith.constant dense<0.000000e+00> : vector<8x128xf32>
    %34 = tpu.matmul %31, %33, %cst_45 {dimension_numbers = #tpu.dot_dimension_numbers<[1], [0], [0], [1], [0, 0, 1, 1], [], []>} : vector<8x256xbf16>, vector<256x128xbf16>, vector<8x128xf32> -> vector<8x128xf32>
    %c0_46 = arith.constant 0 : index
    %c0_47 = arith.constant 0 : index
    %c0_48 = arith.constant 0 : index
    %c0_49 = arith.constant 0 : index
    %35 = vector.load %arg6[%c0_46, %c0_47, %c0_48, %c0_49] : memref<1x1x8x128xf32, #tpu.memory_space<vmem>>, vector<1x1x8x128xf32>
    %36 = vector.shape_cast %35 : vector<1x1x8x128xf32> to vector<8x128xf32>
    %37 = arith.addf %36, %34 : vector<8x128xf32>
    %c0_50 = arith.constant 0 : index
    %c0_51 = arith.constant 0 : index
    %c0_52 = arith.constant 0 : index
    %c0_53 = arith.constant 0 : index
    %38 = vector.load %arg6[%c0_50, %c0_51, %c0_52, %c0_53] : memref<1x1x8x128xf32, #tpu.memory_space<vmem>>, vector<1x1x8x128xf32>
    %39 = vector.shape_cast %38 : vector<1x1x8x128xf32> to vector<8x128xf32>
    %40 = vector.shape_cast %37 : vector<8x128xf32> to vector<1x1x8x128xf32>
    tpu.vector_store %arg6[%c0_50, %c0_51, %c0_52, %c0_53], %40 {strides = array<i32>} : memref<1x1x8x128xf32, #tpu.memory_space<vmem>>, vector<1x1x8x128xf32>,
    %c0_54 = arith.constant 0 : index
    %c0_55 = arith.constant 0 : index
    %c0_56 = arith.constant 0 : index
    %c0_57 = arith.constant 0 : index
    %41 = vector.load %arg3[%c0_54, %c0_55, %c0_56, %c0_57] : memref<1x1x16x256xbf16, #tpu.memory_space<vmem>>, vector<1x1x8x256xbf16>
    %42 = vector.shape_cast %41 : vector<1x1x8x256xbf16> to vector<8x256xbf16>
    %c4_58 = arith.constant 4 : index
    %c0_59 = arith.constant 0 : index
    %c0_60 = arith.constant 0 : index
    %43 = vector.load %arg4[%c4_58, %c0_59, %c0_60] : memref<8x256x128xbf16, #tpu.memory_space<vmem>>, vector<1x256x128xbf16>
    %44 = vector.shape_cast %43 : vector<1x256x128xbf16> to vector<256x128xbf16>
    %cst_61 = arith.constant dense<0.000000e+00> : vector<8x128xf32>
    %45 = tpu.matmul %42, %44, %cst_61 {dimension_numbers = #tpu.dot_dimension_numbers<[1], [0], [0], [1], [0, 0, 1, 1], [], []>} : vector<8x256xbf16>, vector<256x128xbf16>, vector<8x128xf32> -> vector<8x128xf32>
    %c0_62 = arith.constant 0 : index
    %c0_63 = arith.constant 0 : index
    %c0_64 = arith.constant 0 : index
    %c0_65 = arith.constant 0 : index
    %46 = vector.load %arg6[%c0_62, %c0_63, %c0_64, %c0_65] : memref<1x1x8x128xf32, #tpu.memory_space<vmem>>, vector<1x1x8x128xf32>
    %47 = vector.shape_cast %46 : vector<1x1x8x128xf32> to vector<8x128xf32>
    %48 = arith.addf %47, %45 : vector<8x128xf32>
    %c0_66 = arith.constant 0 : index
    %c0_67 = arith.constant 0 : index
    %c0_68 = arith.constant 0 : index
    %c0_69 = arith.constant 0 : index
    %49 = vector.load %arg6[%c0_66, %c0_67, %c0_68, %c0_69] : memref<1x1x8x128xf32, #tpu.memory_space<vmem>>, vector<1x1x8x128xf32>
    %50 = vector.shape_cast %49 : vector<1x1x8x128xf32> to vector<8x128xf32>
    %51 = vector.shape_cast %48 : vector<8x128xf32> to vector<1x1x8x128xf32>
    tpu.vector_store %arg6[%c0_66, %c0_67, %c0_68, %c0_69], %51 {strides = array<i32>} : memref<1x1x8x128xf32, #tpu.memory_space<vmem>>, vector<1x1x8x128xf32>,
    %c0_70 = arith.constant 0 : index
    %c0_71 = arith.constant 0 : index
    %c1_72 = arith.constant 1 : index
    %c0_73 = arith.constant 0 : index
    %52 = vector.load %arg3[%c0_70, %c0_71, %c1_72, %c0_73] : memref<1x1x16x256xbf16, #tpu.memory_space<vmem>>, vector<1x1x8x256xbf16>
    %53 = vector.shape_cast %52 : vector<1x1x8x256xbf16> to vector<8x256xbf16>
    %c5 = arith.constant 5 : index
    %c0_74 = arith.constant 0 : index
    %c0_75 = arith.constant 0 : index
    %54 = vector.load %arg4[%c5, %c0_74, %c0_75] : memref<8x256x128xbf16, #tpu.memory_space<vmem>>, vector<1x256x128xbf16>
    %55 = vector.shape_cast %54 : vector<1x256x128xbf16> to vector<256x128xbf16>
    %cst_76 = arith.constant dense<0.000000e+00> : vector<8x128xf32>
    %56 = tpu.matmul %53, %55, %cst_76 {dimension_numbers = #tpu.dot_dimension_numbers<[1], [0], [0], [1], [0, 0, 1, 1], [], []>} : vector<8x256xbf16>, vector<256x128xbf16>, vector<8x128xf32> -> vector<8x128xf32>
    %c0_77 = arith.constant 0 : index
    %c0_78 = arith.constant 0 : index
    %c0_79 = arith.constant 0 : index
    %c0_80 = arith.constant 0 : index
    %57 = vector.load %arg6[%c0_77, %c0_78, %c0_79, %c0_80] : memref<1x1x8x128xf32, #tpu.memory_space<vmem>>, vector<1x1x8x128xf32>
    %58 = vector.shape_cast %57 : vector<1x1x8x128xf32> to vector<8x128xf32>
    %59 = arith.addf %58, %56 : vector<8x128xf32>
    %c0_81 = arith.constant 0 : index
    %c0_82 = arith.constant 0 : index
    %c0_83 = arith.constant 0 : index
    %c0_84 = arith.constant 0 : index
    %60 = vector.load %arg6[%c0_81, %c0_82, %c0_83, %c0_84] : memref<1x1x8x128xf32, #tpu.memory_space<vmem>>, vector<1x1x8x128xf32>
    %61 = vector.shape_cast %60 : vector<1x1x8x128xf32> to vector<8x128xf32>
    %62 = vector.shape_cast %59 : vector<8x128xf32> to vector<1x1x8x128xf32>
    tpu.vector_store %arg6[%c0_81, %c0_82, %c0_83, %c0_84], %62 {strides = array<i32>} : memref<1x1x8x128xf32, #tpu.memory_space<vmem>>, vector<1x1x8x128xf32>,
    %c0_85 = arith.constant 0 : index
    %c0_86 = arith.constant 0 : index
    %c3_87 = arith.constant 3 : index
    %c0_88 = arith.constant 0 : index
    %63 = vector.load %arg3[%c0_85, %c0_86, %c3_87, %c0_88] : memref<1x1x16x256xbf16, #tpu.memory_space<vmem>>, vector<1x1x8x256xbf16>
    %64 = vector.shape_cast %63 : vector<1x1x8x256xbf16> to vector<8x256xbf16>
    %c6 = arith.constant 6 : index
    %c0_89 = arith.constant 0 : index
    %c0_90 = arith.constant 0 : index
    %65 = vector.load %arg4[%c6, %c0_89, %c0_90] : memref<8x256x128xbf16, #tpu.memory_space<vmem>>, vector<1x256x128xbf16>
    %66 = vector.shape_cast %65 : vector<1x256x128xbf16> to vector<256x128xbf16>
    %cst_91 = arith.constant dense<0.000000e+00> : vector<8x128xf32>
    %67 = tpu.matmul %64, %66, %cst_91 {dimension_numbers = #tpu.dot_dimension_numbers<[1], [0], [0], [1], [0, 0, 1, 1], [], []>} : vector<8x256xbf16>, vector<256x128xbf16>, vector<8x128xf32> -> vector<8x128xf32>
    %c0_92 = arith.constant 0 : index
    %c0_93 = arith.constant 0 : index
    %c0_94 = arith.constant 0 : index
    %c0_95 = arith.constant 0 : index
    %68 = vector.load %arg6[%c0_92, %c0_93, %c0_94, %c0_95] : memref<1x1x8x128xf32, #tpu.memory_space<vmem>>, vector<1x1x8x128xf32>
    %69 = vector.shape_cast %68 : vector<1x1x8x128xf32> to vector<8x128xf32>
    %70 = arith.addf %69, %67 : vector<8x128xf32>
    %c0_96 = arith.constant 0 : index
    %c0_97 = arith.constant 0 : index
    %c0_98 = arith.constant 0 : index
    %c0_99 = arith.constant 0 : index
    %71 = vector.load %arg6[%c0_96, %c0_97, %c0_98, %c0_99] : memref<1x1x8x128xf32, #tpu.memory_space<vmem>>, vector<1x1x8x128xf32>
    %72 = vector.shape_cast %71 : vector<1x1x8x128xf32> to vector<8x128xf32>
    %73 = vector.shape_cast %70 : vector<8x128xf32> to vector<1x1x8x128xf32>
    tpu.vector_store %arg6[%c0_96, %c0_97, %c0_98, %c0_99], %73 {strides = array<i32>} : memref<1x1x8x128xf32, #tpu.memory_space<vmem>>, vector<1x1x8x128xf32>,
    %c0_100 = arith.constant 0 : index
    %c0_101 = arith.constant 0 : index
    %c4_102 = arith.constant 4 : index
    %c0_103 = arith.constant 0 : index
    %74 = vector.load %arg3[%c0_100, %c0_101, %c4_102, %c0_103] : memref<1x1x16x256xbf16, #tpu.memory_space<vmem>>, vector<1x1x8x256xbf16>
    %75 = vector.shape_cast %74 : vector<1x1x8x256xbf16> to vector<8x256xbf16>
    %c7 = arith.constant 7 : index
    %c0_104 = arith.constant 0 : index
    %c0_105 = arith.constant 0 : index
    %76 = vector.load %arg4[%c7, %c0_104, %c0_105] : memref<8x256x128xbf16, #tpu.memory_space<vmem>>, vector<1x256x128xbf16>
    %77 = vector.shape_cast %76 : vector<1x256x128xbf16> to vector<256x128xbf16>
    %cst_106 = arith.constant dense<0.000000e+00> : vector<8x128xf32>
    %78 = tpu.matmul %75, %77, %cst_106 {dimension_numbers = #tpu.dot_dimension_numbers<[1], [0], [0], [1], [0, 0, 1, 1], [], []>} : vector<8x256xbf16>, vector<256x128xbf16>, vector<8x128xf32> -> vector<8x128xf32>
    %c0_107 = arith.constant 0 : index
    %c0_108 = arith.constant 0 : index
    %c0_109 = arith.constant 0 : index
    %c0_110 = arith.constant 0 : index
    %79 = vector.load %arg6[%c0_107, %c0_108, %c0_109, %c0_110] : memref<1x1x8x128xf32, #tpu.memory_space<vmem>>, vector<1x1x8x128xf32>
    %80 = vector.shape_cast %79 : vector<1x1x8x128xf32> to vector<8x128xf32>
    %81 = arith.addf %80, %78 : vector<8x128xf32>
    %c0_111 = arith.constant 0 : index
    %c0_112 = arith.constant 0 : index
    %c0_113 = arith.constant 0 : index
    %c0_114 = arith.constant 0 : index
    %82 = vector.load %arg6[%c0_111, %c0_112, %c0_113, %c0_114] : memref<1x1x8x128xf32, #tpu.memory_space<vmem>>, vector<1x1x8x128xf32>
    %83 = vector.shape_cast %82 : vector<1x1x8x128xf32> to vector<8x128xf32>
    %84 = vector.shape_cast %81 : vector<8x128xf32> to vector<1x1x8x128xf32>
    tpu.vector_store %arg6[%c0_111, %c0_112, %c0_113, %c0_114], %84 {strides = array<i32>} : memref<1x1x8x128xf32, #tpu.memory_space<vmem>>, vector<1x1x8x128xf32>,
    %c0_115 = arith.constant 0 : index
    %c0_116 = arith.constant 0 : index
    %c0_117 = arith.constant 0 : index
    %c0_118 = arith.constant 0 : index
    %85 = vector.load %arg6[%c0_115, %c0_116, %c0_117, %c0_118] : memref<1x1x8x128xf32, #tpu.memory_space<vmem>>, vector<1x1x8x128xf32>
    %86 = vector.shape_cast %85 : vector<1x1x8x128xf32> to vector<8x128xf32>
    %c0_119 = arith.constant 0 : index
    %c0_120 = arith.constant 0 : index
    %87 = vector.load %arg5[%c0_119, %c0_120] : memref<1x128xf32, #tpu.memory_space<vmem>>, vector<1x128xf32>
    %88 = vector.broadcast %87 : vector<1x128xf32> to vector<8x128xf32>
    %89 = arith.addf %86, %88 : vector<8x128xf32>
    %cst_121 = arith.constant 0.000000e+00 : f32
    %90 = vector.broadcast %cst_121 : f32 to vector<8x128xf32>
    %91 = arith.cmpf oge, %89, %90 : vector<8x128xf32>
    %cst_122 = arith.constant 0.00999999977 : f32
    %92 = vector.broadcast %cst_122 : f32 to vector<8x128xf32>
    %93 = arith.mulf %92, %89 : vector<8x128xf32>
    %94 = arith.select %91, %89, %93 : vector<8x128xi1>, vector<8x128xf32>
    %c0_123 = arith.constant 0 : index
    %c0_124 = arith.constant 0 : index
    %c0_125 = arith.constant 0 : index
    %c0_126 = arith.constant 0 : index
    %95 = vector.load %arg6[%c0_123, %c0_124, %c0_125, %c0_126] : memref<1x1x8x128xf32, #tpu.memory_space<vmem>>, vector<1x1x8x128xf32>
    %96 = vector.shape_cast %95 : vector<1x1x8x128xf32> to vector<8x128xf32>
    %97 = vector.shape_cast %94 : vector<8x128xf32> to vector<1x1x8x128xf32>
    tpu.vector_store %arg6[%c0_123, %c0_124, %c0_125, %c0_126], %97 {strides = array<i32>} : memref<1x1x8x128xf32, #tpu.memory_space<vmem>>, vector<1x1x8x128xf32>,
    return
  }
  func.func @transform_0(%arg0: i32, %arg1: i32) -> (i32, i32, i32, i32) {
    %c0_i32 = arith.constant 0 : i32
    %c0_i32_0 = arith.constant 0 : i32
    %c0_i32_1 = arith.constant 0 : i32
    return %arg0, %arg1, %c0_i32, %c0_i32_0 : i32, i32, i32, i32
  }
  func.func @transform_1(%arg0: i32, %arg1: i32) -> (i32, i32, i32, i32) {
    %c1_i32 = arith.constant 1 : i32
    %0 = arith.addi %arg1, %c1_i32 : i32
    %c0_i32 = arith.constant 0 : i32
    %c0_i32_0 = arith.constant 0 : i32
    %c0_i32_1 = arith.constant 0 : i32
    return %arg0, %0, %c0_i32, %c0_i32_0 : i32, i32, i32, i32
  }
  func.func @transform_2(%arg0: i32, %arg1: i32) -> (i32, i32, i32) {
    %c0_i32 = arith.constant 0 : i32
    %c0_i32_0 = arith.constant 0 : i32
    %c0_i32_1 = arith.constant 0 : i32
    %c0_i32_2 = arith.constant 0 : i32
    return %c0_i32, %c0_i32_0, %c0_i32_1 : i32, i32, i32
  }
  func.func @transform_3(%arg0: i32, %arg1: i32) -> (i32, i32) {
    %c0_i32 = arith.constant 0 : i32
    %c0_i32_0 = arith.constant 0 : i32
    %c0_i32_1 = arith.constant 0 : i32
    return %c0_i32, %c0_i32_0 : i32, i32
  }
  func.func @transform_4(%arg0: i32, %arg1: i32) -> (i32, i32, i32, i32) {
    %c0_i32 = arith.constant 0 : i32
    %c0_i32_0 = arith.constant 0 : i32
    %c0_i32_1 = arith.constant 0 : i32
    return %arg0, %arg1, %c0_i32, %c0_i32_0 : i32, i32, i32, i32
  }
}

module attributes {stable_mosaic.version = 11 : i64} {
  func.func @_conv2_kernel(%arg0: i32, %arg1: i32, %arg2: memref<1x1x24x64xbf16, #tpu.memory_space<vmem>>, %arg3: memref<1x1x24x64xbf16, #tpu.memory_space<vmem>>, %arg4: memref<8x64x512xbf16, #tpu.memory_space<vmem>>, %arg5: memref<1x512xf32, #tpu.memory_space<vmem>>, %arg6: memref<1x1x16x512xf32, #tpu.memory_space<vmem>>) attributes {dimension_semantics = [#tpu.dimension_semantics<parallel>, #tpu.dimension_semantics<parallel>], iteration_bounds = array<i64: 2, 3>, scalar_prefetch = 0 : i64, scratch_operands = 0 : i64, tpu.core_type = #tpu.core_type<tc>, window_params = [{transform_indices = @transform_0, window_bounds = array<i64: 1, 1, 24, 64>}, {transform_indices = @transform_1, window_bounds = array<i64: 1, 1, 24, 64>}, {pipeline_mode = #tpu.pipeline_mode<synchronous>, transform_indices = @transform_2, window_bounds = array<i64: 8, 64, 512>}, {pipeline_mode = #tpu.pipeline_mode<synchronous>, transform_indices = @transform_3, window_bounds = array<i64: 1, 512>}, {transform_indices = @transform_4, window_bounds = array<i64: 1, 1, 16, 512>}]} {
    %c0 = arith.constant 0 : index
    %c0_0 = arith.constant 0 : index
    %c0_1 = arith.constant 0 : index
    %c0_2 = arith.constant 0 : index
    %0 = vector.load %arg2[%c0, %c0_0, %c0_1, %c0_2] : memref<1x1x24x64xbf16, #tpu.memory_space<vmem>>, vector<1x1x16x64xbf16>
    %1 = vector.shape_cast %0 : vector<1x1x16x64xbf16> to vector<16x64xbf16>
    %c0_3 = arith.constant 0 : index
    %c0_4 = arith.constant 0 : index
    %c0_5 = arith.constant 0 : index
    %2 = vector.load %arg4[%c0_3, %c0_4, %c0_5] : memref<8x64x512xbf16, #tpu.memory_space<vmem>>, vector<1x64x512xbf16>
    %3 = vector.shape_cast %2 : vector<1x64x512xbf16> to vector<64x512xbf16>
    %cst = arith.constant dense<0.000000e+00> : vector<16x512xf32>
    %4 = tpu.matmul %1, %3, %cst {dimension_numbers = #tpu.dot_dimension_numbers<[1], [0], [0], [1], [0, 0, 1, 1], [], []>} : vector<16x64xbf16>, vector<64x512xbf16>, vector<16x512xf32> -> vector<16x512xf32>
    %c0_6 = arith.constant 0 : index
    %c0_7 = arith.constant 0 : index
    %c0_8 = arith.constant 0 : index
    %c0_9 = arith.constant 0 : index
    %5 = vector.load %arg6[%c0_6, %c0_7, %c0_8, %c0_9] : memref<1x1x16x512xf32, #tpu.memory_space<vmem>>, vector<1x1x16x512xf32>
    %6 = vector.shape_cast %5 : vector<1x1x16x512xf32> to vector<16x512xf32>
    %7 = vector.shape_cast %4 : vector<16x512xf32> to vector<1x1x16x512xf32>
    tpu.vector_store %arg6[%c0_6, %c0_7, %c0_8, %c0_9], %7 {strides = array<i32>} : memref<1x1x16x512xf32, #tpu.memory_space<vmem>>, vector<1x1x16x512xf32>,
    %c0_10 = arith.constant 0 : index
    %c0_11 = arith.constant 0 : index
    %c1 = arith.constant 1 : index
    %c0_12 = arith.constant 0 : index
    %8 = vector.load %arg2[%c0_10, %c0_11, %c1, %c0_12] : memref<1x1x24x64xbf16, #tpu.memory_space<vmem>>, vector<1x1x16x64xbf16>
    %9 = vector.shape_cast %8 : vector<1x1x16x64xbf16> to vector<16x64xbf16>
    %c1_13 = arith.constant 1 : index
    %c0_14 = arith.constant 0 : index
    %c0_15 = arith.constant 0 : index
    %10 = vector.load %arg4[%c1_13, %c0_14, %c0_15] : memref<8x64x512xbf16, #tpu.memory_space<vmem>>, vector<1x64x512xbf16>
    %11 = vector.shape_cast %10 : vector<1x64x512xbf16> to vector<64x512xbf16>
    %cst_16 = arith.constant dense<0.000000e+00> : vector<16x512xf32>
    %12 = tpu.matmul %9, %11, %cst_16 {dimension_numbers = #tpu.dot_dimension_numbers<[1], [0], [0], [1], [0, 0, 1, 1], [], []>} : vector<16x64xbf16>, vector<64x512xbf16>, vector<16x512xf32> -> vector<16x512xf32>
    %c0_17 = arith.constant 0 : index
    %c0_18 = arith.constant 0 : index
    %c0_19 = arith.constant 0 : index
    %c0_20 = arith.constant 0 : index
    %13 = vector.load %arg6[%c0_17, %c0_18, %c0_19, %c0_20] : memref<1x1x16x512xf32, #tpu.memory_space<vmem>>, vector<1x1x16x512xf32>
    %14 = vector.shape_cast %13 : vector<1x1x16x512xf32> to vector<16x512xf32>
    %15 = arith.addf %14, %12 : vector<16x512xf32>
    %c0_21 = arith.constant 0 : index
    %c0_22 = arith.constant 0 : index
    %c0_23 = arith.constant 0 : index
    %c0_24 = arith.constant 0 : index
    %16 = vector.load %arg6[%c0_21, %c0_22, %c0_23, %c0_24] : memref<1x1x16x512xf32, #tpu.memory_space<vmem>>, vector<1x1x16x512xf32>
    %17 = vector.shape_cast %16 : vector<1x1x16x512xf32> to vector<16x512xf32>
    %18 = vector.shape_cast %15 : vector<16x512xf32> to vector<1x1x16x512xf32>
    tpu.vector_store %arg6[%c0_21, %c0_22, %c0_23, %c0_24], %18 {strides = array<i32>} : memref<1x1x16x512xf32, #tpu.memory_space<vmem>>, vector<1x1x16x512xf32>,
    %c0_25 = arith.constant 0 : index
    %c0_26 = arith.constant 0 : index
    %c4 = arith.constant 4 : index
    %c0_27 = arith.constant 0 : index
    %19 = vector.load %arg2[%c0_25, %c0_26, %c4, %c0_27] : memref<1x1x24x64xbf16, #tpu.memory_space<vmem>>, vector<1x1x16x64xbf16>
    %20 = vector.shape_cast %19 : vector<1x1x16x64xbf16> to vector<16x64xbf16>
    %c2 = arith.constant 2 : index
    %c0_28 = arith.constant 0 : index
    %c0_29 = arith.constant 0 : index
    %21 = vector.load %arg4[%c2, %c0_28, %c0_29] : memref<8x64x512xbf16, #tpu.memory_space<vmem>>, vector<1x64x512xbf16>
    %22 = vector.shape_cast %21 : vector<1x64x512xbf16> to vector<64x512xbf16>
    %cst_30 = arith.constant dense<0.000000e+00> : vector<16x512xf32>
    %23 = tpu.matmul %20, %22, %cst_30 {dimension_numbers = #tpu.dot_dimension_numbers<[1], [0], [0], [1], [0, 0, 1, 1], [], []>} : vector<16x64xbf16>, vector<64x512xbf16>, vector<16x512xf32> -> vector<16x512xf32>
    %c0_31 = arith.constant 0 : index
    %c0_32 = arith.constant 0 : index
    %c0_33 = arith.constant 0 : index
    %c0_34 = arith.constant 0 : index
    %24 = vector.load %arg6[%c0_31, %c0_32, %c0_33, %c0_34] : memref<1x1x16x512xf32, #tpu.memory_space<vmem>>, vector<1x1x16x512xf32>
    %25 = vector.shape_cast %24 : vector<1x1x16x512xf32> to vector<16x512xf32>
    %26 = arith.addf %25, %23 : vector<16x512xf32>
    %c0_35 = arith.constant 0 : index
    %c0_36 = arith.constant 0 : index
    %c0_37 = arith.constant 0 : index
    %c0_38 = arith.constant 0 : index
    %27 = vector.load %arg6[%c0_35, %c0_36, %c0_37, %c0_38] : memref<1x1x16x512xf32, #tpu.memory_space<vmem>>, vector<1x1x16x512xf32>
    %28 = vector.shape_cast %27 : vector<1x1x16x512xf32> to vector<16x512xf32>
    %29 = vector.shape_cast %26 : vector<16x512xf32> to vector<1x1x16x512xf32>
    tpu.vector_store %arg6[%c0_35, %c0_36, %c0_37, %c0_38], %29 {strides = array<i32>} : memref<1x1x16x512xf32, #tpu.memory_space<vmem>>, vector<1x1x16x512xf32>,
    %c0_39 = arith.constant 0 : index
    %c0_40 = arith.constant 0 : index
    %c5 = arith.constant 5 : index
    %c0_41 = arith.constant 0 : index
    %30 = vector.load %arg2[%c0_39, %c0_40, %c5, %c0_41] : memref<1x1x24x64xbf16, #tpu.memory_space<vmem>>, vector<1x1x16x64xbf16>
    %31 = vector.shape_cast %30 : vector<1x1x16x64xbf16> to vector<16x64xbf16>
    %c3 = arith.constant 3 : index
    %c0_42 = arith.constant 0 : index
    %c0_43 = arith.constant 0 : index
    %32 = vector.load %arg4[%c3, %c0_42, %c0_43] : memref<8x64x512xbf16, #tpu.memory_space<vmem>>, vector<1x64x512xbf16>
    %33 = vector.shape_cast %32 : vector<1x64x512xbf16> to vector<64x512xbf16>
    %cst_44 = arith.constant dense<0.000000e+00> : vector<16x512xf32>
    %34 = tpu.matmul %31, %33, %cst_44 {dimension_numbers = #tpu.dot_dimension_numbers<[1], [0], [0], [1], [0, 0, 1, 1], [], []>} : vector<16x64xbf16>, vector<64x512xbf16>, vector<16x512xf32> -> vector<16x512xf32>
    %c0_45 = arith.constant 0 : index
    %c0_46 = arith.constant 0 : index
    %c0_47 = arith.constant 0 : index
    %c0_48 = arith.constant 0 : index
    %35 = vector.load %arg6[%c0_45, %c0_46, %c0_47, %c0_48] : memref<1x1x16x512xf32, #tpu.memory_space<vmem>>, vector<1x1x16x512xf32>
    %36 = vector.shape_cast %35 : vector<1x1x16x512xf32> to vector<16x512xf32>
    %37 = arith.addf %36, %34 : vector<16x512xf32>
    %c0_49 = arith.constant 0 : index
    %c0_50 = arith.constant 0 : index
    %c0_51 = arith.constant 0 : index
    %c0_52 = arith.constant 0 : index
    %38 = vector.load %arg6[%c0_49, %c0_50, %c0_51, %c0_52] : memref<1x1x16x512xf32, #tpu.memory_space<vmem>>, vector<1x1x16x512xf32>
    %39 = vector.shape_cast %38 : vector<1x1x16x512xf32> to vector<16x512xf32>
    %40 = vector.shape_cast %37 : vector<16x512xf32> to vector<1x1x16x512xf32>
    tpu.vector_store %arg6[%c0_49, %c0_50, %c0_51, %c0_52], %40 {strides = array<i32>} : memref<1x1x16x512xf32, #tpu.memory_space<vmem>>, vector<1x1x16x512xf32>,
    %c0_53 = arith.constant 0 : index
    %c0_54 = arith.constant 0 : index
    %c0_55 = arith.constant 0 : index
    %c0_56 = arith.constant 0 : index
    %41 = vector.load %arg3[%c0_53, %c0_54, %c0_55, %c0_56] : memref<1x1x24x64xbf16, #tpu.memory_space<vmem>>, vector<1x1x16x64xbf16>
    %42 = vector.shape_cast %41 : vector<1x1x16x64xbf16> to vector<16x64xbf16>
    %c4_57 = arith.constant 4 : index
    %c0_58 = arith.constant 0 : index
    %c0_59 = arith.constant 0 : index
    %43 = vector.load %arg4[%c4_57, %c0_58, %c0_59] : memref<8x64x512xbf16, #tpu.memory_space<vmem>>, vector<1x64x512xbf16>
    %44 = vector.shape_cast %43 : vector<1x64x512xbf16> to vector<64x512xbf16>
    %cst_60 = arith.constant dense<0.000000e+00> : vector<16x512xf32>
    %45 = tpu.matmul %42, %44, %cst_60 {dimension_numbers = #tpu.dot_dimension_numbers<[1], [0], [0], [1], [0, 0, 1, 1], [], []>} : vector<16x64xbf16>, vector<64x512xbf16>, vector<16x512xf32> -> vector<16x512xf32>
    %c0_61 = arith.constant 0 : index
    %c0_62 = arith.constant 0 : index
    %c0_63 = arith.constant 0 : index
    %c0_64 = arith.constant 0 : index
    %46 = vector.load %arg6[%c0_61, %c0_62, %c0_63, %c0_64] : memref<1x1x16x512xf32, #tpu.memory_space<vmem>>, vector<1x1x16x512xf32>
    %47 = vector.shape_cast %46 : vector<1x1x16x512xf32> to vector<16x512xf32>
    %48 = arith.addf %47, %45 : vector<16x512xf32>
    %c0_65 = arith.constant 0 : index
    %c0_66 = arith.constant 0 : index
    %c0_67 = arith.constant 0 : index
    %c0_68 = arith.constant 0 : index
    %49 = vector.load %arg6[%c0_65, %c0_66, %c0_67, %c0_68] : memref<1x1x16x512xf32, #tpu.memory_space<vmem>>, vector<1x1x16x512xf32>
    %50 = vector.shape_cast %49 : vector<1x1x16x512xf32> to vector<16x512xf32>
    %51 = vector.shape_cast %48 : vector<16x512xf32> to vector<1x1x16x512xf32>
    tpu.vector_store %arg6[%c0_65, %c0_66, %c0_67, %c0_68], %51 {strides = array<i32>} : memref<1x1x16x512xf32, #tpu.memory_space<vmem>>, vector<1x1x16x512xf32>,
    %c0_69 = arith.constant 0 : index
    %c0_70 = arith.constant 0 : index
    %c1_71 = arith.constant 1 : index
    %c0_72 = arith.constant 0 : index
    %52 = vector.load %arg3[%c0_69, %c0_70, %c1_71, %c0_72] : memref<1x1x24x64xbf16, #tpu.memory_space<vmem>>, vector<1x1x16x64xbf16>
    %53 = vector.shape_cast %52 : vector<1x1x16x64xbf16> to vector<16x64xbf16>
    %c5_73 = arith.constant 5 : index
    %c0_74 = arith.constant 0 : index
    %c0_75 = arith.constant 0 : index
    %54 = vector.load %arg4[%c5_73, %c0_74, %c0_75] : memref<8x64x512xbf16, #tpu.memory_space<vmem>>, vector<1x64x512xbf16>
    %55 = vector.shape_cast %54 : vector<1x64x512xbf16> to vector<64x512xbf16>
    %cst_76 = arith.constant dense<0.000000e+00> : vector<16x512xf32>
    %56 = tpu.matmul %53, %55, %cst_76 {dimension_numbers = #tpu.dot_dimension_numbers<[1], [0], [0], [1], [0, 0, 1, 1], [], []>} : vector<16x64xbf16>, vector<64x512xbf16>, vector<16x512xf32> -> vector<16x512xf32>
    %c0_77 = arith.constant 0 : index
    %c0_78 = arith.constant 0 : index
    %c0_79 = arith.constant 0 : index
    %c0_80 = arith.constant 0 : index
    %57 = vector.load %arg6[%c0_77, %c0_78, %c0_79, %c0_80] : memref<1x1x16x512xf32, #tpu.memory_space<vmem>>, vector<1x1x16x512xf32>
    %58 = vector.shape_cast %57 : vector<1x1x16x512xf32> to vector<16x512xf32>
    %59 = arith.addf %58, %56 : vector<16x512xf32>
    %c0_81 = arith.constant 0 : index
    %c0_82 = arith.constant 0 : index
    %c0_83 = arith.constant 0 : index
    %c0_84 = arith.constant 0 : index
    %60 = vector.load %arg6[%c0_81, %c0_82, %c0_83, %c0_84] : memref<1x1x16x512xf32, #tpu.memory_space<vmem>>, vector<1x1x16x512xf32>
    %61 = vector.shape_cast %60 : vector<1x1x16x512xf32> to vector<16x512xf32>
    %62 = vector.shape_cast %59 : vector<16x512xf32> to vector<1x1x16x512xf32>
    tpu.vector_store %arg6[%c0_81, %c0_82, %c0_83, %c0_84], %62 {strides = array<i32>} : memref<1x1x16x512xf32, #tpu.memory_space<vmem>>, vector<1x1x16x512xf32>,
    %c0_85 = arith.constant 0 : index
    %c0_86 = arith.constant 0 : index
    %c4_87 = arith.constant 4 : index
    %c0_88 = arith.constant 0 : index
    %63 = vector.load %arg3[%c0_85, %c0_86, %c4_87, %c0_88] : memref<1x1x24x64xbf16, #tpu.memory_space<vmem>>, vector<1x1x16x64xbf16>
    %64 = vector.shape_cast %63 : vector<1x1x16x64xbf16> to vector<16x64xbf16>
    %c6 = arith.constant 6 : index
    %c0_89 = arith.constant 0 : index
    %c0_90 = arith.constant 0 : index
    %65 = vector.load %arg4[%c6, %c0_89, %c0_90] : memref<8x64x512xbf16, #tpu.memory_space<vmem>>, vector<1x64x512xbf16>
    %66 = vector.shape_cast %65 : vector<1x64x512xbf16> to vector<64x512xbf16>
    %cst_91 = arith.constant dense<0.000000e+00> : vector<16x512xf32>
    %67 = tpu.matmul %64, %66, %cst_91 {dimension_numbers = #tpu.dot_dimension_numbers<[1], [0], [0], [1], [0, 0, 1, 1], [], []>} : vector<16x64xbf16>, vector<64x512xbf16>, vector<16x512xf32> -> vector<16x512xf32>
    %c0_92 = arith.constant 0 : index
    %c0_93 = arith.constant 0 : index
    %c0_94 = arith.constant 0 : index
    %c0_95 = arith.constant 0 : index
    %68 = vector.load %arg6[%c0_92, %c0_93, %c0_94, %c0_95] : memref<1x1x16x512xf32, #tpu.memory_space<vmem>>, vector<1x1x16x512xf32>
    %69 = vector.shape_cast %68 : vector<1x1x16x512xf32> to vector<16x512xf32>
    %70 = arith.addf %69, %67 : vector<16x512xf32>
    %c0_96 = arith.constant 0 : index
    %c0_97 = arith.constant 0 : index
    %c0_98 = arith.constant 0 : index
    %c0_99 = arith.constant 0 : index
    %71 = vector.load %arg6[%c0_96, %c0_97, %c0_98, %c0_99] : memref<1x1x16x512xf32, #tpu.memory_space<vmem>>, vector<1x1x16x512xf32>
    %72 = vector.shape_cast %71 : vector<1x1x16x512xf32> to vector<16x512xf32>
    %73 = vector.shape_cast %70 : vector<16x512xf32> to vector<1x1x16x512xf32>
    tpu.vector_store %arg6[%c0_96, %c0_97, %c0_98, %c0_99], %73 {strides = array<i32>} : memref<1x1x16x512xf32, #tpu.memory_space<vmem>>, vector<1x1x16x512xf32>,
    %c0_100 = arith.constant 0 : index
    %c0_101 = arith.constant 0 : index
    %c5_102 = arith.constant 5 : index
    %c0_103 = arith.constant 0 : index
    %74 = vector.load %arg3[%c0_100, %c0_101, %c5_102, %c0_103] : memref<1x1x24x64xbf16, #tpu.memory_space<vmem>>, vector<1x1x16x64xbf16>
    %75 = vector.shape_cast %74 : vector<1x1x16x64xbf16> to vector<16x64xbf16>
    %c7 = arith.constant 7 : index
    %c0_104 = arith.constant 0 : index
    %c0_105 = arith.constant 0 : index
    %76 = vector.load %arg4[%c7, %c0_104, %c0_105] : memref<8x64x512xbf16, #tpu.memory_space<vmem>>, vector<1x64x512xbf16>
    %77 = vector.shape_cast %76 : vector<1x64x512xbf16> to vector<64x512xbf16>
    %cst_106 = arith.constant dense<0.000000e+00> : vector<16x512xf32>
    %78 = tpu.matmul %75, %77, %cst_106 {dimension_numbers = #tpu.dot_dimension_numbers<[1], [0], [0], [1], [0, 0, 1, 1], [], []>} : vector<16x64xbf16>, vector<64x512xbf16>, vector<16x512xf32> -> vector<16x512xf32>
    %c0_107 = arith.constant 0 : index
    %c0_108 = arith.constant 0 : index
    %c0_109 = arith.constant 0 : index
    %c0_110 = arith.constant 0 : index
    %79 = vector.load %arg6[%c0_107, %c0_108, %c0_109, %c0_110] : memref<1x1x16x512xf32, #tpu.memory_space<vmem>>, vector<1x1x16x512xf32>
    %80 = vector.shape_cast %79 : vector<1x1x16x512xf32> to vector<16x512xf32>
    %81 = arith.addf %80, %78 : vector<16x512xf32>
    %c0_111 = arith.constant 0 : index
    %c0_112 = arith.constant 0 : index
    %c0_113 = arith.constant 0 : index
    %c0_114 = arith.constant 0 : index
    %82 = vector.load %arg6[%c0_111, %c0_112, %c0_113, %c0_114] : memref<1x1x16x512xf32, #tpu.memory_space<vmem>>, vector<1x1x16x512xf32>
    %83 = vector.shape_cast %82 : vector<1x1x16x512xf32> to vector<16x512xf32>
    %84 = vector.shape_cast %81 : vector<16x512xf32> to vector<1x1x16x512xf32>
    tpu.vector_store %arg6[%c0_111, %c0_112, %c0_113, %c0_114], %84 {strides = array<i32>} : memref<1x1x16x512xf32, #tpu.memory_space<vmem>>, vector<1x1x16x512xf32>,
    %c0_115 = arith.constant 0 : index
    %c0_116 = arith.constant 0 : index
    %c0_117 = arith.constant 0 : index
    %c0_118 = arith.constant 0 : index
    %85 = vector.load %arg6[%c0_115, %c0_116, %c0_117, %c0_118] : memref<1x1x16x512xf32, #tpu.memory_space<vmem>>, vector<1x1x16x512xf32>
    %86 = vector.shape_cast %85 : vector<1x1x16x512xf32> to vector<16x512xf32>
    %c0_119 = arith.constant 0 : index
    %c0_120 = arith.constant 0 : index
    %87 = vector.load %arg5[%c0_119, %c0_120] : memref<1x512xf32, #tpu.memory_space<vmem>>, vector<1x512xf32>
    %88 = vector.broadcast %87 : vector<1x512xf32> to vector<16x512xf32>
    %89 = arith.addf %86, %88 : vector<16x512xf32>
    %cst_121 = arith.constant 0.000000e+00 : f32
    %90 = vector.broadcast %cst_121 : f32 to vector<16x512xf32>
    %91 = arith.cmpf oge, %89, %90 : vector<16x512xf32>
    %cst_122 = arith.constant 0.00999999977 : f32
    %92 = vector.broadcast %cst_122 : f32 to vector<16x512xf32>
    %93 = arith.mulf %92, %89 : vector<16x512xf32>
    %94 = arith.select %91, %89, %93 : vector<16x512xi1>, vector<16x512xf32>
    %c0_123 = arith.constant 0 : index
    %c0_124 = arith.constant 0 : index
    %c0_125 = arith.constant 0 : index
    %c0_126 = arith.constant 0 : index
    %95 = vector.load %arg6[%c0_123, %c0_124, %c0_125, %c0_126] : memref<1x1x16x512xf32, #tpu.memory_space<vmem>>, vector<1x1x16x512xf32>
    %96 = vector.shape_cast %95 : vector<1x1x16x512xf32> to vector<16x512xf32>
    %97 = vector.shape_cast %94 : vector<16x512xf32> to vector<1x1x16x512xf32>
    tpu.vector_store %arg6[%c0_123, %c0_124, %c0_125, %c0_126], %97 {strides = array<i32>} : memref<1x1x16x512xf32, #tpu.memory_space<vmem>>, vector<1x1x16x512xf32>,
    return
  }
  func.func @transform_0(%arg0: i32, %arg1: i32) -> (i32, i32, i32, i32) {
    %c0_i32 = arith.constant 0 : i32
    %c0_i32_0 = arith.constant 0 : i32
    %c0_i32_1 = arith.constant 0 : i32
    return %arg0, %arg1, %c0_i32, %c0_i32_0 : i32, i32, i32, i32
  }
  func.func @transform_1(%arg0: i32, %arg1: i32) -> (i32, i32, i32, i32) {
    %c1_i32 = arith.constant 1 : i32
    %0 = arith.addi %arg1, %c1_i32 : i32
    %c0_i32 = arith.constant 0 : i32
    %c0_i32_0 = arith.constant 0 : i32
    %c0_i32_1 = arith.constant 0 : i32
    return %arg0, %0, %c0_i32, %c0_i32_0 : i32, i32, i32, i32
  }
  func.func @transform_2(%arg0: i32, %arg1: i32) -> (i32, i32, i32) {
    %c0_i32 = arith.constant 0 : i32
    %c0_i32_0 = arith.constant 0 : i32
    %c0_i32_1 = arith.constant 0 : i32
    %c0_i32_2 = arith.constant 0 : i32
    return %c0_i32, %c0_i32_0, %c0_i32_1 : i32, i32, i32
  }
  func.func @transform_3(%arg0: i32, %arg1: i32) -> (i32, i32) {
    %c0_i32 = arith.constant 0 : i32
    %c0_i32_0 = arith.constant 0 : i32
    %c0_i32_1 = arith.constant 0 : i32
    return %c0_i32, %c0_i32_0 : i32, i32
  }
  func.func @transform_4(%arg0: i32, %arg1: i32) -> (i32, i32, i32, i32) {
    %c0_i32 = arith.constant 0 : i32
    %c0_i32_0 = arith.constant 0 : i32
    %c0_i32_1 = arith.constant 0 : i32
    return %arg0, %arg1, %c0_i32, %c0_i32_0 : i32, i32, i32, i32
  }
}

module attributes {stable_mosaic.version = 11 : i64} {
  func.func @_conv2_kernel(%arg0: i32, %arg1: i32, %arg2: memref<1x1x40x96xbf16, #tpu.memory_space<vmem>>, %arg3: memref<1x1x40x96xbf16, #tpu.memory_space<vmem>>, %arg4: memref<8x96x256xbf16, #tpu.memory_space<vmem>>, %arg5: memref<1x256xf32, #tpu.memory_space<vmem>>, %arg6: memref<1x1x32x256xf32, #tpu.memory_space<vmem>>) attributes {dimension_semantics = [#tpu.dimension_semantics<parallel>, #tpu.dimension_semantics<parallel>], iteration_bounds = array<i64: 2, 5>, scalar_prefetch = 0 : i64, scratch_operands = 0 : i64, tpu.core_type = #tpu.core_type<tc>, window_params = [{transform_indices = @transform_0, window_bounds = array<i64: 1, 1, 40, 96>}, {transform_indices = @transform_1, window_bounds = array<i64: 1, 1, 40, 96>}, {pipeline_mode = #tpu.pipeline_mode<synchronous>, transform_indices = @transform_2, window_bounds = array<i64: 8, 96, 256>}, {pipeline_mode = #tpu.pipeline_mode<synchronous>, transform_indices = @transform_3, window_bounds = array<i64: 1, 256>}, {transform_indices = @transform_4, window_bounds = array<i64: 1, 1, 32, 256>}]} {
    %c0 = arith.constant 0 : index
    %c0_0 = arith.constant 0 : index
    %c0_1 = arith.constant 0 : index
    %c0_2 = arith.constant 0 : index
    %0 = vector.load %arg2[%c0, %c0_0, %c0_1, %c0_2] : memref<1x1x40x96xbf16, #tpu.memory_space<vmem>>, vector<1x1x32x96xbf16>
    %1 = vector.shape_cast %0 : vector<1x1x32x96xbf16> to vector<32x96xbf16>
    %c0_3 = arith.constant 0 : index
    %c0_4 = arith.constant 0 : index
    %c0_5 = arith.constant 0 : index
    %2 = vector.load %arg4[%c0_3, %c0_4, %c0_5] : memref<8x96x256xbf16, #tpu.memory_space<vmem>>, vector<1x96x256xbf16>
    %3 = vector.shape_cast %2 : vector<1x96x256xbf16> to vector<96x256xbf16>
    %cst = arith.constant dense<0.000000e+00> : vector<32x256xf32>
    %4 = tpu.matmul %1, %3, %cst {dimension_numbers = #tpu.dot_dimension_numbers<[1], [0], [0], [1], [0, 0, 1, 1], [], []>} : vector<32x96xbf16>, vector<96x256xbf16>, vector<32x256xf32> -> vector<32x256xf32>
    %c0_6 = arith.constant 0 : index
    %c0_7 = arith.constant 0 : index
    %c0_8 = arith.constant 0 : index
    %c0_9 = arith.constant 0 : index
    %5 = vector.load %arg6[%c0_6, %c0_7, %c0_8, %c0_9] : memref<1x1x32x256xf32, #tpu.memory_space<vmem>>, vector<1x1x32x256xf32>
    %6 = vector.shape_cast %5 : vector<1x1x32x256xf32> to vector<32x256xf32>
    %7 = vector.shape_cast %4 : vector<32x256xf32> to vector<1x1x32x256xf32>
    tpu.vector_store %arg6[%c0_6, %c0_7, %c0_8, %c0_9], %7 {strides = array<i32>} : memref<1x1x32x256xf32, #tpu.memory_space<vmem>>, vector<1x1x32x256xf32>,
    %c0_10 = arith.constant 0 : index
    %c0_11 = arith.constant 0 : index
    %c1 = arith.constant 1 : index
    %c0_12 = arith.constant 0 : index
    %8 = vector.load %arg2[%c0_10, %c0_11, %c1, %c0_12] : memref<1x1x40x96xbf16, #tpu.memory_space<vmem>>, vector<1x1x32x96xbf16>
    %9 = vector.shape_cast %8 : vector<1x1x32x96xbf16> to vector<32x96xbf16>
    %c1_13 = arith.constant 1 : index
    %c0_14 = arith.constant 0 : index
    %c0_15 = arith.constant 0 : index
    %10 = vector.load %arg4[%c1_13, %c0_14, %c0_15] : memref<8x96x256xbf16, #tpu.memory_space<vmem>>, vector<1x96x256xbf16>
    %11 = vector.shape_cast %10 : vector<1x96x256xbf16> to vector<96x256xbf16>
    %cst_16 = arith.constant dense<0.000000e+00> : vector<32x256xf32>
    %12 = tpu.matmul %9, %11, %cst_16 {dimension_numbers = #tpu.dot_dimension_numbers<[1], [0], [0], [1], [0, 0, 1, 1], [], []>} : vector<32x96xbf16>, vector<96x256xbf16>, vector<32x256xf32> -> vector<32x256xf32>
    %c0_17 = arith.constant 0 : index
    %c0_18 = arith.constant 0 : index
    %c0_19 = arith.constant 0 : index
    %c0_20 = arith.constant 0 : index
    %13 = vector.load %arg6[%c0_17, %c0_18, %c0_19, %c0_20] : memref<1x1x32x256xf32, #tpu.memory_space<vmem>>, vector<1x1x32x256xf32>
    %14 = vector.shape_cast %13 : vector<1x1x32x256xf32> to vector<32x256xf32>
    %15 = arith.addf %14, %12 : vector<32x256xf32>
    %c0_21 = arith.constant 0 : index
    %c0_22 = arith.constant 0 : index
    %c0_23 = arith.constant 0 : index
    %c0_24 = arith.constant 0 : index
    %16 = vector.load %arg6[%c0_21, %c0_22, %c0_23, %c0_24] : memref<1x1x32x256xf32, #tpu.memory_space<vmem>>, vector<1x1x32x256xf32>
    %17 = vector.shape_cast %16 : vector<1x1x32x256xf32> to vector<32x256xf32>
    %18 = vector.shape_cast %15 : vector<32x256xf32> to vector<1x1x32x256xf32>
    tpu.vector_store %arg6[%c0_21, %c0_22, %c0_23, %c0_24], %18 {strides = array<i32>} : memref<1x1x32x256xf32, #tpu.memory_space<vmem>>, vector<1x1x32x256xf32>,
    %c0_25 = arith.constant 0 : index
    %c0_26 = arith.constant 0 : index
    %c6 = arith.constant 6 : index
    %c0_27 = arith.constant 0 : index
    %19 = vector.load %arg2[%c0_25, %c0_26, %c6, %c0_27] : memref<1x1x40x96xbf16, #tpu.memory_space<vmem>>, vector<1x1x32x96xbf16>
    %20 = vector.shape_cast %19 : vector<1x1x32x96xbf16> to vector<32x96xbf16>
    %c2 = arith.constant 2 : index
    %c0_28 = arith.constant 0 : index
    %c0_29 = arith.constant 0 : index
    %21 = vector.load %arg4[%c2, %c0_28, %c0_29] : memref<8x96x256xbf16, #tpu.memory_space<vmem>>, vector<1x96x256xbf16>
    %22 = vector.shape_cast %21 : vector<1x96x256xbf16> to vector<96x256xbf16>
    %cst_30 = arith.constant dense<0.000000e+00> : vector<32x256xf32>
    %23 = tpu.matmul %20, %22, %cst_30 {dimension_numbers = #tpu.dot_dimension_numbers<[1], [0], [0], [1], [0, 0, 1, 1], [], []>} : vector<32x96xbf16>, vector<96x256xbf16>, vector<32x256xf32> -> vector<32x256xf32>
    %c0_31 = arith.constant 0 : index
    %c0_32 = arith.constant 0 : index
    %c0_33 = arith.constant 0 : index
    %c0_34 = arith.constant 0 : index
    %24 = vector.load %arg6[%c0_31, %c0_32, %c0_33, %c0_34] : memref<1x1x32x256xf32, #tpu.memory_space<vmem>>, vector<1x1x32x256xf32>
    %25 = vector.shape_cast %24 : vector<1x1x32x256xf32> to vector<32x256xf32>
    %26 = arith.addf %25, %23 : vector<32x256xf32>
    %c0_35 = arith.constant 0 : index
    %c0_36 = arith.constant 0 : index
    %c0_37 = arith.constant 0 : index
    %c0_38 = arith.constant 0 : index
    %27 = vector.load %arg6[%c0_35, %c0_36, %c0_37, %c0_38] : memref<1x1x32x256xf32, #tpu.memory_space<vmem>>, vector<1x1x32x256xf32>
    %28 = vector.shape_cast %27 : vector<1x1x32x256xf32> to vector<32x256xf32>
    %29 = vector.shape_cast %26 : vector<32x256xf32> to vector<1x1x32x256xf32>
    tpu.vector_store %arg6[%c0_35, %c0_36, %c0_37, %c0_38], %29 {strides = array<i32>} : memref<1x1x32x256xf32, #tpu.memory_space<vmem>>, vector<1x1x32x256xf32>,
    %c0_39 = arith.constant 0 : index
    %c0_40 = arith.constant 0 : index
    %c7 = arith.constant 7 : index
    %c0_41 = arith.constant 0 : index
    %30 = vector.load %arg2[%c0_39, %c0_40, %c7, %c0_41] : memref<1x1x40x96xbf16, #tpu.memory_space<vmem>>, vector<1x1x32x96xbf16>
    %31 = vector.shape_cast %30 : vector<1x1x32x96xbf16> to vector<32x96xbf16>
    %c3 = arith.constant 3 : index
    %c0_42 = arith.constant 0 : index
    %c0_43 = arith.constant 0 : index
    %32 = vector.load %arg4[%c3, %c0_42, %c0_43] : memref<8x96x256xbf16, #tpu.memory_space<vmem>>, vector<1x96x256xbf16>
    %33 = vector.shape_cast %32 : vector<1x96x256xbf16> to vector<96x256xbf16>
    %cst_44 = arith.constant dense<0.000000e+00> : vector<32x256xf32>
    %34 = tpu.matmul %31, %33, %cst_44 {dimension_numbers = #tpu.dot_dimension_numbers<[1], [0], [0], [1], [0, 0, 1, 1], [], []>} : vector<32x96xbf16>, vector<96x256xbf16>, vector<32x256xf32> -> vector<32x256xf32>
    %c0_45 = arith.constant 0 : index
    %c0_46 = arith.constant 0 : index
    %c0_47 = arith.constant 0 : index
    %c0_48 = arith.constant 0 : index
    %35 = vector.load %arg6[%c0_45, %c0_46, %c0_47, %c0_48] : memref<1x1x32x256xf32, #tpu.memory_space<vmem>>, vector<1x1x32x256xf32>
    %36 = vector.shape_cast %35 : vector<1x1x32x256xf32> to vector<32x256xf32>
    %37 = arith.addf %36, %34 : vector<32x256xf32>
    %c0_49 = arith.constant 0 : index
    %c0_50 = arith.constant 0 : index
    %c0_51 = arith.constant 0 : index
    %c0_52 = arith.constant 0 : index
    %38 = vector.load %arg6[%c0_49, %c0_50, %c0_51, %c0_52] : memref<1x1x32x256xf32, #tpu.memory_space<vmem>>, vector<1x1x32x256xf32>
    %39 = vector.shape_cast %38 : vector<1x1x32x256xf32> to vector<32x256xf32>
    %40 = vector.shape_cast %37 : vector<32x256xf32> to vector<1x1x32x256xf32>
    tpu.vector_store %arg6[%c0_49, %c0_50, %c0_51, %c0_52], %40 {strides = array<i32>} : memref<1x1x32x256xf32, #tpu.memory_space<vmem>>, vector<1x1x32x256xf32>,
    %c0_53 = arith.constant 0 : index
    %c0_54 = arith.constant 0 : index
    %c0_55 = arith.constant 0 : index
    %c0_56 = arith.constant 0 : index
    %41 = vector.load %arg3[%c0_53, %c0_54, %c0_55, %c0_56] : memref<1x1x40x96xbf16, #tpu.memory_space<vmem>>, vector<1x1x32x96xbf16>
    %42 = vector.shape_cast %41 : vector<1x1x32x96xbf16> to vector<32x96xbf16>
    %c4 = arith.constant 4 : index
    %c0_57 = arith.constant 0 : index
    %c0_58 = arith.constant 0 : index
    %43 = vector.load %arg4[%c4, %c0_57, %c0_58] : memref<8x96x256xbf16, #tpu.memory_space<vmem>>, vector<1x96x256xbf16>
    %44 = vector.shape_cast %43 : vector<1x96x256xbf16> to vector<96x256xbf16>
    %cst_59 = arith.constant dense<0.000000e+00> : vector<32x256xf32>
    %45 = tpu.matmul %42, %44, %cst_59 {dimension_numbers = #tpu.dot_dimension_numbers<[1], [0], [0], [1], [0, 0, 1, 1], [], []>} : vector<32x96xbf16>, vector<96x256xbf16>, vector<32x256xf32> -> vector<32x256xf32>
    %c0_60 = arith.constant 0 : index
    %c0_61 = arith.constant 0 : index
    %c0_62 = arith.constant 0 : index
    %c0_63 = arith.constant 0 : index
    %46 = vector.load %arg6[%c0_60, %c0_61, %c0_62, %c0_63] : memref<1x1x32x256xf32, #tpu.memory_space<vmem>>, vector<1x1x32x256xf32>
    %47 = vector.shape_cast %46 : vector<1x1x32x256xf32> to vector<32x256xf32>
    %48 = arith.addf %47, %45 : vector<32x256xf32>
    %c0_64 = arith.constant 0 : index
    %c0_65 = arith.constant 0 : index
    %c0_66 = arith.constant 0 : index
    %c0_67 = arith.constant 0 : index
    %49 = vector.load %arg6[%c0_64, %c0_65, %c0_66, %c0_67] : memref<1x1x32x256xf32, #tpu.memory_space<vmem>>, vector<1x1x32x256xf32>
    %50 = vector.shape_cast %49 : vector<1x1x32x256xf32> to vector<32x256xf32>
    %51 = vector.shape_cast %48 : vector<32x256xf32> to vector<1x1x32x256xf32>
    tpu.vector_store %arg6[%c0_64, %c0_65, %c0_66, %c0_67], %51 {strides = array<i32>} : memref<1x1x32x256xf32, #tpu.memory_space<vmem>>, vector<1x1x32x256xf32>,
    %c0_68 = arith.constant 0 : index
    %c0_69 = arith.constant 0 : index
    %c1_70 = arith.constant 1 : index
    %c0_71 = arith.constant 0 : index
    %52 = vector.load %arg3[%c0_68, %c0_69, %c1_70, %c0_71] : memref<1x1x40x96xbf16, #tpu.memory_space<vmem>>, vector<1x1x32x96xbf16>
    %53 = vector.shape_cast %52 : vector<1x1x32x96xbf16> to vector<32x96xbf16>
    %c5 = arith.constant 5 : index
    %c0_72 = arith.constant 0 : index
    %c0_73 = arith.constant 0 : index
    %54 = vector.load %arg4[%c5, %c0_72, %c0_73] : memref<8x96x256xbf16, #tpu.memory_space<vmem>>, vector<1x96x256xbf16>
    %55 = vector.shape_cast %54 : vector<1x96x256xbf16> to vector<96x256xbf16>
    %cst_74 = arith.constant dense<0.000000e+00> : vector<32x256xf32>
    %56 = tpu.matmul %53, %55, %cst_74 {dimension_numbers = #tpu.dot_dimension_numbers<[1], [0], [0], [1], [0, 0, 1, 1], [], []>} : vector<32x96xbf16>, vector<96x256xbf16>, vector<32x256xf32> -> vector<32x256xf32>
    %c0_75 = arith.constant 0 : index
    %c0_76 = arith.constant 0 : index
    %c0_77 = arith.constant 0 : index
    %c0_78 = arith.constant 0 : index
    %57 = vector.load %arg6[%c0_75, %c0_76, %c0_77, %c0_78] : memref<1x1x32x256xf32, #tpu.memory_space<vmem>>, vector<1x1x32x256xf32>
    %58 = vector.shape_cast %57 : vector<1x1x32x256xf32> to vector<32x256xf32>
    %59 = arith.addf %58, %56 : vector<32x256xf32>
    %c0_79 = arith.constant 0 : index
    %c0_80 = arith.constant 0 : index
    %c0_81 = arith.constant 0 : index
    %c0_82 = arith.constant 0 : index
    %60 = vector.load %arg6[%c0_79, %c0_80, %c0_81, %c0_82] : memref<1x1x32x256xf32, #tpu.memory_space<vmem>>, vector<1x1x32x256xf32>
    %61 = vector.shape_cast %60 : vector<1x1x32x256xf32> to vector<32x256xf32>
    %62 = vector.shape_cast %59 : vector<32x256xf32> to vector<1x1x32x256xf32>
    tpu.vector_store %arg6[%c0_79, %c0_80, %c0_81, %c0_82], %62 {strides = array<i32>} : memref<1x1x32x256xf32, #tpu.memory_space<vmem>>, vector<1x1x32x256xf32>,
    %c0_83 = arith.constant 0 : index
    %c0_84 = arith.constant 0 : index
    %c6_85 = arith.constant 6 : index
    %c0_86 = arith.constant 0 : index
    %63 = vector.load %arg3[%c0_83, %c0_84, %c6_85, %c0_86] : memref<1x1x40x96xbf16, #tpu.memory_space<vmem>>, vector<1x1x32x96xbf16>
    %64 = vector.shape_cast %63 : vector<1x1x32x96xbf16> to vector<32x96xbf16>
    %c6_87 = arith.constant 6 : index
    %c0_88 = arith.constant 0 : index
    %c0_89 = arith.constant 0 : index
    %65 = vector.load %arg4[%c6_87, %c0_88, %c0_89] : memref<8x96x256xbf16, #tpu.memory_space<vmem>>, vector<1x96x256xbf16>
    %66 = vector.shape_cast %65 : vector<1x96x256xbf16> to vector<96x256xbf16>
    %cst_90 = arith.constant dense<0.000000e+00> : vector<32x256xf32>
    %67 = tpu.matmul %64, %66, %cst_90 {dimension_numbers = #tpu.dot_dimension_numbers<[1], [0], [0], [1], [0, 0, 1, 1], [], []>} : vector<32x96xbf16>, vector<96x256xbf16>, vector<32x256xf32> -> vector<32x256xf32>
    %c0_91 = arith.constant 0 : index
    %c0_92 = arith.constant 0 : index
    %c0_93 = arith.constant 0 : index
    %c0_94 = arith.constant 0 : index
    %68 = vector.load %arg6[%c0_91, %c0_92, %c0_93, %c0_94] : memref<1x1x32x256xf32, #tpu.memory_space<vmem>>, vector<1x1x32x256xf32>
    %69 = vector.shape_cast %68 : vector<1x1x32x256xf32> to vector<32x256xf32>
    %70 = arith.addf %69, %67 : vector<32x256xf32>
    %c0_95 = arith.constant 0 : index
    %c0_96 = arith.constant 0 : index
    %c0_97 = arith.constant 0 : index
    %c0_98 = arith.constant 0 : index
    %71 = vector.load %arg6[%c0_95, %c0_96, %c0_97, %c0_98] : memref<1x1x32x256xf32, #tpu.memory_space<vmem>>, vector<1x1x32x256xf32>
    %72 = vector.shape_cast %71 : vector<1x1x32x256xf32> to vector<32x256xf32>
    %73 = vector.shape_cast %70 : vector<32x256xf32> to vector<1x1x32x256xf32>
    tpu.vector_store %arg6[%c0_95, %c0_96, %c0_97, %c0_98], %73 {strides = array<i32>} : memref<1x1x32x256xf32, #tpu.memory_space<vmem>>, vector<1x1x32x256xf32>,
    %c0_99 = arith.constant 0 : index
    %c0_100 = arith.constant 0 : index
    %c7_101 = arith.constant 7 : index
    %c0_102 = arith.constant 0 : index
    %74 = vector.load %arg3[%c0_99, %c0_100, %c7_101, %c0_102] : memref<1x1x40x96xbf16, #tpu.memory_space<vmem>>, vector<1x1x32x96xbf16>
    %75 = vector.shape_cast %74 : vector<1x1x32x96xbf16> to vector<32x96xbf16>
    %c7_103 = arith.constant 7 : index
    %c0_104 = arith.constant 0 : index
    %c0_105 = arith.constant 0 : index
    %76 = vector.load %arg4[%c7_103, %c0_104, %c0_105] : memref<8x96x256xbf16, #tpu.memory_space<vmem>>, vector<1x96x256xbf16>
    %77 = vector.shape_cast %76 : vector<1x96x256xbf16> to vector<96x256xbf16>
    %cst_106 = arith.constant dense<0.000000e+00> : vector<32x256xf32>
    %78 = tpu.matmul %75, %77, %cst_106 {dimension_numbers = #tpu.dot_dimension_numbers<[1], [0], [0], [1], [0, 0, 1, 1], [], []>} : vector<32x96xbf16>, vector<96x256xbf16>, vector<32x256xf32> -> vector<32x256xf32>
    %c0_107 = arith.constant 0 : index
    %c0_108 = arith.constant 0 : index
    %c0_109 = arith.constant 0 : index
    %c0_110 = arith.constant 0 : index
    %79 = vector.load %arg6[%c0_107, %c0_108, %c0_109, %c0_110] : memref<1x1x32x256xf32, #tpu.memory_space<vmem>>, vector<1x1x32x256xf32>
    %80 = vector.shape_cast %79 : vector<1x1x32x256xf32> to vector<32x256xf32>
    %81 = arith.addf %80, %78 : vector<32x256xf32>
    %c0_111 = arith.constant 0 : index
    %c0_112 = arith.constant 0 : index
    %c0_113 = arith.constant 0 : index
    %c0_114 = arith.constant 0 : index
    %82 = vector.load %arg6[%c0_111, %c0_112, %c0_113, %c0_114] : memref<1x1x32x256xf32, #tpu.memory_space<vmem>>, vector<1x1x32x256xf32>
    %83 = vector.shape_cast %82 : vector<1x1x32x256xf32> to vector<32x256xf32>
    %84 = vector.shape_cast %81 : vector<32x256xf32> to vector<1x1x32x256xf32>
    tpu.vector_store %arg6[%c0_111, %c0_112, %c0_113, %c0_114], %84 {strides = array<i32>} : memref<1x1x32x256xf32, #tpu.memory_space<vmem>>, vector<1x1x32x256xf32>,
    %c0_115 = arith.constant 0 : index
    %c0_116 = arith.constant 0 : index
    %c0_117 = arith.constant 0 : index
    %c0_118 = arith.constant 0 : index
    %85 = vector.load %arg6[%c0_115, %c0_116, %c0_117, %c0_118] : memref<1x1x32x256xf32, #tpu.memory_space<vmem>>, vector<1x1x32x256xf32>
    %86 = vector.shape_cast %85 : vector<1x1x32x256xf32> to vector<32x256xf32>
    %c0_119 = arith.constant 0 : index
    %c0_120 = arith.constant 0 : index
    %87 = vector.load %arg5[%c0_119, %c0_120] : memref<1x256xf32, #tpu.memory_space<vmem>>, vector<1x256xf32>
    %88 = vector.broadcast %87 : vector<1x256xf32> to vector<32x256xf32>
    %89 = arith.addf %86, %88 : vector<32x256xf32>
    %cst_121 = arith.constant 0.000000e+00 : f32
    %90 = vector.broadcast %cst_121 : f32 to vector<32x256xf32>
    %91 = arith.cmpf oge, %89, %90 : vector<32x256xf32>
    %cst_122 = arith.constant 0.00999999977 : f32
    %92 = vector.broadcast %cst_122 : f32 to vector<32x256xf32>
    %93 = arith.mulf %92, %89 : vector<32x256xf32>
    %94 = arith.select %91, %89, %93 : vector<32x256xi1>, vector<32x256xf32>
    %c0_123 = arith.constant 0 : index
    %c0_124 = arith.constant 0 : index
    %c0_125 = arith.constant 0 : index
    %c0_126 = arith.constant 0 : index
    %95 = vector.load %arg6[%c0_123, %c0_124, %c0_125, %c0_126] : memref<1x1x32x256xf32, #tpu.memory_space<vmem>>, vector<1x1x32x256xf32>
    %96 = vector.shape_cast %95 : vector<1x1x32x256xf32> to vector<32x256xf32>
    %97 = vector.shape_cast %94 : vector<32x256xf32> to vector<1x1x32x256xf32>
    tpu.vector_store %arg6[%c0_123, %c0_124, %c0_125, %c0_126], %97 {strides = array<i32>} : memref<1x1x32x256xf32, #tpu.memory_space<vmem>>, vector<1x1x32x256xf32>,
    return
  }
  func.func @transform_0(%arg0: i32, %arg1: i32) -> (i32, i32, i32, i32) {
    %c0_i32 = arith.constant 0 : i32
    %c0_i32_0 = arith.constant 0 : i32
    %c0_i32_1 = arith.constant 0 : i32
    return %arg0, %arg1, %c0_i32, %c0_i32_0 : i32, i32, i32, i32
  }
  func.func @transform_1(%arg0: i32, %arg1: i32) -> (i32, i32, i32, i32) {
    %c1_i32 = arith.constant 1 : i32
    %0 = arith.addi %arg1, %c1_i32 : i32
    %c0_i32 = arith.constant 0 : i32
    %c0_i32_0 = arith.constant 0 : i32
    %c0_i32_1 = arith.constant 0 : i32
    return %arg0, %0, %c0_i32, %c0_i32_0 : i32, i32, i32, i32
  }
  func.func @transform_2(%arg0: i32, %arg1: i32) -> (i32, i32, i32) {
    %c0_i32 = arith.constant 0 : i32
    %c0_i32_0 = arith.constant 0 : i32
    %c0_i32_1 = arith.constant 0 : i32
    %c0_i32_2 = arith.constant 0 : i32
    return %c0_i32, %c0_i32_0, %c0_i32_1 : i32, i32, i32
  }
  func.func @transform_3(%arg0: i32, %arg1: i32) -> (i32, i32) {
    %c0_i32 = arith.constant 0 : i32
    %c0_i32_0 = arith.constant 0 : i32
    %c0_i32_1 = arith.constant 0 : i32
    return %c0_i32, %c0_i32_0 : i32, i32
  }
  func.func @transform_4(%arg0: i32, %arg1: i32) -> (i32, i32, i32, i32) {
    %c0_i32 = arith.constant 0 : i32
    %c0_i32_0 = arith.constant 0 : i32
    %c0_i32_1 = arith.constant 0 : i32
    return %arg0, %arg1, %c0_i32, %c0_i32_0 : i32, i32, i32, i32
  }
}

module attributes {stable_mosaic.version = 11 : i64} {
  func.func @_mm_kernel(%arg0: i32, %arg1: i32, %arg2: i32, %arg3: memref<512x128xbf16, #tpu.memory_space<vmem>>, %arg4: memref<128x128xbf16, #tpu.memory_space<vmem>>, %arg5: memref<1x128xf32, #tpu.memory_space<vmem>>, %arg6: memref<512x128xf32, #tpu.memory_space<vmem>>) attributes {dimension_semantics = [#tpu.dimension_semantics<parallel>, #tpu.dimension_semantics<parallel>, #tpu.dimension_semantics<arbitrary>], iteration_bounds = array<i64: 2, 1, 1>, scalar_prefetch = 0 : i64, scratch_operands = 0 : i64, tpu.core_type = #tpu.core_type<tc>, window_params = [{transform_indices = @transform_0, window_bounds = array<i64: 512, 128>}, {transform_indices = @transform_1, window_bounds = array<i64: 128, 128>}, {transform_indices = @transform_2, window_bounds = array<i64: 1, 128>}, {transform_indices = @transform_3, window_bounds = array<i64: 512, 128>}]} {
    %c0_i32 = arith.constant 0 : i32
    %0 = arith.cmpi eq, %arg2, %c0_i32 : i32
    %1 = arith.extui %0 : i1 to i32
    %c0_i32_0 = arith.constant 0 : i32
    %2 = arith.cmpi ne, %1, %c0_i32_0 : i32
    scf.if %2 {
      %cst_10 = arith.constant 0.000000e+00 : f32
      %12 = vector.broadcast %cst_10 : f32 to vector<512x128xf32>
      %c0_11 = arith.constant 0 : index
      %c0_12 = arith.constant 0 : index
      %13 = vector.load %arg6[%c0_11, %c0_12] : memref<512x128xf32, #tpu.memory_space<vmem>>, vector<512x128xf32>
      tpu.vector_store %arg6[%c0_11, %c0_12], %12 {strides = array<i32>} : memref<512x128xf32, #tpu.memory_space<vmem>>, vector<512x128xf32>,
    } else {
    }
    %c0 = arith.constant 0 : index
    %c0_1 = arith.constant 0 : index
    %3 = vector.load %arg6[%c0, %c0_1] : memref<512x128xf32, #tpu.memory_space<vmem>>, vector<512x128xf32>
    %c0_2 = arith.constant 0 : index
    %c0_3 = arith.constant 0 : index
    %4 = vector.load %arg3[%c0_2, %c0_3] : memref<512x128xbf16, #tpu.memory_space<vmem>>, vector<512x128xbf16>
    %c0_4 = arith.constant 0 : index
    %c0_5 = arith.constant 0 : index
    %5 = vector.load %arg4[%c0_4, %c0_5] : memref<128x128xbf16, #tpu.memory_space<vmem>>, vector<128x128xbf16>
    %cst = arith.constant dense<0.000000e+00> : vector<512x128xf32>
    %6 = tpu.matmul %4, %5, %cst {dimension_numbers = #tpu.dot_dimension_numbers<[1], [0], [0], [1], [0, 0, 1, 1], [], []>} : vector<512x128xbf16>, vector<128x128xbf16>, vector<512x128xf32> -> vector<512x128xf32>
    %7 = arith.addf %3, %6 : vector<512x128xf32>
    %c0_6 = arith.constant 0 : index
    %c0_7 = arith.constant 0 : index
    %8 = vector.load %arg6[%c0_6, %c0_7] : memref<512x128xf32, #tpu.memory_space<vmem>>, vector<512x128xf32>
    tpu.vector_store %arg6[%c0_6, %c0_7], %7 {strides = array<i32>} : memref<512x128xf32, #tpu.memory_space<vmem>>, vector<512x128xf32>,
    %c0_i32_8 = arith.constant 0 : i32
    %9 = arith.cmpi eq, %arg2, %c0_i32_8 : i32
    %10 = arith.extui %9 : i1 to i32
    %c0_i32_9 = arith.constant 0 : i32
    %11 = arith.cmpi ne, %10, %c0_i32_9 : i32
    scf.if %11 {
      %c0_10 = arith.constant 0 : index
      %c0_11 = arith.constant 0 : index
      %12 = vector.load %arg6[%c0_10, %c0_11] : memref<512x128xf32, #tpu.memory_space<vmem>>, vector<512x128xf32>
      %c0_12 = arith.constant 0 : index
      %c0_13 = arith.constant 0 : index
      %13 = vector.load %arg5[%c0_12, %c0_13] : memref<1x128xf32, #tpu.memory_space<vmem>>, vector<1x128xf32>
      %14 = vector.broadcast %13 : vector<1x128xf32> to vector<512x128xf32>
      %15 = arith.addf %12, %14 : vector<512x128xf32>
      %16 = arith.mulf %15, %15 : vector<512x128xf32>
      %cst_14 = arith.constant dense<0.000000e+00> : vector<512xf32>
      %17 = vector.multi_reduction <add>, %16, %cst_14 [1] : vector<512x128xf32> to vector<512xf32>
      %18 = vector.shape_cast %17 : vector<512xf32> to vector<512x1xf32>
      %cst_15 = arith.constant 1.000000e-24 : f32
      %19 = vector.broadcast %cst_15 : f32 to vector<512x1xf32>
      %20 = arith.maximumf %18, %19 : vector<512x1xf32>
      %21 = math.rsqrt %20 : vector<512x1xf32>
      %22 = vector.broadcast %21 : vector<512x1xf32> to vector<512x128xf32>
      %23 = arith.mulf %15, %22 : vector<512x128xf32>
      %c0_16 = arith.constant 0 : index
      %c0_17 = arith.constant 0 : index
      %24 = vector.load %arg6[%c0_16, %c0_17] : memref<512x128xf32, #tpu.memory_space<vmem>>, vector<512x128xf32>
      tpu.vector_store %arg6[%c0_16, %c0_17], %23 {strides = array<i32>} : memref<512x128xf32, #tpu.memory_space<vmem>>, vector<512x128xf32>,
    } else {
    }
    return
  }
  func.func @transform_0(%arg0: i32, %arg1: i32, %arg2: i32) -> (i32, i32) {
    %c0_i32 = arith.constant 0 : i32
    return %arg0, %arg2 : i32, i32
  }
  func.func @transform_1(%arg0: i32, %arg1: i32, %arg2: i32) -> (i32, i32) {
    %c0_i32 = arith.constant 0 : i32
    return %arg2, %arg1 : i32, i32
  }
  func.func @transform_2(%arg0: i32, %arg1: i32, %arg2: i32) -> (i32, i32) {
    %c0_i32 = arith.constant 0 : i32
    %c0_i32_0 = arith.constant 0 : i32
    return %c0_i32, %arg1 : i32, i32
  }
  func.func @transform_3(%arg0: i32, %arg1: i32, %arg2: i32) -> (i32, i32) {
    %c0_i32 = arith.constant 0 : i32
    return %arg0, %arg1 : i32, i32
  }
}

</mosaic_0001>

<bundles_post_ra>
// kernel: featnet_forward.6
= control target key start
LH: loop header
LB: loop body
LE: loop exit
PB: predicated region body
PF: predicated region fallthrough
CT: control target
= control target key end

     0   :  { %s2486_s15 = smov 0   ;;  %s2488_s16 = smov 0   ;;  %s2990_s0 = inlined_call_operand.vmem [shape: bf16[2,9,88,32], index: 0, kind: input, shape index: {}, may-alias: {0,1}]   ;;  %s2991_s1 = inlined_call_operand.vmem [shape: bf16[2,9,88,32], index: 1, kind: input, shape index: {}, may-alias: {0,1}]   ;;  %s2992_s2 = inlined_call_operand.vmem [shape: bf16[8,32,128], index: 2, kind: input, shape index: {}]   ;;  %s2993_s3 = inlined_call_operand.vmem [shape: f32[1,128], index: 3, kind: input, shape index: {}]   ;;  %s2994_s4 = inlined_call_operand.vmem [shape: f32[2,8,72,128], index: 4, kind: output, shape index: {}]  }
   0x1   :  { %s2490_s17 = smov 0   ;;  %s2492_s18 = smov 0  }
   0x2   :  { %s2494_s19 = smov 0  }
   0x3 LB: > { %s23_s20 = sadd.s32 1, %s2449_s17  ;;  %s26_s21 = sadd.s32 1, %s2453_s18  ;;  %s2457_s19 = sphi %s2494_s19, %s14_s19   ;;  %s2453_s18 = sphi %s2492_s18, %s2998_s18   ;;  %s2449_s17 = sphi %s2490_s17, %s2997_s17   ;;  %s2445_s16 = sphi %s2488_s16, %s2996_s16   ;;  %s2441_s15 = sphi %s2486_s15, %s2995_s15  }
   0x4   : > { %p24_p0 = scmp.ge.s32.totalorder %s23_s20, 8  ;;  %p1937_p1 = scmp.ge.s32.totalorder %s2457_s19, 1 }
   0x5   : > { %p202_p2 = scmp.lt.s32.totalorder %s2457_s19, 17 }
   0x6   : > { %s3000_s20 = smov (%p24_p0, %s23_s20), 0  ;;  %s3002_s21 = smov (!%p24_p0, %s26_s21), %s2453_s18 }
   0x7   : > { %p203_p3 = pnand %p1937_p1, %p202_p2  ;;  %p28_p4 = scmp.ge.s32.totalorder %s3002_s21, 2 }
   0x8   : > { %p246_p5 = scmp.lt.s32.totalorder (!%p203_p3), %s2445_s16, 1  ;;  %p248_p6 = scmp.lt.s32.totalorder (!%p203_p3), %s2441_s15, 8 }
   0x9   : > { %s3004_s21 = smov (%p28_p4, %s3002_s21), 0  ;;  %206 = sbr.rel (%p203_p3) target bundleno = 384 (0x180), region = 36 }
   0xa   : > { %s255_s14 = sadd.s32 (!%p203_p3), 1, %s2441_s15  ;;  %p268_p8 = scmp.lt.s32.totalorder (!%p203_p3), %s2441_s15, 7 }
   0xb   : > { %p258_p7 = scmp.lt.s32.totalorder (!%p203_p3), %s255_s14, 8 }
   0xe   : > { %v2363_v0 = vld [vmem:[%s2992_s2 + $0x8] sm:$0xff]   ;;  %v2459_v1 = vmov 0.0   ;;  %v2364_v2 = vld [vmem:[%s2992_s2] sm:$0xff]   ;;  %vm2460_vm0 = vmmov 0   ;;  %v2366_v3 = vld [vmem:[%s2992_s2 + $0x18] sm:$0xff]   ;;  %s3006_s16 = smov (!%p246_p5, %s2445_s16), 1 }
   0xf   : > { %2124 = vmatprep.subr.bf16.mxu0 %v2459_v1  ;;  %2148 = vmatprep.subr.bf16.mxu1 %v2459_v1  ;;  %s249_s28 = scalar_select %p248_p6, %s2441_s15, 8  ;;  %v2368_v4 = vld [vmem:[%s2992_s2 + $0x10] sm:$0xff]   ;;  %vm324_vm1 = vcmask 261120   ;;  %v2367_v5 = vld [vmem:[%s2992_s2 + $0x28] sm:$0xff]   ;;  %vm461_vm2 = vsmask.f32 7424 }
  0x10   : > { %2125 = vmatpush3.bf16.msra.mxu0 %v2363_v0  ;;  %2128 = vmatprep.mubr.msk.bf16.mxu0 %vm2460_vm0, %v2459_v1  ;;  %s2317_s5 = smul.u32 99, %s3006_s16  ;;  %v2375_v11 = vld [vmem:[%s2992_s2 + $0x20] sm:$0xff]   ;;  %v2372_v15 = vld [vmem:[%s2992_s2 + $0x38] sm:$0xff]   ;;  %s3008_s14 = smov (!%p258_p7, %s255_s14), 8  ;;  %v2378_v25 = vld [vmem:[%s2992_s2 + $0x30] sm:$0xff]   ;;  %vm872_vm3 = vcmask 1046528  }
  0x11   : > { %2126 = vmatprep.subr.bf16.mxu0 %v2459_v1  ;;  %2152 = vmatprep.mubr.msk.bf16.mxu1 %vm2460_vm0, %v2459_v1  ;;  %s2316_s6 = smul.u32 11, %s249_s28  ;;  %s3010_s15 = smov (!%p268_p8, %s2441_s15), 7 }
  0x12   : > { %2149 = vmatpush3.bf16.msra.mxu1 %v2366_v3  ;;  %s2318_s28 = smul.u32 11, %s3008_s14 }
  0x13   : > { %2150 = vmatprep.subr.bf16.mxu1 %v2459_v1  ;;  %s252_s7 = sadd.s32 %s2317_s5, %s2316_s6  ;;  %s2319_s6 = smul.u32 9, %s3010_s15 }
  0x14   : > { %2127 = vmatpush3.bf16.msra.mxu0 %v2364_v2  ;;  %s1938_s8 = sshll.u32 %s252_s7, 2  ;;  %s262_s29 = sadd.s32 %s2318_s28, %s2317_s5 }
  0x15   : > { %2172 = vmatprep.subr.bf16.mxu0 %v2459_v1  ;;  %s2553_s13 = scalar_lea.vmem %s2990_s0, %s1938_s8  ;;  %s1939_s30 = sshll.u32 %s262_s29, 2 }
  0x16   : > { %2151 = vmatpush3.bf16.msra.mxu1 %v2368_v4  ;;  %v2365_v6 = vld [vmem:[%s2553_s13] sm:$0xff]   ;;  %v2370_v8 = vld [vmem:[%s2553_s13 + $0x8] sm:$0xff]   ;;  %v2373_v13 = vld [vmem:[%s2553_s13 + $0x10] sm:$0xff]   ;;  %s2605_s7 = scalar_lea.vmem %s2991_s1, %s1939_s30  ;;  %s2320_s5 = smul.u32 72, %s3006_s16 }
  0x17   : > { %2196 = vmatprep.subr.bf16.mxu1 %v2459_v1  ;;  %v2369_v7 = vld [vmem:[%s2553_s13] sm:$0xff]   ;;  %2129 = vmatmul.mubr.msk.bf16.vlgmr.msra.gmra.mxu0 %vm324_vm1, %v2365_v6  ;;  %v470_v12 = vshll.u32 %v2370_v8, 16  ;;  %v2371_v17 = vld [vmem:[%s2553_s13 + $0x8] sm:$0xff]   ;;  %v474_v19 = vshrl.u32 %v2370_v8, 16  ;;  %v478_v20 = vshll.u32 %v2373_v13, 16  ;;  %v2376_v24 = vld [vmem:[%s2553_s13 + $0x18] sm:$0xff]  }
  0x18   : > { %2173 = vmatpush3.bf16.msra.mxu0 %v2367_v5  ;;  %2132 = vmatprep.mubr.msk.bf16.mxu0 %vm2460_vm0, %v2459_v1  ;;  %v463_v9 = vshrl.u32 %v2369_v7, 16  ;;  %v465_v10 = vshll.u32 %v2369_v7, 16  ;;  %v2374_v26 = vld [vmem:[%s2553_s13 + $0x10] sm:$0xff]   ;;  %v482_v28 = vshrl.u32 %v2373_v13, 16  ;;  %v486_v29 = vshll.u32 %v2376_v24, 16  ;;  %v2381_v33 = vld [vmem:[%s2553_s13 + $0x4] sm:$0xff]  }
  0x19   : > { %2174 = vmatprep.subr.bf16.mxu0 %v2459_v1  ;;  %v472_v16 = vrot.slane %v470_v12, 1  ;;  %v480_v23 = vrot.slane %v478_v20, 1  ;;  %v2379_v30 = vld [vmem:[%s2553_s13 + $0x20] sm:$0x1f]   ;;  %v2377_v34 = vld [vmem:[%s2553_s13 + $0x18] sm:$0xff]   ;;  %v2599_v35 = vld [vmem:[%s2553_s13 + $0xc] sm:$0xff]  }
  0x1a   : > { %v467_v14 = vrot.slane %v465_v10, 1  ;;  %v488_v32 = vrot.slane %v486_v29, 1  ;;  %v490_v37 = vshrl.u32 %v2376_v24, 16  ;;  %v494_v38 = vshll.u32 %v2379_v30, 16  ;;  %v2608_v40 = vld [vmem:[%s2553_s13 + $0x4] sm:$0xfe]  }
  0x1b   : > { %v476_v22 = vor.u32 %v474_v19, %v472_v16  ;;  %v484_v31 = vor.u32 %v482_v28, %v480_v23  ;;  %v670_v39 = vshll.u32 %v2381_v33, 16  ;;  %v675_v41 = vshll.u32 %v2599_v35, 16  ;;  %v2614_v42 = vld [vmem:[%s2553_s13 + $0xc] sm:$0xff]   ;;  %v2380_v46 = vld [vmem:[%s2553_s13 + $0x20] ss:$0 sps:$4 sm:$0xff]   ;;  %v2622_v48 = vld [vmem:[%s2553_s13 + $0x14] sm:$0xff]  }
  0x1c   : > { %v468_v18 = vor.u32 %v467_v14, %v463_v9  ;;  %2175 = vmatpush3.bf16.msra.mxu0 %v2375_v11  ;;  %v492_v43 = vor.u32 %v490_v37, %v488_v32  ;;  %v496_v44 = vrot.slane %v494_v38, 1  ;;  %v498_v45 = vshrl.u32 %v2379_v30, 16  ;;  %v2398_v50 = vld [vmem:[%s2605_s7 + $0x8] sm:$0xff]   ;;  %v2628_v54 = vld [vmem:[%s2553_s13 + $0x1c] sm:$0xff]   ;;  %v2401_v57 = vld [vmem:[%s2605_s7 + $0x10] sm:$0xff]  }
  0x1d   : > { %2220 = vmatprep.subr.bf16.mxu0 %v2459_v1  ;;  %v481_v27 = vsel %vm461_vm2, %v476_v22, %v480_v23  ;;  %v489_v36 = vsel %vm461_vm2, %v484_v31, %v488_v32  ;;  %v668_v47 = vshrl.u32 %v2381_v33, 16  ;;  %v672_v49 = vrot.slane %v670_v39, 1  ;;  %v2635_v61 = vld [vmem:[%s2553_s13 + $0x14] sm:$0xff]   ;;  %v2383_v7 = vld [vmem:[%s2992_s2 + $0x48] sm:$0xff]   ;;  %v2656_v13 = vld [vmem:[%s2605_s7 + $0x20] sm:$0x1f]  }
  0x1e   : > { %v473_v21 = vsel %vm461_vm2, %v468_v18, %v472_v16  ;;  %v677_v51 = vrot.slane %v675_v41, 1  ;;  %v873_v52 = vrot.slane %v2608_v40, 1  ;;  %v874_v53 = vrot.slane %v2614_v42, 1  ;;  %v2404_v5 = vld [vmem:[%s2605_s7 + $0x18] sm:$0xff]   ;;  %v2410_v20 = vld [vmem:[%s2605_s7 + $0xc] sm:$0xff]   ;;  %v2390_v23 = vld [vmem:[%s2992_s2 + $0x40] sm:$0xff]  }
  0x1f   : > { %2153 = vmatmul.mubr.msk.bf16.vlgmr.msra.gmra.mxu1 %vm324_vm1, %v473_v21  ;;  %2133 = vmatmul.mubr.msk.bf16.gmra.mxu0 %vm324_vm1, %v2371_v17  ;;  %v497_v55 = vsel %vm461_vm2, %v492_v43, %v496_v44  ;;  %v1219_v56 = vshll.u32 %v2398_v50, 16  ;;  %v679_v58 = vshrl.u32 %v2599_v35, 16  ;;  %v1223_v59 = vshrl.u32 %v2398_v50, 16  ;;  %v2412_v32 = vld [vmem:[%s2605_s7 + $0xc] sm:$0xff]   ;;  %v2411_v35 = vld [vmem:[%s2605_s7 + $0x4] sm:$0xfe]  }
  0x20   : > { %2197 = vmatpush3.bf16.msra.mxu1 %v2372_v15  ;;  %2156 = vmatprep.mubr.msk.bf16.mxu1 %vm2460_vm0, %v2459_v1  ;;  %v683_v60 = vshll.u32 %v2622_v48, 16  ;;  %v1227_v63 = vshll.u32 %v2401_v57, 16  ;;  %v673_v0 = vor.u32 %v672_v49, %v668_v47  ;;  %v691_v2 = vshll.u32 %v2628_v54, 16  ;;  %v2409_v15 = vld [vmem:[%s2605_s7 + $0x4] sm:$0xff]   ;;  %v2387_v37 = vld [vmem:[%s2992_s2 + $0x58] sm:$0xff]  }
  0x21   : > { %2136 = vmatprep.mubr.msk.bf16.mxu0 %vm2460_vm0, %v2459_v1  ;;  %2198 = vmatprep.subr.bf16.mxu1 %v2459_v1  ;;  %v2637_v62 = vrot.slane %v1219_v56, 1  ;;  %v1231_v6 = vshrl.u32 %v2401_v57, 16  ;;  %v876_v8 = vrot.slane %v2635_v61, 1  ;;  %v1235_v11 = vshll.u32 %v2404_v5, 16  ;;  %v2415_v47 = vld [vmem:[%s2605_s7 + $0x1c] sm:$0xff]  }
  0x22   : > { %v1229_v4 = vrot.slane %v1227_v63, 1  ;;  %v500_v12 = vor.u32 %v498_v45, %v496_v44  ;;  %v1239_v14 = vshrl.u32 %v2404_v5, 16  ;;  %v678_v16 = vsel %vm461_vm2, %v673_v0, %v677_v51  ;;  %v2393_v63 = vld [vmem:[%s2992_s2 + $0x50] sm:$0xff]   ;;  %v2719_v5 = vld [vmem:[%s2605_s7 + $0x24] sm:$0x1f]  }
  0x23   : > { %v1225_v3 = vor.u32 %v1223_v59, %v2637_v62  ;;  %v685_v17 = vrot.slane %v683_v60, 1  ;;  %v687_v18 = vshrl.u32 %v2622_v48, 16  ;;  %v1237_v19 = vrot.slane %v1235_v11, 1 }
  0x24   : > { %2199 = vmatpush3.bf16.msra.mxu1 %v2378_v25  ;;  %v1233_v10 = vor.u32 %v1231_v6, %v1229_v4  ;;  %v2662_v21 = vrot.slane %v691_v2, 1  ;;  %v1243_v22 = vshll.u32 %v2656_v13, 16  ;;  %v1424_v29 = vshll.u32 %v2410_v20, 16 }
  0x25   : > { %2244 = vmatprep.subr.bf16.mxu1 %v2459_v1  ;;  %v2653_v9 = vsel %vm461_vm2, %v1225_v3, %v1229_v4  ;;  %v1241_v25 = vor.u32 %v1239_v14, %v1237_v19  ;;  %v681_v30 = vor.u32 %v679_v58, %v677_v51  ;;  %v1622_v39 = vrot.slane %v2412_v32, 1  ;;  %v2392_v58 = vld [vmem:[%s2553_s13 + $0x24] sm:$0x1f]  }
  0x26   : > { %v2669_v24 = vsel %vm461_vm2, %v1233_v10, %v1237_v19  ;;  %v2673_v28 = vrot.slane %v1243_v22, 1  ;;  %v1428_v41 = vshrl.u32 %v2410_v20, 16  ;;  %v875_v43 = vsel %vm872_vm3, %v873_v52, %v874_v53  ;;  %v2727_v10 = vld [vmem:[%s2605_s7 + $0x24] sm:$0x1f]   ;;  %v2391_v19 = vld [vmem:[%s2553_s13 + $0x1c] sm:$0xff]  }
  0x27   : > { %2157 = vmatmul.mubr.msk.bf16.gmra.mxu1 %vm324_vm1, %v481_v27  ;;  %2137 = vmatmul.mubr.msk.bf16.gmra.mxu0 %vm324_vm1, %v2374_v26  ;;  %v1417_v26 = vshrl.u32 %v2409_v15, 16  ;;  %v1419_v27 = vshll.u32 %v2409_v15, 16  ;;  %v1621_v44 = vrot.slane %v2411_v35, 1  ;;  %v686_v48 = vsel %vm461_vm2, %v681_v30, %v685_v17  ;;  %v2396_v35 = vld [vmem:[%s2992_s2 + $0x68] sm:$0xff]  }
  0x28   : > { %2160 = vmatprep.mubr.msk.bf16.mxu1 %vm2460_vm0, %v2459_v1  ;;  %2140 = vmatprep.mubr.msk.bf16.mxu0 %vm2460_vm0, %v2459_v1  ;;  %v2683_v33 = vsel %vm461_vm2, %v1241_v25, %v2673_v28  ;;  %v1440_v57 = vshll.u32 %v2415_v47, 16  ;;  %v1444_v60 = vshrl.u32 %v2415_v47, 16  ;;  %v689_v6 = vor.u32 %v687_v18, %v685_v17 }
  0x29   : > { %v1421_v31 = vrot.slane %v1419_v27, 1  ;;  %v2704_v40 = vsel %vm872_vm3, %v1621_v44, %v1622_v39  ;;  %v1448_v14 = vshll.u32 %v2719_v5, 16  ;;  %v1628_v15 = vrot.slane %v2727_v10, 1  ;;  %v2400_v44 = vld [vmem:[%s2992_s2 + $0x78] sm:$0xff]  }
  0x2a   : > { %v1442_v4 = vrot.slane %v1440_v57, 1  ;;  %v694_v18 = vsel %vm461_vm2, %v689_v6, %v2662_v21  ;;  %v695_v20 = vshrl.u32 %v2628_v54, 16  ;;  %v699_v22 = vshll.u32 %v2392_v58, 16 }
  0x2b   : > { %v1422_v38 = vor.u32 %v1421_v31, %v1417_v26  ;;  %v2742_v17 = vrot.slane %v1448_v14, 1  ;;  %v703_v30 = vshrl.u32 %v2392_v58, 16  ;;  %v1247_v47 = vshrl.u32 %v2656_v13, 16 }
  0x2c   : > { %v697_v54 = vor.u32 %v695_v20, %v2662_v21  ;;  %v701_v25 = vrot.slane %v699_v22, 1  ;;  %v1452_v13 = vshrl.u32 %v2719_v5, 16 }
  0x2e   : > { %v702_v27 = vsel %vm461_vm2, %v697_v54, %v701_v25  ;;  %v705_v31 = vor.u32 %v703_v30, %v701_v25 }
  0x2f   : > { %2161 = vmatmul.mubr.msk.bf16.gmra.mxu1 %vm324_vm1, %v489_v36  ;;  %2141 = vmatmul.mubr.msk.bf16.gmra.mxu0 %vm324_vm1, %v2377_v34  ;;  %v1426_v34 = vrot.slane %v1424_v29, 1  ;;  %v2413_v36 = vld [vmem:[%s2605_s7 + $0x14] sm:$0xff]   ;;  %v2394_v29 = vld [vmem:[%s2553_s13 + $0x24] sm:$0x1f]  }
  0x30   : > { %2164 = vmatprep.mubr.msk.bf16.mxu1 %vm2460_vm0, %v2459_v1  ;;  %2144 = vmatprep.mubr.msk.bf16.mxu0 %vm2460_vm0, %v2459_v1  ;;  %v1432_v45 = vshll.u32 %v2413_v36, 16  ;;  %v1436_v51 = vshrl.u32 %v2413_v36, 16  ;;  %v880_v21 = vrot.slane %v2394_v29, 1 }
  0x31   : > { %v2699_v49 = vsel %vm461_vm2, %v1422_v38, %v1426_v34  ;;  %v1430_v50 = vor.u32 %v1428_v41, %v1426_v34  ;;  %v2395_v34 = vld [vmem:[%s2605_s7] sm:$0xff]   ;;  %v2399_v41 = vld [vmem:[%s2605_s7 + $0x8] sm:$0xff]  }
  0x32   : > { %v1434_v52 = vrot.slane %v1432_v45, 1  ;;  %v2406_v45 = vld [vmem:[%s2992_s2 + $0x70] sm:$0xff]  }
  0x34   : > { %v2713_v0 = vsel %vm461_vm2, %v1430_v50, %v1434_v52  ;;  %v1438_v3 = vor.u32 %v1436_v51, %v1434_v52 }
  0x36   : > { %v2733_v11 = vsel %vm461_vm2, %v1438_v3, %v1442_v4 }
  0x37   : > { %2165 = vmatmul.mubr.msk.bf16.gmra.mxu1 %vm324_vm1, %v497_v55  ;;  %2145 = vmatmul.mubr.msk.bf16.gmra.mxu0 %vm324_vm1, %v2380_v46  ;;  %v2414_v46 = vld [vmem:[%s2605_s7 + $0x14] sm:$0xff]   ;;  %v2416_v55 = vld [vmem:[%s2605_s7 + $0x1c] sm:$0xff]  }
  0x38   : > { %2168 = vmatprep.mubr.msk.bf16.mxu1 %vm2460_vm0, %v2459_v1  ;;  %2176 = vmatprep.mubr.msk.bf16.mxu0 %vm2460_vm0, %v2459_v1  ;;  %v1624_v56 = vrot.slane %v2414_v46, 1  ;;  %v1626_v59 = vrot.slane %v2416_v55, 1  ;;  %v2405_v46 = vld [vmem:[%s2605_s7 + $0x18] sm:$0xff]  }
  0x3a   : > { %v2716_v2 = vsel %vm872_vm3, %v1622_v39, %v1624_v56  ;;  %v2403_v39 = vld [vmem:[%s2992_s2 + $0x60] sm:$0xff]  }
  0x3f   : > { %2169 = vmatmul.mubr.msk.bf16.gmra.mxu1 %vm324_vm1, %v500_v12  ;;  %2177 = vmatmul.mubr.msk.bf16.vlgmr.msra.gmra.mxu0 %vm324_vm1, %v678_v16  ;;  %v1446_v12 = vor.u32 %v1444_v60, %v1442_v4  ;;  %v877_v16 = vsel %vm872_vm3, %v874_v53, %v876_v8  ;;  %v878_v53 = vrot.slane %v2391_v19, 1 }
  0x40   : > { %2221 = vmatpush3.bf16.msra.mxu0 %v2383_v7  ;;  %2200 = vmatprep.mubr.msk.bf16.mxu1 %vm2460_vm0, %v2459_v1  ;;  %v2724_v7 = vsel %vm872_vm3, %v1624_v56, %v1626_v59 }
  0x41   : > { %2180 = vmatprep.mubr.msk.bf16.mxu0 %vm2460_vm0, %v2459_v1  ;;  %2222 = vmatprep.subr.bf16.mxu0 %v2459_v1  ;;  %v2756_v42 = vsel %vm461_vm2, %v1446_v12, %v2742_v17  ;;  %v879_v26 = vsel %vm872_vm3, %v876_v8, %v878_v53  ;;  %v881_v61 = vsel %vm872_vm3, %v878_v53, %v880_v21  ;;  %v2397_v8 = vld [vmem:[%s2605_s7] sm:$0xff]  }
  0x42   : > { %v1214_v32 = vshll.u32 %v2397_v8, 16  ;;  %v1212_v36 = vshrl.u32 %v2397_v8, 16 }
  0x44   : > { %2223 = vmatpush3.bf16.msra.mxu0 %v2390_v23  ;;  %v2751_v23 = vsel %vm872_vm3, %v1626_v59, %v1628_v15 }
  0x45   : > { %2268 = vmatprep.subr.bf16.mxu0 %v2459_v1 }
  0x47   : > { %2201 = vmatmul.mubr.msk.bf16.vlgmr.msra.gmra.mxu1 %vm324_vm1, %v875_v43  ;;  %2181 = vmatmul.mubr.msk.bf16.gmra.mxu0 %vm324_vm1, %v686_v48 }
  0x48   : > { %2245 = vmatpush3.bf16.msra.mxu1 %v2387_v37  ;;  %2204 = vmatprep.mubr.msk.bf16.mxu1 %vm2460_vm0, %v2459_v1  ;;  %v1216_v37 = vrot.slane %v1214_v32, 1 }
  0x49   : > { %2184 = vmatprep.mubr.msk.bf16.mxu0 %vm2460_vm0, %v2459_v1  ;;  %2246 = vmatprep.subr.bf16.mxu1 %v2459_v1 }
  0x4a   : > { %v1217_v38 = vor.u32 %v1216_v37, %v1212_v36 }
  0x4c   : > { %2247 = vmatpush3.bf16.msra.mxu1 %v2393_v63  ;;  %v1222_v43 = vsel %vm461_vm2, %v1217_v38, %v2637_v62  ;;  %v2402_v62 = vld [vmem:[%s2605_s7 + $0x10] sm:$0xff]  }
  0x4d   : > { %2292 = vmatprep.subr.bf16.mxu1 %v2459_v1 }
  0x4f   : > { %2205 = vmatmul.mubr.msk.bf16.gmra.mxu1 %vm324_vm1, %v877_v16  ;;  %2185 = vmatmul.mubr.msk.bf16.gmra.mxu0 %vm324_vm1, %v694_v18 }
  0x50   : > { %2208 = vmatprep.mubr.msk.bf16.mxu1 %vm2460_vm0, %v2459_v1  ;;  %2188 = vmatprep.mubr.msk.bf16.mxu0 %vm2460_vm0, %v2459_v1 }
  0x57   : > { %2209 = vmatmul.mubr.msk.bf16.gmra.mxu1 %vm324_vm1, %v879_v26  ;;  %2189 = vmatmul.mubr.msk.bf16.gmra.mxu0 %vm324_vm1, %v702_v27 }
  0x58   : > { %2212 = vmatprep.mubr.msk.bf16.mxu1 %vm2460_vm0, %v2459_v1  ;;  %2192 = vmatprep.mubr.msk.bf16.mxu0 %vm2460_vm0, %v2459_v1 }
  0x5f   : > { %2213 = vmatmul.mubr.msk.bf16.gmra.mxu1 %vm324_vm1, %v881_v61  ;;  %2193 = vmatmul.mubr.msk.bf16.gmra.mxu0 %vm324_vm1, %v705_v31 }
  0x60   : > { %2216 = vmatprep.mubr.msk.bf16.mxu1 %vm2460_vm0, %v2459_v1  ;;  %2224 = vmatprep.mubr.msk.bf16.mxu0 %vm2460_vm0, %v2459_v1 }
  0x67   : > { %2217 = vmatmul.mubr.msk.bf16.gmra.mxu1 %vm324_vm1, %v880_v21  ;;  %2225 = vmatmul.mubr.msk.bf16.vlgmr.msra.gmra.mxu0 %vm324_vm1, %v2395_v34 }
  0x68   : > { %2269 = vmatpush3.bf16.msra.mxu0 %v2396_v35  ;;  %2248 = vmatprep.mubr.msk.bf16.mxu1 %vm2460_vm0, %v2459_v1 }
  0x69   : > { %2228 = vmatprep.mubr.msk.bf16.mxu0 %vm2460_vm0, %v2459_v1  ;;  %2270 = vmatprep.subr.bf16.mxu0 %v2459_v1 }
  0x6c   : > { %2271 = vmatpush3.bf16.msra.mxu0 %v2403_v39 }
  0x6f   : > { %2249 = vmatmul.mubr.msk.bf16.vlgmr.msra.gmra.mxu1 %vm324_vm1, %v1222_v43  ;;  %2229 = vmatmul.mubr.msk.bf16.gmra.mxu0 %vm324_vm1, %v2399_v41 }
  0x70   : > { %2293 = vmatpush3.bf16.msra.mxu1 %v2400_v44  ;;  %2252 = vmatprep.mubr.msk.bf16.mxu1 %vm2460_vm0, %v2459_v1 }
  0x71   : > { %2232 = vmatprep.mubr.msk.bf16.mxu0 %vm2460_vm0, %v2459_v1  ;;  %2294 = vmatprep.subr.bf16.mxu1 %v2459_v1 }
  0x74   : > { %2295 = vmatpush3.bf16.msra.mxu1 %v2406_v45 }
  0x77   : > { %2253 = vmatmul.mubr.msk.bf16.gmra.mxu1 %vm324_vm1, %v2653_v9  ;;  %2233 = vmatmul.mubr.msk.bf16.gmra.mxu0 %vm324_vm1, %v2402_v62  ;;  %v2408_v9 = vld [vmem:[%s2605_s7 + $0x20] ss:$0 sps:$4 sm:$0xff]   ;;  %s272_s7 = sadd.s32 %s2320_s5, %s2319_s6 }
  0x78   : > { %2256 = vmatprep.mubr.msk.bf16.mxu1 %vm2460_vm0, %v2459_v1  ;;  %2236 = vmatprep.mubr.msk.bf16.mxu0 %vm2460_vm0, %v2459_v1  ;;  %s1940_s15 = sshll.u32 %s272_s7, 3 }
  0x79   : > { %s2938_s11 = scalar_lea.vmem %s2994_s4, %s1940_s15 }
  0x7f   : > { %2257 = vmatmul.mubr.msk.bf16.gmra.mxu1 %vm324_vm1, %v2669_v24  ;;  %2237 = vmatmul.mubr.msk.bf16.gmra.mxu0 %vm324_vm1, %v2405_v46  ;;  %v1249_v24 = vor.u32 %v1247_v47, %v2673_v28  ;;  %v1454_v28 = vor.u32 %v1452_v13, %v2742_v17 }
  0x80   : > { %2260 = vmatprep.mubr.msk.bf16.mxu1 %vm2460_vm0, %v2459_v1  ;;  %2240 = vmatprep.mubr.msk.bf16.mxu0 %vm2460_vm0, %v2459_v1 }
  0x87   : > { %2261 = vmatmul.mubr.msk.bf16.gmra.mxu1 %vm324_vm1, %v2683_v33  ;;  %2241 = vmatmul.mubr.msk.bf16.gmra.mxu0 %vm324_vm1, %v2408_v9 }
  0x88   : > { %2264 = vmatprep.mubr.msk.bf16.mxu1 %vm2460_vm0, %v2459_v1  ;;  %2272 = vmatprep.mubr.msk.bf16.mxu0 %vm2460_vm0, %v2459_v1 }
  0x8f   : > { %2265 = vmatmul.mubr.msk.bf16.gmra.mxu1 %vm324_vm1, %v1249_v24  ;;  %2273 = vmatmul.mubr.msk.bf16.vlgmr.msra.gmra.mxu0 %vm324_vm1, %v2699_v49 }
  0x90   : > { %2296 = vmatprep.mubr.msk.bf16.mxu1 %vm2460_vm0, %v2459_v1  ;;  %2276 = vmatprep.mubr.msk.bf16.mxu0 %vm2460_vm0, %v2459_v1 }
  0x97   : > { %2297 = vmatmul.mubr.msk.bf16.vlgmr.msra.gmra.mxu1 %vm324_vm1, %v2704_v40  ;;  %2277 = vmatmul.mubr.msk.bf16.gmra.mxu0 %vm324_vm1, %v2713_v0 }
  0x98   : > { %2300 = vmatprep.mubr.msk.bf16.mxu1 %vm2460_vm0, %v2459_v1  ;;  %2280 = vmatprep.mubr.msk.bf16.mxu0 %vm2460_vm0, %v2459_v1 }
  0x9f   : > { %2301 = vmatmul.mubr.msk.bf16.gmra.mxu1 %vm324_vm1, %v2716_v2  ;;  %2281 = vmatmul.mubr.msk.bf16.gmra.mxu0 %vm324_vm1, %v2733_v11 }
  0xa0   : > { %2304 = vmatprep.mubr.msk.bf16.mxu1 %vm2460_vm0, %v2459_v1  ;;  %2284 = vmatprep.mubr.msk.bf16.mxu0 %vm2460_vm0, %v2459_v1 }
  0xa7   : > { %2305 = vmatmul.mubr.msk.bf16.gmra.mxu1 %vm324_vm1, %v2724_v7  ;;  %2285 = vmatmul.mubr.msk.bf16.gmra.mxu0 %vm324_vm1, %v2756_v42 }
  0xa8   : > { %2308 = vmatprep.mubr.msk.bf16.mxu1 %vm2460_vm0, %v2459_v1  ;;  %2288 = vmatprep.mubr.msk.bf16.mxu0 %vm2460_vm0, %v2459_v1 }
  0xaf   : > { %2309 = vmatmul.mubr.msk.bf16.gmra.mxu1 %vm324_vm1, %v2751_v23  ;;  %2289 = vmatmul.mubr.msk.bf16.gmra.mxu0 %vm324_vm1, %v1454_v28 }
  0xb0   : > { %2312 = vmatprep.mubr.msk.bf16.mxu1 %vm2460_vm0, %v2459_v1 }
  0xb7   : > { %2313 = vmatmul.mubr.msk.bf16.gmra.mxu1 %vm324_vm1, %v1628_v15 }
  0xd7   : > { %v374_v33 = vpop.f32.mrf.mxu0 }
  0xd9   : > { %v2130_v48 = vpop.f32.mrf.mxu0 }
  0xdb   : > { %v377_v49 = vpop.f32.mrf.mxu0 }
  0xdd   : > { %v2131_v50 = vpop.f32.mrf.mxu0 }
  0xdf   : > { %v562_v51 = vpop.f32.mrf.mxu1  ;;  %v382_v55 = vpop.f32.mrf.mxu0 }
  0xe0   : > { %v609_v40 = vadd.f32 %v562_v51, %v374_v33 }
  0xe1   : > { %v2154_v52 = vpop.f32.mrf.mxu1  ;;  %v2134_v56 = vpop.f32.mrf.mxu0 }
  0xe3   : > { %v565_v57 = vpop.f32.mrf.mxu1  ;;  %v385_v58 = vpop.f32.mrf.mxu0 }
  0xe4   : > { %v610_v59 = vadd.f32 %v565_v57, %v377_v49 }
  0xe5   : > { %v2155_v60 = vpop.f32.mrf.mxu1  ;;  %v2135_v63 = vpop.f32.mrf.mxu0 }
  0xe7   : > { %v570_v0 = vpop.f32.mrf.mxu1  ;;  %v390_v1 = vpop.f32.mrf.mxu0 }
  0xe8   : > { %v611_v2 = vadd.f32 %v570_v0, %v382_v55 }
  0xe9   : > { %v2158_v3 = vpop.f32.mrf.mxu1  ;;  %v2138_v4 = vpop.f32.mrf.mxu0 }
  0xeb   : > { %v573_v5 = vpop.f32.mrf.mxu1  ;;  %v393_v6 = vpop.f32.mrf.mxu0 }
  0xec   : > { %v612_v7 = vadd.f32 %v573_v5, %v385_v58 }
  0xed   : > { %v2159_v10 = vpop.f32.mrf.mxu1  ;;  %v2139_v11 = vpop.f32.mrf.mxu0 }
  0xef   : > { %v578_v12 = vpop.f32.mrf.mxu1  ;;  %v398_v14 = vpop.f32.mrf.mxu0 }
  0xf0   : > { %v613_v15 = vadd.f32 %v578_v12, %v390_v1 }
  0xf1   : > { %v2162_v16 = vpop.f32.mrf.mxu1  ;;  %v2142_v17 = vpop.f32.mrf.mxu0 }
  0xf3   : > { %v581_v18 = vpop.f32.mrf.mxu1  ;;  %v401_v19 = vpop.f32.mrf.mxu0 }
  0xf4   : > { %v614_v20 = vadd.f32 %v581_v18, %v393_v6 }
  0xf5   : > { %v2163_v22 = vpop.f32.mrf.mxu1  ;;  %v2143_v23 = vpop.f32.mrf.mxu0 }
  0xf7   : > { %v586_v42 = vpop.f32.mrf.mxu1  ;;  %v406_v53 = vpop.f32.mrf.mxu0 }
  0xf8   : > { %v615_v54 = vadd.f32 %v586_v42, %v398_v14 }
  0xf9   : > { %v2166_v25 = vpop.f32.mrf.mxu1  ;;  %v2146_v26 = vpop.f32.mrf.mxu0 }
  0xfb   : > { %v589_v27 = vpop.f32.mrf.mxu1  ;;  %v409_v29 = vpop.f32.mrf.mxu0 }
  0xfc   : > { %v616_v30 = vadd.f32 %v589_v27, %v401_v19 }
  0xfd   : > { %v2167_v21 = vpop.f32.mrf.mxu1  ;;  %v2147_v31 = vpop.f32.mrf.mxu0 }
  0xff   : > { %v594_v61 = vpop.f32.mrf.mxu1  ;;  %v767_v8 = vpop.f32.mrf.mxu0 }
 0x100   : > { %v617_v32 = vadd.f32 %v594_v61, %v406_v53  ;;  %v814_v34 = vadd.f32 %v767_v8, %v609_v40 }
 0x101   : > { %v2170_v35 = vpop.f32.mrf.mxu1  ;;  %v2178_v36 = vpop.f32.mrf.mxu0 }
 0x103   : > { %v597_v37 = vpop.f32.mrf.mxu1  ;;  %v770_v38 = vpop.f32.mrf.mxu0 }
 0x104   : > { %v815_v39 = vadd.f32 %v770_v38, %v610_v59 }
 0x105   : > { %v2171_v41 = vpop.f32.mrf.mxu1  ;;  %v2179_v43 = vpop.f32.mrf.mxu0 }
 0x107   : > { %v943_v44 = vpop.f32.mrf.mxu1  ;;  %v775_v45 = vpop.f32.mrf.mxu0 }
 0x108   : > { %v2881_v62 = vadd.f32 %v943_v44, %v814_v34  ;;  %v816_v46 = vadd.f32 %v775_v45, %v611_v2 }
 0x109   : > { %v2202_v9 = vpop.f32.mrf.mxu1  ;;  %v2182_v47 = vpop.f32.mrf.mxu0 }
 0x10b   : > { %v946_v24 = vpop.f32.mrf.mxu1  ;;  %v778_v13 = vpop.f32.mrf.mxu0 }
 0x10c   : > { %v2883_v28 = vadd.f32 %v946_v24, %v815_v39  ;;  %v817_v33 = vadd.f32 %v778_v13, %v612_v7 }
 0x10d   : > { %v2203_v48 = vpop.f32.mrf.mxu1  ;;  %v2183_v49 = vpop.f32.mrf.mxu0 }
 0x10f   : > { %v951_v50 = vpop.f32.mrf.mxu1  ;;  %v783_v51 = vpop.f32.mrf.mxu0 }
 0x110   : > { %v2885_v55 = vadd.f32 %v951_v50, %v816_v46  ;;  %v818_v40 = vadd.f32 %v783_v51, %v613_v15 }
 0x111   : > { %v2206_v52 = vpop.f32.mrf.mxu1  ;;  %v2186_v56 = vpop.f32.mrf.mxu0 }
 0x113   : > { %v954_v57 = vpop.f32.mrf.mxu1  ;;  %v786_v58 = vpop.f32.mrf.mxu0 }
 0x114   : > { %v2887_v59 = vadd.f32 %v954_v57, %v817_v33  ;;  %v819_v60 = vadd.f32 %v786_v58, %v614_v20 }
 0x115   : > { %v2207_v63 = vpop.f32.mrf.mxu1  ;;  %v2187_v0 = vpop.f32.mrf.mxu0 }
 0x117   : > { %v959_v1 = vpop.f32.mrf.mxu1  ;;  %v791_v2 = vpop.f32.mrf.mxu0 }
 0x118   : > { %v2889_v3 = vadd.f32 %v959_v1, %v818_v40  ;;  %v820_v4 = vadd.f32 %v791_v2, %v615_v54 }
 0x119   : > { %v2210_v5 = vpop.f32.mrf.mxu1  ;;  %v2190_v6 = vpop.f32.mrf.mxu0 }
 0x11b   : > { %v962_v7 = vpop.f32.mrf.mxu1  ;;  %v794_v10 = vpop.f32.mrf.mxu0 }
 0x11c   : > { %v2891_v11 = vadd.f32 %v962_v7, %v819_v60  ;;  %v821_v12 = vadd.f32 %v794_v10, %v616_v30 }
 0x11d   : > { %v2211_v14 = vpop.f32.mrf.mxu1  ;;  %v2191_v15 = vpop.f32.mrf.mxu0 }
 0x11f   : > { %v967_v16 = vpop.f32.mrf.mxu1  ;;  %v799_v17 = vpop.f32.mrf.mxu0 }
 0x120   : > { %v2893_v18 = vadd.f32 %v967_v16, %v820_v4  ;;  %v822_v19 = vadd.f32 %v799_v17, %v617_v32 }
 0x121   : > { %v2214_v20 = vpop.f32.mrf.mxu1  ;;  %v2194_v22 = vpop.f32.mrf.mxu0 }
 0x123   : > { %v970_v23 = vpop.f32.mrf.mxu1  ;;  %v802_v42 = vpop.f32.mrf.mxu0 }
 0x124   : > { %v2895_v53 = vadd.f32 %v970_v23, %v821_v12 }
 0x125   : > { %v2215_v54 = vpop.f32.mrf.mxu1  ;;  %v2195_v25 = vpop.f32.mrf.mxu0 }
 0x126   : > { %v2931_v54 = vld [vmem:[%s2993_s3] ss:$0 sm:$0xff] }
 0x127   : > { %v975_v26 = vpop.f32.mrf.mxu1  ;;  %v1106_v27 = vpop.f32.mrf.mxu0 }
 0x128   : > { %v2897_v29 = vadd.f32 %v975_v26, %v822_v19  ;;  %v1153_v14 = vadd.f32 %v1106_v27, %v2881_v62 }
 0x129   : > { %v2218_v30 = vpop.f32.mrf.mxu1  ;;  %v2226_v21 = vpop.f32.mrf.mxu0 }
 0x12b   : > { %v978_v31 = vpop.f32.mrf.mxu1  ;;  %v1109_v61 = vpop.f32.mrf.mxu0 }
 0x12c   : > { %v1154_v22 = vadd.f32 %v1109_v61, %v2883_v28 }
 0x12d   : > { %v2219_v8 = vpop.f32.mrf.mxu1  ;;  %v2227_v34 = vpop.f32.mrf.mxu0 }
 0x12f   : > { %v1311_v35 = vpop.f32.mrf.mxu1  ;;  %v1114_v32 = vpop.f32.mrf.mxu0 }
 0x130   : > { %v1358_v17 = vadd.f32 %v1311_v35, %v1153_v14  ;;  %v1155_v21 = vadd.f32 %v1114_v32, %v2885_v55 }
 0x131   : > { %v2250_v36 = vpop.f32.mrf.mxu1  ;;  %v2230_v37 = vpop.f32.mrf.mxu0 }
 0x133   : > { %v1314_v38 = vpop.f32.mrf.mxu1  ;;  %v2899_v39 = vpop.f32.mrf.mxu0 }
 0x134   : > { %v1359_v26 = vadd.f32 %v1314_v38, %v1154_v22  ;;  %v1156_v55 = vadd.f32 %v2899_v39, %v2887_v59 }
 0x135   : > { %v2251_v41 = vpop.f32.mrf.mxu1  ;;  %v2231_v43 = vpop.f32.mrf.mxu0 }
 0x137   : > { %v1319_v44 = vpop.f32.mrf.mxu1  ;;  %v2901_v45 = vpop.f32.mrf.mxu0 }
 0x138   : > { %v1360_v61 = vadd.f32 %v1319_v44, %v1155_v21 }
 0x139   : > { %v2254_v46 = vpop.f32.mrf.mxu1  ;;  %v2234_v9 = vpop.f32.mrf.mxu0 }
 0x13b   : > { %v2903_v47 = vpop.f32.mrf.mxu1  ;;  %v2905_v24 = vpop.f32.mrf.mxu0 }
 0x13d   : > { %v2255_v13 = vpop.f32.mrf.mxu1  ;;  %v2235_v33 = vpop.f32.mrf.mxu0 }
 0x13e   : > { %v1361_v13 = vadd.f32 %v2903_v47, %v1156_v55 }
 0x13f   : > { %v2907_v48 = vpop.f32.mrf.mxu1  ;;  %v2909_v49 = vpop.f32.mrf.mxu0 }
 0x140   : > { %v1159_v22 = vadd.f32 %v2909_v49, %v2893_v18 }
 0x141   : > { %v2258_v50 = vpop.f32.mrf.mxu1  ;;  %v2238_v51 = vpop.f32.mrf.mxu0 }
 0x143   : > { %v2911_v40 = vpop.f32.mrf.mxu1  ;;  %v2913_v52 = vpop.f32.mrf.mxu0 }
 0x144   : > { %v1160_v21 = vadd.f32 %v2913_v52, %v2895_v53 }
 0x145   : > { %v2259_v56 = vpop.f32.mrf.mxu1  ;;  %v2239_v57 = vpop.f32.mrf.mxu0 }
 0x146   : > { %v1157_v56 = vadd.f32 %v2901_v45, %v2889_v3 }
 0x147   : > { %v2915_v58 = vpop.f32.mrf.mxu1  ;;  %v2917_v60 = vpop.f32.mrf.mxu0 }
 0x149   : > { %v2262_v63 = vpop.f32.mrf.mxu1  ;;  %v2242_v0 = vpop.f32.mrf.mxu0 }
 0x14b   : > { %v2920_v1 = vpop.f32.mrf.mxu1  ;;  %v1141_v2 = vpop.f32.mrf.mxu0 }
 0x14c   : > { %v1362_v2 = vadd.f32 %v2907_v48, %v1157_v56 }
 0x14d   : > { %v2263_v4 = vpop.f32.mrf.mxu1  ;;  %v2243_v5 = vpop.f32.mrf.mxu0 }
 0x14f   : > { %v2923_v6 = vpop.f32.mrf.mxu1  ;;  %v1516_v7 = vpop.f32.mrf.mxu0 }
 0x150   : > { %v1563_v23 = vadd.f32 %v1516_v7, %v1358_v17 }
 0x151   : > { %v2266_v10 = vpop.f32.mrf.mxu1  ;;  %v2274_v12 = vpop.f32.mrf.mxu0 }
 0x152   : > { %v1158_v10 = vadd.f32 %v2905_v24, %v2891_v11 }
 0x153   : > { %v1346_v15 = vpop.f32.mrf.mxu1  ;;  %v1519_v16 = vpop.f32.mrf.mxu0 }
 0x154   : > { %v1564_v31 = vadd.f32 %v1519_v16, %v1359_v26  ;;  %v1363_v16 = vadd.f32 %v2911_v40, %v1158_v10  ;;  %v1364_v26 = vadd.f32 %v2915_v58, %v1159_v22 }
 0x155   : > { %v2267_v19 = vpop.f32.mrf.mxu1  ;;  %v2275_v20 = vpop.f32.mrf.mxu0 }
 0x157   : > { %v1691_v42 = vpop.f32.mrf.mxu1  ;;  %v1524_v25 = vpop.f32.mrf.mxu0 }
 0x158   : > { %v1738_v30 = vadd.f32 %v1691_v42, %v1563_v23  ;;  %v1565_v41 = vadd.f32 %v1524_v25, %v1360_v61 }
 0x159   : > { %v2298_v62 = vpop.f32.mrf.mxu1  ;;  %v2278_v27 = vpop.f32.mrf.mxu0 }
 0x15a   : > { %v1772_v8 = vadd.f32 %v2931_v54, %v1738_v30 }
 0x15b   : > { %v1694_v34 = vpop.f32.mrf.mxu1  ;;  %v1527_v28 = vpop.f32.mrf.mxu0 }
 0x15c   : > { %vm1781_vm4 = vcmp.ge.f32.partialorder %v1772_v8, 0.0  ;;  %v1790_v35 = vmul.f32 0.01, %v1772_v8  ;;  %v1739_v36 = vadd.f32 %v1694_v34, %v1564_v31  ;;  %v1566_v59 = vadd.f32 %v1527_v28, %v1361_v13 }
 0x15d   : > { %v2299_v37 = vpop.f32.mrf.mxu1  ;;  %v2279_v38 = vpop.f32.mrf.mxu0  ;;  %v1365_v28 = vadd.f32 %v2920_v1, %v1160_v21 }
 0x15e   : > { %v1799_v32 = vsel %vm1781_vm4, %v1772_v8, %v1790_v35  ;;  %v1773_v43 = vadd.f32 %v2931_v54, %v1739_v36  ;;  %v1161_v37 = vadd.f32 %v2917_v60, %v2897_v29 }
 0x15f   : > { %1808 = vst [vmem:[%s2938_s11] sm:$0xff] %v1799_v32  ;;  %v1699_v46 = vpop.f32.mrf.mxu1  ;;  %v1532_v9 = vpop.f32.mrf.mxu0 }
 0x160   : > { %vm1782_vm5 = vcmp.ge.f32.partialorder %v1773_v43, 0.0  ;;  %v1791_v44 = vmul.f32 0.01, %v1773_v43  ;;  %v1740_v33 = vadd.f32 %v1699_v46, %v1565_v41  ;;  %v1567_v3 = vadd.f32 %v1532_v9, %v1362_v2 }
 0x161   : > { %v2302_v50 = vpop.f32.mrf.mxu1  ;;  %v2282_v51 = vpop.f32.mrf.mxu0  ;;  %v1366_v41 = vadd.f32 %v2923_v6, %v1161_v37 }
 0x162   : > { %v1800_v57 = vsel %vm1782_vm5, %v1773_v43, %v1791_v44  ;;  %v1774_v39 = vadd.f32 %v2931_v54, %v1740_v33 }
 0x163   : > { %1809 = vst [vmem:[%s2938_s11 + $0x8] sm:$0xff] %v1800_v57  ;;  %v1702_v63 = vpop.f32.mrf.mxu1  ;;  %v1535_v0 = vpop.f32.mrf.mxu0 }
 0x164   : > { %vm1783_vm6 = vcmp.ge.f32.partialorder %v1774_v39, 0.0  ;;  %v1792_v47 = vmul.f32 0.01, %v1774_v39  ;;  %v1741_v4 = vadd.f32 %v1702_v63, %v1566_v59  ;;  %v1568_v11 = vadd.f32 %v1535_v0, %v1363_v16 }
 0x165   : > { %v2303_v5 = vpop.f32.mrf.mxu1  ;;  %v2283_v7 = vpop.f32.mrf.mxu0 }
 0x166   : > { %v1801_v12 = vsel %vm1783_vm6, %v1774_v39, %v1792_v47  ;;  %v1775_v45 = vadd.f32 %v2931_v54, %v1741_v4 }
 0x167   : > { %1810 = vst [vmem:[%s2938_s11 + $0x10] sm:$0xff] %v1801_v12  ;;  %v1707_v14 = vpop.f32.mrf.mxu1  ;;  %v1540_v15 = vpop.f32.mrf.mxu0 }
 0x168   : > { %vm1784_vm7 = vcmp.ge.f32.partialorder %v1775_v45, 0.0  ;;  %v1793_v48 = vmul.f32 0.01, %v1775_v45  ;;  %v1742_v17 = vadd.f32 %v1707_v14, %v1567_v3  ;;  %v1569_v18 = vadd.f32 %v1540_v15, %v1364_v26 }
 0x169   : > { %v2306_v19 = vpop.f32.mrf.mxu1  ;;  %v2286_v20 = vpop.f32.mrf.mxu0 }
 0x16a   : > { %v1802_v23 = vsel %vm1784_vm7, %v1775_v45, %v1793_v48  ;;  %v1776_v24 = vadd.f32 %v2931_v54, %v1742_v17 }
 0x16b   : > { %1811 = vst [vmem:[%s2938_s11 + $0x18] sm:$0xff] %v1802_v23  ;;  %v1710_v42 = vpop.f32.mrf.mxu1  ;;  %v1543_v25 = vpop.f32.mrf.mxu0 }
 0x16c   : > { %vm1785_vm8 = vcmp.ge.f32.partialorder %v1776_v24, 0.0  ;;  %v1794_v40 = vmul.f32 0.01, %v1776_v24  ;;  %v1743_v30 = vadd.f32 %v1710_v42, %v1568_v11  ;;  %v1570_v52 = vadd.f32 %v1543_v25, %v1365_v28 }
 0x16d   : > { %v2307_v62 = vpop.f32.mrf.mxu1  ;;  %v2287_v27 = vpop.f32.mrf.mxu0 }
 0x16e   : > { %v1803_v31 = vsel %vm1785_vm8, %v1776_v24, %v1794_v40  ;;  %v1777_v49 = vadd.f32 %v2931_v54, %v1743_v30 }
 0x16f   : > { %1812 = vst [vmem:[%s2938_s11 + $0x20] sm:$0xff] %v1803_v31  ;;  %v1715_v8 = vpop.f32.mrf.mxu1  ;;  %v1548_v34 = vpop.f32.mrf.mxu0 }
 0x170   : > { %vm1786_vm9 = vcmp.ge.f32.partialorder %v1777_v49, 0.0  ;;  %v1795_v58 = vmul.f32 0.01, %v1777_v49  ;;  %v1744_v61 = vadd.f32 %v1715_v8, %v1569_v18  ;;  %v1571_v44 = vadd.f32 %v1548_v34, %v1366_v41 }
 0x171   : > { %v2310_v35 = vpop.f32.mrf.mxu1  ;;  %v2290_v36 = vpop.f32.mrf.mxu0 }
 0x172   : > { %v1804_v53 = vsel %vm1786_vm9, %v1777_v49, %v1795_v58  ;;  %v1778_v38 = vadd.f32 %v2931_v54, %v1744_v61 }
 0x173   : > { %1813 = vst [vmem:[%s2938_s11 + $0x28] sm:$0xff] %v1804_v53  ;;  %v1718_v55 = vpop.f32.mrf.mxu1  ;;  %v1551_v32 = vpop.f32.mrf.mxu0 }
 0x174   : > { %vm1787_vm10 = vcmp.ge.f32.partialorder %v1778_v38, 0.0  ;;  %v1796_v1 = vmul.f32 0.01, %v1778_v38  ;;  %v1745_v43 = vadd.f32 %v1718_v55, %v1570_v52 }
 0x175   : > { %v2311_v46 = vpop.f32.mrf.mxu1  ;;  %v2291_v9 = vpop.f32.mrf.mxu0 }
 0x176   : > { %v1805_v13 = vsel %vm1787_vm10, %v1778_v38, %v1796_v1  ;;  %v1779_v29 = vadd.f32 %v2931_v54, %v1745_v43 }
 0x177   : > { %1814 = vst [vmem:[%s2938_s11 + $0x30] sm:$0xff] %v1805_v13  ;;  %v1723_v60 = vpop.f32.mrf.mxu1 }
 0x178   : > { %vm1788_vm11 = vcmp.ge.f32.partialorder %v1779_v29, 0.0  ;;  %v1797_v33 = vmul.f32 0.01, %v1779_v29  ;;  %v1746_v50 = vadd.f32 %v1723_v60, %v1571_v44 }
 0x179   : > { %v2314_v51 = vpop.f32.mrf.mxu1 }
 0x17a   : > { %v1806_v56 = vsel %vm1788_vm11, %v1779_v29, %v1797_v33  ;;  %v1780_v6 = vadd.f32 %v2931_v54, %v1746_v50 }
 0x17b   : > { %1815 = vst [vmem:[%s2938_s11 + $0x38] sm:$0xff] %v1806_v56  ;;  %v1726_v57 = vpop.f32.mrf.mxu1 }
 0x17c   : > { %vm1789_vm12 = vcmp.ge.f32.partialorder %v1780_v6, 0.0  ;;  %v1798_v59 = vmul.f32 0.01, %v1780_v6 }
 0x17d   : > { %v2315_v39 = vpop.f32.mrf.mxu1 }
 0x17e   : > { %v1807_v63 = vsel %vm1789_vm12, %v1780_v6, %v1798_v59 }
 0x17f   : > { %1816 = vst [vmem:[%s2938_s11 + $0x40] sm:$0xff] %v1807_v63 }
 0x180 PF: > { %s14_s19 = sadd.s32 1, %s2457_s19   ;;  %s2995_s15 = smov %s2449_s17 }
 0x181   : > { %p11_p9 = scmp.ge.s32.totalorder %s14_s19, 18   ;;  %s2996_s16 = smov %s2453_s18 }
 0x182   : > { %s2997_s17 = smov %s3000_s20  ;;  %s2998_s18 = smov %s3004_s21 }
 0x183   :  { %13 = sbr.rel (!%p11_p9) target bundleno = 3 (0x3), region = 76 }

// kernel: featnet_forward.7
= control target key start
LH: loop header
LB: loop body
LE: loop exit
PB: predicated region body
PF: predicated region fallthrough
CT: control target
= control target key end

     0   :  { %s2214_s15 = smov 0   ;;  %s2216_s16 = smov 0   ;;  %s2518_s0 = inlined_call_operand.vmem [shape: bf16[2,5,32,128], index: 0, kind: input, shape index: {}, may-alias: {0,1}]   ;;  %s2519_s1 = inlined_call_operand.vmem [shape: bf16[2,5,32,128], index: 1, kind: input, shape index: {}, may-alias: {0,1}]   ;;  %s2520_s2 = inlined_call_operand.vmem [shape: bf16[8,128,128], index: 2, kind: input, shape index: {}]   ;;  %s2521_s3 = inlined_call_operand.vmem [shape: f32[1,128], index: 3, kind: input, shape index: {}]   ;;  %s2522_s4 = inlined_call_operand.vmem [shape: f32[2,4,24,128], index: 4, kind: output, shape index: {}]  }
   0x1   :  { %s2218_s17 = smov 0   ;;  %s2220_s18 = smov 0  }
   0x2   :  { %s2222_s19 = smov 0  }
   0x3 LB: > { %s23_s20 = sadd.s32 1, %s2179_s17  ;;  %s26_s21 = sadd.s32 1, %s2183_s18  ;;  %s2187_s19 = sphi %s2222_s19, %s14_s19   ;;  %s2183_s18 = sphi %s2220_s18, %s2526_s18   ;;  %s2179_s17 = sphi %s2218_s17, %s2525_s17   ;;  %s2175_s16 = sphi %s2216_s16, %s2524_s16   ;;  %s2171_s15 = sphi %s2214_s15, %s2523_s15  }
   0x4   : > { %p24_p0 = scmp.ge.s32.totalorder %s23_s20, 4  ;;  %p1585_p1 = scmp.ge.s32.totalorder %s2187_s19, 1 }
   0x5   : > { %p202_p2 = scmp.lt.s32.totalorder %s2187_s19, 9 }
   0x6   : > { %s2528_s20 = smov (%p24_p0, %s23_s20), 0  ;;  %s2530_s21 = smov (!%p24_p0, %s26_s21), %s2183_s18 }
   0x7   : > { %p203_p3 = pnand %p1585_p1, %p202_p2  ;;  %p28_p4 = scmp.ge.s32.totalorder %s2530_s21, 2 }
   0x8   : > { %p246_p5 = scmp.lt.s32.totalorder (!%p203_p3), %s2175_s16, 1  ;;  %p248_p6 = scmp.lt.s32.totalorder (!%p203_p3), %s2171_s15, 4 }
   0x9   : > { %s2532_s21 = smov (%p28_p4, %s2530_s21), 0  ;;  %206 = sbr.rel (%p203_p3) target bundleno = 352 (0x160), region = 36 }
   0xa   : > { %s255_s29 = sadd.s32 (!%p203_p3), 1, %s2171_s15  ;;  %p268_p8 = scmp.lt.s32.totalorder (!%p203_p3), %s2171_s15, 3 }
   0xb   : > { %p258_p7 = scmp.lt.s32.totalorder (!%p203_p3), %s255_s29, 4 }
   0xe   : > { %v2069_v0 = vld [vmem:[%s2520_s2 + $0x38] sm:$0xff]   ;;  %v2070_v1 = vld [vmem:[%s2520_s2 + $0x30] sm:$0xff]   ;;  %s2534_s16 = smov (!%p246_p5, %s2175_s16), 1  ;;  %v2072_v3 = vld [vmem:[%s2520_s2 + $0x28] sm:$0xff]   ;;  %vm435_vm0 = vsmask.f32 7424 }
   0xf   : > { %1866 = vmatprep.subr.bf16.mxu0 %v2069_v0  ;;  %v2071_v2 = vld [vmem:[%s2520_s2 + $0x78] sm:$0xff]   ;;  %s249_s30 = scalar_select %p248_p6, %s2171_s15, 4  ;;  %v2073_v4 = vld [vmem:[%s2520_s2 + $0x70] sm:$0xff]   ;;  %v2075_v5 = vld [vmem:[%s2520_s2 + $0x68] sm:$0xff]   ;;  %vm589_vm1 = vsmask.f32 5376 }
  0x10   : > { %1867 = vmatpush3.bf16.msra.mxu0 %v2069_v0  ;;  %1886 = vmatprep.subr.bf16.mxu1 %v2071_v2  ;;  %s2026_s7 = smul.u32 20, %s2534_s16  ;;  %v2074_v6 = vld [vmem:[%s2520_s2 + $0x20] sm:$0xff]   ;;  %v2076_v8 = vld [vmem:[%s2520_s2 + $0x18] sm:$0xff]   ;;  %v2078_v11 = vld [vmem:[%s2520_s2 + $0x10] sm:$0xff]   ;;  %s2536_s29 = smov (!%p258_p7, %s255_s29), 4  ;;  %vm745_vm2 = vcmask 1044480  }
  0x11   : > { %1868 = vmatprep.subr.bf16.mxu0 %v2070_v1  ;;  %1887 = vmatpush3.bf16.msra.mxu1 %v2071_v2  ;;  %s1586_s8 = sshll.u32 %s249_s30, 2  ;;  %v2077_v7 = vld [vmem:[%s2520_s2 + $0x60] sm:$0xff]   ;;  %v2079_v9 = vld [vmem:[%s2520_s2 + $0x58] sm:$0xff]   ;;  %v2081_v12 = vld [vmem:[%s2520_s2 + $0x50] sm:$0xff]   ;;  %s2538_s15 = smov (!%p268_p8, %s2171_s15), 3 }
  0x12   : > { %1888 = vmatprep.subr.bf16.mxu1 %v2073_v4  ;;  %s252_s13 = sadd.s32 %s2026_s7, %s1586_s8  ;;  %v2080_v13 = vld [vmem:[%s2520_s2 + $0x8] sm:$0xff]   ;;  %v2082_v20 = vld [vmem:[%s2520_s2] sm:$0xff]   ;;  %v2087_v25 = vld [vmem:[%s2520_s2 + $0xb8] sm:$0xff]   ;;  %s2028_s12 = smul.u32 12, %s2534_s16 }
  0x13   : > { %s1587_s23 = sshll.u32 %s252_s13, 2  ;;  %v2083_v16 = vld [vmem:[%s2520_s2 + $0x48] sm:$0xff]   ;;  %v2086_v23 = vld [vmem:[%s2520_s2 + $0x40] sm:$0xff]   ;;  %v2091_v29 = vld [vmem:[%s2520_s2 + $0xf8] sm:$0xff]  }
  0x14   : > { %1869 = vmatpush3.bf16.msra.mxu0 %v2070_v1  ;;  %s2286_s30 = scalar_lea.vmem %s2518_s0, %s1587_s23  ;;  %v2090_v30 = vld [vmem:[%s2520_s2 + $0xb0] sm:$0xff]   ;;  %v2092_v33 = vld [vmem:[%s2520_s2 + $0xa8] sm:$0xff]   ;;  %v2094_v37 = vld [vmem:[%s2520_s2 + $0xa0] sm:$0xff]  }
  0x15   : > { %1870 = vmatprep.subr.bf16.mxu0 %v2072_v3  ;;  %1889 = vmatpush3.bf16.msra.mxu1 %v2073_v4  ;;  %v2084_v10 = vld [vmem:[%s2286_s30] sm:$0xff]   ;;  %v2089_v15 = vld [vmem:[%s2286_s30 + $0x8] sm:$0x1f]   ;;  %v2093_v32 = vld [vmem:[%s2520_s2 + $0xf0] sm:$0xff]  }
  0x16   : > { %1890 = vmatprep.subr.bf16.mxu1 %v2075_v5  ;;  %1882 = vmatprep.mubr.bf16.mxu0 %v2084_v10  ;;  %v2088_v14 = vld [vmem:[%s2286_s30] sm:$0xff]   ;;  %v444_v19 = vshll.u32 %v2089_v15, 16  ;;  %v448_v27 = vshrl.u32 %v2089_v15, 16  ;;  %v2085_v28 = vld [vmem:[%s2286_s30 + $0x8] ss:$0 sps:$4 sm:$0xff]   ;;  %v2096_v51 = vld [vmem:[%s2520_s2 + $0x98] sm:$0xff]  }
  0x17   : > { %v437_v17 = vshrl.u32 %v2088_v14, 16  ;;  %v439_v18 = vshll.u32 %v2088_v14, 16  ;;  %v2104_v34 = vld [vmem:[%s2286_s30] sm:$0xfc]   ;;  %v2095_v35 = vld [vmem:[%s2520_s2 + $0xe8] sm:$0xff]   ;;  %v2099_v55 = vld [vmem:[%s2520_s2 + $0xd8] sm:$0xff]  }
  0x18   : > { %1871 = vmatpush3.bf16.msra.mxu0 %v2072_v3  ;;  %v446_v22 = vrot.slane %v444_v19, 1  ;;  %v2105_v36 = vld [vmem:[%s2286_s30 + $0x8] sm:$0x7f]   ;;  %v591_v38 = vshrl.u32 %v2104_v34, 16  ;;  %v594_v39 = vshll.u32 %v2104_v34, 16  ;;  %v2097_v42 = vld [vmem:[%s2520_s2 + $0xe0] sm:$0xff]  }
  0x19   : > { %1872 = vmatprep.subr.bf16.mxu0 %v2074_v6  ;;  %1891 = vmatpush3.bf16.msra.mxu1 %v2075_v5  ;;  %v441_v21 = vrot.slane %v439_v18, 1  ;;  %v599_v40 = vshrl.u32 %v2105_v36, 16  ;;  %v602_v41 = vshll.u32 %v2105_v36, 16  ;;  %v2108_v48 = vld [vmem:[%s2286_s30] sm:$0xf8]   ;;  %v2098_v57 = vld [vmem:[%s2520_s2 + $0x90] sm:$0xff]  }
  0x1a   : > { %1892 = vmatprep.subr.bf16.mxu1 %v2077_v7  ;;  %v450_v31 = vor.u32 %v448_v27, %v446_v22  ;;  %v593_v43 = vrot.slane %v591_v38, 2  ;;  %v596_v44 = vrot.slane %v594_v39, 3  ;;  %v2109_v49 = vld [vmem:[%s2286_s30 + $0x8] sm:$0x7f]   ;;  %v746_v52 = vrot.slane %v2108_v48, 3  ;;  %s1588_s30 = sshll.u32 %s2536_s29, 2 }
  0x1b   : > { %v442_v24 = vor.u32 %v441_v21, %v437_v17  ;;  %v601_v45 = vrot.slane %v599_v40, 2  ;;  %v604_v46 = vrot.slane %v602_v41, 3  ;;  %v747_v53 = vrot.slane %v2109_v49, 3  ;;  %s262_s8 = sadd.s32 %s2026_s7, %s1588_s30  ;;  %v2101_v58 = vld [vmem:[%s2520_s2 + $0xd0] sm:$0xff]   ;;  %v2100_v59 = vld [vmem:[%s2520_s2 + $0x88] sm:$0xff]   ;;  %v2102_v61 = vld [vmem:[%s2520_s2 + $0x80] sm:$0xff]  }
  0x1c   : > { %1873 = vmatpush3.bf16.msra.mxu0 %v2074_v6  ;;  %v597_v47 = vor.u32 %v596_v44, %v593_v43  ;;  %s1589_s29 = sshll.u32 %s262_s8, 2  ;;  %v2103_v60 = vld [vmem:[%s2520_s2 + $0xc8] sm:$0xff]   ;;  %v2106_v62 = vld [vmem:[%s2520_s2 + $0xc0] sm:$0xff]   ;;  %v2107_v63 = vld [vmem:[%s2520_s2 + $0x138] sm:$0xff]  }
  0x1d   : > { %1874 = vmatprep.subr.bf16.mxu0 %v2076_v8  ;;  %1893 = vmatpush3.bf16.msra.mxu1 %v2077_v7  ;;  %v447_v26 = vsel %vm435_vm0, %v442_v24, %v446_v22  ;;  %v605_v50 = vor.u32 %v604_v46, %v601_v45  ;;  %v748_v56 = vsel %vm745_vm2, %v746_v52, %v747_v53  ;;  %s2368_s23 = scalar_lea.vmem %s2519_s1, %s1589_s29  ;;  %v2111_v0 = vld [vmem:[%s2520_s2 + $0x178] sm:$0xff]   ;;  %v2110_v6 = vld [vmem:[%s2520_s2 + $0x130] sm:$0xff]   ;;  %v2115_v14 = vld [vmem:[%s2520_s2 + $0x168] sm:$0xff]   ;;  %s2027_s29 = smul.u32 3, %s2538_s15 }
  0x1e   : > { %1894 = vmatprep.subr.bf16.mxu1 %v2079_v9  ;;  %1902 = vmatprep.mubr.bf16.mxu1 %v447_v26  ;;  %v2128_v1 = vld [vmem:[%s2368_s23] sm:$0xff]   ;;  %v2384_v2 = vld [vmem:[%s2368_s23 + $0x8] sm:$0x1f]   ;;  %v2116_v17 = vld [vmem:[%s2520_s2 + $0x118] sm:$0xff]  }
  0x1f   : > { %v606_v54 = vsel %vm589_vm1, %v597_v47, %v605_v50  ;;  %v2124_v3 = vld [vmem:[%s2368_s23] sm:$0xff]   ;;  %v1023_v4 = vshrl.u32 %v2128_v1, 16  ;;  %v1025_v5 = vshll.u32 %v2128_v1, 16  ;;  %v1030_v7 = vshll.u32 %v2384_v2, 16  ;;  %v2119_v18 = vld [vmem:[%s2520_s2 + $0x158] sm:$0xff]   ;;  %v2118_v19 = vld [vmem:[%s2520_s2 + $0x110] sm:$0xff]   ;;  %s272_s13 = sadd.s32 %s2028_s12, %s2027_s29 }
  0x20   : > { %1875 = vmatpush3.bf16.msra.mxu0 %v2076_v8  ;;  %v2114_v15 = vld [vmem:[%s2520_s2 + $0x120] sm:$0xff]   ;;  %v2145_v21 = vld [vmem:[%s2368_s23 + $0x8] sm:$0x7f]   ;;  %v2121_v22 = vld [vmem:[%s2520_s2 + $0x150] sm:$0xff]   ;;  %v1034_v38 = vshrl.u32 %v2384_v2, 16  ;;  %s1590_s16 = sshll.u32 %s272_s13, 3 }
  0x21   : > { %1876 = vmatprep.subr.bf16.mxu0 %v2078_v11  ;;  %1895 = vmatpush3.bf16.msra.mxu1 %v2079_v9  ;;  %v1027_v8 = vrot.slane %v1025_v5, 1  ;;  %v2113_v9 = vld [vmem:[%s2520_s2 + $0x170] sm:$0xff]   ;;  %v2394_v10 = vrot.slane %v1030_v7, 1  ;;  %v1184_v26 = vshrl.u32 %v2145_v21, 16  ;;  %v1187_v27 = vshll.u32 %v2145_v21, 16  ;;  %v2126_v34 = vld [vmem:[%s2520_s2 + $0x140] sm:$0xff]   ;;  %s274_s24 = scalar_lea.vmem %s2522_s4, %s1590_s16 }
  0x22   : > { %1896 = vmatprep.subr.bf16.mxu1 %v2081_v12  ;;  %v2438_v36 = vld [vmem:[%s2368_s23 + $0x8] sm:$0x7f]   ;;  %v2130_v45 = vld [vmem:[%s2520_s2 + $0x1b0] sm:$0xff]   ;;  %v2134_v52 = vld [vmem:[%s2520_s2 + $0x1a0] sm:$0xff]  }
  0x23   : > { %v2125_v41 = vld [vmem:[%s2368_s23 + $0x8] ss:$0 sps:$4 sm:$0xff]   ;;  %v1331_v44 = vrot.slane %v2438_v36, 3  ;;  %v1036_v46 = vor.u32 %v1034_v38, %v2394_v10  ;;  %v2133_v48 = vld [vmem:[%s2520_s2 + $0x1f0] sm:$0xff]  }
  0x24   : > { %1877 = vmatpush3.bf16.msra.mxu0 %v2078_v11  ;;  %v1028_v11 = vor.u32 %v1027_v8, %v1023_v4 }
  0x25   : > { %1878 = vmatprep.subr.bf16.mxu0 %v2080_v13  ;;  %1897 = vmatpush3.bf16.msra.mxu1 %v2081_v12  ;;  %v2112_v12 = vld [vmem:[%s2520_s2 + $0x128] sm:$0xff]  }
  0x26   : > { %1898 = vmatprep.subr.bf16.mxu1 %v2083_v16 }
  0x28   : > { %1879 = vmatpush3.bf16.msra.mxu0 %v2080_v13  ;;  %v1033_v13 = vsel %vm435_vm0, %v1028_v11, %v2394_v10 }
  0x29   : > { %1880 = vmatprep.subr.bf16.mxu0 %v2082_v20  ;;  %1899 = vmatpush3.bf16.msra.mxu1 %v2083_v16  ;;  %v2117_v16 = vld [vmem:[%s2520_s2 + $0x160] sm:$0xff]  }
  0x2a   : > { %1900 = vmatprep.subr.bf16.mxu1 %v2086_v23 }
  0x2c   : > { %1881 = vmatpush3.bf16.msra.mxu0 %v2082_v20  ;;  %v2144_v20 = vld [vmem:[%s2368_s23] sm:$0xfc]  }
  0x2d   : > { %1906 = vmatprep.subr.bf16.mxu0 %v2087_v25  ;;  %1901 = vmatpush3.bf16.msra.mxu1 %v2086_v23  ;;  %v2120_v23 = vld [vmem:[%s2520_s2 + $0x108] sm:$0xff]   ;;  %v1176_v24 = vshrl.u32 %v2144_v20, 16 }
  0x2e   : > { %1926 = vmatprep.subr.bf16.mxu1 %v2091_v29 }
  0x2f   : > { %1883 = vmatmul.mubr.bf16.vlgmr.msra.gmra.mxu0 %v2085_v28  ;;  %v2123_v28 = vld [vmem:[%s2520_s2 + $0x148] sm:$0xff]  }
  0x30   : > { %1907 = vmatpush3.bf16.msra.mxu0 %v2087_v25  ;;  %1903 = vmatmul.mubr.bf16.vlgmr.msra.gmra.mxu1 %v450_v31  ;;  %v1179_v25 = vshll.u32 %v2144_v20, 16 }
  0x31   : > { %1908 = vmatprep.subr.bf16.mxu0 %v2090_v30  ;;  %1927 = vmatpush3.bf16.msra.mxu1 %v2091_v29  ;;  %v2122_v29 = vld [vmem:[%s2520_s2 + $0x100] sm:$0xff]  }
  0x32   : > { %1928 = vmatprep.subr.bf16.mxu1 %v2093_v32  ;;  %1922 = vmatprep.mubr.bf16.mxu0 %v606_v54  ;;  %v1181_v31 = vrot.slane %v1179_v25, 3  ;;  %v2136_v54 = vld [vmem:[%s2520_s2 + $0x198] sm:$0xff]  }
  0x33   : > { %1942 = vmatprep.mubr.bf16.mxu1 %v748_v56  ;;  %v2138_v56 = vld [vmem:[%s2520_s2 + $0x190] sm:$0xff]  }
  0x34   : > { %1909 = vmatpush3.bf16.msra.mxu0 %v2090_v30  ;;  %v1178_v30 = vrot.slane %v1176_v24, 2 }
  0x35   : > { %1910 = vmatprep.subr.bf16.mxu0 %v2092_v33  ;;  %1929 = vmatpush3.bf16.msra.mxu1 %v2093_v32  ;;  %v1186_v32 = vrot.slane %v1184_v26, 2 }
  0x36   : > { %1930 = vmatprep.subr.bf16.mxu1 %v2095_v35  ;;  %v1182_v39 = vor.u32 %v1181_v31, %v1178_v30 }
  0x38   : > { %1911 = vmatpush3.bf16.msra.mxu0 %v2092_v33  ;;  %v1189_v33 = vrot.slane %v1187_v27, 3 }
  0x39   : > { %1912 = vmatprep.subr.bf16.mxu0 %v2094_v37  ;;  %1931 = vmatpush3.bf16.msra.mxu1 %v2095_v35  ;;  %v2147_v35 = vld [vmem:[%s2368_s23] sm:$0xf8]  }
  0x3a   : > { %1932 = vmatprep.subr.bf16.mxu1 %v2097_v42  ;;  %v1190_v40 = vor.u32 %v1189_v33, %v1186_v32  ;;  %v1330_v43 = vrot.slane %v2147_v35, 3 }
  0x3c   : > { %1913 = vmatpush3.bf16.msra.mxu0 %v2094_v37  ;;  %v2127_v37 = vld [vmem:[%s2520_s2 + $0x1b8] sm:$0xff]   ;;  %v1191_v47 = vsel %vm589_vm1, %v1182_v39, %v1190_v40  ;;  %v1332_v49 = vsel %vm745_vm2, %v1330_v43, %v1331_v44 }
  0x3d   : > { %1914 = vmatprep.subr.bf16.mxu0 %v2096_v51  ;;  %1933 = vmatpush3.bf16.msra.mxu1 %v2097_v42  ;;  %v2131_v42 = vld [vmem:[%s2520_s2 + $0x1f8] sm:$0xff]  }
  0x3e   : > { %1934 = vmatprep.subr.bf16.mxu1 %v2099_v55 }
  0x40   : > { %1915 = vmatpush3.bf16.msra.mxu0 %v2096_v51  ;;  %v2135_v51 = vld [vmem:[%s2520_s2 + $0x1e8] sm:$0xff]  }
  0x41   : > { %1916 = vmatprep.subr.bf16.mxu0 %v2098_v57  ;;  %1935 = vmatpush3.bf16.msra.mxu1 %v2099_v55  ;;  %v2139_v55 = vld [vmem:[%s2520_s2 + $0x1d8] sm:$0xff]  }
  0x42   : > { %1936 = vmatprep.subr.bf16.mxu1 %v2101_v58 }
  0x44   : > { %1917 = vmatpush3.bf16.msra.mxu0 %v2098_v57  ;;  %v2141_v57 = vld [vmem:[%s2520_s2 + $0x1d0] sm:$0xff]  }
  0x45   : > { %1918 = vmatprep.subr.bf16.mxu0 %v2100_v59  ;;  %1937 = vmatpush3.bf16.msra.mxu1 %v2101_v58  ;;  %v2140_v58 = vld [vmem:[%s2520_s2 + $0x188] sm:$0xff]  }
  0x46   : > { %1938 = vmatprep.subr.bf16.mxu1 %v2103_v60 }
  0x48   : > { %1919 = vmatpush3.bf16.msra.mxu0 %v2100_v59  ;;  %v2143_v59 = vld [vmem:[%s2520_s2 + $0x1c8] sm:$0xff]  }
  0x49   : > { %1920 = vmatprep.subr.bf16.mxu0 %v2102_v61  ;;  %1939 = vmatpush3.bf16.msra.mxu1 %v2103_v60  ;;  %v2142_v60 = vld [vmem:[%s2520_s2 + $0x180] sm:$0xff]  }
  0x4a   : > { %1940 = vmatprep.subr.bf16.mxu1 %v2106_v62 }
  0x4c   : > { %1921 = vmatpush3.bf16.msra.mxu0 %v2102_v61  ;;  %v2146_v61 = vld [vmem:[%s2520_s2 + $0x1c0] sm:$0xff]  }
  0x4d   : > { %1946 = vmatprep.subr.bf16.mxu0 %v2107_v63  ;;  %1941 = vmatpush3.bf16.msra.mxu1 %v2106_v62 }
  0x4e   : > { %1966 = vmatprep.subr.bf16.mxu1 %v2111_v0 }
  0x4f   : > { %1923 = vmatmul.mubr.bf16.vlgmr.msra.gmra.mxu0 %v605_v50  ;;  %v2132_v50 = vld [vmem:[%s2520_s2 + $0x1a8] sm:$0xff]  }
  0x50   : > { %1947 = vmatpush3.bf16.msra.mxu0 %v2107_v63  ;;  %1962 = vmatprep.mubr.bf16.mxu0 %v2124_v3 }
  0x51   : > { %1948 = vmatprep.subr.bf16.mxu0 %v2110_v6  ;;  %1943 = vmatmul.mubr.bf16.vlgmr.msra.gmra.mxu1 %v747_v53  ;;  %v2137_v53 = vld [vmem:[%s2520_s2 + $0x1e0] sm:$0xff]  }
  0x52   : > { %1967 = vmatpush3.bf16.msra.mxu1 %v2111_v0  ;;  %1982 = vmatprep.mubr.bf16.mxu1 %v1033_v13 }
  0x53   : > { %1968 = vmatprep.subr.bf16.mxu1 %v2113_v9 }
  0x54   : > { %1949 = vmatpush3.bf16.msra.mxu0 %v2110_v6 }
  0x55   : > { %1950 = vmatprep.subr.bf16.mxu0 %v2112_v12 }
  0x56   : > { %1969 = vmatpush3.bf16.msra.mxu1 %v2113_v9 }
  0x57   : > { %1970 = vmatprep.subr.bf16.mxu1 %v2115_v14 }
  0x58   : > { %1951 = vmatpush3.bf16.msra.mxu0 %v2112_v12 }
  0x59   : > { %1952 = vmatprep.subr.bf16.mxu0 %v2114_v15 }
  0x5a   : > { %1971 = vmatpush3.bf16.msra.mxu1 %v2115_v14 }
  0x5b   : > { %1972 = vmatprep.subr.bf16.mxu1 %v2117_v16 }
  0x5c   : > { %1953 = vmatpush3.bf16.msra.mxu0 %v2114_v15 }
  0x5d   : > { %1954 = vmatprep.subr.bf16.mxu0 %v2116_v17 }
  0x5e   : > { %1973 = vmatpush3.bf16.msra.mxu1 %v2117_v16 }
  0x5f   : > { %1974 = vmatprep.subr.bf16.mxu1 %v2119_v18 }
  0x60   : > { %1955 = vmatpush3.bf16.msra.mxu0 %v2116_v17 }
  0x61   : > { %1956 = vmatprep.subr.bf16.mxu0 %v2118_v19 }
  0x62   : > { %1975 = vmatpush3.bf16.msra.mxu1 %v2119_v18 }
  0x63   : > { %1976 = vmatprep.subr.bf16.mxu1 %v2121_v22 }
  0x64   : > { %1957 = vmatpush3.bf16.msra.mxu0 %v2118_v19 }
  0x65   : > { %1958 = vmatprep.subr.bf16.mxu0 %v2120_v23 }
  0x66   : > { %1977 = vmatpush3.bf16.msra.mxu1 %v2121_v22 }
  0x67   : > { %1978 = vmatprep.subr.bf16.mxu1 %v2123_v28 }
  0x68   : > { %1959 = vmatpush3.bf16.msra.mxu0 %v2120_v23 }
  0x69   : > { %1960 = vmatprep.subr.bf16.mxu0 %v2122_v29 }
  0x6a   : > { %1979 = vmatpush3.bf16.msra.mxu1 %v2123_v28 }
  0x6b   : > { %1980 = vmatprep.subr.bf16.mxu1 %v2126_v34 }
  0x6c   : > { %1961 = vmatpush3.bf16.msra.mxu0 %v2122_v29 }
  0x6d   : > { %1986 = vmatprep.subr.bf16.mxu0 %v2127_v37 }
  0x6e   : > { %1981 = vmatpush3.bf16.msra.mxu1 %v2126_v34 }
  0x6f   : > { %1963 = vmatmul.mubr.bf16.vlgmr.msra.gmra.mxu0 %v2125_v41  ;;  %2006 = vmatprep.subr.bf16.mxu1 %v2131_v42 }
  0x70   : > { %1987 = vmatpush3.bf16.msra.mxu0 %v2127_v37  ;;  %2002 = vmatprep.mubr.bf16.mxu0 %v1191_v47 }
  0x71   : > { %1988 = vmatprep.subr.bf16.mxu0 %v2130_v45  ;;  %1983 = vmatmul.mubr.bf16.vlgmr.msra.gmra.mxu1 %v1036_v46 }
  0x72   : > { %2007 = vmatpush3.bf16.msra.mxu1 %v2131_v42  ;;  %2022 = vmatprep.mubr.bf16.mxu1 %v1332_v49 }
  0x73   : > { %2008 = vmatprep.subr.bf16.mxu1 %v2133_v48 }
  0x74   : > { %1989 = vmatpush3.bf16.msra.mxu0 %v2130_v45 }
  0x75   : > { %1990 = vmatprep.subr.bf16.mxu0 %v2132_v50 }
  0x76   : > { %2009 = vmatpush3.bf16.msra.mxu1 %v2133_v48 }
  0x77   : > { %2010 = vmatprep.subr.bf16.mxu1 %v2135_v51 }
  0x78   : > { %1991 = vmatpush3.bf16.msra.mxu0 %v2132_v50 }
  0x79   : > { %1992 = vmatprep.subr.bf16.mxu0 %v2134_v52 }
  0x7a   : > { %2011 = vmatpush3.bf16.msra.mxu1 %v2135_v51 }
  0x7b   : > { %2012 = vmatprep.subr.bf16.mxu1 %v2137_v53 }
  0x7c   : > { %1993 = vmatpush3.bf16.msra.mxu0 %v2134_v52 }
  0x7d   : > { %1994 = vmatprep.subr.bf16.mxu0 %v2136_v54 }
  0x7e   : > { %2013 = vmatpush3.bf16.msra.mxu1 %v2137_v53 }
  0x7f   : > { %2014 = vmatprep.subr.bf16.mxu1 %v2139_v55 }
  0x80   : > { %1995 = vmatpush3.bf16.msra.mxu0 %v2136_v54 }
  0x81   : > { %1996 = vmatprep.subr.bf16.mxu0 %v2138_v56 }
  0x82   : > { %2015 = vmatpush3.bf16.msra.mxu1 %v2139_v55 }
  0x83   : > { %2016 = vmatprep.subr.bf16.mxu1 %v2141_v57 }
  0x84   : > { %1997 = vmatpush3.bf16.msra.mxu0 %v2138_v56 }
  0x85   : > { %1998 = vmatprep.subr.bf16.mxu0 %v2140_v58 }
  0x86   : > { %2017 = vmatpush3.bf16.msra.mxu1 %v2141_v57 }
  0x87   : > { %2018 = vmatprep.subr.bf16.mxu1 %v2143_v59 }
  0x88   : > { %1999 = vmatpush3.bf16.msra.mxu0 %v2140_v58 }
  0x89   : > { %2000 = vmatprep.subr.bf16.mxu0 %v2142_v60 }
  0x8a   : > { %2019 = vmatpush3.bf16.msra.mxu1 %v2143_v59 }
  0x8b   : > { %2020 = vmatprep.subr.bf16.mxu1 %v2146_v61 }
  0x8c   : > { %2001 = vmatpush3.bf16.msra.mxu0 %v2142_v60 }
  0x8e   : > { %2021 = vmatpush3.bf16.msra.mxu1 %v2146_v61 }
  0x8f   : > { %2003 = vmatmul.mubr.bf16.vlgmr.msra.gmra.mxu0 %v1190_v40  ;;  %v1783_v40 = vld [vmem:[%s2521_s3] ss:$0 sm:$0xff] }
  0x91   : > { %2023 = vmatmul.mubr.bf16.vlgmr.msra.gmra.mxu1 %v1331_v44 }
  0xef   : > { %v1884_v62 = vpop.f32.mrf.mxu0 }
  0xf0   : > { %v1904_v0 = vpop.f32.mrf.mxu1 }
  0xf1   : > { %v387_v63 = vpop.f32.mrf.mxu0  ;;  %v554_v1 = vadd.f32 %v1904_v0, %v1884_v62 }
  0xf2   : > { %v535_v3 = vpop.f32.mrf.mxu1 }
  0xf3   : > { %v1885_v2 = vpop.f32.mrf.mxu0  ;;  %v552_v4 = vadd.f32 %v535_v3, %v387_v63 }
  0xf4   : > { %v1905_v5 = vpop.f32.mrf.mxu1 }
  0xf5   : > { %v390_v6 = vpop.f32.mrf.mxu0 }
  0xf6   : > { %v538_v7 = vpop.f32.mrf.mxu1 }
  0xf7   : > { %v553_v24 = vadd.f32 %v538_v7, %v390_v6 }
 0x10f   : > { %v1924_v8 = vpop.f32.mrf.mxu0 }
 0x110   : > { %v710_v22 = vadd.f32 %v1924_v8, %v554_v1 }
 0x111   : > { %v691_v9 = vpop.f32.mrf.mxu0  ;;  %v1944_v10 = vpop.f32.mrf.mxu1 }
 0x112   : > { %v708_v23 = vadd.f32 %v691_v9, %v552_v4  ;;  %v852_v25 = vadd.f32 %v1944_v10, %v710_v22 }
 0x113   : > { %v1925_v11 = vpop.f32.mrf.mxu0  ;;  %v833_v12 = vpop.f32.mrf.mxu1 }
 0x114   : > { %v850_v27 = vadd.f32 %v833_v12, %v708_v23 }
 0x115   : > { %v1945_v13 = vpop.f32.mrf.mxu1  ;;  %v694_v14 = vpop.f32.mrf.mxu0 }
 0x116   : > { %v709_v26 = vadd.f32 %v694_v14, %v553_v24 }
 0x117   : > { %v836_v15 = vpop.f32.mrf.mxu1 }
 0x118   : > { %v851_v31 = vadd.f32 %v836_v15, %v709_v26 }
 0x12f   : > { %v1964_v16 = vpop.f32.mrf.mxu0 }
 0x130   : > { %v987_v28 = vadd.f32 %v1964_v16, %v852_v25 }
 0x131   : > { %v968_v17 = vpop.f32.mrf.mxu0  ;;  %v1984_v18 = vpop.f32.mrf.mxu1 }
 0x132   : > { %v985_v29 = vadd.f32 %v968_v17, %v850_v27  ;;  %v1140_v32 = vadd.f32 %v1984_v18, %v987_v28 }
 0x133   : > { %v1965_v19 = vpop.f32.mrf.mxu0  ;;  %v1121_v20 = vpop.f32.mrf.mxu1 }
 0x134   : > { %v1138_v36 = vadd.f32 %v1121_v20, %v985_v29 }
 0x135   : > { %v1985_v21 = vpop.f32.mrf.mxu1  ;;  %v971_v30 = vpop.f32.mrf.mxu0 }
 0x136   : > { %v986_v35 = vadd.f32 %v971_v30, %v851_v31 }
 0x137   : > { %v1124_v33 = vpop.f32.mrf.mxu1 }
 0x138   : > { %v1139_v45 = vadd.f32 %v1124_v33, %v986_v35 }
 0x14f   : > { %v2004_v34 = vpop.f32.mrf.mxu0 }
 0x150   : > { %v1295_v37 = vadd.f32 %v2004_v34, %v1140_v32 }
 0x151   : > { %v1276_v38 = vpop.f32.mrf.mxu0  ;;  %v2024_v39 = vpop.f32.mrf.mxu1 }
 0x152   : > { %v1293_v41 = vadd.f32 %v1276_v38, %v1138_v36  ;;  %v1436_v42 = vadd.f32 %v2024_v39, %v1295_v37 }
 0x153   : > { %v2005_v43 = vpop.f32.mrf.mxu0  ;;  %v1417_v44 = vpop.f32.mrf.mxu1 }
 0x154   : > { %v1452_v46 = vadd.f32 %v1783_v40, %v1436_v42  ;;  %v1434_v47 = vadd.f32 %v1417_v44, %v1293_v41 }
 0x155   : > { %v1279_v48 = vpop.f32.mrf.mxu0  ;;  %v2025_v49 = vpop.f32.mrf.mxu1 }
 0x156   : > { %vm1455_vm3 = vcmp.ge.f32.partialorder %v1452_v46, 0.0  ;;  %v1458_v50 = vmul.f32 0.01, %v1452_v46  ;;  %v1294_v51 = vadd.f32 %v1279_v48, %v1139_v45  ;;  %v1450_v52 = vadd.f32 %v1783_v40, %v1434_v47 }
 0x157   : > { %v1420_v53 = vpop.f32.mrf.mxu1 }
 0x158   : > { %v1461_v54 = vsel %vm1455_vm3, %v1452_v46, %v1458_v50  ;;  %vm1453_vm4 = vcmp.ge.f32.partialorder %v1450_v52, 0.0  ;;  %v1456_v55 = vmul.f32 0.01, %v1450_v52  ;;  %v1435_v56 = vadd.f32 %v1420_v53, %v1294_v51 }
 0x159   : > { %1464 = vst [vmem:[%s274_s24 + $0x10] sm:$0xff] %v1461_v54 }
 0x15a   : > { %v1459_v57 = vsel %vm1453_vm4, %v1450_v52, %v1456_v55  ;;  %v1451_v58 = vadd.f32 %v1783_v40, %v1435_v56 }
 0x15b   : > { %1462 = vst [vmem:[%s274_s24] sm:$0xff] %v1459_v57 }
 0x15c   : > { %vm1454_vm5 = vcmp.ge.f32.partialorder %v1451_v58, 0.0  ;;  %v1457_v59 = vmul.f32 0.01, %v1451_v58 }
 0x15e   : > { %v1460_v60 = vsel %vm1454_vm5, %v1451_v58, %v1457_v59 }
 0x15f   : > { %1463 = vst [vmem:[%s274_s24 + $0x8] sm:$0xff] %v1460_v60 }
 0x160 PF: > { %s14_s19 = sadd.s32 1, %s2187_s19   ;;  %s2523_s15 = smov %s2179_s17 }
 0x161   : > { %p11_p9 = scmp.ge.s32.totalorder %s14_s19, 10   ;;  %s2524_s16 = smov %s2183_s18 }
 0x162   : > { %s2525_s17 = smov %s2528_s20  ;;  %s2526_s18 = smov %s2532_s21 }
 0x163   :  { %13 = sbr.rel (!%p11_p9) target bundleno = 3 (0x3), region = 76 }

// kernel: featnet_forward.8
= control target key start
LH: loop header
LB: loop body
LE: loop exit
PB: predicated region body
PF: predicated region fallthrough
CT: control target
= control target key end

     0   :  { %s2734_s15 = smov 0   ;;  %s2736_s16 = smov 0   ;;  %s3210_s0 = inlined_call_operand.vmem [shape: bf16[2,3,16,256], index: 0, kind: input, shape index: {}, may-alias: {0,1}]   ;;  %s3211_s1 = inlined_call_operand.vmem [shape: bf16[2,3,16,256], index: 1, kind: input, shape index: {}, may-alias: {0,1}]   ;;  %s3212_s2 = inlined_call_operand.vmem [shape: bf16[8,256,128], index: 2, kind: input, shape index: {}]   ;;  %s3213_s3 = inlined_call_operand.vmem [shape: f32[1,128], index: 3, kind: input, shape index: {}]   ;;  %s3214_s4 = inlined_call_operand.vmem [shape: f32[2,2,8,128], index: 4, kind: output, shape index: {}]  }
   0x1   :  { %s2738_s17 = smov 0   ;;  %s2740_s18 = smov 0  }
   0x2   :  { %s2742_s19 = smov 0  }
   0x3 LB: > { %s23_s20 = sadd.s32 1, %s2699_s17  ;;  %s26_s21 = sadd.s32 1, %s2703_s18  ;;  %s2707_s19 = sphi %s2742_s19, %s14_s19   ;;  %s2703_s18 = sphi %s2740_s18, %s3218_s18   ;;  %s2699_s17 = sphi %s2738_s17, %s3217_s17   ;;  %s2695_s16 = sphi %s2736_s16, %s3216_s16   ;;  %s2691_s15 = sphi %s2734_s15, %s3215_s15  }
   0x4   : > { %p24_p0 = scmp.ge.s32.totalorder %s23_s20, 2  ;;  %p1926_p1 = scmp.ge.s32.totalorder %s2707_s19, 1 }
   0x5   : > { %p202_p2 = scmp.lt.s32.totalorder %s2707_s19, 5 }
   0x6   : > { %s3220_s20 = smov (%p24_p0, %s23_s20), 0  ;;  %s3222_s21 = smov (!%p24_p0, %s26_s21), %s2703_s18 }
   0x7   : > { %p203_p3 = pnand %p1926_p1, %p202_p2  ;;  %p28_p4 = scmp.ge.s32.totalorder %s3222_s21, 2 }
   0x8   : > { %p245_p5 = scmp.lt.s32.totalorder (!%p203_p3), %s2695_s16, 1  ;;  %p247_p6 = scmp.lt.s32.totalorder (!%p203_p3), %s2691_s15, 2 }
   0x9   : > { %s3224_s21 = smov (%p28_p4, %s3222_s21), 0  ;;  %206 = sbr.rel (%p203_p3) target bundleno = 350 (0x15e), region = 36 }
   0xa   : > { %s254_s30 = sadd.s32 (!%p203_p3), 1, %s2691_s15  ;;  %p267_p8 = scmp.lt.s32.totalorder (!%p203_p3), %s2691_s15, 1 }
   0xb   : > { %p257_p7 = scmp.lt.s32.totalorder (!%p203_p3), %s254_s30, 2 }
   0xe   : > { %v2521_v0 = vld [vmem:[%s3212_s2 + $0x78] sm:$0xff]   ;;  %v2523_v2 = vld [vmem:[%s3212_s2 + $0x70] sm:$0xff]   ;;  %v2527_v6 = vld [vmem:[%s3212_s2 + $0x68] sm:$0xff]   ;;  %s3226_s16 = smov (!%p245_p5, %s2695_s16), 1  ;;  %s3228_s30 = smov (!%p257_p7, %s254_s30), 2 }
   0xf   : > { %v2522_v1 = vld [vmem:[%s3212_s2 + $0x38] sm:$0xff]   ;;  %2304 = vmatprep.subr.bf16.mxu0 %v2521_v0  ;;  %v2525_v4 = vld [vmem:[%s3212_s2 + $0x30] sm:$0xff]   ;;  %v2529_v8 = vld [vmem:[%s3212_s2 + $0x28] sm:$0xff]   ;;  %s248_s7 = scalar_select %p247_p6, %s2691_s15, 2 }
  0x10   : > { %2305 = vmatpush3.bf16.msra.mxu0 %v2522_v1  ;;  %v2524_v3 = vld [vmem:[%s3212_s2 + $0xf8] sm:$0xff]   ;;  %v2528_v7 = vld [vmem:[%s3212_s2 + $0xf0] sm:$0xff]   ;;  %v2531_v10 = vld [vmem:[%s3212_s2 + $0x60] sm:$0xff]   ;;  %s2480_s14 = smul.u32 12, %s3226_s16  ;;  %s1929_s10 = sshll.u32 %s3228_s30, 2 }
  0x11   : > { %2306 = vmatprep.subr.bf16.mxu0 %v2523_v2  ;;  %2326 = vmatprep.subr.bf16.mxu1 %v2524_v3  ;;  %v2526_v5 = vld [vmem:[%s3212_s2 + $0xb8] sm:$0xff]   ;;  %v2530_v9 = vld [vmem:[%s3212_s2 + $0xb0] sm:$0xff]   ;;  %v2532_v11 = vld [vmem:[%s3212_s2 + $0xe8] sm:$0xff]   ;;  %s1927_s24 = sshll.u32 %s248_s7, 2  ;;  %s3230_s15 = smov (!%p267_p8, %s2691_s15), 1 }
  0x12   : > { %2327 = vmatpush3.bf16.msra.mxu1 %v2526_v5  ;;  %v2533_v12 = vld [vmem:[%s3212_s2 + $0x20] sm:$0xff]   ;;  %v2534_v13 = vld [vmem:[%s3212_s2 + $0xa8] sm:$0xff]   ;;  %v2535_v14 = vld [vmem:[%s3212_s2 + $0x58] sm:$0xff]   ;;  %s251_s5 = sadd.s32 %s2480_s14, %s1927_s24  ;;  %s261_s25 = sadd.s32 %s2480_s14, %s1929_s10 }
  0x13   : > { %2328 = vmatprep.subr.bf16.mxu1 %v2528_v7  ;;  %v2536_v15 = vld [vmem:[%s3212_s2 + $0xe0] sm:$0xff]   ;;  %v2537_v16 = vld [vmem:[%s3212_s2 + $0x18] sm:$0xff]   ;;  %v2539_v18 = vld [vmem:[%s3212_s2 + $0x50] sm:$0xff]   ;;  %s1928_s12 = sshll.u32 %s251_s5, 2  ;;  %s1930_s6 = sshll.u32 %s261_s25, 2 }
  0x14   : > { %2307 = vmatpush3.bf16.msra.mxu0 %v2525_v4  ;;  %v2538_v17 = vld [vmem:[%s3212_s2 + $0xa0] sm:$0xff]   ;;  %v2540_v19 = vld [vmem:[%s3212_s2 + $0xd8] sm:$0xff]   ;;  %v2541_v20 = vld [vmem:[%s3212_s2 + $0x10] sm:$0xff]   ;;  %s2864_s29 = scalar_lea.vmem %s3210_s0, %s1928_s12  ;;  %s3067_s22 = scalar_lea.vmem %s3211_s1, %s1930_s6 }
  0x15   : > { %2308 = vmatprep.subr.bf16.mxu0 %v2527_v6  ;;  %v2542_v21 = vld [vmem:[%s3212_s2 + $0x98] sm:$0xff]   ;;  %v2543_v22 = vld [vmem:[%s3212_s2 + $0x48] sm:$0xff]   ;;  %v2544_v23 = vld [vmem:[%s3212_s2 + $0xd0] sm:$0xff]  }
  0x16   : > { %2329 = vmatpush3.bf16.msra.mxu1 %v2530_v9  ;;  %v2545_v24 = vld [vmem:[%s3212_s2 + $0x8] sm:$0xff]   ;;  %v2546_v25 = vld [vmem:[%s3212_s2 + $0x90] sm:$0xff]   ;;  %v2547_v26 = vld [vmem:[%s3212_s2 + $0x40] sm:$0xff]  }
  0x17   : > { %2330 = vmatprep.subr.bf16.mxu1 %v2532_v11  ;;  %v2548_v27 = vld [vmem:[%s3212_s2 + $0xc8] sm:$0xff]   ;;  %v2549_v28 = vld [vmem:[%s3212_s2] sm:$0xff]   ;;  %v2554_v34 = vld [vmem:[%s3212_s2 + $0x178] sm:$0xff]  }
  0x18   : > { %2309 = vmatpush3.bf16.msra.mxu0 %v2529_v8  ;;  %v2550_v29 = vld [vmem:[%s3212_s2 + $0x88] sm:$0xff]   ;;  %v274_v30 = vld [vmem:[%s2864_s29] sm:$0xff]  ;;  %v2556_v36 = vld [vmem:[%s3212_s2 + $0x138] sm:$0xff]  }
  0x19   : > { %2310 = vmatprep.subr.bf16.mxu0 %v2531_v10  ;;  %v1933_v31 = vcombine.low %v274_v30, %v274_v30  ;;  %v1934_v32 = vcombine.high %v274_v30, %v274_v30  ;;  %v2553_v33 = vld [vmem:[%s3212_s2 + $0xc0] sm:$0xff]   ;;  %v452_v37 = vld [vmem:[%s2864_s29 + $0x8] sm:$0x11]  ;;  %v2559_v40 = vld [vmem:[%s3212_s2 + $0x170] sm:$0xff]  }
  0x1a   : > { %2331 = vmatpush3.bf16.msra.mxu1 %v2534_v13  ;;  %v2555_v35 = vld [vmem:[%s3212_s2 + $0x80] sm:$0xff]   ;;  %v1983_v38 = vcombine.low %v274_v30, %v452_v37  ;;  %v1984_v39 = vcombine.high %v274_v30, %v452_v37  ;;  %v2560_v41 = vld [vmem:[%s3212_s2 + $0x1f8] sm:$0xff]   ;;  %v2561_v46 = vld [vmem:[%s3212_s2 + $0x130] sm:$0xff]  }
  0x1b   : > { %2332 = vmatprep.subr.bf16.mxu1 %v2536_v15  ;;  %442 = vmatprep.mubr.bf16.mxu0 %v1934_v32  ;;  %v2562_v49 = vld [vmem:[%s3212_s2 + $0x1b8] sm:$0xff]   ;;  %v2563_v50 = vld [vmem:[%s3212_s2 + $0x168] sm:$0xff]   ;;  %v2564_v53 = vld [vmem:[%s3212_s2 + $0x1f0] sm:$0xff]  }
  0x1c   : > { %2311 = vmatpush3.bf16.msra.mxu0 %v2533_v12  ;;  %v502_v42 = vshrl.u32 %v1984_v39, 16  ;;  %v504_v43 = vshll.u32 %v1984_v39, 16  ;;  %v495_v44 = vshrl.u32 %v1983_v38, 16  ;;  %v497_v45 = vshll.u32 %v1983_v38, 16  ;;  %v2565_v54 = vld [vmem:[%s3212_s2 + $0x128] sm:$0xff]   ;;  %v2566_v55 = vld [vmem:[%s3212_s2 + $0x1b0] sm:$0xff]  }
  0x1d   : > { %2312 = vmatprep.subr.bf16.mxu0 %v2535_v14  ;;  %v2567_v56 = vld [vmem:[%s3212_s2 + $0x160] sm:$0xff]   ;;  %v2568_v57 = vld [vmem:[%s3212_s2 + $0x1e8] sm:$0xff]   ;;  %v2571_v60 = vld [vmem:[%s3212_s2 + $0x158] sm:$0xff]  }
  0x1e   : > { %2333 = vmatpush3.bf16.msra.mxu1 %v2538_v17  ;;  %v506_v47 = vrot.slane %v504_v43, 1  ;;  %v499_v48 = vrot.slane %v497_v45, 1  ;;  %v2569_v58 = vld [vmem:[%s3212_s2 + $0x120] sm:$0xff]   ;;  %v2570_v59 = vld [vmem:[%s3212_s2 + $0x1a8] sm:$0xff]   ;;  %v2573_v62 = vld [vmem:[%s3212_s2 + $0x118] sm:$0xff]  }
  0x1f   : > { %2334 = vmatprep.subr.bf16.mxu1 %v2540_v19  ;;  %v2572_v61 = vld [vmem:[%s3212_s2 + $0x1e0] sm:$0xff]   ;;  %v2575_v0 = vld [vmem:[%s3212_s2 + $0x150] sm:$0xff]   ;;  %v2576_v1 = vld [vmem:[%s3212_s2 + $0x1d8] sm:$0xff]  }
  0x20   : > { %2313 = vmatpush3.bf16.msra.mxu0 %v2537_v16  ;;  %v507_v51 = vor.u32 %v506_v47, %v502_v42  ;;  %v500_v52 = vor.u32 %v499_v48, %v495_v44  ;;  %v2574_v63 = vld [vmem:[%s3212_s2 + $0x1a0] sm:$0xff]   ;;  %v2577_v2 = vld [vmem:[%s3212_s2 + $0x110] sm:$0xff]   ;;  %v2578_v3 = vld [vmem:[%s3212_s2 + $0x198] sm:$0xff]  }
  0x21   : > { %2314 = vmatprep.subr.bf16.mxu0 %v2539_v18  ;;  %v2579_v4 = vld [vmem:[%s3212_s2 + $0x148] sm:$0xff]   ;;  %v2580_v5 = vld [vmem:[%s3212_s2 + $0x1d0] sm:$0xff]   ;;  %v2583_v8 = vld [vmem:[%s3212_s2 + $0x140] sm:$0xff]  }
  0x22   : > { %2335 = vmatpush3.bf16.msra.mxu1 %v2542_v21  ;;  %638 = vmatprep.mubr.bf16.mxu1 %v507_v51  ;;  %v2581_v6 = vld [vmem:[%s3212_s2 + $0x108] sm:$0xff]   ;;  %v2582_v7 = vld [vmem:[%s3212_s2 + $0x190] sm:$0xff]   ;;  %v2585_v10 = vld [vmem:[%s3212_s2 + $0x100] sm:$0xff]  }
  0x23   : > { %2336 = vmatprep.subr.bf16.mxu1 %v2544_v23  ;;  %v2584_v9 = vld [vmem:[%s3212_s2 + $0x1c8] sm:$0xff]   ;;  %v2590_v14 = vld [vmem:[%s3212_s2 + $0x1c0] sm:$0xff]   ;;  %v2591_v19 = vld [vmem:[%s3212_s2 + $0x278] sm:$0xff]  }
  0x24   : > { %2315 = vmatpush3.bf16.msra.mxu0 %v2541_v20  ;;  %v2586_v11 = vld [vmem:[%s3212_s2 + $0x188] sm:$0xff]   ;;  %v2597_v30 = vld [vmem:[%s3212_s2 + $0x270] sm:$0xff]   ;;  %v2607_v42 = vld [vmem:[%s3212_s2 + $0x220] sm:$0xff]  }
  0x25   : > { %2316 = vmatprep.subr.bf16.mxu0 %v2543_v22  ;;  %v2587_v12 = vld [vmem:[%s2864_s29] ss:$8 sps:$4 sm:$0x3e]   ;;  %v2589_v13 = vld [vmem:[%s2864_s29 + $0x4] ss:$8 sps:$4 sm:$0x3e]  }
  0x26   : > { %2337 = vmatpush3.bf16.msra.mxu1 %v2546_v25  ;;  %v701_v15 = vshrl.u32 %v2589_v13, 16  ;;  %v704_v16 = vshll.u32 %v2589_v13, 16  ;;  %v693_v17 = vshrl.u32 %v2587_v12, 16  ;;  %v696_v18 = vshll.u32 %v2587_v12, 16  ;;  %v2602_v37 = vld [vmem:[%s3212_s2 + $0x2f0] sm:$0xff]   ;;  %v2603_v38 = vld [vmem:[%s3212_s2 + $0x228] sm:$0xff]  }
  0x27   : > { %2338 = vmatprep.subr.bf16.mxu1 %v2548_v27  ;;  %v2593_v27 = vld [vmem:[%s3212_s2 + $0x238] sm:$0xff]   ;;  %v2604_v39 = vld [vmem:[%s3212_s2 + $0x2b0] sm:$0xff]   ;;  %v2608_v43 = vld [vmem:[%s3212_s2 + $0x2a8] sm:$0xff]  }
  0x28   : > { %2317 = vmatpush3.bf16.msra.mxu0 %v2545_v24  ;;  %v703_v20 = vrot.slane %v701_v15, 1  ;;  %v706_v21 = vrot.slane %v704_v16, 2  ;;  %v695_v22 = vrot.slane %v693_v17, 1  ;;  %v698_v23 = vrot.slane %v696_v18, 2  ;;  %v2592_v24 = vld [vmem:[%s3212_s2 + $0x180] sm:$0xff]   ;;  %v2609_v44 = vld [vmem:[%s3212_s2 + $0x258] sm:$0xff]  }
  0x29   : > { %2318 = vmatprep.subr.bf16.mxu0 %v2547_v26  ;;  %v2610_v45 = vld [vmem:[%s3212_s2 + $0x2e0] sm:$0xff]   ;;  %v2613_v48 = vld [vmem:[%s3212_s2 + $0x250] sm:$0xff]   ;;  %v2616_v51 = vld [vmem:[%s3212_s2 + $0x298] sm:$0xff]  }
  0x2a   : > { %2339 = vmatpush3.bf16.msra.mxu1 %v2550_v29  ;;  %v707_v25 = vor.u32 %v706_v21, %v703_v20  ;;  %v699_v26 = vor.u32 %v698_v23, %v695_v22  ;;  %v2596_v29 = vld [vmem:[%s2864_s29 + $0x4] ss:$8 sps:$4 sm:$0x3c]   ;;  %v2635_v12 = vld [vmem:[%s3212_s2 + $0x330] sm:$0xff]   ;;  %v2636_v15 = vld [vmem:[%s3212_s2 + $0x3b8] sm:$0xff]  }
  0x2b   : > { %2340 = vmatprep.subr.bf16.mxu1 %v2553_v33  ;;  %v893_v32 = vrot.slane %v2596_v29, 2  ;;  %v2598_v33 = vld [vmem:[%s3212_s2 + $0x2f8] sm:$0xff]   ;;  %v2612_v47 = vld [vmem:[%s3212_s2 + $0x2a0] sm:$0xff]   ;;  %v2637_v16 = vld [vmem:[%s3212_s2 + $0x368] sm:$0xff]  }
  0x2c   : > { %2319 = vmatpush3.bf16.msra.mxu0 %v2549_v28  ;;  %v2594_v28 = vld [vmem:[%s2864_s29] ss:$8 sps:$4 sm:$0x3c]   ;;  %v2640_v21 = vld [vmem:[%s3212_s2 + $0x3b0] sm:$0xff]  }
  0x2d   : > { %2348 = vmatprep.subr.bf16.mxu0 %v2554_v34  ;;  %v2599_v34 = vld [vmem:[%s3212_s2 + $0x230] sm:$0xff]   ;;  %v2639_v20 = vld [vmem:[%s3212_s2 + $0x328] sm:$0xff]   ;;  %v2641_v22 = vld [vmem:[%s3212_s2 + $0x360] sm:$0xff]  }
  0x2e   : > { %2341 = vmatpush3.bf16.msra.mxu1 %v2555_v35  ;;  %v2600_v35 = vld [vmem:[%s3212_s2 + $0x2b8] sm:$0xff]   ;;  %v2642_v23 = vld [vmem:[%s3212_s2 + $0x3e8] sm:$0xff]   ;;  %v2648_v29 = vld [vmem:[%s3212_s2 + $0x3a0] sm:$0xff]  }
  0x2f   : > { %443 = vmatmul.mubr.bf16.vlgmr.msra.gmra.mxu0 %v1933_v31  ;;  %2370 = vmatprep.subr.bf16.mxu1 %v2560_v41  ;;  %v892_v31 = vrot.slane %v2594_v28, 2  ;;  %v2606_v41 = vld [vmem:[%s3212_s2 + $0x2e8] sm:$0xff]   ;;  %v2647_v28 = vld [vmem:[%s3212_s2 + $0x318] sm:$0xff]  }
  0x30   : > { %2349 = vmatpush3.bf16.msra.mxu0 %v2556_v36  ;;  %838 = vmatprep.mubr.bf16.mxu0 %v707_v25  ;;  %v2601_v36 = vld [vmem:[%s3212_s2 + $0x268] sm:$0xff]  }
  0x31   : > { %2350 = vmatprep.subr.bf16.mxu0 %v2559_v40  ;;  %639 = vmatmul.mubr.bf16.vlgmr.msra.gmra.mxu1 %v500_v52  ;;  %v2605_v40 = vld [vmem:[%s3212_s2 + $0x260] sm:$0xff]   ;;  %v2617_v52 = vld [vmem:[%s3212_s2 + $0x248] sm:$0xff]  }
  0x32   : > { %2371 = vmatpush3.bf16.msra.mxu1 %v2562_v49  ;;  %1024 = vmatprep.mubr.bf16.mxu1 %v893_v32  ;;  %v2614_v49 = vld [vmem:[%s3212_s2 + $0x2d8] sm:$0xff]   ;;  %v2644_v25 = vld [vmem:[%s3212_s2 + $0x3a8] sm:$0xff]   ;;  %v2651_v32 = vld [vmem:[%s3212_s2 + $0x310] sm:$0xff]  }
  0x33   : > { %2372 = vmatprep.subr.bf16.mxu1 %v2564_v53  ;;  %v2618_v53 = vld [vmem:[%s3212_s2 + $0x2d0] sm:$0xff]  }
  0x34   : > { %2351 = vmatpush3.bf16.msra.mxu0 %v2561_v46  ;;  %v2611_v46 = vld [vmem:[%s3212_s2 + $0x218] sm:$0xff]  }
  0x35   : > { %2352 = vmatprep.subr.bf16.mxu0 %v2563_v50  ;;  %v2615_v50 = vld [vmem:[%s3212_s2 + $0x210] sm:$0xff]  }
  0x36   : > { %2373 = vmatpush3.bf16.msra.mxu1 %v2566_v55  ;;  %v2620_v55 = vld [vmem:[%s3212_s2 + $0x290] sm:$0xff]  }
  0x37   : > { %2374 = vmatprep.subr.bf16.mxu1 %v2568_v57  ;;  %v2622_v57 = vld [vmem:[%s3212_s2 + $0x2c8] sm:$0xff]  }
  0x38   : > { %2353 = vmatpush3.bf16.msra.mxu0 %v2565_v54  ;;  %v2619_v54 = vld [vmem:[%s3212_s2 + $0x208] sm:$0xff]  }
  0x39   : > { %2354 = vmatprep.subr.bf16.mxu0 %v2567_v56  ;;  %v2621_v56 = vld [vmem:[%s3212_s2 + $0x240] sm:$0xff]  }
  0x3a   : > { %2375 = vmatpush3.bf16.msra.mxu1 %v2570_v59  ;;  %v2624_v59 = vld [vmem:[%s3212_s2 + $0x288] sm:$0xff]  }
  0x3b   : > { %2376 = vmatprep.subr.bf16.mxu1 %v2572_v61 }
  0x3c   : > { %2355 = vmatpush3.bf16.msra.mxu0 %v2569_v58  ;;  %v2623_v58 = vld [vmem:[%s3212_s2 + $0x200] sm:$0xff]  }
  0x3d   : > { %2356 = vmatprep.subr.bf16.mxu0 %v2571_v60  ;;  %v1035_v60 = vld [vmem:[%s3067_s22] sm:$0xff] }
  0x3e   : > { %2377 = vmatpush3.bf16.msra.mxu1 %v2574_v63  ;;  %v2133_v61 = vcombine.low %v1035_v60, %v1035_v60  ;;  %v2627_v63 = vld [vmem:[%s3212_s2 + $0x2c0] sm:$0xff]  }
  0x3f   : > { %2378 = vmatprep.subr.bf16.mxu1 %v2576_v1  ;;  %v2629_v1 = vld [vmem:[%s3212_s2 + $0x280] sm:$0xff]  }
  0x40   : > { %2357 = vmatpush3.bf16.msra.mxu0 %v2573_v62  ;;  %v2134_v62 = vcombine.high %v1035_v60, %v1035_v60 }
  0x41   : > { %2358 = vmatprep.subr.bf16.mxu0 %v2575_v0  ;;  %v2628_v0 = vld [vmem:[%s3212_s2 + $0x378] sm:$0xff]  }
  0x42   : > { %2379 = vmatpush3.bf16.msra.mxu1 %v2578_v3  ;;  %v1216_v3 = vld [vmem:[%s3067_s22 + $0x8] sm:$0x11] }
  0x43   : > { %2380 = vmatprep.subr.bf16.mxu1 %v2580_v5  ;;  %v2184_v5 = vcombine.high %v1035_v60, %v1216_v3 }
  0x44   : > { %2359 = vmatpush3.bf16.msra.mxu0 %v2577_v2  ;;  %v2630_v2 = vld [vmem:[%s3212_s2 + $0x338] sm:$0xff]  }
  0x45   : > { %2360 = vmatprep.subr.bf16.mxu0 %v2579_v4  ;;  %v2183_v4 = vcombine.low %v1035_v60, %v1216_v3 }
  0x46   : > { %2381 = vmatpush3.bf16.msra.mxu1 %v2582_v7  ;;  %v2634_v7 = vld [vmem:[%s3212_s2 + $0x3f8] sm:$0xff]  }
  0x47   : > { %2382 = vmatprep.subr.bf16.mxu1 %v2584_v9  ;;  %v1268_v9 = vshll.u32 %v2184_v5, 16 }
  0x48   : > { %2361 = vmatpush3.bf16.msra.mxu0 %v2581_v6  ;;  %v2633_v6 = vld [vmem:[%s3212_s2 + $0x370] sm:$0xff]  }
  0x49   : > { %2362 = vmatprep.subr.bf16.mxu0 %v2583_v8  ;;  %v1266_v8 = vshrl.u32 %v2184_v5, 16  ;;  %v1270_v13 = vrot.slane %v1268_v9, 1 }
  0x4a   : > { %2383 = vmatpush3.bf16.msra.mxu1 %v2586_v11  ;;  %v1261_v11 = vshll.u32 %v2183_v4, 16 }
  0x4b   : > { %2384 = vmatprep.subr.bf16.mxu1 %v2590_v14  ;;  %v1271_v17 = vor.u32 %v1270_v13, %v1266_v8 }
  0x4c   : > { %2363 = vmatpush3.bf16.msra.mxu0 %v2585_v10  ;;  %v1259_v10 = vshrl.u32 %v2183_v4, 16  ;;  %v1263_v14 = vrot.slane %v1261_v11, 1 }
  0x4d   : > { %2392 = vmatprep.subr.bf16.mxu0 %v2591_v19  ;;  %v2638_v19 = vld [vmem:[%s3212_s2 + $0x3f0] sm:$0xff]  }
  0x4e   : > { %2385 = vmatpush3.bf16.msra.mxu1 %v2592_v24  ;;  %v1264_v18 = vor.u32 %v1263_v14, %v1259_v10  ;;  %v2643_v24 = vld [vmem:[%s3212_s2 + $0x320] sm:$0xff]  }
  0x4f   : > { %839 = vmatmul.mubr.bf16.vlgmr.msra.gmra.mxu0 %v699_v26  ;;  %2414 = vmatprep.subr.bf16.mxu1 %v2598_v33  ;;  %v2645_v26 = vld [vmem:[%s3212_s2 + $0x358] sm:$0xff]  }
  0x50   : > { %2393 = vmatpush3.bf16.msra.mxu0 %v2593_v27  ;;  %1204 = vmatprep.mubr.bf16.mxu0 %v2134_v62  ;;  %v2646_v27 = vld [vmem:[%s3212_s2 + $0x3e0] sm:$0xff]   ;;  %v2652_v33 = vld [vmem:[%s3212_s2 + $0x398] sm:$0xff]  }
  0x51   : > { %2394 = vmatprep.subr.bf16.mxu0 %v2597_v30  ;;  %1025 = vmatmul.mubr.bf16.vlgmr.msra.gmra.mxu1 %v892_v31  ;;  %v2649_v30 = vld [vmem:[%s3212_s2 + $0x350] sm:$0xff]   ;;  %v2650_v31 = vld [vmem:[%s3212_s2 + $0x3d8] sm:$0xff]  }
  0x52   : > { %2415 = vmatpush3.bf16.msra.mxu1 %v2600_v35  ;;  %1402 = vmatprep.mubr.bf16.mxu1 %v1271_v17  ;;  %v2654_v35 = vld [vmem:[%s3212_s2 + $0x3d0] sm:$0xff]  }
  0x53   : > { %2416 = vmatprep.subr.bf16.mxu1 %v2602_v37  ;;  %v2656_v37 = vld [vmem:[%s3212_s2 + $0x390] sm:$0xff]  }
  0x54   : > { %2395 = vmatpush3.bf16.msra.mxu0 %v2599_v34  ;;  %v2653_v34 = vld [vmem:[%s3212_s2 + $0x348] sm:$0xff]  }
  0x55   : > { %2396 = vmatprep.subr.bf16.mxu0 %v2601_v36  ;;  %v2655_v36 = vld [vmem:[%s3212_s2 + $0x308] sm:$0xff]  }
  0x56   : > { %2417 = vmatpush3.bf16.msra.mxu1 %v2604_v39  ;;  %v2658_v39 = vld [vmem:[%s3212_s2 + $0x3c8] sm:$0xff]  }
  0x57   : > { %2418 = vmatprep.subr.bf16.mxu1 %v2606_v41  ;;  %v2660_v41 = vld [vmem:[%s3212_s2 + $0x388] sm:$0xff]  }
  0x58   : > { %2397 = vmatpush3.bf16.msra.mxu0 %v2603_v38  ;;  %v2657_v38 = vld [vmem:[%s3212_s2 + $0x340] sm:$0xff]  }
  0x59   : > { %2398 = vmatprep.subr.bf16.mxu0 %v2605_v40  ;;  %v2659_v40 = vld [vmem:[%s3212_s2 + $0x300] sm:$0xff]  }
  0x5a   : > { %2419 = vmatpush3.bf16.msra.mxu1 %v2608_v43  ;;  %v2663_v43 = vld [vmem:[%s3067_s22 + $0x4] ss:$8 sps:$4 sm:$0x3e]  }
  0x5b   : > { %2420 = vmatprep.subr.bf16.mxu1 %v2610_v45 }
  0x5c   : > { %2399 = vmatpush3.bf16.msra.mxu0 %v2607_v42  ;;  %v2661_v42 = vld [vmem:[%s3067_s22] ss:$8 sps:$4 sm:$0x3e]  }
  0x5d   : > { %2400 = vmatprep.subr.bf16.mxu0 %v2609_v44  ;;  %v2664_v44 = vld [vmem:[%s3212_s2 + $0x3c0] sm:$0xff]   ;;  %v1457_v45 = vshrl.u32 %v2661_v42, 16 }
  0x5e   : > { %2421 = vmatpush3.bf16.msra.mxu1 %v2612_v47  ;;  %v1465_v47 = vshrl.u32 %v2663_v43, 16 }
  0x5f   : > { %2422 = vmatprep.subr.bf16.mxu1 %v2614_v49  ;;  %v1459_v49 = vrot.slane %v1457_v45, 1 }
  0x60   : > { %2401 = vmatpush3.bf16.msra.mxu0 %v2611_v46  ;;  %v1460_v46 = vshll.u32 %v2661_v42, 16 }
  0x61   : > { %2402 = vmatprep.subr.bf16.mxu0 %v2613_v48  ;;  %v1468_v48 = vshll.u32 %v2663_v43, 16 }
  0x62   : > { %2423 = vmatpush3.bf16.msra.mxu1 %v2616_v51  ;;  %v1467_v51 = vrot.slane %v1465_v47, 1 }
  0x63   : > { %2424 = vmatprep.subr.bf16.mxu1 %v2618_v53  ;;  %v2665_v53 = vld [vmem:[%s3212_s2 + $0x380] sm:$0xff]  }
  0x64   : > { %2403 = vmatpush3.bf16.msra.mxu0 %v2615_v50  ;;  %v1462_v50 = vrot.slane %v1460_v46, 2 }
  0x65   : > { %2404 = vmatprep.subr.bf16.mxu0 %v2617_v52  ;;  %v1470_v52 = vrot.slane %v1468_v48, 2 }
  0x66   : > { %2425 = vmatpush3.bf16.msra.mxu1 %v2620_v55  ;;  %v1463_v55 = vor.u32 %v1462_v50, %v1459_v49 }
  0x67   : > { %2426 = vmatprep.subr.bf16.mxu1 %v2622_v57  ;;  %v1471_v57 = vor.u32 %v1470_v52, %v1467_v51 }
  0x68   : > { %2405 = vmatpush3.bf16.msra.mxu0 %v2619_v54  ;;  %v2666_v54 = vld [vmem:[%s3067_s22] ss:$8 sps:$4 sm:$0x3c]  }
  0x69   : > { %2406 = vmatprep.subr.bf16.mxu0 %v2621_v56  ;;  %v2668_v56 = vld [vmem:[%s3067_s22 + $0x4] ss:$8 sps:$4 sm:$0x3c]   ;;  %s1931_s22 = sshll.u32 %s3226_s16, 1 }
  0x6a   : > { %2427 = vmatpush3.bf16.msra.mxu1 %v2624_v59  ;;  %v1657_v59 = vrot.slane %v2668_v56, 2  ;;  %s270_s25 = sadd.s32 %s1931_s22, %s3230_s15 }
  0x6b   : > { %2428 = vmatprep.subr.bf16.mxu1 %v2627_v63  ;;  %s1932_s26 = sshll.u32 %s270_s25, 3 }
  0x6c   : > { %2407 = vmatpush3.bf16.msra.mxu0 %v2623_v58  ;;  %v1656_v58 = vrot.slane %v2666_v54, 2  ;;  %s272_s28 = scalar_lea.vmem %s3214_s4, %s1932_s26 }
  0x6d   : > { %2436 = vmatprep.subr.bf16.mxu0 %v2628_v0 }
  0x6e   : > { %2429 = vmatpush3.bf16.msra.mxu1 %v2629_v1 }
  0x6f   : > { %1205 = vmatmul.mubr.bf16.vlgmr.msra.gmra.mxu0 %v2133_v61  ;;  %2458 = vmatprep.subr.bf16.mxu1 %v2634_v7 }
  0x70   : > { %2437 = vmatpush3.bf16.msra.mxu0 %v2630_v2  ;;  %1602 = vmatprep.mubr.bf16.mxu0 %v1471_v57 }
  0x71   : > { %2438 = vmatprep.subr.bf16.mxu0 %v2633_v6  ;;  %1403 = vmatmul.mubr.bf16.vlgmr.msra.gmra.mxu1 %v1264_v18 }
  0x72   : > { %2459 = vmatpush3.bf16.msra.mxu1 %v2636_v15  ;;  %1788 = vmatprep.mubr.bf16.mxu1 %v1657_v59 }
  0x73   : > { %2460 = vmatprep.subr.bf16.mxu1 %v2638_v19 }
  0x74   : > { %2439 = vmatpush3.bf16.msra.mxu0 %v2635_v12 }
  0x75   : > { %2440 = vmatprep.subr.bf16.mxu0 %v2637_v16 }
  0x76   : > { %2461 = vmatpush3.bf16.msra.mxu1 %v2640_v21 }
  0x77   : > { %2462 = vmatprep.subr.bf16.mxu1 %v2642_v23 }
  0x78   : > { %2441 = vmatpush3.bf16.msra.mxu0 %v2639_v20 }
  0x79   : > { %2442 = vmatprep.subr.bf16.mxu0 %v2641_v22 }
  0x7a   : > { %2463 = vmatpush3.bf16.msra.mxu1 %v2644_v25 }
  0x7b   : > { %2464 = vmatprep.subr.bf16.mxu1 %v2646_v27 }
  0x7c   : > { %2443 = vmatpush3.bf16.msra.mxu0 %v2643_v24 }
  0x7d   : > { %2444 = vmatprep.subr.bf16.mxu0 %v2645_v26 }
  0x7e   : > { %2465 = vmatpush3.bf16.msra.mxu1 %v2648_v29 }
  0x7f   : > { %2466 = vmatprep.subr.bf16.mxu1 %v2650_v31 }
  0x80   : > { %2445 = vmatpush3.bf16.msra.mxu0 %v2647_v28 }
  0x81   : > { %2446 = vmatprep.subr.bf16.mxu0 %v2649_v30 }
  0x82   : > { %2467 = vmatpush3.bf16.msra.mxu1 %v2652_v33 }
  0x83   : > { %2468 = vmatprep.subr.bf16.mxu1 %v2654_v35 }
  0x84   : > { %2447 = vmatpush3.bf16.msra.mxu0 %v2651_v32 }
  0x85   : > { %2448 = vmatprep.subr.bf16.mxu0 %v2653_v34 }
  0x86   : > { %2469 = vmatpush3.bf16.msra.mxu1 %v2656_v37 }
  0x87   : > { %2470 = vmatprep.subr.bf16.mxu1 %v2658_v39 }
  0x88   : > { %2449 = vmatpush3.bf16.msra.mxu0 %v2655_v36 }
  0x89   : > { %2450 = vmatprep.subr.bf16.mxu0 %v2657_v38 }
  0x8a   : > { %2471 = vmatpush3.bf16.msra.mxu1 %v2660_v41 }
  0x8b   : > { %2472 = vmatprep.subr.bf16.mxu1 %v2664_v44 }
  0x8c   : > { %2451 = vmatpush3.bf16.msra.mxu0 %v2659_v40  ;;  %v2301_v40 = vld [vmem:[%s3213_s3] ss:$0 sm:$0xff] }
  0x8e   : > { %2473 = vmatpush3.bf16.msra.mxu1 %v2665_v53 }
  0x8f   : > { %1603 = vmatmul.mubr.bf16.vlgmr.msra.gmra.mxu0 %v1463_v55 }
  0x91   : > { %1789 = vmatmul.mubr.bf16.vlgmr.msra.gmra.mxu1 %v1656_v58 }
  0xef   : > { %v2320_v60 = vpop.f32.mrf.mxu0 }
  0xf1   : > { %v2321_v61 = vpop.f32.mrf.mxu0  ;;  %v2342_v1 = vpop.f32.mrf.mxu1 }
  0xf2   : > { %v2322_v62 = vadd.f32 %v2321_v61, %v2320_v60 }
  0xf3   : > { %v2323_v63 = vpop.f32.mrf.mxu0  ;;  %v2343_v2 = vpop.f32.mrf.mxu1 }
  0xf4   : > { %v2344_v3 = vadd.f32 %v2343_v2, %v2342_v1 }
  0xf5   : > { %v2324_v0 = vpop.f32.mrf.mxu0  ;;  %v2345_v4 = vpop.f32.mrf.mxu1 }
  0xf6   : > { %v647_v5 = vadd.f32 %v2344_v3, %v2322_v62 }
  0xf7   : > { %v2346_v6 = vpop.f32.mrf.mxu1 }
 0x10f   : > { %v2364_v7 = vpop.f32.mrf.mxu0 }
 0x111   : > { %v2365_v8 = vpop.f32.mrf.mxu0  ;;  %v2386_v10 = vpop.f32.mrf.mxu1 }
 0x112   : > { %v2366_v9 = vadd.f32 %v2365_v8, %v2364_v7 }
 0x113   : > { %v2367_v11 = vpop.f32.mrf.mxu0  ;;  %v2387_v13 = vpop.f32.mrf.mxu1 }
 0x114   : > { %v847_v12 = vadd.f32 %v2366_v9, %v647_v5  ;;  %v2388_v15 = vadd.f32 %v2387_v13, %v2386_v10 }
 0x115   : > { %v2368_v14 = vpop.f32.mrf.mxu0  ;;  %v2389_v16 = vpop.f32.mrf.mxu1 }
 0x116   : > { %v1033_v17 = vadd.f32 %v2388_v15, %v847_v12 }
 0x117   : > { %v2390_v18 = vpop.f32.mrf.mxu1 }
 0x12f   : > { %v2408_v19 = vpop.f32.mrf.mxu0 }
 0x131   : > { %v2409_v20 = vpop.f32.mrf.mxu0  ;;  %v2430_v23 = vpop.f32.mrf.mxu1 }
 0x132   : > { %v2410_v27 = vadd.f32 %v2409_v20, %v2408_v19 }
 0x133   : > { %v2411_v21 = vpop.f32.mrf.mxu0  ;;  %v2431_v24 = vpop.f32.mrf.mxu1 }
 0x134   : > { %v1213_v28 = vadd.f32 %v2410_v27, %v1033_v17  ;;  %v2432_v29 = vadd.f32 %v2431_v24, %v2430_v23 }
 0x135   : > { %v2412_v22 = vpop.f32.mrf.mxu0  ;;  %v2433_v25 = vpop.f32.mrf.mxu1 }
 0x136   : > { %v1411_v33 = vadd.f32 %v2432_v29, %v1213_v28 }
 0x137   : > { %v2434_v26 = vpop.f32.mrf.mxu1 }
 0x14f   : > { %v2452_v30 = vpop.f32.mrf.mxu0 }
 0x151   : > { %v2453_v31 = vpop.f32.mrf.mxu0  ;;  %v2474_v32 = vpop.f32.mrf.mxu1 }
 0x152   : > { %v2454_v34 = vadd.f32 %v2453_v31, %v2452_v30 }
 0x153   : > { %v2455_v35 = vpop.f32.mrf.mxu0  ;;  %v2475_v36 = vpop.f32.mrf.mxu1 }
 0x154   : > { %v1611_v37 = vadd.f32 %v2454_v34, %v1411_v33  ;;  %v2476_v38 = vadd.f32 %v2475_v36, %v2474_v32 }
 0x155   : > { %v2456_v39 = vpop.f32.mrf.mxu0  ;;  %v2477_v41 = vpop.f32.mrf.mxu1 }
 0x156   : > { %v1797_v42 = vadd.f32 %v2476_v38, %v1611_v37 }
 0x157   : > { %v2478_v43 = vpop.f32.mrf.mxu1 }
 0x158   : > { %v1807_v44 = vadd.f32 %v2301_v40, %v1797_v42 }
 0x15a   : > { %vm1808_vm0 = vcmp.ge.f32.partialorder %v1807_v44, 0.0  ;;  %v1809_v45 = vmul.f32 0.01, %v1807_v44 }
 0x15c   : > { %v1810_v46 = vsel %vm1808_vm0, %v1807_v44, %v1809_v45 }
 0x15d   : > { %1811 = vst [vmem:[%s272_s28] sm:$0xff] %v1810_v46 }
 0x15e PF: > { %s14_s19 = sadd.s32 1, %s2707_s19   ;;  %s3215_s15 = smov %s2699_s17 }
 0x15f   : > { %p11_p9 = scmp.ge.s32.totalorder %s14_s19, 6   ;;  %s3216_s16 = smov %s2703_s18 }
 0x160   : > { %s3217_s17 = smov %s3220_s20  ;;  %s3218_s18 = smov %s3224_s21 }
 0x161   :  { %13 = sbr.rel (!%p11_p9) target bundleno = 3 (0x3), region = 76 }

// kernel: featnet_forward.9
= control target key start
LH: loop header
LB: loop body
LE: loop exit
PB: predicated region body
PF: predicated region fallthrough
CT: control target
= control target key end

     0   :  { %s2871_s15 = smov 0   ;;  %s2873_s16 = smov 0   ;;  %s3492_s0 = inlined_call_operand.vmem [shape: bf16[2,4,24,64], index: 0, kind: input, shape index: {}, may-alias: {0,1}]   ;;  %s3493_s1 = inlined_call_operand.vmem [shape: bf16[2,4,24,64], index: 1, kind: input, shape index: {}, may-alias: {0,1}]   ;;  %s3494_s2 = inlined_call_operand.vmem [shape: bf16[8,64,512], index: 2, kind: input, shape index: {}]   ;;  %s3495_s3 = inlined_call_operand.vmem [shape: f32[1,512], index: 3, kind: input, shape index: {}]   ;;  %s3496_s4 = inlined_call_operand.vmem [shape: f32[2,3,16,512], index: 4, kind: output, shape index: {}]  }
   0x1   :  { %s2875_s17 = smov 0   ;;  %s2877_s18 = smov 0  }
   0x2   :  { %s2879_s19 = smov 0  }
   0x3 LB: > { %s23_s20 = sadd.s32 1, %s2835_s17  ;;  %s26_s21 = sadd.s32 1, %s2839_s18  ;;  %s2843_s19 = sphi %s2879_s19, %s14_s19   ;;  %s2839_s18 = sphi %s2877_s18, %s3504_s18   ;;  %s2835_s17 = sphi %s2875_s17, %s3503_s17   ;;  %s2831_s16 = sphi %s2873_s16, %s3502_s16   ;;  %s2827_s15 = sphi %s2871_s15, %s3501_s15  }
   0x4   : > { %p24_p0 = scmp.ge.s32.totalorder %s23_s20, 3  ;;  %p2277_p1 = scmp.ge.s32.totalorder %s2843_s19, 1 }
   0x5   : > { %p202_p2 = scmp.lt.s32.totalorder %s2843_s19, 7 }
   0x6   : > { %s3506_s20 = smov (%p24_p0, %s23_s20), 0  ;;  %s3508_s21 = smov (!%p24_p0, %s26_s21), %s2839_s18 }
   0x7   : > { %p203_p3 = pnand %p2277_p1, %p202_p2  ;;  %p28_p4 = scmp.ge.s32.totalorder %s3508_s21, 2 }
   0x9   : > { %s3510_s21 = smov (%p28_p4, %s3508_s21), 0  ;;  %206 = sbr.rel (%p203_p3) target bundleno = 352 (0x160), region = 36 }
   0xe   : > { %v2599_v0 = vld [vmem:[%s3494_s2 + $0x64] ss:$16 sps:$4 sm:$0xff]   ;;  %p246_p5 = scmp.lt.s32.totalorder %s2831_s16, 1  ;;  %v2601_v1 = vld [vmem:[%s3494_s2 + $0x6c] ss:$16 sps:$4 sm:$0xff]   ;;  %v2845_v2 = vmov 0  }
   0xf   : > { %415 = vmatprep.mubr.bf16.mxu0 %v2845_v2  ;;  %458 = vmatprep.mubr.bf16.mxu1 %v2845_v2  ;;  %p248_p6 = scmp.lt.s32.totalorder %s2827_s15, 3  ;;  %v2603_v3 = vld [vmem:[%s3494_s2 + $0x60] ss:$16 sps:$4 sm:$0xff]   ;;  %v2604_v4 = vld [vmem:[%s3494_s2 + $0x68] ss:$16 sps:$4 sm:$0xff]   ;;  %vm379_vm0 = vcmask 523264  }
  0x10   : > { %391 = vmatprep.subr.bf16.mxu0 %v2599_v0  ;;  %s3512_s16 = smov (!%p246_p5, %s2831_s16), 1  ;;  %434 = vmatprep.subr.bf16.mxu1 %v2601_v1  ;;  %v2605_v5 = vld [vmem:[%s3494_s2 + $0x44] ss:$16 sps:$4 sm:$0xff]   ;;  %v2607_v6 = vld [vmem:[%s3494_s2 + $0x4c] ss:$16 sps:$4 sm:$0xff]   ;;  %s255_s9 = sadd.s32 1, %s2827_s15 }
  0x11   : > { %s249_s6 = scalar_select %p248_p6, %s2827_s15, 3  ;;  %392 = vmatpush1.bf16.msra.mxu0 %v2603_v3  ;;  %435 = vmatpush1.bf16.msra.mxu1 %v2604_v4  ;;  %v2609_v7 = vld [vmem:[%s3494_s2 + $0x40] ss:$16 sps:$4 sm:$0xff]   ;;  %v2610_v8 = vld [vmem:[%s3494_s2 + $0x48] ss:$16 sps:$4 sm:$0xff]   ;;  %vm739_vm2 = vcmask 1045504  }
  0x12   : > { %s2555_s11 = smul.u32 12, %s3512_s16  ;;  %393 = vmatprep.subr.bf16.mxu0 %v2605_v5  ;;  %436 = vmatprep.subr.bf16.mxu1 %v2607_v6  ;;  %v2611_v9 = vld [vmem:[%s3494_s2 + $0x24] ss:$16 sps:$4 sm:$0xff]   ;;  %v2613_v10 = vld [vmem:[%s3494_s2 + $0x2c] ss:$16 sps:$4 sm:$0xff]   ;;  %p258_p7 = scmp.lt.s32.totalorder %s255_s9, 3 }
  0x13   : > { %s2554_s14 = smul.u32 3, %s249_s6  ;;  %v2615_v11 = vld [vmem:[%s3494_s2 + $0x20] ss:$16 sps:$4 sm:$0xff]   ;;  %v2616_v12 = vld [vmem:[%s3494_s2 + $0x28] ss:$16 sps:$4 sm:$0xff]   ;;  %p268_p8 = scmp.lt.s32.totalorder %s2827_s15, 2 }
  0x14   : > { %v2617_v13 = vld [vmem:[%s3494_s2 + $0x4] ss:$16 sps:$4 sm:$0xff]   ;;  %v2619_v14 = vld [vmem:[%s3494_s2 + $0xc] ss:$16 sps:$4 sm:$0xff]   ;;  %v2621_v15 = vld [vmem:[%s3494_s2] ss:$16 sps:$4 sm:$0xff]  }
  0x15   : > { %s252_s30 = sadd.s32 %s2555_s11, %s2554_s14  ;;  %394 = vmatpush1.bf16.msra.mxu0 %v2609_v7  ;;  %437 = vmatpush1.bf16.msra.mxu1 %v2610_v8  ;;  %v2622_v16 = vld [vmem:[%s3494_s2 + $0x8] ss:$16 sps:$4 sm:$0xff]   ;;  %v2626_v17 = vld [vmem:[%s3494_s2 + $0xe4] ss:$16 sps:$4 sm:$0xff]   ;;  %v2629_v18 = vld [vmem:[%s3494_s2 + $0xec] ss:$16 sps:$4 sm:$0xff]  }
  0x16   : > { %s2278_s7 = sshll.u32 %s252_s30, 2  ;;  %395 = vmatprep.subr.bf16.mxu0 %v2611_v9  ;;  %438 = vmatprep.subr.bf16.mxu1 %v2613_v10  ;;  %v2624_v20 = vld [vmem:[%s3494_s2 + $0xe0] ss:$16 sps:$4 sm:$0xff]   ;;  %v2627_v21 = vld [vmem:[%s3494_s2 + $0xe8] ss:$16 sps:$4 sm:$0xff]   ;;  %s3514_s9 = smov (!%p258_p7, %s255_s9), 3 }
  0x17   : > { %s2957_s13 = scalar_lea.vmem %s3492_s0, %s2278_s7  ;;  %v2632_v22 = vld [vmem:[%s3494_s2 + $0xc4] ss:$16 sps:$4 sm:$0xff]   ;;  %v2635_v23 = vld [vmem:[%s3494_s2 + $0xcc] ss:$16 sps:$4 sm:$0xff]   ;;  %v2630_v24 = vld [vmem:[%s3494_s2 + $0xc0] ss:$16 sps:$4 sm:$0xff]  }
  0x18   : > { %v2623_v19 = vld [vmem:[%s2957_s13] sm:$0xff]   ;;  %v2633_v25 = vld [vmem:[%s3494_s2 + $0xc8] ss:$16 sps:$4 sm:$0xff]   ;;  %v2641_v27 = vld [vmem:[%s3494_s2 + $0xac] ss:$16 sps:$4 sm:$0xff]   ;;  %s2556_s7 = smul.u32 3, %s3514_s9 }
  0x19   : > { %396 = vmatpush1.bf16.msra.mxu0 %v2615_v11  ;;  %439 = vmatpush1.bf16.msra.mxu1 %v2616_v12  ;;  %v2638_v26 = vld [vmem:[%s3494_s2 + $0xa4] ss:$16 sps:$4 sm:$0xff]   ;;  %v2636_v28 = vld [vmem:[%s3494_s2 + $0xa0] ss:$16 sps:$4 sm:$0xff]   ;;  %v2639_v29 = vld [vmem:[%s3494_s2 + $0xa8] ss:$16 sps:$4 sm:$0xff]  }
  0x1a   : > { %397 = vmatprep.subr.bf16.mxu0 %v2617_v13  ;;  %440 = vmatprep.subr.bf16.mxu1 %v2619_v14  ;;  %v2648_v30 = vld [vmem:[%s2957_s13] sm:$0xff]   ;;  %v2649_v31 = vld [vmem:[%s2957_s13 + $0x8] ss:$0 sps:$4 sm:$0x11]   ;;  %v2647_v33 = vld [vmem:[%s3494_s2 + $0x8c] ss:$16 sps:$4 sm:$0xff]   ;;  %s262_s25 = sadd.s32 %s2556_s7, %s2555_s11 }
  0x1b   : > { %v2644_v32 = vld [vmem:[%s3494_s2 + $0x84] ss:$16 sps:$4 sm:$0xff]   ;;  %v507_v34 = vshrl.u32 %v2648_v30, 16  ;;  %v509_v35 = vshll.u32 %v2648_v30, 16  ;;  %v514_v36 = vshll.u32 %v2649_v31, 16  ;;  %s2279_s6 = sshll.u32 %s262_s25, 2 }
  0x1c   : > { %vm505_vm1 = vsmask.f32 7424  ;;  %v2642_v37 = vld [vmem:[%s3494_s2 + $0x80] ss:$16 sps:$4 sm:$0xff]   ;;  %v2645_v39 = vld [vmem:[%s3494_s2 + $0x88] ss:$16 sps:$4 sm:$0xff]   ;;  %s3139_s24 = scalar_lea.vmem %s3493_s1, %s2279_s6 }
  0x1d   : > { %398 = vmatpush1.bf16.msra.mxu0 %v2621_v15  ;;  %441 = vmatpush1.bf16.msra.mxu1 %v2622_v16  ;;  %v511_v38 = vrot.slane %v509_v35, 1  ;;  %v516_v40 = vrot.slane %v514_v36, 1  ;;  %v2652_v42 = vld [vmem:[%s3494_s2 + $0x164] ss:$16 sps:$4 sm:$0xff]   ;;  %v2655_v43 = vld [vmem:[%s3494_s2 + $0x16c] ss:$16 sps:$4 sm:$0xff]  }
  0x1e   : > { %609 = vmatprep.subr.bf16.mxu0 %v2626_v17  ;;  %652 = vmatprep.subr.bf16.mxu1 %v2629_v18  ;;  %v2650_v44 = vld [vmem:[%s3494_s2 + $0x160] ss:$16 sps:$4 sm:$0xff]   ;;  %v2653_v46 = vld [vmem:[%s3494_s2 + $0x168] ss:$16 sps:$4 sm:$0xff]   ;;  %v2658_v47 = vld [vmem:[%s3494_s2 + $0x144] ss:$16 sps:$4 sm:$0xff]  }
  0x1f   : > { %v512_v41 = vor.u32 %v511_v38, %v507_v34  ;;  %v2661_v48 = vld [vmem:[%s3494_s2 + $0x14c] ss:$16 sps:$4 sm:$0xff]   ;;  %v2656_v49 = vld [vmem:[%s3494_s2 + $0x140] ss:$16 sps:$4 sm:$0xff]   ;;  %v2659_v50 = vld [vmem:[%s3494_s2 + $0x148] ss:$16 sps:$4 sm:$0xff]  }
  0x20   : > { %2299 = vmatmul.mubr.msk.bf16.vlgmr.msra.gmra.mxu0 %vm379_vm0, %v2623_v19  ;;  %2300 = vmatmul.mubr.msk.bf16.vlgmr.msra.gmra.mxu1 %vm379_vm0, %v2623_v19  ;;  %v2664_v51 = vld [vmem:[%s3494_s2 + $0x124] ss:$16 sps:$4 sm:$0xff]   ;;  %v2667_v52 = vld [vmem:[%s3494_s2 + $0x12c] ss:$16 sps:$4 sm:$0xff]   ;;  %v2662_v53 = vld [vmem:[%s3494_s2 + $0x120] ss:$16 sps:$4 sm:$0xff]  }
  0x21   : > { %610 = vmatpush1.bf16.msra.mxu0 %v2624_v20  ;;  %653 = vmatpush1.bf16.msra.mxu1 %v2627_v21  ;;  %v517_v45 = vsel %vm505_vm1, %v512_v41, %v516_v40  ;;  %v2665_v54 = vld [vmem:[%s3494_s2 + $0x128] ss:$16 sps:$4 sm:$0xff]   ;;  %v2674_v55 = vld [vmem:[%s2957_s13] sm:$0xfc]   ;;  %v2673_v58 = vld [vmem:[%s3494_s2 + $0x10c] ss:$16 sps:$4 sm:$0xff]  }
  0x22   : > { %611 = vmatprep.subr.bf16.mxu0 %v2632_v22  ;;  %654 = vmatprep.subr.bf16.mxu1 %v2635_v23  ;;  %v2675_v56 = vld [vmem:[%s2957_s13 + $0x8] ss:$0 sps:$4 sm:$0x33]   ;;  %v2670_v57 = vld [vmem:[%s3494_s2 + $0x104] ss:$16 sps:$4 sm:$0xff]   ;;  %v740_v61 = vrot.slane %v2674_v55, 2 }
  0x23   : > { %633 = vmatprep.mubr.bf16.mxu0 %v2845_v2  ;;  %676 = vmatprep.mubr.bf16.mxu1 %v2845_v2  ;;  %v2668_v59 = vld [vmem:[%s3494_s2 + $0x100] ss:$16 sps:$4 sm:$0xff]   ;;  %v2671_v60 = vld [vmem:[%s3494_s2 + $0x108] ss:$16 sps:$4 sm:$0xff]   ;;  %v741_v62 = vrot.slane %v2675_v56, 2  ;;  %s3516_s15 = smov (!%p268_p8, %s2827_s15), 2 }
  0x24   : > { %v2678_v63 = vld [vmem:[%s3494_s2 + $0x1e4] ss:$16 sps:$4 sm:$0xff]   ;;  %v2681_v0 = vld [vmem:[%s3494_s2 + $0x1ec] ss:$16 sps:$4 sm:$0xff]   ;;  %v2676_v1 = vld [vmem:[%s3494_s2 + $0x1e0] ss:$16 sps:$4 sm:$0xff]  }
  0x25   : > { %612 = vmatpush1.bf16.msra.mxu0 %v2630_v24  ;;  %655 = vmatpush1.bf16.msra.mxu1 %v2633_v25  ;;  %v2679_v3 = vld [vmem:[%s3494_s2 + $0x1e8] ss:$16 sps:$4 sm:$0xff]   ;;  %v2684_v4 = vld [vmem:[%s3494_s2 + $0x1c4] ss:$16 sps:$4 sm:$0xff]   ;;  %v742_v5 = vsel %vm739_vm2, %v740_v61, %v741_v62  ;;  %v2687_v7 = vld [vmem:[%s3494_s2 + $0x1cc] ss:$16 sps:$4 sm:$0xff]  }
  0x26   : > { %613 = vmatprep.subr.bf16.mxu0 %v2638_v26  ;;  %656 = vmatprep.subr.bf16.mxu1 %v2641_v27  ;;  %v2700_v6 = vld [vmem:[%s2957_s13] sm:$0xfc]   ;;  %v2701_v8 = vld [vmem:[%s2957_s13 + $0x8] ss:$0 sps:$4 sm:$0x77]   ;;  %s2557_s26 = smul.u32 24, %s3512_s16 }
  0x27   : > { %v2682_v9 = vld [vmem:[%s3494_s2 + $0x1c0] ss:$16 sps:$4 sm:$0xff]   ;;  %v2685_v10 = vld [vmem:[%s3494_s2 + $0x1c8] ss:$16 sps:$4 sm:$0xff]   ;;  %v2690_v11 = vld [vmem:[%s3494_s2 + $0x1a4] ss:$16 sps:$4 sm:$0xff]  }
  0x28   : > { %v966_v12 = vshrl.u32 %v2700_v6, 16  ;;  %v969_v13 = vshll.u32 %v2700_v6, 16  ;;  %v974_v14 = vshrl.u32 %v2701_v8, 16  ;;  %v977_v15 = vshll.u32 %v2701_v8, 16  ;;  %v2693_v16 = vld [vmem:[%s3494_s2 + $0x1ac] ss:$16 sps:$4 sm:$0xff]  }
  0x29   : > { %614 = vmatpush1.bf16.msra.mxu0 %v2636_v28  ;;  %657 = vmatpush1.bf16.msra.mxu1 %v2639_v29  ;;  %v2688_v17 = vld [vmem:[%s3494_s2 + $0x1a0] ss:$16 sps:$4 sm:$0xff]   ;;  %v2691_v18 = vld [vmem:[%s3494_s2 + $0x1a8] ss:$16 sps:$4 sm:$0xff]   ;;  %v2696_v19 = vld [vmem:[%s3494_s2 + $0x184] ss:$16 sps:$4 sm:$0xff]  }
  0x2a   : > { %615 = vmatprep.subr.bf16.mxu0 %v2644_v32  ;;  %658 = vmatprep.subr.bf16.mxu1 %v2647_v33  ;;  %v968_v20 = vrot.slane %v966_v12, 2  ;;  %v971_v21 = vrot.slane %v969_v13, 3  ;;  %v976_v22 = vrot.slane %v974_v14, 2  ;;  %v979_v23 = vrot.slane %v977_v15, 3  ;;  %v2699_v24 = vld [vmem:[%s3494_s2 + $0x18c] ss:$16 sps:$4 sm:$0xff]  }
  0x2b   : > { %v2694_v25 = vld [vmem:[%s3494_s2 + $0x180] ss:$16 sps:$4 sm:$0xff]   ;;  %v2697_v26 = vld [vmem:[%s3494_s2 + $0x188] ss:$16 sps:$4 sm:$0xff]   ;;  %v2704_v29 = vld [vmem:[%s3494_s2 + $0x264] ss:$16 sps:$4 sm:$0xff]  }
  0x2c   : > { %v972_v27 = vor.u32 %v971_v21, %v968_v20  ;;  %v980_v28 = vor.u32 %v979_v23, %v976_v22  ;;  %vm964_vm3 = vsmask.f32 5376  ;;  %v2707_v30 = vld [vmem:[%s3494_s2 + $0x26c] ss:$16 sps:$4 sm:$0xff]   ;;  %v2702_v31 = vld [vmem:[%s3494_s2 + $0x260] ss:$16 sps:$4 sm:$0xff]  }
  0x2d   : > { %616 = vmatpush1.bf16.msra.mxu0 %v2642_v37  ;;  %659 = vmatpush1.bf16.msra.mxu1 %v2645_v39  ;;  %v2705_v33 = vld [vmem:[%s3494_s2 + $0x268] ss:$16 sps:$4 sm:$0xff]   ;;  %v2710_v34 = vld [vmem:[%s3494_s2 + $0x244] ss:$16 sps:$4 sm:$0xff]   ;;  %v2713_v35 = vld [vmem:[%s3494_s2 + $0x24c] ss:$16 sps:$4 sm:$0xff]  }
  0x2e   : > { %834 = vmatprep.subr.bf16.mxu0 %v2652_v42  ;;  %877 = vmatprep.subr.bf16.mxu1 %v2655_v43  ;;  %v981_v32 = vsel %vm964_vm3, %v972_v27, %v980_v28  ;;  %v2708_v36 = vld [vmem:[%s3494_s2 + $0x240] ss:$16 sps:$4 sm:$0xff]   ;;  %v2711_v37 = vld [vmem:[%s3494_s2 + $0x248] ss:$16 sps:$4 sm:$0xff]   ;;  %v2716_v38 = vld [vmem:[%s3494_s2 + $0x224] ss:$16 sps:$4 sm:$0xff]  }
  0x2f   : > { %v2719_v39 = vld [vmem:[%s3494_s2 + $0x22c] ss:$16 sps:$4 sm:$0xff]   ;;  %v2714_v40 = vld [vmem:[%s3494_s2 + $0x220] ss:$16 sps:$4 sm:$0xff]   ;;  %v2717_v41 = vld [vmem:[%s3494_s2 + $0x228] ss:$16 sps:$4 sm:$0xff]  }
  0x30   : > { %2335 = vmatmul.mubr.msk.bf16.vlgmr.msra.gmra.mxu0 %vm379_vm0, %v517_v45  ;;  %2336 = vmatmul.mubr.msk.bf16.vlgmr.msra.gmra.mxu1 %vm379_vm0, %v517_v45  ;;  %v2722_v42 = vld [vmem:[%s3494_s2 + $0x204] ss:$16 sps:$4 sm:$0xff]   ;;  %v2725_v43 = vld [vmem:[%s3494_s2 + $0x20c] ss:$16 sps:$4 sm:$0xff]   ;;  %v2723_v45 = vld [vmem:[%s3494_s2 + $0x208] ss:$16 sps:$4 sm:$0xff]  }
  0x31   : > { %835 = vmatpush1.bf16.msra.mxu0 %v2650_v44  ;;  %878 = vmatpush1.bf16.msra.mxu1 %v2653_v46  ;;  %v2720_v44 = vld [vmem:[%s3494_s2 + $0x200] ss:$16 sps:$4 sm:$0xff]   ;;  %v2729_v46 = vld [vmem:[%s3494_s2 + $0x2e4] ss:$16 sps:$4 sm:$0xff]   ;;  %v2736_v55 = vld [vmem:[%s3494_s2 + $0x2c8] ss:$16 sps:$4 sm:$0xff]  }
  0x32   : > { %836 = vmatprep.subr.bf16.mxu0 %v2658_v47  ;;  %879 = vmatprep.subr.bf16.mxu1 %v2661_v48  ;;  %v2732_v47 = vld [vmem:[%s3494_s2 + $0x2ec] ss:$16 sps:$4 sm:$0xff]   ;;  %v2726_v48 = vld [vmem:[%s3139_s24] sm:$0xff]   ;;  %v2742_v61 = vld [vmem:[%s3494_s2 + $0x2a8] ss:$16 sps:$4 sm:$0xff]   ;;  %s2280_s27 = sshll.u32 %s3516_s15, 3 }
  0x33   : > { %858 = vmatprep.mubr.bf16.mxu0 %v2845_v2  ;;  %901 = vmatprep.mubr.bf16.mxu1 %v2845_v2  ;;  %v2741_v56 = vld [vmem:[%s3494_s2 + $0x2a4] ss:$16 sps:$4 sm:$0xff]   ;;  %v2756_v12 = vld [vmem:[%s3494_s2 + $0x368] ss:$16 sps:$4 sm:$0xff]   ;;  %v2764_v14 = vld [vmem:[%s3494_s2 + $0x34c] ss:$16 sps:$4 sm:$0xff]   ;;  %s3445_s15 = sadd.s32 %s2557_s26, %s2280_s27 }
  0x34   : > { %v2755_v8 = vld [vmem:[%s3494_s2 + $0x364] ss:$16 sps:$4 sm:$0xff]   ;;  %v2759_v15 = vld [vmem:[%s3494_s2 + $0x340] ss:$16 sps:$4 sm:$0xff]   ;;  %v2768_v20 = vld [vmem:[%s3494_s2 + $0x328] ss:$16 sps:$4 sm:$0xff]  }
  0x35   : > { %837 = vmatpush1.bf16.msra.mxu0 %v2656_v49  ;;  %880 = vmatpush1.bf16.msra.mxu1 %v2659_v50  ;;  %v2727_v49 = vld [vmem:[%s3494_s2 + $0x2e0] ss:$16 sps:$4 sm:$0xff]   ;;  %v2730_v50 = vld [vmem:[%s3494_s2 + $0x2e8] ss:$16 sps:$4 sm:$0xff]   ;;  %v2761_v13 = vld [vmem:[%s3494_s2 + $0x344] ss:$16 sps:$4 sm:$0xff]  }
  0x36   : > { %838 = vmatprep.subr.bf16.mxu0 %v2664_v51  ;;  %881 = vmatprep.subr.bf16.mxu1 %v2667_v52  ;;  %v2751_v51 = vld [vmem:[%s3139_s24] sm:$0xff]   ;;  %v2778_v22 = vld [vmem:[%s3139_s24 + $0x8] ss:$0 sps:$4 sm:$0x33]   ;;  %s2281_s16 = sshll.u32 %s3445_s15, 3 }
  0x37   : > { %v2735_v52 = vld [vmem:[%s3494_s2 + $0x2c4] ss:$16 sps:$4 sm:$0xff]   ;;  %v1421_v62 = vshrl.u32 %v2751_v51, 16  ;;  %v1654_v28 = vrot.slane %v2778_v22, 2  ;;  %s3461_s29 = scalar_lea.vmem %s3496_s4, %s2281_s16 }
  0x38   : > { %v2777_v21 = vld [vmem:[%s3139_s24] sm:$0xfc]  }
  0x39   : > { %839 = vmatpush1.bf16.msra.mxu0 %v2662_v53  ;;  %882 = vmatpush1.bf16.msra.mxu1 %v2665_v54  ;;  %v2738_v53 = vld [vmem:[%s3494_s2 + $0x2cc] ss:$16 sps:$4 sm:$0xff]   ;;  %v2733_v54 = vld [vmem:[%s3494_s2 + $0x2c0] ss:$16 sps:$4 sm:$0xff]   ;;  %v2773_v23 = vld [vmem:[%s3494_s2 + $0x304] ss:$16 sps:$4 sm:$0xff]  }
  0x3a   : > { %840 = vmatprep.subr.bf16.mxu0 %v2670_v57  ;;  %883 = vmatprep.subr.bf16.mxu1 %v2673_v58  ;;  %v2752_v57 = vld [vmem:[%s3139_s24 + $0x8] ss:$0 sps:$4 sm:$0x11]   ;;  %v1423_v58 = vshll.u32 %v2751_v51, 16  ;;  %v1653_v27 = vrot.slane %v2777_v21, 2 }
  0x3d   : > { %841 = vmatpush1.bf16.msra.mxu0 %v2668_v59  ;;  %884 = vmatpush1.bf16.msra.mxu1 %v2671_v60  ;;  %v2744_v59 = vld [vmem:[%s3494_s2 + $0x2ac] ss:$16 sps:$4 sm:$0xff]   ;;  %v2739_v60 = vld [vmem:[%s3494_s2 + $0x2a0] ss:$16 sps:$4 sm:$0xff]  }
  0x3e   : > { %1073 = vmatprep.subr.bf16.mxu0 %v2678_v63  ;;  %1116 = vmatprep.subr.bf16.mxu1 %v2681_v0  ;;  %v1425_v63 = vrot.slane %v1423_v58, 1  ;;  %v1428_v0 = vshll.u32 %v2752_v57, 16 }
  0x40   : > { %2371 = vmatmul.mubr.msk.bf16.vlgmr.msra.gmra.mxu0 %vm379_vm0, %v742_v5  ;;  %2372 = vmatmul.mubr.msk.bf16.vlgmr.msra.gmra.mxu1 %vm379_vm0, %v742_v5  ;;  %v2748_v5 = vld [vmem:[%s3494_s2 + $0x288] ss:$16 sps:$4 sm:$0xff]   ;;  %v1426_v6 = vor.u32 %v1425_v63, %v1421_v62 }
  0x41   : > { %1074 = vmatpush1.bf16.msra.mxu0 %v2676_v1  ;;  %1117 = vmatpush1.bf16.msra.mxu1 %v2679_v3  ;;  %v2747_v1 = vld [vmem:[%s3494_s2 + $0x284] ss:$16 sps:$4 sm:$0xff]   ;;  %v2750_v3 = vld [vmem:[%s3494_s2 + $0x28c] ss:$16 sps:$4 sm:$0xff]  }
  0x42   : > { %1075 = vmatprep.subr.bf16.mxu0 %v2684_v4  ;;  %1118 = vmatprep.subr.bf16.mxu1 %v2687_v7  ;;  %v2745_v4 = vld [vmem:[%s3494_s2 + $0x280] ss:$16 sps:$4 sm:$0xff]   ;;  %v1430_v7 = vrot.slane %v1428_v0, 1 }
  0x43   : > { %1097 = vmatprep.mubr.bf16.mxu0 %v2845_v2  ;;  %1140 = vmatprep.mubr.bf16.mxu1 %v2845_v2 }
  0x45   : > { %1076 = vmatpush1.bf16.msra.mxu0 %v2682_v9  ;;  %1119 = vmatpush1.bf16.msra.mxu1 %v2685_v10  ;;  %v2758_v9 = vld [vmem:[%s3494_s2 + $0x36c] ss:$16 sps:$4 sm:$0xff]   ;;  %v2753_v10 = vld [vmem:[%s3494_s2 + $0x360] ss:$16 sps:$4 sm:$0xff]  }
  0x46   : > { %1077 = vmatprep.subr.bf16.mxu0 %v2690_v11  ;;  %1120 = vmatprep.subr.bf16.mxu1 %v2693_v16  ;;  %v1431_v11 = vsel %vm505_vm1, %v1426_v6, %v1430_v7  ;;  %v2762_v16 = vld [vmem:[%s3494_s2 + $0x348] ss:$16 sps:$4 sm:$0xff]  }
  0x49   : > { %1078 = vmatpush1.bf16.msra.mxu0 %v2688_v17  ;;  %1121 = vmatpush1.bf16.msra.mxu1 %v2691_v18  ;;  %v2767_v17 = vld [vmem:[%s3494_s2 + $0x324] ss:$16 sps:$4 sm:$0xff]   ;;  %v2770_v18 = vld [vmem:[%s3494_s2 + $0x32c] ss:$16 sps:$4 sm:$0xff]  }
  0x4a   : > { %1079 = vmatprep.subr.bf16.mxu0 %v2696_v19  ;;  %1122 = vmatprep.subr.bf16.mxu1 %v2699_v24  ;;  %v2765_v19 = vld [vmem:[%s3494_s2 + $0x320] ss:$16 sps:$4 sm:$0xff]   ;;  %v2776_v24 = vld [vmem:[%s3494_s2 + $0x30c] ss:$16 sps:$4 sm:$0xff]  }
  0x4d   : > { %1080 = vmatpush1.bf16.msra.mxu0 %v2694_v25  ;;  %1123 = vmatpush1.bf16.msra.mxu1 %v2697_v26  ;;  %v2771_v25 = vld [vmem:[%s3494_s2 + $0x300] ss:$16 sps:$4 sm:$0xff]   ;;  %v2774_v26 = vld [vmem:[%s3494_s2 + $0x308] ss:$16 sps:$4 sm:$0xff]  }
  0x4e   : > { %1290 = vmatprep.subr.bf16.mxu0 %v2704_v29  ;;  %1333 = vmatprep.subr.bf16.mxu1 %v2707_v30  ;;  %v2781_v29 = vld [vmem:[%s3494_s2 + $0x3e4] ss:$16 sps:$4 sm:$0xff]   ;;  %v2784_v30 = vld [vmem:[%s3494_s2 + $0x3ec] ss:$16 sps:$4 sm:$0xff]  }
  0x50   : > { %2407 = vmatmul.mubr.msk.bf16.vlgmr.msra.gmra.mxu0 %vm379_vm0, %v981_v32  ;;  %2408 = vmatmul.mubr.msk.bf16.vlgmr.msra.gmra.mxu1 %vm379_vm0, %v981_v32  ;;  %v2782_v32 = vld [vmem:[%s3494_s2 + $0x3e8] ss:$16 sps:$4 sm:$0xff]  }
  0x51   : > { %1291 = vmatpush1.bf16.msra.mxu0 %v2702_v31  ;;  %1334 = vmatpush1.bf16.msra.mxu1 %v2705_v33  ;;  %v2779_v31 = vld [vmem:[%s3494_s2 + $0x3e0] ss:$16 sps:$4 sm:$0xff]   ;;  %v1655_v33 = vsel %vm739_vm2, %v1653_v27, %v1654_v28 }
  0x52   : > { %1292 = vmatprep.subr.bf16.mxu0 %v2710_v34  ;;  %1335 = vmatprep.subr.bf16.mxu1 %v2713_v35  ;;  %v2803_v34 = vld [vmem:[%s3139_s24] sm:$0xfc]   ;;  %v2804_v35 = vld [vmem:[%s3139_s24 + $0x8] ss:$0 sps:$4 sm:$0x77]  }
  0x53   : > { %1314 = vmatprep.mubr.bf16.mxu0 %v2845_v2  ;;  %1357 = vmatprep.mubr.bf16.mxu1 %v2845_v2 }
  0x55   : > { %1293 = vmatpush1.bf16.msra.mxu0 %v2708_v36  ;;  %1336 = vmatpush1.bf16.msra.mxu1 %v2711_v37  ;;  %v2787_v36 = vld [vmem:[%s3494_s2 + $0x3c4] ss:$16 sps:$4 sm:$0xff]   ;;  %v2790_v37 = vld [vmem:[%s3494_s2 + $0x3cc] ss:$16 sps:$4 sm:$0xff]  }
  0x56   : > { %1294 = vmatprep.subr.bf16.mxu0 %v2716_v38  ;;  %1337 = vmatprep.subr.bf16.mxu1 %v2719_v39  ;;  %v2785_v38 = vld [vmem:[%s3494_s2 + $0x3c0] ss:$16 sps:$4 sm:$0xff]   ;;  %v2788_v39 = vld [vmem:[%s3494_s2 + $0x3c8] ss:$16 sps:$4 sm:$0xff]  }
  0x59   : > { %1295 = vmatpush1.bf16.msra.mxu0 %v2714_v40  ;;  %1338 = vmatpush1.bf16.msra.mxu1 %v2717_v41  ;;  %v1878_v40 = vshrl.u32 %v2803_v34, 16  ;;  %v1881_v41 = vshll.u32 %v2803_v34, 16 }
  0x5a   : > { %1296 = vmatprep.subr.bf16.mxu0 %v2722_v42  ;;  %1339 = vmatprep.subr.bf16.mxu1 %v2725_v43  ;;  %v1886_v42 = vshrl.u32 %v2804_v35, 16  ;;  %v1889_v43 = vshll.u32 %v2804_v35, 16 }
  0x5c   : > { %v1891_v51 = vrot.slane %v1889_v43, 3 }
  0x5d   : > { %1297 = vmatpush1.bf16.msra.mxu0 %v2720_v44  ;;  %1340 = vmatpush1.bf16.msra.mxu1 %v2723_v45  ;;  %v2793_v44 = vld [vmem:[%s3494_s2 + $0x3a4] ss:$16 sps:$4 sm:$0xff]   ;;  %v2796_v45 = vld [vmem:[%s3494_s2 + $0x3ac] ss:$16 sps:$4 sm:$0xff]  }
  0x5e   : > { %1523 = vmatprep.subr.bf16.mxu0 %v2729_v46  ;;  %1566 = vmatprep.subr.bf16.mxu1 %v2732_v47  ;;  %v2791_v46 = vld [vmem:[%s3494_s2 + $0x3a0] ss:$16 sps:$4 sm:$0xff]   ;;  %v2794_v47 = vld [vmem:[%s3494_s2 + $0x3a8] ss:$16 sps:$4 sm:$0xff]  }
  0x60   : > { %2442 = vmatmul.mubr.msk.bf16.vlgmr.msra.gmra.mxu0 %vm379_vm0, %v2726_v48  ;;  %2443 = vmatmul.mubr.msk.bf16.vlgmr.msra.gmra.mxu1 %vm379_vm0, %v2726_v48  ;;  %v1880_v48 = vrot.slane %v1878_v40, 2 }
  0x61   : > { %1524 = vmatpush1.bf16.msra.mxu0 %v2727_v49  ;;  %1567 = vmatpush1.bf16.msra.mxu1 %v2730_v50  ;;  %v1883_v49 = vrot.slane %v1881_v41, 3  ;;  %v1888_v50 = vrot.slane %v1886_v42, 2  ;;  %v2097_v41 = vlaneseq }
  0x62   : > { %1525 = vmatprep.subr.bf16.mxu0 %v2735_v52  ;;  %1568 = vmatprep.subr.bf16.mxu1 %v2738_v53  ;;  %v2802_v52 = vld [vmem:[%s3494_s2 + $0x38c] ss:$16 sps:$4 sm:$0xff]   ;;  %v2797_v53 = vld [vmem:[%s3494_s2 + $0x380] ss:$16 sps:$4 sm:$0xff]  }
  0x63   : > { %1547 = vmatprep.mubr.bf16.mxu0 %v2845_v2  ;;  %1590 = vmatprep.mubr.bf16.mxu1 %v2845_v2 }
  0x65   : > { %1526 = vmatpush1.bf16.msra.mxu0 %v2733_v54  ;;  %1569 = vmatpush1.bf16.msra.mxu1 %v2736_v55  ;;  %v2800_v54 = vld [vmem:[%s3494_s2 + $0x388] ss:$16 sps:$4 sm:$0xff]   ;;  %v1884_v55 = vor.u32 %v1883_v49, %v1880_v48 }
  0x66   : > { %1527 = vmatprep.subr.bf16.mxu0 %v2741_v56  ;;  %1570 = vmatprep.subr.bf16.mxu1 %v2744_v59  ;;  %v1892_v56 = vor.u32 %v1891_v51, %v1888_v50 }
  0x68   : > { %v1893_v57 = vsel %vm964_vm3, %v1884_v55, %v1892_v56 }
  0x69   : > { %1528 = vmatpush1.bf16.msra.mxu0 %v2739_v60  ;;  %1571 = vmatpush1.bf16.msra.mxu1 %v2742_v61 }
  0x6a   : > { %1529 = vmatprep.subr.bf16.mxu0 %v2747_v1  ;;  %1572 = vmatprep.subr.bf16.mxu1 %v2750_v3 }
  0x6d   : > { %1530 = vmatpush1.bf16.msra.mxu0 %v2745_v4  ;;  %1573 = vmatpush1.bf16.msra.mxu1 %v2748_v5 }
  0x6e   : > { %1747 = vmatprep.subr.bf16.mxu0 %v2755_v8  ;;  %1790 = vmatprep.subr.bf16.mxu1 %v2758_v9 }
  0x70   : > { %2478 = vmatmul.mubr.msk.bf16.vlgmr.msra.gmra.mxu0 %vm379_vm0, %v1431_v11  ;;  %2479 = vmatmul.mubr.msk.bf16.vlgmr.msra.gmra.mxu1 %vm379_vm0, %v1431_v11 }
  0x71   : > { %1748 = vmatpush1.bf16.msra.mxu0 %v2753_v10  ;;  %1791 = vmatpush1.bf16.msra.mxu1 %v2756_v12 }
  0x72   : > { %1749 = vmatprep.subr.bf16.mxu0 %v2761_v13  ;;  %1792 = vmatprep.subr.bf16.mxu1 %v2764_v14 }
  0x73   : > { %1771 = vmatprep.mubr.bf16.mxu0 %v2845_v2  ;;  %1814 = vmatprep.mubr.bf16.mxu1 %v2845_v2 }
  0x75   : > { %1750 = vmatpush1.bf16.msra.mxu0 %v2759_v15  ;;  %1793 = vmatpush1.bf16.msra.mxu1 %v2762_v16 }
  0x76   : > { %1751 = vmatprep.subr.bf16.mxu0 %v2767_v17  ;;  %1794 = vmatprep.subr.bf16.mxu1 %v2770_v18 }
  0x79   : > { %1752 = vmatpush1.bf16.msra.mxu0 %v2765_v19  ;;  %1795 = vmatpush1.bf16.msra.mxu1 %v2768_v20 }
  0x7a   : > { %1753 = vmatprep.subr.bf16.mxu0 %v2773_v23  ;;  %1796 = vmatprep.subr.bf16.mxu1 %v2776_v24 }
  0x7d   : > { %1754 = vmatpush1.bf16.msra.mxu0 %v2771_v25  ;;  %1797 = vmatpush1.bf16.msra.mxu1 %v2774_v26 }
  0x7e   : > { %1985 = vmatprep.subr.bf16.mxu0 %v2781_v29  ;;  %2028 = vmatprep.subr.bf16.mxu1 %v2784_v30 }
  0x80   : > { %2514 = vmatmul.mubr.msk.bf16.vlgmr.msra.gmra.mxu0 %vm379_vm0, %v1655_v33  ;;  %2515 = vmatmul.mubr.msk.bf16.vlgmr.msra.gmra.mxu1 %vm379_vm0, %v1655_v33 }
  0x81   : > { %1986 = vmatpush1.bf16.msra.mxu0 %v2779_v31  ;;  %2029 = vmatpush1.bf16.msra.mxu1 %v2782_v32 }
  0x82   : > { %1987 = vmatprep.subr.bf16.mxu0 %v2787_v36  ;;  %2030 = vmatprep.subr.bf16.mxu1 %v2790_v37 }
  0x83   : > { %2009 = vmatprep.mubr.bf16.mxu0 %v2845_v2  ;;  %2052 = vmatprep.mubr.bf16.mxu1 %v2845_v2  ;;  %v2799_v2 = vld [vmem:[%s3494_s2 + $0x384] ss:$16 sps:$4 sm:$0xff]  }
  0x85   : > { %1988 = vmatpush1.bf16.msra.mxu0 %v2785_v38  ;;  %2031 = vmatpush1.bf16.msra.mxu1 %v2788_v39 }
  0x86   : > { %1989 = vmatprep.subr.bf16.mxu0 %v2793_v44  ;;  %2032 = vmatprep.subr.bf16.mxu1 %v2796_v45  ;;  %v2098_v44 = vshrl.u32 %v2097_v41, 7 }
  0x88   : > { %v2107_v48 = vsub.s32 2, %v2098_v44  ;;  %v2103_v49 = vsub.s32 1, %v2098_v44  ;;  %v2111_v50 = vsub.s32 3, %v2098_v44 }
  0x89   : > { %1990 = vmatpush1.bf16.msra.mxu0 %v2791_v46  ;;  %2033 = vmatpush1.bf16.msra.mxu1 %v2794_v47  ;;  %v2099_v47 = vsub.s32 0, %v2098_v44 }
  0x8a   : > { %1991 = vmatprep.subr.bf16.mxu0 %v2799_v2  ;;  %2034 = vmatprep.subr.bf16.mxu1 %v2802_v52  ;;  %v2095_v52 = vld [vmem:[%s3495_s3] sm:$0xf] }
  0x8d   : > { %1992 = vmatpush1.bf16.msra.mxu0 %v2797_v53  ;;  %2035 = vmatpush1.bf16.msra.mxu1 %v2800_v54 }
  0x90   : > { %2550 = vmatmul.mubr.msk.bf16.vlgmr.msra.gmra.mxu0 %vm379_vm0, %v1893_v57  ;;  %2551 = vmatmul.mubr.msk.bf16.vlgmr.msra.gmra.mxu1 %vm379_vm0, %v1893_v57 }
  0xe0   : > { %v417_v58 = vpop.f32.mrf.mxu0  ;;  %v460_v59 = vpop.f32.mrf.mxu1 }
  0xe2   : > { %v419_v60 = vpop.f32.mrf.mxu0  ;;  %v462_v61 = vpop.f32.mrf.mxu1 }
  0xe4   : > { %v3362_v62 = vpop.f32.mrf.mxu0  ;;  %v3364_v63 = vpop.f32.mrf.mxu1 }
  0xe6   : > { %v3366_v0 = vpop.f32.mrf.mxu0  ;;  %v3368_v1 = vpop.f32.mrf.mxu1 }
  0xf0   : > { %v635_v3 = vpop.f32.mrf.mxu0  ;;  %v678_v4 = vpop.f32.mrf.mxu1 }
  0xf1   : > { %v695_v51 = vadd.f32 %v635_v3, %v417_v58  ;;  %v697_v2 = vadd.f32 %v678_v4, %v460_v59  ;;  %v3423_v58 = vrot.slane %v2095_v52, %v2103_v49  ;;  %v3425_v59 = vrot.slane %v2095_v52, %v2111_v50 }
  0xf2   : > { %v637_v5 = vpop.f32.mrf.mxu0  ;;  %v680_v6 = vpop.f32.mrf.mxu1 }
  0xf3   : > { %v696_v55 = vadd.f32 %v637_v5, %v419_v60  ;;  %v698_v56 = vadd.f32 %v680_v6, %v462_v61 }
  0xf4   : > { %v3370_v7 = vpop.f32.mrf.mxu0  ;;  %v3372_v8 = vpop.f32.mrf.mxu1 }
  0xf5   : > { %v699_v61 = vadd.f32 %v3370_v7, %v3362_v62  ;;  %v701_v5 = vadd.f32 %v3372_v8, %v3364_v63 }
  0xf6   : > { %v3374_v9 = vpop.f32.mrf.mxu0  ;;  %v3376_v10 = vpop.f32.mrf.mxu1 }
  0xf7   : > { %v700_v6 = vadd.f32 %v3374_v9, %v3366_v0 }
 0x100   : > { %v860_v11 = vpop.f32.mrf.mxu0  ;;  %v903_v12 = vpop.f32.mrf.mxu1 }
 0x101   : > { %v920_v57 = vadd.f32 %v860_v11, %v695_v51  ;;  %v922_v41 = vadd.f32 %v903_v12, %v697_v2  ;;  %v702_v11 = vadd.f32 %v3376_v10, %v3368_v1 }
 0x102   : > { %v862_v13 = vpop.f32.mrf.mxu0  ;;  %v905_v14 = vpop.f32.mrf.mxu1 }
 0x103   : > { %v921_v3 = vadd.f32 %v862_v13, %v696_v55  ;;  %v923_v4 = vadd.f32 %v905_v14, %v698_v56 }
 0x104   : > { %v3378_v15 = vpop.f32.mrf.mxu0  ;;  %v3380_v16 = vpop.f32.mrf.mxu1 }
 0x105   : > { %v926_v62 = vadd.f32 %v3380_v16, %v701_v5 }
 0x106   : > { %v3382_v17 = vpop.f32.mrf.mxu0  ;;  %v3384_v18 = vpop.f32.mrf.mxu1 }
 0x107   : > { %v925_v63 = vadd.f32 %v3382_v17, %v700_v6  ;;  %v927_v7 = vadd.f32 %v3384_v18, %v702_v11 }
 0x110   : > { %v1099_v19 = vpop.f32.mrf.mxu0  ;;  %v1142_v20 = vpop.f32.mrf.mxu1 }
 0x111   : > { %v1159_v44 = vadd.f32 %v1099_v19, %v920_v57  ;;  %v1161_v60 = vadd.f32 %v1142_v20, %v922_v41  ;;  %v924_v20 = vadd.f32 %v3378_v15, %v699_v61 }
 0x112   : > { %v1101_v21 = vpop.f32.mrf.mxu0  ;;  %v1144_v22 = vpop.f32.mrf.mxu1 }
 0x113   : > { %v1162_v13 = vadd.f32 %v1144_v22, %v923_v4 }
 0x114   : > { %v3386_v23 = vpop.f32.mrf.mxu0  ;;  %v3388_v24 = vpop.f32.mrf.mxu1 }
 0x115   : > { %v1163_v10 = vadd.f32 %v3386_v23, %v924_v20 }
 0x116   : > { %v3390_v25 = vpop.f32.mrf.mxu0  ;;  %v3392_v26 = vpop.f32.mrf.mxu1 }
 0x117   : > { %v1164_v22 = vadd.f32 %v3390_v25, %v925_v63 }
 0x120   : > { %v1316_v27 = vpop.f32.mrf.mxu0  ;;  %v1359_v28 = vpop.f32.mrf.mxu1 }
 0x121   : > { %v1376_v14 = vadd.f32 %v1316_v27, %v1159_v44  ;;  %v1378_v19 = vadd.f32 %v1359_v28, %v1161_v60  ;;  %v1166_v27 = vadd.f32 %v3392_v26, %v927_v7 }
 0x122   : > { %v1318_v29 = vpop.f32.mrf.mxu0  ;;  %v1361_v30 = vpop.f32.mrf.mxu1 }
 0x123   : > { %v1379_v8 = vadd.f32 %v1361_v30, %v1162_v13 }
 0x124   : > { %v3394_v31 = vpop.f32.mrf.mxu0  ;;  %v3396_v32 = vpop.f32.mrf.mxu1 }
 0x125   : > { %v1380_v30 = vadd.f32 %v3394_v31, %v1163_v10 }
 0x126   : > { %v3398_v33 = vpop.f32.mrf.mxu0  ;;  %v3400_v34 = vpop.f32.mrf.mxu1 }
 0x127   : > { %v1381_v23 = vadd.f32 %v3398_v33, %v1164_v22 }
 0x130   : > { %v1549_v35 = vpop.f32.mrf.mxu0  ;;  %v1592_v36 = vpop.f32.mrf.mxu1 }
 0x131   : > { %v1609_v9 = vadd.f32 %v1549_v35, %v1376_v14  ;;  %v1611_v1 = vadd.f32 %v1592_v36, %v1378_v19 }
 0x132   : > { %v1551_v37 = vpop.f32.mrf.mxu0  ;;  %v1594_v38 = vpop.f32.mrf.mxu1 }
 0x133   : > { %v1612_v17 = vadd.f32 %v1594_v38, %v1379_v8 }
 0x134   : > { %v3402_v39 = vpop.f32.mrf.mxu0  ;;  %v3404_v40 = vpop.f32.mrf.mxu1 }
 0x136   : > { %v3406_v42 = vpop.f32.mrf.mxu0  ;;  %v3408_v43 = vpop.f32.mrf.mxu1 }
 0x137   : > { %3497 = vst [vmem:[#allocation2_spill] sm:$0xff] %v3406_v42  ;;  %3498 = vst [vmem:[#allocation3_spill] sm:$0xff] %v3408_v43  ;;  %v3419_v43 = vrot.slane %v2095_v52, %v2099_v47  ;;  %v3421_v42 = vrot.slane %v2095_v52, %v2107_v48  ;;  %v1160_v48 = vadd.f32 %v1101_v21, %v921_v3 }
 0x138   : > { %v1165_v21 = vadd.f32 %v3388_v24, %v926_v62  ;;  %v1383_v24 = vadd.f32 %v3400_v34, %v1166_v27 }
 0x139   : > { %v1377_v0 = vadd.f32 %v1318_v29, %v1160_v48 }
 0x13a   : > { %v1382_v35 = vadd.f32 %v3396_v32, %v1165_v21 }
 0x13b   : > { %v1610_v16 = vadd.f32 %v1551_v37, %v1377_v0  ;;  %v1613_v37 = vadd.f32 %v3402_v39, %v1380_v30 }
 0x13c   : > { %v1615_v38 = vadd.f32 %v3404_v40, %v1382_v35 }
 0x13e   : > { %v3500_v31 = vld [vmem:[#allocation3_spill] sm:$0xff] }
 0x13f   : > { %v1616_v2 = vadd.f32 %v3500_v31, %v1383_v24 }
 0x140   : > { %v1773_v45 = vpop.f32.mrf.mxu0  ;;  %v1816_v46 = vpop.f32.mrf.mxu1 }
 0x141   : > { %v1833_v18 = vadd.f32 %v1773_v45, %v1609_v9  ;;  %v1835_v29 = vadd.f32 %v1816_v46, %v1611_v1  ;;  %v3499_v45 = vld [vmem:[#allocation2_spill] sm:$0xff] }
 0x142   : > { %v1775_v53 = vpop.f32.mrf.mxu0  ;;  %v1818_v54 = vpop.f32.mrf.mxu1  ;;  %v1614_v46 = vadd.f32 %v3499_v45, %v1381_v23 }
 0x143   : > { %v1834_v26 = vadd.f32 %v1775_v53, %v1610_v16  ;;  %v1836_v49 = vadd.f32 %v1818_v54, %v1612_v17 }
 0x144   : > { %v1777_v12 = vpop.f32.mrf.mxu0  ;;  %v1820_v47 = vpop.f32.mrf.mxu1 }
 0x145   : > { %v1837_v54 = vadd.f32 %v1777_v12, %v1613_v37  ;;  %v1839_v56 = vadd.f32 %v1820_v47, %v1615_v38 }
 0x146   : > { %v1779_v28 = vpop.f32.mrf.mxu0  ;;  %v1822_v15 = vpop.f32.mrf.mxu1 }
 0x147   : > { %v1838_v57 = vadd.f32 %v1779_v28, %v1614_v46  ;;  %v1840_v41 = vadd.f32 %v1822_v15, %v1616_v2 }
 0x150   : > { %v2011_v25 = vpop.f32.mrf.mxu0  ;;  %v2054_v36 = vpop.f32.mrf.mxu1 }
 0x151   : > { %v2071_v50 = vadd.f32 %v2011_v25, %v1833_v18  ;;  %v2073_v51 = vadd.f32 %v2054_v36, %v1835_v29 }
 0x152   : > { %v2013_v32 = vpop.f32.mrf.mxu0  ;;  %v2056_v52 = vpop.f32.mrf.mxu1 }
 0x153   : > { %v2117_v33 = vadd.f32 %v3419_v43, %v2071_v50  ;;  %v2119_v34 = vadd.f32 %v3421_v42, %v2073_v51  ;;  %v2072_v55 = vadd.f32 %v2013_v32, %v1834_v26  ;;  %v2074_v53 = vadd.f32 %v2056_v52, %v1836_v49 }
 0x154   : > { %v2015_v3 = vpop.f32.mrf.mxu0  ;;  %v2058_v39 = vpop.f32.mrf.mxu1 }
 0x155   : > { %vm2125_vm4 = vcmp.ge.f32.partialorder %v2117_v33, 0.0  ;;  %v2133_v40 = vmul.f32 0.01, %v2117_v33  ;;  %vm2127_vm5 = vcmp.ge.f32.partialorder %v2119_v34, 0.0  ;;  %v2135_v4 = vmul.f32 0.01, %v2119_v34 }
 0x156   : > { %v2118_v44 = vadd.f32 %v3423_v58, %v2072_v55  ;;  %v2120_v60 = vadd.f32 %v3425_v59, %v2074_v53  ;;  %v2075_v61 = vadd.f32 %v2015_v3, %v1837_v54  ;;  %v2077_v5 = vadd.f32 %v2058_v39, %v1839_v56  ;;  %v2017_v6 = vpop.f32.mrf.mxu0  ;;  %v2060_v11 = vpop.f32.mrf.mxu1 }
 0x157   : > { %v2141_v12 = vsel %vm2125_vm4, %v2117_v33, %v2133_v40  ;;  %v2143_v47 = vsel %vm2127_vm5, %v2119_v34, %v2135_v4  ;;  %v2076_v48 = vadd.f32 %v2017_v6, %v1838_v57  ;;  %v2078_v13 = vadd.f32 %v2060_v11, %v1840_v41 }
 0x158   : > { %2149 = vst [vmem:[%s3461_s29] sm:$0xff] %v2141_v12  ;;  %2151 = vst [vmem:[%s3461_s29 + $0x10] sm:$0xff] %v2143_v47  ;;  %vm2126_vm6 = vcmp.ge.f32.partialorder %v2118_v44, 0.0  ;;  %v2134_v14 = vmul.f32 0.01, %v2118_v44  ;;  %vm2128_vm7 = vcmp.ge.f32.partialorder %v2120_v60, 0.0  ;;  %v2121_v20 = vadd.f32 %v3419_v43, %v2075_v61 }
 0x159   : > { %v2136_v19 = vmul.f32 0.01, %v2120_v60  ;;  %v2123_v62 = vadd.f32 %v3421_v42, %v2077_v5  ;;  %v2122_v63 = vadd.f32 %v3423_v58, %v2076_v48  ;;  %v2124_v7 = vadd.f32 %v3425_v59, %v2078_v13 }
 0x15a   : > { %v2142_v0 = vsel %vm2126_vm6, %v2118_v44, %v2134_v14  ;;  %vm2129_vm8 = vcmp.ge.f32.partialorder %v2121_v20, 0.0  ;;  %v2137_v9 = vmul.f32 0.01, %v2121_v20 }
 0x15b   : > { %v2144_v8 = vsel %vm2128_vm7, %v2120_v60, %v2136_v19  ;;  %2150 = vst [vmem:[%s3461_s29 + $0x8] sm:$0xff] %v2142_v0  ;;  %vm2131_vm9 = vcmp.ge.f32.partialorder %v2123_v62, 0.0  ;;  %v2139_v1 = vmul.f32 0.01, %v2123_v62  ;;  %vm2130_vm10 = vcmp.ge.f32.partialorder %v2122_v63, 0.0 }
 0x15c   : > { %2152 = vst [vmem:[%s3461_s29 + $0x18] sm:$0xff] %v2144_v8  ;;  %v2138_v43 = vmul.f32 0.01, %v2122_v63  ;;  %vm2132_vm11 = vcmp.ge.f32.partialorder %v2124_v7, 0.0  ;;  %v2140_v42 = vmul.f32 0.01, %v2124_v7  ;;  %v2145_v10 = vsel %vm2129_vm8, %v2121_v20, %v2137_v9 }
 0x15d   : > { %v2147_v58 = vsel %vm2131_vm9, %v2123_v62, %v2139_v1  ;;  %2153 = vst [vmem:[%s3461_s29 + $0x20] sm:$0xff] %v2145_v10 }
 0x15e   : > { %2155 = vst [vmem:[%s3461_s29 + $0x30] sm:$0xff] %v2147_v58  ;;  %v2146_v59 = vsel %vm2130_vm10, %v2122_v63, %v2138_v43  ;;  %v2148_v21 = vsel %vm2132_vm11, %v2124_v7, %v2140_v42 }
 0x15f   : > { %2154 = vst [vmem:[%s3461_s29 + $0x28] sm:$0xff] %v2146_v59  ;;  %2156 = vst [vmem:[%s3461_s29 + $0x38] sm:$0xff] %v2148_v21 }
 0x160 PF: > { %s14_s19 = sadd.s32 1, %s2843_s19   ;;  %s3501_s15 = smov %s2835_s17 }
 0x161   : > { %p11_p9 = scmp.ge.s32.totalorder %s14_s19, 8   ;;  %s3502_s16 = smov %s2839_s18 }
 0x162   : > { %s3503_s17 = smov %s3506_s20  ;;  %s3504_s18 = smov %s3510_s21 }
 0x163   :  { %13 = sbr.rel (!%p11_p9) target bundleno = 3 (0x3), region = 76 }

// kernel: featnet_forward.10
= control target key start
LH: loop header
LB: loop body
LE: loop exit
PB: predicated region body
PF: predicated region fallthrough
CT: control target
= control target key end

     0   :  { %s2431_s15 = smov 0   ;;  %s2433_s16 = smov 0   ;;  %s2907_s0 = inlined_call_operand.vmem [shape: bf16[2,6,40,96], index: 0, kind: input, shape index: {}, may-alias: {0,1}]   ;;  %s2908_s1 = inlined_call_operand.vmem [shape: bf16[2,6,40,96], index: 1, kind: input, shape index: {}, may-alias: {0,1}]   ;;  %s2909_s2 = inlined_call_operand.vmem [shape: bf16[8,96,256], index: 2, kind: input, shape index: {}]   ;;  %s2910_s3 = inlined_call_operand.vmem [shape: f32[1,256], index: 3, kind: input, shape index: {}]   ;;  %s2911_s4 = inlined_call_operand.vmem [shape: f32[2,5,32,256], index: 4, kind: output, shape index: {}]  }
   0x1   :  { %s2435_s17 = smov 0   ;;  %s2437_s18 = smov 0  }
   0x2   :  { %s2439_s19 = smov 0  }
   0x3 LB: > { %s23_s20 = sadd.s32 1, %s2395_s17  ;;  %s26_s21 = sadd.s32 1, %s2399_s18  ;;  %s2403_s19 = sphi %s2439_s19, %s14_s19   ;;  %s2399_s18 = sphi %s2437_s18, %s2915_s18   ;;  %s2395_s17 = sphi %s2435_s17, %s2914_s17   ;;  %s2391_s16 = sphi %s2433_s16, %s2913_s16   ;;  %s2387_s15 = sphi %s2431_s15, %s2912_s15  }
   0x4   : > { %p24_p0 = scmp.ge.s32.totalorder %s23_s20, 5  ;;  %p1929_p1 = scmp.ge.s32.totalorder %s2403_s19, 1 }
   0x5   : > { %p202_p2 = scmp.lt.s32.totalorder %s2403_s19, 11 }
   0x6   : > { %s2917_s20 = smov (%p24_p0, %s23_s20), 0  ;;  %s2919_s21 = smov (!%p24_p0, %s26_s21), %s2399_s18 }
   0x7   : > { %p203_p3 = pnand %p1929_p1, %p202_p2  ;;  %p28_p4 = scmp.ge.s32.totalorder %s2919_s21, 2 }
   0x8   : > { %p246_p5 = scmp.lt.s32.totalorder (!%p203_p3), %s2391_s16, 1  ;;  %p248_p6 = scmp.lt.s32.totalorder (!%p203_p3), %s2387_s15, 5 }
   0x9   : > { %s2921_s21 = smov (%p28_p4, %s2919_s21), 0  ;;  %206 = sbr.rel (%p203_p3) target bundleno = 329 (0x149), region = 36 }
   0xa   : > { %s255_s5 = sadd.s32 (!%p203_p3), 1, %s2387_s15  ;;  %p268_p8 = scmp.lt.s32.totalorder (!%p203_p3), %s2387_s15, 4 }
   0xb   : > { %p258_p7 = scmp.lt.s32.totalorder (!%p203_p3), %s255_s5, 5 }
   0xe   : > { %v2199_v0 = vld [vmem:[%s2909_s2 + $0x54] ss:$8 sps:$4 sm:$0xff]   ;;  %v2201_v1 = vld [vmem:[%s2909_s2 + $0x50] ss:$8 sps:$4 sm:$0xff]   ;;  %v2405_v2 = vmov 0   ;;  %s2923_s16 = smov (!%p246_p5, %s2391_s16), 1 }
   0xf   : > { %401 = vmatprep.mubr.bf16.mxu0 %v2405_v2  ;;  %580 = vmatprep.mubr.bf16.mxu1 %v2405_v2  ;;  %v2202_v3 = vld [vmem:[%s2909_s2 + $0x44] ss:$8 sps:$4 sm:$0xff]   ;;  %v2204_v4 = vld [vmem:[%s2909_s2 + $0xb4] ss:$8 sps:$4 sm:$0xff]   ;;  %v2206_v5 = vld [vmem:[%s2909_s2 + $0x40] ss:$8 sps:$4 sm:$0xff]  }
  0x10   : > { %373 = vmatprep.subr.bf16.mxu0 %v2199_v0  ;;  %v2207_v6 = vld [vmem:[%s2909_s2 + $0xb0] ss:$8 sps:$4 sm:$0xff]   ;;  %v2208_v7 = vld [vmem:[%s2909_s2 + $0x34] ss:$8 sps:$4 sm:$0xff]   ;;  %s249_s10 = scalar_select %p248_p6, %s2387_s15, 5  ;;  %552 = vmatprep.subr.bf16.mxu1 %v2204_v4  ;;  %vm362_vm0 = vcmask 785408  }
  0x11   : > { %374 = vmatpush1.bf16.msra.mxu0 %v2201_v1  ;;  %v2210_v8 = vld [vmem:[%s2909_s2 + $0xa4] ss:$8 sps:$4 sm:$0xff]   ;;  %s2155_s13 = smul.u32 30, %s2923_s16  ;;  %553 = vmatpush1.bf16.msra.mxu1 %v2207_v6  ;;  %v2213_v9 = vld [vmem:[%s2909_s2 + $0xa0] ss:$8 sps:$4 sm:$0xff]   ;;  %vm656_vm2 = vcmask 1044480  }
  0x12   : > { %375 = vmatprep.subr.bf16.mxu0 %v2202_v3  ;;  %s2154_s23 = smul.u32 5, %s249_s10  ;;  %554 = vmatprep.subr.bf16.mxu1 %v2210_v8  ;;  %v2212_v10 = vld [vmem:[%s2909_s2 + $0x30] ss:$8 sps:$4 sm:$0xff]   ;;  %v2214_v11 = vld [vmem:[%s2909_s2 + $0x24] ss:$8 sps:$4 sm:$0xff]   ;;  %s2925_s5 = smov (!%p258_p7, %s255_s5), 5 }
  0x13   : > { %v2216_v12 = vld [vmem:[%s2909_s2 + $0x94] ss:$8 sps:$4 sm:$0xff]   ;;  %v2219_v13 = vld [vmem:[%s2909_s2 + $0x90] ss:$8 sps:$4 sm:$0xff]   ;;  %v2218_v14 = vld [vmem:[%s2909_s2 + $0x20] ss:$8 sps:$4 sm:$0xff]  }
  0x14   : > { %s252_s30 = sadd.s32 %s2155_s13, %s2154_s23  ;;  %v2222_v15 = vld [vmem:[%s2909_s2 + $0x84] ss:$8 sps:$4 sm:$0xff]   ;;  %v2220_v16 = vld [vmem:[%s2909_s2 + $0x14] ss:$8 sps:$4 sm:$0xff]   ;;  %v2224_v17 = vld [vmem:[%s2909_s2 + $0x10] ss:$8 sps:$4 sm:$0xff]  }
  0x15   : > { %376 = vmatpush1.bf16.msra.mxu0 %v2206_v5  ;;  %555 = vmatpush1.bf16.msra.mxu1 %v2213_v9  ;;  %s1930_s11 = sshll.u32 %s252_s30, 2  ;;  %v2225_v18 = vld [vmem:[%s2909_s2 + $0x80] ss:$8 sps:$4 sm:$0xff]   ;;  %v2228_v19 = vld [vmem:[%s2909_s2 + $0x74] ss:$8 sps:$4 sm:$0xff]   ;;  %s2156_s12 = smul.u32 5, %s2925_s5 }
  0x16   : > { %377 = vmatprep.subr.bf16.mxu0 %v2208_v7  ;;  %556 = vmatprep.subr.bf16.mxu1 %v2216_v12  ;;  %s2532_s30 = scalar_lea.vmem %s2907_s0, %s1930_s11  ;;  %v2226_v20 = vld [vmem:[%s2909_s2 + $0x4] ss:$8 sps:$4 sm:$0xff]   ;;  %v2231_v21 = vld [vmem:[%s2909_s2 + $0x70] ss:$8 sps:$4 sm:$0xff]   ;;  %v2230_v22 = vld [vmem:[%s2909_s2] ss:$8 sps:$4 sm:$0xff]  }
  0x17   : > { %v2233_v23 = vld [vmem:[%s2909_s2 + $0x64] ss:$8 sps:$4 sm:$0xff]   ;;  %v2237_v25 = vld [vmem:[%s2909_s2 + $0x114] ss:$8 sps:$4 sm:$0xff]   ;;  %v2238_v26 = vld [vmem:[%s2909_s2 + $0x60] ss:$8 sps:$4 sm:$0xff]   ;;  %s262_s6 = sadd.s32 %s2156_s12, %s2155_s13 }
  0x18   : > { %v2232_v24 = vld [vmem:[%s2532_s30] sm:$0xff]   ;;  %v2235_v27 = vld [vmem:[%s2909_s2 + $0x110] ss:$8 sps:$4 sm:$0xff]   ;;  %v2246_v29 = vld [vmem:[%s2532_s30 + $0x8] sm:$0xff]   ;;  %vm461_vm1 = vsmask.f32 7424 }
  0x19   : > { %378 = vmatpush1.bf16.msra.mxu0 %v2212_v10  ;;  %557 = vmatpush1.bf16.msra.mxu1 %v2219_v13  ;;  %v2245_v28 = vld [vmem:[%s2532_s30] sm:$0xff]   ;;  %v2244_v30 = vld [vmem:[%s2909_s2 + $0x174] ss:$8 sps:$4 sm:$0xff]   ;;  %v470_v34 = vshll.u32 %v2246_v29, 16  ;;  %v2242_v38 = vld [vmem:[%s2909_s2 + $0x170] ss:$8 sps:$4 sm:$0xff]  }
  0x1a   : > { %379 = vmatprep.subr.bf16.mxu0 %v2214_v11  ;;  %558 = vmatprep.subr.bf16.mxu1 %v2222_v15  ;;  %v2241_v31 = vld [vmem:[%s2909_s2 + $0x104] ss:$8 sps:$4 sm:$0xff]   ;;  %v463_v32 = vshrl.u32 %v2245_v28, 16  ;;  %v465_v33 = vshll.u32 %v2245_v28, 16  ;;  %v2239_v37 = vld [vmem:[%s2909_s2 + $0x100] ss:$8 sps:$4 sm:$0xff]  }
  0x1b   : > { %v472_v36 = vrot.slane %v470_v34, 1  ;;  %v2249_v40 = vld [vmem:[%s2909_s2 + $0xf4] ss:$8 sps:$4 sm:$0xff]   ;;  %v2247_v41 = vld [vmem:[%s2909_s2 + $0xf0] ss:$8 sps:$4 sm:$0xff]   ;;  %v2253_v44 = vld [vmem:[%s2532_s30 + $0x8] sm:$0xff]  }
  0x1c   : > { %v467_v35 = vrot.slane %v465_v33, 1  ;;  %v2252_v42 = vld [vmem:[%s2909_s2 + $0x164] ss:$8 sps:$4 sm:$0xff]   ;;  %v2250_v45 = vld [vmem:[%s2909_s2 + $0x160] ss:$8 sps:$4 sm:$0xff]   ;;  %v474_v46 = vshrl.u32 %v2246_v29, 16 }
  0x1d   : > { %380 = vmatpush1.bf16.msra.mxu0 %v2218_v14  ;;  %559 = vmatpush1.bf16.msra.mxu1 %v2225_v18  ;;  %v2256_v47 = vld [vmem:[%s2909_s2 + $0xe4] ss:$8 sps:$4 sm:$0xff]   ;;  %v2259_v48 = vld [vmem:[%s2909_s2 + $0x154] ss:$8 sps:$4 sm:$0xff]   ;;  %v2254_v50 = vld [vmem:[%s2909_s2 + $0xe0] ss:$8 sps:$4 sm:$0xff]  }
  0x1e   : > { %381 = vmatprep.subr.bf16.mxu0 %v2220_v16  ;;  %560 = vmatprep.subr.bf16.mxu1 %v2228_v19  ;;  %v468_v39 = vor.u32 %v467_v35, %v463_v32  ;;  %v2266_v49 = vld [vmem:[%s2532_s30 + $0x10] ss:$0 sps:$4 sm:$0x11]   ;;  %v2262_v52 = vld [vmem:[%s2909_s2 + $0xd4] ss:$8 sps:$4 sm:$0xff]   ;;  %v476_v54 = vor.u32 %v474_v46, %v472_v36  ;;  %v2612_v58 = vld [vmem:[%s2532_s30 + $0x8] sm:$0xff]  }
  0x1f   : > { %v2257_v51 = vld [vmem:[%s2909_s2 + $0x150] ss:$8 sps:$4 sm:$0xff]   ;;  %v2265_v53 = vld [vmem:[%s2909_s2 + $0x144] ss:$8 sps:$4 sm:$0xff]   ;;  %v478_v55 = vshll.u32 %v2266_v49, 16  ;;  %v658_v4 = vrot.slane %v2612_v58, 3 }
  0x20   : > { %v473_v43 = vsel %vm461_vm1, %v468_v39, %v472_v36  ;;  %v2273_v57 = vld [vmem:[%s2532_s30] sm:$0xf8]   ;;  %v2260_v59 = vld [vmem:[%s2909_s2 + $0xd0] ss:$8 sps:$4 sm:$0xff]   ;;  %v2272_v0 = vld [vmem:[%s2909_s2 + $0x134] ss:$8 sps:$4 sm:$0xff]  }
  0x21   : > { %382 = vmatpush1.bf16.msra.mxu0 %v2224_v17  ;;  %561 = vmatpush1.bf16.msra.mxu1 %v2231_v21  ;;  %v480_v56 = vrot.slane %v478_v55, 1  ;;  %v2263_v61 = vld [vmem:[%s2909_s2 + $0x140] ss:$8 sps:$4 sm:$0xff]   ;;  %v2269_v62 = vld [vmem:[%s2909_s2 + $0xc4] ss:$8 sps:$4 sm:$0xff]   ;;  %v657_v3 = vrot.slane %v2273_v57, 3 }
  0x22   : > { %383 = vmatprep.subr.bf16.mxu0 %v2226_v20  ;;  %562 = vmatprep.subr.bf16.mxu1 %v2233_v23  ;;  %v2267_v63 = vld [vmem:[%s2909_s2 + $0xc0] ss:$8 sps:$4 sm:$0xff]   ;;  %v2270_v1 = vld [vmem:[%s2909_s2 + $0x130] ss:$8 sps:$4 sm:$0xff]   ;;  %v2280_v5 = vld [vmem:[%s2909_s2 + $0x1d4] ss:$8 sps:$4 sm:$0xff]  }
  0x23   : > { %v481_v60 = vsel %vm461_vm1, %v476_v54, %v480_v56  ;;  %v2287_v6 = vld [vmem:[%s2532_s30] sm:$0xf8]   ;;  %v2288_v8 = vld [vmem:[%s2532_s30 + $0x8] sm:$0xff]   ;;  %v2278_v10 = vld [vmem:[%s2909_s2 + $0x1d0] ss:$8 sps:$4 sm:$0xff]   ;;  %v659_v13 = vsel %vm656_vm2, %v657_v3, %v658_v4  ;;  %s1931_s12 = sshll.u32 %s262_s6, 2 }
  0x24   : > { %v2277_v7 = vld [vmem:[%s2909_s2 + $0x124] ss:$8 sps:$4 sm:$0xff]   ;;  %v2275_v9 = vld [vmem:[%s2909_s2 + $0x120] ss:$8 sps:$4 sm:$0xff]   ;;  %v838_v11 = vshrl.u32 %v2287_v6, 16  ;;  %v841_v12 = vshll.u32 %v2287_v6, 16  ;;  %s2690_s28 = scalar_lea.vmem %s2908_s1, %s1931_s12 }
  0x25   : > { %384 = vmatpush1.bf16.msra.mxu0 %v2230_v22  ;;  %563 = vmatpush1.bf16.msra.mxu1 %v2238_v26  ;;  %v846_v14 = vshrl.u32 %v2288_v8, 16  ;;  %v849_v15 = vshll.u32 %v2288_v8, 16  ;;  %v2289_v16 = vld [vmem:[%s2532_s30 + $0x10] ss:$0 sps:$4 sm:$0x77]   ;;  %s2927_s15 = smov (!%p268_p8, %s2387_s15), 4 }
  0x26   : > { %732 = vmatprep.subr.bf16.mxu0 %v2237_v25  ;;  %933 = vmatprep.subr.bf16.mxu1 %v2244_v30  ;;  %v2283_v17 = vld [vmem:[%s2909_s2 + $0x1c4] ss:$8 sps:$4 sm:$0xff]   ;;  %v840_v18 = vrot.slane %v838_v11, 3  ;;  %v843_v19 = vrot.slane %v841_v12, 4  ;;  %v2286_v20 = vld [vmem:[%s2909_s2 + $0x234] ss:$8 sps:$4 sm:$0xff]  }
  0x27   : > { %v848_v21 = vrot.slane %v846_v14, 3  ;;  %v851_v22 = vrot.slane %v849_v15, 4  ;;  %vm836_vm3 = vsmask.f32 4352  ;;  %v660_v26 = vrot.slane %v2289_v16, 3  ;;  %s1932_s8 = sshll.u32 %s2927_s15, 3 }
  0x28   : > { %1948 = vmatmul.mubr.msk.bf16.vlgmr.msra.gmra.mxu0 %vm362_vm0, %v2232_v24  ;;  %1977 = vmatmul.mubr.msk.bf16.vlgmr.msra.gmra.mxu1 %vm362_vm0, %v473_v43  ;;  %v844_v23 = vor.u32 %v843_v19, %v840_v18  ;;  %v2281_v24 = vld [vmem:[%s2909_s2 + $0x1c0] ss:$8 sps:$4 sm:$0xff]   ;;  %v2292_v28 = vld [vmem:[%s2909_s2 + $0x1b4] ss:$8 sps:$4 sm:$0xff]   ;;  %v2295_v30 = vld [vmem:[%s2909_s2 + $0x224] ss:$8 sps:$4 sm:$0xff]  }
  0x29   : > { %733 = vmatpush1.bf16.msra.mxu0 %v2235_v27  ;;  %411 = vmatprep.mubr.bf16.mxu0 %v2405_v2  ;;  %v852_v25 = vor.u32 %v851_v22, %v848_v21  ;;  %v2284_v27 = vld [vmem:[%s2909_s2 + $0x230] ss:$8 sps:$4 sm:$0xff]   ;;  %v661_v33 = vsel %vm656_vm2, %v658_v4, %v660_v26  ;;  %v2293_v34 = vld [vmem:[%s2909_s2 + $0x220] ss:$8 sps:$4 sm:$0xff]   ;;  %v2298_v35 = vld [vmem:[%s2909_s2 + $0x1a4] ss:$8 sps:$4 sm:$0xff]  }
  0x2a   : > { %734 = vmatprep.subr.bf16.mxu0 %v2241_v31  ;;  %934 = vmatpush1.bf16.msra.mxu1 %v2242_v38  ;;  %v2290_v31 = vld [vmem:[%s2909_s2 + $0x1b0] ss:$8 sps:$4 sm:$0xff]   ;;  %v2301_v38 = vld [vmem:[%s2909_s2 + $0x214] ss:$8 sps:$4 sm:$0xff]   ;;  %v2311_v49 = vld [vmem:[%s2909_s2 + $0x184] ss:$8 sps:$4 sm:$0xff]  }
  0x2b   : > { %935 = vmatprep.subr.bf16.mxu1 %v2252_v42  ;;  %590 = vmatprep.mubr.bf16.mxu1 %v2405_v2  ;;  %v853_v29 = vsel %vm836_vm3, %v844_v23, %v852_v25  ;;  %v2308_v32 = vld [vmem:[%s2532_s30 + $0x10] ss:$0 sps:$4 sm:$0xff]   ;;  %v2304_v43 = vld [vmem:[%s2909_s2 + $0x194] ss:$8 sps:$4 sm:$0xff]   ;;  %v2322_v6 = vld [vmem:[%s2909_s2 + $0x280] ss:$8 sps:$4 sm:$0xff]  }
  0x2c   : > { %v855_v36 = vshrl.u32 %v2308_v32, 16  ;;  %v2299_v42 = vld [vmem:[%s2909_s2 + $0x210] ss:$8 sps:$4 sm:$0xff]   ;;  %v2321_v56 = vld [vmem:[%s2909_s2 + $0x294] ss:$8 sps:$4 sm:$0xff]  }
  0x2d   : > { %735 = vmatpush1.bf16.msra.mxu0 %v2239_v37  ;;  %v858_v37 = vshll.u32 %v2308_v32, 16  ;;  %v2302_v46 = vld [vmem:[%s2909_s2 + $0x190] ss:$8 sps:$4 sm:$0xff]   ;;  %v2336_v12 = vld [vmem:[%s2909_s2 + $0x2e4] ss:$8 sps:$4 sm:$0xff]  }
  0x2e   : > { %736 = vmatprep.subr.bf16.mxu0 %v2249_v40  ;;  %936 = vmatpush1.bf16.msra.mxu1 %v2250_v45  ;;  %v857_v39 = vrot.slane %v855_v36, 3  ;;  %v2307_v45 = vld [vmem:[%s2909_s2 + $0x204] ss:$8 sps:$4 sm:$0xff]   ;;  %v2312_v54 = vld [vmem:[%s2909_s2 + $0x1f0] ss:$8 sps:$4 sm:$0xff]  }
  0x2f   : > { %937 = vmatprep.subr.bf16.mxu1 %v2259_v48  ;;  %v860_v40 = vrot.slane %v858_v37, 4  ;;  %v2331_v14 = vld [vmem:[%s2909_s2 + $0x270] ss:$8 sps:$4 sm:$0xff]   ;;  %v2334_v15 = vld [vmem:[%s2909_s2 + $0x2e0] ss:$8 sps:$4 sm:$0xff]  }
  0x30   : > { %1949 = vmatmul.mubr.msk.bf16.gmra.mxu0 %vm362_vm0, %v2253_v44  ;;  %1978 = vmatmul.mubr.msk.bf16.gmra.mxu1 %vm362_vm0, %v481_v60  ;;  %v2318_v60 = vld [vmem:[%s2909_s2 + $0x1e4] ss:$8 sps:$4 sm:$0xff]   ;;  %v2337_v19 = vld [vmem:[%s2909_s2 + $0x260] ss:$8 sps:$4 sm:$0xff]   ;;  %v2340_v21 = vld [vmem:[%s2909_s2 + $0x2d0] ss:$8 sps:$4 sm:$0xff]  }
  0x31   : > { %737 = vmatpush1.bf16.msra.mxu0 %v2247_v41  ;;  %760 = vmatprep.mubr.bf16.mxu0 %v2405_v2  ;;  %v2296_v41 = vld [vmem:[%s2909_s2 + $0x1a0] ss:$8 sps:$4 sm:$0xff]   ;;  %v861_v44 = vor.u32 %v860_v40, %v857_v39  ;;  %v2339_v16 = vld [vmem:[%s2909_s2 + $0x264] ss:$8 sps:$4 sm:$0xff]   ;;  %v2346_v22 = vld [vmem:[%s2909_s2 + $0x254] ss:$8 sps:$4 sm:$0xff]  }
  0x32   : > { %738 = vmatprep.subr.bf16.mxu0 %v2256_v47  ;;  %938 = vmatpush1.bf16.msra.mxu1 %v2257_v51  ;;  %v2305_v47 = vld [vmem:[%s2909_s2 + $0x200] ss:$8 sps:$4 sm:$0xff]   ;;  %v2349_v26 = vld [vmem:[%s2909_s2 + $0x2c4] ss:$8 sps:$4 sm:$0xff]   ;;  %v2355_v36 = vld [vmem:[%s2909_s2 + $0x2b4] ss:$8 sps:$4 sm:$0xff]  }
  0x33   : > { %939 = vmatprep.subr.bf16.mxu1 %v2265_v53  ;;  %961 = vmatprep.mubr.bf16.mxu1 %v2405_v2  ;;  %v862_v48 = vsel %vm836_vm3, %v852_v25, %v861_v44  ;;  %v2309_v51 = vld [vmem:[%s2909_s2 + $0x180] ss:$8 sps:$4 sm:$0xff]  }
  0x34   : > { %v2329_v53 = vld [vmem:[%s2690_s28 + $0x8] sm:$0xff]  }
  0x35   : > { %739 = vmatpush1.bf16.msra.mxu0 %v2254_v50  ;;  %v2314_v50 = vld [vmem:[%s2909_s2 + $0x1f4] ss:$8 sps:$4 sm:$0xff]   ;;  %v1215_v58 = vshll.u32 %v2329_v53, 16  ;;  %v2362_v25 = vld [vmem:[%s2690_s28 + $0x8] sm:$0xff]  }
  0x36   : > { %740 = vmatprep.subr.bf16.mxu0 %v2262_v52  ;;  %940 = vmatpush1.bf16.msra.mxu1 %v2263_v61  ;;  %v2328_v52 = vld [vmem:[%s2690_s28] sm:$0xff]  }
  0x37   : > { %941 = vmatprep.subr.bf16.mxu1 %v2272_v0  ;;  %v1210_v55 = vshll.u32 %v2328_v52, 16  ;;  %v1208_v57 = vshrl.u32 %v2328_v52, 16  ;;  %v2324_v0 = vld [vmem:[%s2909_s2 + $0x284] ss:$8 sps:$4 sm:$0xff]   ;;  %v1217_v4 = vrot.slane %v1215_v58, 1 }
  0x38   : > { %v2350_v37 = vld [vmem:[%s2909_s2 + $0x240] ss:$8 sps:$4 sm:$0xff]  }
  0x39   : > { %741 = vmatpush1.bf16.msra.mxu0 %v2260_v59  ;;  %v2315_v59 = vld [vmem:[%s2690_s28] sm:$0xff]   ;;  %v1212_v61 = vrot.slane %v1210_v55, 1 }
  0x3a   : > { %742 = vmatprep.subr.bf16.mxu0 %v2269_v62  ;;  %942 = vmatpush1.bf16.msra.mxu1 %v2270_v1  ;;  %v2316_v62 = vld [vmem:[%s2909_s2 + $0x1e0] ss:$8 sps:$4 sm:$0xff]   ;;  %v2327_v1 = vld [vmem:[%s2909_s2 + $0x2f4] ss:$8 sps:$4 sm:$0xff]  }
  0x3b   : > { %943 = vmatprep.subr.bf16.mxu1 %v2277_v7  ;;  %v1213_v3 = vor.u32 %v1212_v61, %v1208_v57  ;;  %v2325_v7 = vld [vmem:[%s2909_s2 + $0x2f0] ss:$8 sps:$4 sm:$0xff]  }
  0x3d   : > { %743 = vmatpush1.bf16.msra.mxu0 %v2267_v63  ;;  %v2319_v63 = vld [vmem:[%s2909_s2 + $0x290] ss:$8 sps:$4 sm:$0xff]   ;;  %v1218_v8 = vsel %vm461_vm1, %v1213_v3, %v1217_v4 }
  0x3e   : > { %1103 = vmatprep.subr.bf16.mxu0 %v2280_v5  ;;  %944 = vmatpush1.bf16.msra.mxu1 %v2275_v9  ;;  %v2343_v5 = vld [vmem:[%s2690_s28 + $0x10] ss:$0 sps:$4 sm:$0x11]   ;;  %v2333_v9 = vld [vmem:[%s2909_s2 + $0x274] ss:$8 sps:$4 sm:$0xff]  }
  0x3f   : > { %1297 = vmatprep.subr.bf16.mxu1 %v2286_v20  ;;  %v1223_v11 = vshll.u32 %v2343_v5, 16  ;;  %v2342_v20 = vld [vmem:[%s2909_s2 + $0x2d4] ss:$8 sps:$4 sm:$0xff]  }
  0x40   : > { %2006 = vmatmul.mubr.msk.bf16.vlgmr.msra.gmra.mxu0 %vm362_vm0, %v659_v13  ;;  %v2330_v13 = vld [vmem:[%s2690_s28 + $0x8] sm:$0xff]  }
  0x41   : > { %1104 = vmatpush1.bf16.msra.mxu0 %v2278_v10  ;;  %770 = vmatprep.mubr.bf16.mxu0 %v2405_v2  ;;  %v1219_v10 = vshrl.u32 %v2329_v53, 16  ;;  %v1225_v18 = vrot.slane %v1223_v11, 1 }
  0x42   : > { %1105 = vmatprep.subr.bf16.mxu0 %v2283_v17  ;;  %2035 = vmatmul.mubr.msk.bf16.vlgmr.msra.gmra.mxu1 %vm362_vm0, %v853_v29  ;;  %v2356_v29 = vld [vmem:[%s2690_s28] sm:$0xf8]  }
  0x43   : > { %1298 = vmatpush1.bf16.msra.mxu1 %v2284_v27  ;;  %971 = vmatprep.mubr.bf16.mxu1 %v2405_v2  ;;  %v1221_v17 = vor.u32 %v1219_v10, %v1217_v4  ;;  %v2344_v27 = vld [vmem:[%s2909_s2 + $0x250] ss:$8 sps:$4 sm:$0xff]   ;;  %v1401_v39 = vrot.slane %v2356_v29, 3 }
  0x44   : > { %1299 = vmatprep.subr.bf16.mxu1 %v2295_v30  ;;  %v2357_v30 = vld [vmem:[%s2690_s28 + $0x8] sm:$0xff]  }
  0x45   : > { %1106 = vmatpush1.bf16.msra.mxu0 %v2281_v24  ;;  %v1226_v23 = vsel %vm461_vm1, %v1221_v17, %v1225_v18  ;;  %v2361_v24 = vld [vmem:[%s2690_s28] sm:$0xf8]   ;;  %v1402_v40 = vrot.slane %v2357_v30, 3 }
  0x46   : > { %1107 = vmatprep.subr.bf16.mxu0 %v2292_v28  ;;  %v2347_v28 = vld [vmem:[%s2909_s2 + $0x2c0] ss:$8 sps:$4 sm:$0xff]   ;;  %v1581_v32 = vshrl.u32 %v2361_v24, 16 }
  0x47   : > { %1300 = vmatpush1.bf16.msra.mxu1 %v2293_v34  ;;  %v1589_v34 = vshrl.u32 %v2362_v25, 16 }
  0x48   : > { %2007 = vmatmul.mubr.msk.bf16.gmra.mxu0 %vm362_vm0, %v661_v33  ;;  %1301 = vmatprep.subr.bf16.mxu1 %v2301_v38  ;;  %v1584_v33 = vshll.u32 %v2361_v24, 16  ;;  %v2353_v38 = vld [vmem:[%s2909_s2 + $0x2b0] ss:$8 sps:$4 sm:$0xff]  }
  0x49   : > { %1108 = vmatpush1.bf16.msra.mxu0 %v2290_v31  ;;  %1131 = vmatprep.mubr.bf16.mxu0 %v2405_v2  ;;  %v2352_v31 = vld [vmem:[%s2909_s2 + $0x244] ss:$8 sps:$4 sm:$0xff]  }
  0x4a   : > { %1109 = vmatprep.subr.bf16.mxu0 %v2298_v35  ;;  %2036 = vmatmul.mubr.msk.bf16.gmra.mxu1 %vm362_vm0, %v862_v48  ;;  %v1592_v35 = vshll.u32 %v2362_v25, 16  ;;  %v2363_v48 = vld [vmem:[%s2690_s28 + $0x10] ss:$0 sps:$4 sm:$0x77]  }
  0x4b   : > { %1302 = vmatpush1.bf16.msra.mxu1 %v2299_v42  ;;  %1325 = vmatprep.mubr.bf16.mxu1 %v2405_v2  ;;  %v1586_v42 = vrot.slane %v1584_v33, 4 }
  0x4c   : > { %1303 = vmatprep.subr.bf16.mxu1 %v2307_v45  ;;  %v1594_v44 = vrot.slane %v1592_v35, 4  ;;  %v2364_v45 = vld [vmem:[%s2690_s28 + $0x10] ss:$0 sps:$4 sm:$0xff]   ;;  %s2157_s28 = smul.u32 40, %s2923_s16 }
  0x4d   : > { %1110 = vmatpush1.bf16.msra.mxu0 %v2296_v41  ;;  %v1583_v41 = vrot.slane %v1581_v32, 3  ;;  %v1598_v52 = vshrl.u32 %v2364_v45, 16  ;;  %v1601_v53 = vshll.u32 %v2364_v45, 16  ;;  %v1759_v45 = vlaneseq }
  0x4e   : > { %1111 = vmatprep.subr.bf16.mxu0 %v2304_v43  ;;  %v1591_v43 = vrot.slane %v1589_v34, 3  ;;  %s272_s16 = sadd.s32 %s2157_s28, %s1932_s8 }
  0x4f   : > { %1304 = vmatpush1.bf16.msra.mxu1 %v2305_v47  ;;  %v1403_v47 = vsel %vm656_vm2, %v1401_v39, %v1402_v40  ;;  %v1603_v57 = vrot.slane %v1601_v53, 4  ;;  %s1933_s15 = sshll.u32 %s272_s16, 3 }
  0x50   : > { %1305 = vmatprep.subr.bf16.mxu1 %v2314_v50  ;;  %v1587_v50 = vor.u32 %v1586_v42, %v1583_v41  ;;  %s2875_s12 = scalar_lea.vmem %s2911_s4, %s1933_s15 }
  0x51   : > { %1112 = vmatpush1.bf16.msra.mxu0 %v2302_v46  ;;  %v2360_v46 = vld [vmem:[%s2909_s2 + $0x2a4] ss:$8 sps:$4 sm:$0xff]  }
  0x52   : > { %1113 = vmatprep.subr.bf16.mxu0 %v2311_v49  ;;  %v2358_v49 = vld [vmem:[%s2909_s2 + $0x2a0] ss:$8 sps:$4 sm:$0xff]  }
  0x53   : > { %1306 = vmatpush1.bf16.msra.mxu1 %v2312_v54  ;;  %v1404_v54 = vrot.slane %v2363_v48, 3 }
  0x54   : > { %1307 = vmatprep.subr.bf16.mxu1 %v2318_v60 }
  0x55   : > { %1114 = vmatpush1.bf16.msra.mxu0 %v2309_v51  ;;  %v1595_v51 = vor.u32 %v1594_v44, %v1591_v43  ;;  %v1405_v58 = vsel %vm656_vm2, %v1402_v40, %v1404_v54  ;;  %v1760_v54 = vshrl.u32 %v1759_v45, 7 }
  0x56   : > { %1476 = vmatprep.subr.bf16.mxu0 %v2321_v56  ;;  %v1600_v56 = vrot.slane %v1598_v52, 3 }
  0x57   : > { %1308 = vmatpush1.bf16.msra.mxu1 %v2316_v62  ;;  %v1596_v55 = vsel %vm836_vm3, %v1587_v50, %v1595_v51 }
  0x58   : > { %2063 = vmatmul.mubr.msk.bf16.vlgmr.msra.gmra.mxu0 %vm362_vm0, %v2315_v59  ;;  %1676 = vmatprep.subr.bf16.mxu1 %v2327_v1  ;;  %v1604_v59 = vor.u32 %v1603_v57, %v1600_v56 }
  0x59   : > { %1477 = vmatpush1.bf16.msra.mxu0 %v2319_v63  ;;  %1141 = vmatprep.mubr.bf16.mxu0 %v2405_v2 }
  0x5a   : > { %1478 = vmatprep.subr.bf16.mxu0 %v2324_v0  ;;  %2092 = vmatmul.mubr.msk.bf16.vlgmr.msra.gmra.mxu1 %vm362_vm0, %v1218_v8  ;;  %v1605_v60 = vsel %vm836_vm3, %v1595_v51, %v1604_v59 }
  0x5b   : > { %1677 = vmatpush1.bf16.msra.mxu1 %v2325_v7  ;;  %1335 = vmatprep.mubr.bf16.mxu1 %v2405_v2 }
  0x5c   : > { %1678 = vmatprep.subr.bf16.mxu1 %v2336_v12 }
  0x5d   : > { %1479 = vmatpush1.bf16.msra.mxu0 %v2322_v6 }
  0x5e   : > { %1480 = vmatprep.subr.bf16.mxu0 %v2333_v9 }
  0x5f   : > { %1679 = vmatpush1.bf16.msra.mxu1 %v2334_v15 }
  0x60   : > { %2064 = vmatmul.mubr.msk.bf16.gmra.mxu0 %vm362_vm0, %v2330_v13  ;;  %1680 = vmatprep.subr.bf16.mxu1 %v2342_v20 }
  0x61   : > { %1481 = vmatpush1.bf16.msra.mxu0 %v2331_v14  ;;  %1504 = vmatprep.mubr.bf16.mxu0 %v2405_v2 }
  0x62   : > { %1482 = vmatprep.subr.bf16.mxu0 %v2339_v16  ;;  %2093 = vmatmul.mubr.msk.bf16.gmra.mxu1 %vm362_vm0, %v1226_v23 }
  0x63   : > { %1681 = vmatpush1.bf16.msra.mxu1 %v2340_v21  ;;  %1704 = vmatprep.mubr.bf16.mxu1 %v2405_v2 }
  0x64   : > { %1682 = vmatprep.subr.bf16.mxu1 %v2349_v26 }
  0x65   : > { %1483 = vmatpush1.bf16.msra.mxu0 %v2337_v19 }
  0x66   : > { %1484 = vmatprep.subr.bf16.mxu0 %v2346_v22 }
  0x67   : > { %1683 = vmatpush1.bf16.msra.mxu1 %v2347_v28 }
  0x68   : > { %1684 = vmatprep.subr.bf16.mxu1 %v2355_v36 }
  0x69   : > { %1485 = vmatpush1.bf16.msra.mxu0 %v2344_v27 }
  0x6a   : > { %1486 = vmatprep.subr.bf16.mxu0 %v2352_v31 }
  0x6b   : > { %1685 = vmatpush1.bf16.msra.mxu1 %v2353_v38 }
  0x6c   : > { %1686 = vmatprep.subr.bf16.mxu1 %v2360_v46 }
  0x6d   : > { %1487 = vmatpush1.bf16.msra.mxu0 %v2350_v37 }
  0x6f   : > { %1687 = vmatpush1.bf16.msra.mxu1 %v2358_v49 }
  0x70   : > { %2121 = vmatmul.mubr.msk.bf16.vlgmr.msra.gmra.mxu0 %vm362_vm0, %v1403_v47 }
  0x71   : > { %1514 = vmatprep.mubr.bf16.mxu0 %v2405_v2 }
  0x72   : > { %2150 = vmatmul.mubr.msk.bf16.vlgmr.msra.gmra.mxu1 %vm362_vm0, %v1596_v55 }
  0x73   : > { %1714 = vmatprep.mubr.bf16.mxu1 %v2405_v2 }
  0x78   : > { %2122 = vmatmul.mubr.msk.bf16.gmra.mxu0 %vm362_vm0, %v1405_v58 }
  0x7a   : > { %2151 = vmatmul.mubr.msk.bf16.gmra.mxu1 %vm362_vm0, %v1605_v60 }
  0xe8   : > { %v403_v61 = vpop.f32.mrf.mxu0  ;;  %v582_v0 = vpop.f32.mrf.mxu1 }
  0xe9   : > { %v609_v37 = vadd.f32 %v582_v0, %v403_v61 }
  0xea   : > { %v405_v62 = vpop.f32.mrf.mxu0  ;;  %v584_v1 = vpop.f32.mrf.mxu1 }
  0xeb   : > { %v610_v39 = vadd.f32 %v584_v1, %v405_v62 }
  0xec   : > { %v407_v63 = vpop.f32.mrf.mxu0  ;;  %v586_v4 = vpop.f32.mrf.mxu1 }
  0xed   : > { %v611_v43 = vadd.f32 %v586_v4, %v407_v63  ;;  %v1761_v4 = vsub.s32 0, %v1760_v54 }
  0xee   : > { %v409_v3 = vpop.f32.mrf.mxu0  ;;  %v588_v6 = vpop.f32.mrf.mxu1 }
  0xef   : > { %v612_v49 = vadd.f32 %v588_v6, %v409_v3 }
  0xf0   : > { %v413_v5 = vpop.f32.mrf.mxu0  ;;  %v592_v8 = vpop.f32.mrf.mxu1 }
  0xf1   : > { %v613_v50 = vadd.f32 %v592_v8, %v413_v5 }
  0xf2   : > { %v415_v7 = vpop.f32.mrf.mxu0  ;;  %v594_v2 = vpop.f32.mrf.mxu1 }
  0xf3   : > { %v614_v55 = vadd.f32 %v594_v2, %v415_v7  ;;  %v1757_v7 = vld [vmem:[%s2910_s3] sm:$0x3] }
  0xf4   : > { %v417_v9 = vpop.f32.mrf.mxu0  ;;  %v596_v11 = vpop.f32.mrf.mxu1 }
  0xf5   : > { %v615_v61 = vadd.f32 %v596_v11, %v417_v9 }
  0xf6   : > { %v2843_v10 = vpop.f32.mrf.mxu0  ;;  %v2845_v14 = vpop.f32.mrf.mxu1 }
  0xf7   : > { %v616_v9 = vadd.f32 %v2845_v14, %v2843_v10 }
 0x100   : > { %v762_v12 = vpop.f32.mrf.mxu0 }
 0x101   : > { %v789_v40 = vadd.f32 %v762_v12, %v609_v37 }
 0x102   : > { %v764_v13 = vpop.f32.mrf.mxu0  ;;  %v963_v16 = vpop.f32.mrf.mxu1 }
 0x103   : > { %v790_v44 = vadd.f32 %v764_v13, %v610_v39  ;;  %v990_v47 = vadd.f32 %v963_v16, %v789_v40 }
 0x104   : > { %v766_v15 = vpop.f32.mrf.mxu0  ;;  %v965_v18 = vpop.f32.mrf.mxu1 }
 0x105   : > { %v791_v46 = vadd.f32 %v766_v15, %v611_v43  ;;  %v991_v52 = vadd.f32 %v965_v18, %v790_v44  ;;  %v1765_v15 = vsub.s32 1, %v1760_v54 }
 0x106   : > { %v768_v17 = vpop.f32.mrf.mxu0  ;;  %v967_v19 = vpop.f32.mrf.mxu1 }
 0x107   : > { %v792_v56 = vadd.f32 %v768_v17, %v612_v49  ;;  %v992_v58 = vadd.f32 %v967_v19, %v791_v46  ;;  %v2868_v10 = vrot.slane %v1757_v7, %v1765_v15 }
 0x108   : > { %v772_v20 = vpop.f32.mrf.mxu0  ;;  %v969_v21 = vpop.f32.mrf.mxu1 }
 0x109   : > { %v793_v57 = vadd.f32 %v772_v20, %v613_v50  ;;  %v993_v5 = vadd.f32 %v969_v21, %v792_v56 }
 0x10a   : > { %v774_v22 = vpop.f32.mrf.mxu0  ;;  %v973_v23 = vpop.f32.mrf.mxu1 }
 0x10b   : > { %v794_v62 = vadd.f32 %v774_v22, %v614_v55  ;;  %v994_v8 = vadd.f32 %v973_v23, %v793_v57  ;;  %v2864_v22 = vrot.slane %v1757_v7, %v1761_v4 }
 0x10c   : > { %v776_v24 = vpop.f32.mrf.mxu0  ;;  %v975_v25 = vpop.f32.mrf.mxu1 }
 0x10d   : > { %v795_v6 = vadd.f32 %v776_v24, %v615_v61  ;;  %v995_v11 = vadd.f32 %v975_v25, %v794_v62 }
 0x10e   : > { %v2847_v26 = vpop.f32.mrf.mxu0  ;;  %v2849_v27 = vpop.f32.mrf.mxu1 }
 0x10f   : > { %v796_v23 = vadd.f32 %v2847_v26, %v616_v9  ;;  %v996_v24 = vadd.f32 %v2849_v27, %v795_v6 }
 0x110   : > { %v2851_v30 = vpop.f32.mrf.mxu1 }
 0x111   : > { %v997_v26 = vadd.f32 %v2851_v30, %v796_v23 }
 0x118   : > { %v1133_v28 = vpop.f32.mrf.mxu0 }
 0x119   : > { %v1160_v53 = vadd.f32 %v1133_v28, %v990_v47 }
 0x11a   : > { %v1135_v29 = vpop.f32.mrf.mxu0  ;;  %v1327_v32 = vpop.f32.mrf.mxu1 }
 0x11b   : > { %v1161_v59 = vadd.f32 %v1135_v29, %v991_v52  ;;  %v1354_v1 = vadd.f32 %v1327_v32, %v1160_v53 }
 0x11c   : > { %v1137_v31 = vpop.f32.mrf.mxu0  ;;  %v1329_v34 = vpop.f32.mrf.mxu1 }
 0x11d   : > { %v1162_v0 = vadd.f32 %v1137_v31, %v992_v58  ;;  %v1355_v2 = vadd.f32 %v1329_v34, %v1161_v59 }
 0x11e   : > { %v1139_v33 = vpop.f32.mrf.mxu0  ;;  %v1331_v35 = vpop.f32.mrf.mxu1 }
 0x11f   : > { %v1163_v16 = vadd.f32 %v1139_v33, %v993_v5  ;;  %v1356_v19 = vadd.f32 %v1331_v35, %v1162_v0 }
 0x120   : > { %v1143_v36 = vpop.f32.mrf.mxu0  ;;  %v1333_v38 = vpop.f32.mrf.mxu1 }
 0x121   : > { %v1164_v17 = vadd.f32 %v1143_v36, %v994_v8  ;;  %v1357_v14 = vadd.f32 %v1333_v38, %v1163_v16 }
 0x122   : > { %v1145_v41 = vpop.f32.mrf.mxu0  ;;  %v1337_v42 = vpop.f32.mrf.mxu1 }
 0x123   : > { %v1165_v28 = vadd.f32 %v1145_v41, %v995_v11  ;;  %v1358_v33 = vadd.f32 %v1337_v42, %v1164_v17 }
 0x124   : > { %v1147_v48 = vpop.f32.mrf.mxu0  ;;  %v1339_v51 = vpop.f32.mrf.mxu1 }
 0x125   : > { %v1166_v25 = vadd.f32 %v1147_v48, %v996_v24  ;;  %v1359_v40 = vadd.f32 %v1339_v51, %v1165_v28 }
 0x126   : > { %v1149_v60 = vpop.f32.mrf.mxu0  ;;  %v1341_v63 = vpop.f32.mrf.mxu1 }
 0x127   : > { %v1167_v46 = vadd.f32 %v1149_v60, %v997_v26  ;;  %v1360_v47 = vadd.f32 %v1341_v63, %v1166_v25 }
 0x128   : > { %v1343_v18 = vpop.f32.mrf.mxu1 }
 0x129   : > { %v1361_v60 = vadd.f32 %v1343_v18, %v1167_v46 }
 0x130   : > { %v1506_v3 = vpop.f32.mrf.mxu0 }
 0x131   : > { %v1533_v12 = vadd.f32 %v1506_v3, %v1354_v1 }
 0x132   : > { %v1508_v13 = vpop.f32.mrf.mxu0  ;;  %v1706_v29 = vpop.f32.mrf.mxu1 }
 0x133   : > { %v1534_v20 = vadd.f32 %v1508_v13, %v1355_v2  ;;  %v1733_v32 = vadd.f32 %v1706_v29, %v1533_v12 }
 0x134   : > { %v1510_v21 = vpop.f32.mrf.mxu0  ;;  %v1708_v35 = vpop.f32.mrf.mxu1 }
 0x135   : > { %v1535_v31 = vadd.f32 %v1510_v21, %v1356_v19  ;;  %v1769_v36 = vadd.f32 %v2864_v22, %v1733_v32  ;;  %v1734_v37 = vadd.f32 %v1708_v35, %v1534_v20 }
 0x136   : > { %v1512_v34 = vpop.f32.mrf.mxu0  ;;  %v1710_v43 = vpop.f32.mrf.mxu1 }
 0x137   : > { %v1536_v27 = vadd.f32 %v1512_v34, %v1357_v14  ;;  %vm1777_vm4 = vcmp.ge.f32.partialorder %v1769_v36, 0.0  ;;  %v1785_v38 = vmul.f32 0.01, %v1769_v36  ;;  %v1770_v42 = vadd.f32 %v2868_v10, %v1734_v37 }
 0x138   : > { %v1516_v39 = vpop.f32.mrf.mxu0  ;;  %v1735_v44 = vadd.f32 %v1710_v43, %v1535_v31  ;;  %v1712_v30 = vpop.f32.mrf.mxu1 }
 0x139   : > { %v1537_v41 = vadd.f32 %v1516_v39, %v1358_v33  ;;  %v1793_v49 = vsel %vm1777_vm4, %v1769_v36, %v1785_v38  ;;  %vm1778_vm5 = vcmp.ge.f32.partialorder %v1770_v42, 0.0  ;;  %v1786_v50 = vmul.f32 0.01, %v1770_v42 }
 0x13a   : > { %v1518_v45 = vpop.f32.mrf.mxu0  ;;  %v1771_v51 = vadd.f32 %v2864_v22, %v1735_v44  ;;  %1801 = vst [vmem:[%s2875_s12] sm:$0xff] %v1793_v49  ;;  %v1736_v53 = vadd.f32 %v1712_v30, %v1536_v27  ;;  %v1716_v55 = vpop.f32.mrf.mxu1 }
 0x13b   : > { %v1538_v48 = vadd.f32 %v1518_v45, %v1359_v40  ;;  %v1794_v56 = vsel %vm1778_vm5, %v1770_v42, %v1786_v50  ;;  %v1737_v58 = vadd.f32 %v1716_v55, %v1537_v41 }
 0x13c   : > { %v1520_v52 = vpop.f32.mrf.mxu0  ;;  %vm1779_vm6 = vcmp.ge.f32.partialorder %v1771_v51, 0.0  ;;  %v1787_v57 = vmul.f32 0.01, %v1771_v51  ;;  %1802 = vst [vmem:[%s2875_s12 + $0x8] sm:$0xff] %v1794_v56  ;;  %v1772_v61 = vadd.f32 %v2868_v10, %v1736_v53  ;;  %v1718_v62 = vpop.f32.mrf.mxu1 }
 0x13d   : > { %v1539_v54 = vadd.f32 %v1520_v52, %v1360_v47  ;;  %v1773_v0 = vadd.f32 %v2864_v22, %v1737_v58  ;;  %v1738_v1 = vadd.f32 %v1718_v62, %v1538_v48 }
 0x13e   : > { %v1522_v59 = vpop.f32.mrf.mxu0  ;;  %v1795_v63 = vsel %vm1779_vm6, %v1771_v51, %v1787_v57  ;;  %vm1780_vm7 = vcmp.ge.f32.partialorder %v1772_v61, 0.0  ;;  %v1788_v3 = vmul.f32 0.01, %v1772_v61  ;;  %v1720_v5 = vpop.f32.mrf.mxu1 }
 0x13f   : > { %1803 = vst [vmem:[%s2875_s12 + $0x10] sm:$0xff] %v1795_v63  ;;  %v1540_v4 = vadd.f32 %v1522_v59, %v1361_v60  ;;  %vm1781_vm8 = vcmp.ge.f32.partialorder %v1773_v0, 0.0  ;;  %v1789_v6 = vmul.f32 0.01, %v1773_v0  ;;  %v1774_v8 = vadd.f32 %v2868_v10, %v1738_v1 }
 0x140   : > { %v1739_v7 = vadd.f32 %v1720_v5, %v1539_v54  ;;  %v1796_v2 = vsel %vm1780_vm7, %v1772_v61, %v1788_v3  ;;  %v1722_v9 = vpop.f32.mrf.mxu1 }
 0x141   : > { %1804 = vst [vmem:[%s2875_s12 + $0x18] sm:$0xff] %v1796_v2  ;;  %v1797_v12 = vsel %vm1781_vm8, %v1773_v0, %v1789_v6  ;;  %vm1782_vm9 = vcmp.ge.f32.partialorder %v1774_v8, 0.0  ;;  %v1790_v13 = vmul.f32 0.01, %v1774_v8  ;;  %v1740_v11 = vadd.f32 %v1722_v9, %v1540_v4 }
 0x142   : > { %v1775_v15 = vadd.f32 %v2864_v22, %v1739_v7  ;;  %1805 = vst [vmem:[%s2875_s12 + $0x20] sm:$0xff] %v1797_v12 }
 0x143   : > { %v1798_v16 = vsel %vm1782_vm9, %v1774_v8, %v1790_v13  ;;  %v1776_v18 = vadd.f32 %v2868_v10, %v1740_v11 }
 0x144   : > { %vm1783_vm10 = vcmp.ge.f32.partialorder %v1775_v15, 0.0  ;;  %v1791_v17 = vmul.f32 0.01, %v1775_v15  ;;  %1806 = vst [vmem:[%s2875_s12 + $0x28] sm:$0xff] %v1798_v16 }
 0x145   : > { %vm1784_vm11 = vcmp.ge.f32.partialorder %v1776_v18, 0.0  ;;  %v1792_v20 = vmul.f32 0.01, %v1776_v18 }
 0x146   : > { %v1799_v19 = vsel %vm1783_vm10, %v1775_v15, %v1791_v17 }
 0x147   : > { %1807 = vst [vmem:[%s2875_s12 + $0x30] sm:$0xff] %v1799_v19  ;;  %v1800_v21 = vsel %vm1784_vm11, %v1776_v18, %v1792_v20 }
 0x148   : > { %1808 = vst [vmem:[%s2875_s12 + $0x38] sm:$0xff] %v1800_v21 }
 0x149 PF: > { %s14_s19 = sadd.s32 1, %s2403_s19   ;;  %s2912_s15 = smov %s2395_s17 }
 0x14a   : > { %p11_p9 = scmp.ge.s32.totalorder %s14_s19, 12   ;;  %s2913_s16 = smov %s2399_s18 }
 0x14b   : > { %s2914_s17 = smov %s2917_s20  ;;  %s2915_s18 = smov %s2921_s21 }
 0x14c   :  { %13 = sbr.rel (!%p11_p9) target bundleno = 3 (0x3), region = 76 }

// kernel: featnet_forward.11
= control target key start
LH: loop header
LB: loop body
LE: loop exit
PB: predicated region body
PF: predicated region fallthrough
CT: control target
= control target key end

     0   :  { %8 = vsyncpa [#allocation3], 0  ;;  %s3011_s0 = inlined_call_operand.vmem [shape: bf16[1024,128], index: 0, kind: input, shape index: {}]   ;;  %s3012_s1 = inlined_call_operand.vmem [shape: bf16[128,128], index: 1, kind: input, shape index: {}]   ;;  %s3013_s2 = inlined_call_operand.vmem [shape: f32[1,128], index: 2, kind: input, shape index: {}]   ;;  %s3014_s3 = inlined_call_operand.hbm [shape: f32[1024,128], index: 3, kind: output, shape index: {}]  }
   0x1   :  { %10 = vsyncpa [#allocation3 + $0x1], 0  ;;  %s2350_s12 = smov 0   ;;  %s2352_s13 = smov 0  }
   0x2   :  { %s2354_s14 = smov 0   ;;  %s2356_s15 = smov 0  }
   0x3   :  { %s2358_s16 = smov 0   ;;  %s2360_s17 = smov 0  }
   0x4 LB: > { %s1830_s18 = sadd.s32 4294967295, %s2325_s17   ;;  %s1831_s19 = sadd.s32 4294967294, %s2325_s17   ;;  %s2325_s17 = sphi %s2360_s17, %s16_s17   ;;  %s2321_s16 = sphi %s2358_s16, %s3063_s16   ;;  %s2317_s15 = sphi %s2356_s15, %s3062_s15   ;;  %s2313_s14 = sphi %s2354_s14, %s3061_s14   ;;  %s2309_s13 = sphi %s2352_s13, %s3060_s13   ;;  %s2305_s12 = sphi %s2350_s12, %s3059_s12  }
   0x5   : > { %s35_s20 = sadd.s32 1, %s2321_s16  ;;  %s126_s21 = sadd.s32 1, %s2313_s14 }
   0x6   : > { %p37_p0 = scmp.ge.s32.totalorder %s35_s20, 2  ;;  %p136_p1 = scmp.ne.s32.totalorder %s2313_s14, %s2309_s13 }
   0x7   : > { %p137_p2 = scmp.eq.s32.totalorder %s1830_s18, 1  ;;  %p142_p3 = scmp.ne.s32.totalorder %s2309_s13, %s2305_s12 }
   0x8   : > { %s3065_s20 = smov (%p37_p0, %s35_s20), 0  ;;  %p143_p5 = scmp.eq.s32.totalorder %s1831_s19, 1 }
   0x9   : > { %p2390_p4 = por %p137_p2, %p136_p1  ;;  %s121_s23 = ssub.s32 %s2321_s16, %s3065_s20 }
   0xa   : > { %p1836_p6 = scmp.ge.s32.totalorder %s2325_s17, 1  ;;  %p124_p7 = scmp.eq.s32.totalorder %s121_s23, 0 }
   0xb   : > { %p2397_p8 = por %p143_p5, %p142_p3  ;;  %p191_p9 = scmp.lt.s32.totalorder %s2325_s17, 3 }
   0xc   : > { %s2403_s25 = scalar_select %p124_p7, %s2313_s14, %s126_s21  }
   0xd   : > { %p192_p10 = pnand %p1836_p6, %p191_p9 }
   0xf   : > { %195 = sbr.rel (%p192_p10) target bundleno = 545 (0x221), region = 32 }
  0x14   : > { %v2081_v0 = vld [vmem:[%s3012_s1 + $0x38] sm:$0xff]   ;;  %s1838_s28 = sshll.u32 %s2317_s15, 6  ;;  %v2082_v1 = vld [vmem:[%s3012_s1 + $0x30] sm:$0xff]   ;;  %v2083_v2 = vld [vmem:[%s3012_s1 + $0x28] sm:$0xff]   ;;  %s226_s5 = sand.u32 1, %s2309_s13  }
  0x15   : > { %p230_p11 = scmp.lt.s32.totalorder %s1838_s28, 127  ;;  %1927 = vmatprep.subr.bf16.mxu0 %v2081_v0  ;;  %2007 = vmatprep.subr.bf16.mxu1 %v2081_v0  ;;  %v2084_v3 = vld [vmem:[%s3012_s1 + $0x20] sm:$0xff]   ;;  %v2085_v6 = vld [vmem:[%s3012_s1 + $0x18] sm:$0xff]   ;;  %v2086_v7 = vld [vmem:[%s3012_s1 + $0x10] sm:$0xff]   ;;  %s1886_s8 = sshll.u32 %s2317_s15, 13 }
  0x16   : > { %1928 = vmatpush3.bf16.msra.mxu0 %v2081_v0  ;;  %2015 = vmatpush3.bf16.msra.mxu1 %v2081_v0  ;;  %v2087_v8 = vld [vmem:[%s3012_s1 + $0x8] sm:$0xff]   ;;  %v2088_v9 = vld [vmem:[%s3012_s1] sm:$0xff]   ;;  %s2957_s18 = scalar_lea.hbm %s3014_s3, %s1886_s8  ;;  %s2966_s15 = scalar_lea.sflag [#allocation3], %s226_s5 }
  0x17   : > { %s3067_s28 = smov (!%p230_p11, %s1838_s28), 127  ;;  %1929 = vmatprep.subr.bf16.mxu0 %v2082_v1  ;;  %2008 = vmatprep.subr.bf16.mxu1 %v2082_v1  ;;  %v2470_v42 = vld [vmem:[%s3013_s2] ss:$0 sm:$0xff]  ;;  %s2327_s21 = smov [#allocation2]  }
  0x18   : > { %s1839_s6 = sshll.u32 %s3067_s28, 2  ;;  %s2253_s23 = sshll.u32 %s2327_s21, 4  ;;  %s2254_s23 = int_to_ptr.vmem [resolvable:$false] %s2253_s23 }
  0x19   : > { %s2418_s9 = scalar_lea.vmem %s3011_s0, %s1839_s6  ;;  %s1837_s6 = sshll.u32 %s226_s5, 9 }
  0x1a   : > { %1930 = vmatpush3.bf16.msra.mxu0 %v2082_v1  ;;  %2016 = vmatpush3.bf16.msra.mxu1 %v2082_v1  ;;  %v2089_v4 = vld [vmem:[%s2418_s9] sm:$0xff]   ;;  %v2091_v10 = vld [vmem:[%s2418_s9 + $0x8] sm:$0xff]   ;;  %v2093_v12 = vld [vmem:[%s2418_s9 + $0x10] sm:$0xff]   ;;  %s2827_s7 = scalar_lea.vmem [#allocation2], %s1837_s6  ;;  %s2255_s26 = scalar_lea.vmem %s2254_s23, 16384 }
  0x1b   : > { %1931 = vmatprep.subr.bf16.mxu0 %v2083_v2  ;;  %2009 = vmatprep.subr.bf16.mxu1 %v2083_v2  ;;  %v2090_v5 = vld [vmem:[%s2418_s9 + $0x80] sm:$0xff]   ;;  %v2092_v11 = vld [vmem:[%s2418_s9 + $0x88] sm:$0xff]   ;;  %v2095_v13 = vld [vmem:[%s2418_s9 + $0x90] sm:$0xff]  }
  0x1c   : > { %1943 = vmatprep.mubr.bf16.mxu0 %v2089_v4  ;;  %1975 = vmatprep.mubr.bf16.mxu1 %v2090_v5  ;;  %v2094_v14 = vld [vmem:[%s2418_s9 + $0x18] sm:$0xff]   ;;  %v2097_v16 = vld [vmem:[%s2418_s9 + $0x20] sm:$0xff]   ;;  %v2098_v18 = vld [vmem:[%s2418_s9 + $0x28] sm:$0xff]  }
  0x1d   : > { %v2096_v15 = vld [vmem:[%s2418_s9 + $0x98] sm:$0xff]   ;;  %v2099_v17 = vld [vmem:[%s2418_s9 + $0xa0] sm:$0xff]   ;;  %v2100_v19 = vld [vmem:[%s2418_s9 + $0xa8] sm:$0xff]  }
  0x1e   : > { %1932 = vmatpush3.bf16.msra.mxu0 %v2083_v2  ;;  %2017 = vmatpush3.bf16.msra.mxu1 %v2083_v2  ;;  %v2101_v20 = vld [vmem:[%s2418_s9 + $0x30] sm:$0xff]   ;;  %v2102_v22 = vld [vmem:[%s2418_s9 + $0x38] sm:$0xff]   ;;  %v2105_v24 = vld [vmem:[%s2418_s9 + $0x40] sm:$0xff]  }
  0x1f   : > { %1933 = vmatprep.subr.bf16.mxu0 %v2084_v3  ;;  %2010 = vmatprep.subr.bf16.mxu1 %v2084_v3  ;;  %v2103_v21 = vld [vmem:[%s2418_s9 + $0xb0] sm:$0xff]   ;;  %v2104_v23 = vld [vmem:[%s2418_s9 + $0xb8] sm:$0xff]   ;;  %v2107_v25 = vld [vmem:[%s2418_s9 + $0xc0] sm:$0xff]  }
  0x20   : > { %v2106_v26 = vld [vmem:[%s2418_s9 + $0x48] sm:$0xff]   ;;  %v2109_v28 = vld [vmem:[%s2418_s9 + $0x50] sm:$0xff]   ;;  %v2110_v30 = vld [vmem:[%s2418_s9 + $0x58] sm:$0xff]  }
  0x21   : > { %v2108_v27 = vld [vmem:[%s2418_s9 + $0xc8] sm:$0xff]   ;;  %v2111_v29 = vld [vmem:[%s2418_s9 + $0xd0] sm:$0xff]   ;;  %v2112_v31 = vld [vmem:[%s2418_s9 + $0xd8] sm:$0xff]  }
  0x22   : > { %1934 = vmatpush3.bf16.msra.mxu0 %v2084_v3  ;;  %2018 = vmatpush3.bf16.msra.mxu1 %v2084_v3  ;;  %v2113_v32 = vld [vmem:[%s2418_s9 + $0x60] sm:$0xff]   ;;  %v2114_v34 = vld [vmem:[%s2418_s9 + $0x68] sm:$0xff]   ;;  %v2117_v36 = vld [vmem:[%s2418_s9 + $0x70] sm:$0xff]  }
  0x23   : > { %1935 = vmatprep.subr.bf16.mxu0 %v2085_v6  ;;  %2011 = vmatprep.subr.bf16.mxu1 %v2085_v6  ;;  %v2115_v33 = vld [vmem:[%s2418_s9 + $0xe0] sm:$0xff]   ;;  %v2116_v35 = vld [vmem:[%s2418_s9 + $0xe8] sm:$0xff]   ;;  %v2119_v37 = vld [vmem:[%s2418_s9 + $0xf0] sm:$0xff]  }
  0x24   : > { %v2118_v38 = vld [vmem:[%s2418_s9 + $0x78] sm:$0xff]  }
  0x25   : > { %v2120_v39 = vld [vmem:[%s2418_s9 + $0xf8] sm:$0xff]   ;;  %s1722_s9 = sshll.u32 %s2827_s7, 4  ;;  %s2959_s9 = int_to_ptr.vmem [resolvable:$true] %s1722_s9 }
  0x26   : > { %1936 = vmatpush3.bf16.msra.mxu0 %v2085_v6  ;;  %2019 = vmatpush3.bf16.msra.mxu1 %v2085_v6  ;;  %s2249_s19 = scalar_lea.vmem %s2959_s9, 8192  ;;  %p2256_p1 = scmp.lt.s32.totalorder %s2959_s9, %s2254_s23 }
  0x27   : > { %1937 = vmatprep.subr.bf16.mxu0 %v2086_v7  ;;  %2012 = vmatprep.subr.bf16.mxu1 %v2086_v7  ;;  %p2250_p12 = scmp.ne.s32.totalorder %s2959_s9, %s2249_s19  ;;  %p2257_p2 = scmp.lt.s32.totalorder %s2255_s26, %s2249_s19 }
  0x29   : > { %p2251_p13 = pnand %p2250_p12, %p2390_p4  ;;  %p2258_p3 = por %p2257_p2, %p2256_p1 }
  0x2a   : > { %1938 = vmatpush3.bf16.msra.mxu0 %v2086_v7  ;;  %2020 = vmatpush3.bf16.msra.mxu1 %v2086_v7 }
  0x2b   : > { %1939 = vmatprep.subr.bf16.mxu0 %v2087_v8  ;;  %2013 = vmatprep.subr.bf16.mxu1 %v2087_v8  ;;  %p2252_p0 = pneg %p2251_p13 }
  0x2d   : > { %p2259_p5 = pnand %p2258_p3, %p2252_p0 }
  0x2e   : > { %1940 = vmatpush3.bf16.msra.mxu0 %v2087_v8  ;;  %2021 = vmatpush3.bf16.msra.mxu1 %v2087_v8 }
  0x2f   : > { %1941 = vmatprep.subr.bf16.mxu0 %v2088_v9  ;;  %2014 = vmatprep.subr.bf16.mxu1 %v2088_v9 }
  0x32   : > { %1942 = vmatpush3.bf16.msra.mxu0 %v2088_v9  ;;  %2022 = vmatpush3.bf16.msra.mxu1 %v2088_v9 }
  0x35   : > { %1944 = vmatmul.mubr.bf16.vlgmr.msra.gmra.mxu0 %v2091_v10  ;;  %1976 = vmatmul.mubr.bf16.vlgmr.msra.gmra.mxu1 %v2092_v11 }
  0x36   : > { %1947 = vmatprep.mubr.bf16.mxu0 %v2093_v12  ;;  %1979 = vmatprep.mubr.bf16.mxu1 %v2095_v13 }
  0x3d   : > { %1948 = vmatmul.mubr.bf16.gmra.mxu0 %v2094_v14  ;;  %1980 = vmatmul.mubr.bf16.gmra.mxu1 %v2096_v15 }
  0x3e   : > { %1951 = vmatprep.mubr.bf16.mxu0 %v2097_v16  ;;  %1983 = vmatprep.mubr.bf16.mxu1 %v2099_v17 }
  0x45   : > { %1952 = vmatmul.mubr.bf16.gmra.mxu0 %v2098_v18  ;;  %1984 = vmatmul.mubr.bf16.gmra.mxu1 %v2100_v19 }
  0x46   : > { %1955 = vmatprep.mubr.bf16.mxu0 %v2101_v20  ;;  %1987 = vmatprep.mubr.bf16.mxu1 %v2103_v21 }
  0x4d   : > { %1956 = vmatmul.mubr.bf16.gmra.mxu0 %v2102_v22  ;;  %1988 = vmatmul.mubr.bf16.gmra.mxu1 %v2104_v23 }
  0x4e   : > { %1959 = vmatprep.mubr.bf16.mxu0 %v2105_v24  ;;  %1991 = vmatprep.mubr.bf16.mxu1 %v2107_v25 }
  0x55   : > { %1960 = vmatmul.mubr.bf16.gmra.mxu0 %v2106_v26  ;;  %1992 = vmatmul.mubr.bf16.gmra.mxu1 %v2108_v27 }
  0x56   : > { %1963 = vmatprep.mubr.bf16.mxu0 %v2109_v28  ;;  %1995 = vmatprep.mubr.bf16.mxu1 %v2111_v29 }
  0x5d   : > { %1964 = vmatmul.mubr.bf16.gmra.mxu0 %v2110_v30  ;;  %1996 = vmatmul.mubr.bf16.gmra.mxu1 %v2112_v31 }
  0x5e   : > { %1967 = vmatprep.mubr.bf16.mxu0 %v2113_v32  ;;  %1999 = vmatprep.mubr.bf16.mxu1 %v2115_v33 }
  0x65   : > { %1968 = vmatmul.mubr.bf16.gmra.mxu0 %v2114_v34  ;;  %2000 = vmatmul.mubr.bf16.gmra.mxu1 %v2116_v35 }
  0x66   : > { %1971 = vmatprep.mubr.bf16.mxu0 %v2117_v36  ;;  %2003 = vmatprep.mubr.bf16.mxu1 %v2119_v37 }
  0x6d   : > { %1972 = vmatmul.mubr.bf16.gmra.mxu0 %v2118_v38  ;;  %2004 = vmatmul.mubr.bf16.gmra.mxu1 %v2120_v39 }
  0xf5   : > { %v1945_v40 = vpop.f32.mrf.mxu0  ;;  %v1977_v41 = vpop.f32.mrf.mxu1 }
  0xf6   : > { %v2473_v45 = vadd.f32 %v1977_v41, %v2470_v42  ;;  %v2476_v46 = vadd.f32 %v1945_v40, %v2470_v42 }
  0xf7   : > { %v738_v43 = vpop.f32.mrf.mxu0  ;;  %v866_v44 = vpop.f32.mrf.mxu1 }
  0xf8   : > { %v1293_v49 = vmul.f32 %v2473_v45, %v2473_v45  ;;  %v1261_v50 = vmul.f32 %v2476_v46, %v2476_v46  ;;  %v2483_v53 = vadd.f32 %v2470_v42, %v738_v43  ;;  %v2489_v57 = vadd.f32 %v2470_v42, %v866_v44 }
  0xf9   : > { %v1946_v47 = vpop.f32.mrf.mxu0  ;;  %v1978_v48 = vpop.f32.mrf.mxu1 }
  0xfa   : > { %1391 = vadd.xlane.f32.xlu0 %v1293_v49  ;;  %1327 = vadd.xlane.f32.xlu1 %v1261_v50  ;;  %v2486_v54 = vadd.f32 %v1946_v47, %v2470_v42  ;;  %v1259_v59 = vmul.f32 %v2483_v53, %v2483_v53  ;;  %v2496_v60 = vadd.f32 %v1978_v48, %v2470_v42 }
  0xfb   : > { %v741_v51 = vpop.f32.mrf.mxu0  ;;  %v869_v52 = vpop.f32.mrf.mxu1  ;;  %v1291_v1 = vmul.f32 %v2489_v57, %v2489_v57 }
  0xfc   : > { %v1262_v58 = vmul.f32 %v2486_v54, %v2486_v54  ;;  %v2501_v2 = vadd.f32 %v2470_v42, %v869_v52  ;;  %v1294_v3 = vmul.f32 %v2496_v60, %v2496_v60  ;;  %v2506_v4 = vadd.f32 %v2470_v42, %v741_v51 }
  0xfd   : > { %v1949_v55 = vpop.f32.mrf.mxu0  ;;  %v1981_v56 = vpop.f32.mrf.mxu1 }
  0xfe   : > { %1329 = vadd.xlane.f32.xlu1 %v1262_v58  ;;  %1323 = vadd.xlane.f32.xlu0 %v1259_v59  ;;  %v1292_v9 = vmul.f32 %v2501_v2, %v2501_v2  ;;  %v1260_v10 = vmul.f32 %v2506_v4, %v2506_v4  ;;  %v2516_v12 = vadd.f32 %v1949_v55, %v2470_v42 }
  0xff   : > { %v754_v61 = vpop.f32.mrf.mxu0  ;;  %v882_v62 = vpop.f32.mrf.mxu1  ;;  %v2521_v17 = vadd.f32 %v1981_v56, %v2470_v42 }
 0x100   : > { %v1265_v19 = vmul.f32 %v2516_v12, %v2516_v12  ;;  %v2535_v24 = vadd.f32 %v2470_v42, %v754_v61  ;;  %v2562_v36 = vadd.f32 %v2470_v42, %v882_v62 }
 0x101   : > { %v1950_v63 = vpop.f32.mrf.mxu0  ;;  %v1982_v0 = vpop.f32.mrf.mxu1  ;;  %v1297_v27 = vmul.f32 %v2521_v17, %v2521_v17 }
 0x102   : > { %1393 = vadd.xlane.f32.xlu1 %v1294_v3  ;;  %1387 = vadd.xlane.f32.xlu0 %v1291_v1  ;;  %v2513_v11 = vadd.f32 %v1950_v63, %v2470_v42  ;;  %v2528_v20 = vadd.f32 %v1982_v0, %v2470_v42  ;;  %v1263_v34 = vmul.f32 %v2535_v24, %v2535_v24 }
 0x103   : > { %v757_v5 = vpop.f32.mrf.mxu0  ;;  %v885_v6 = vpop.f32.mrf.mxu1  ;;  %v1295_v47 = vmul.f32 %v2562_v36, %v2562_v36 }
 0x104   : > { %v1266_v18 = vmul.f32 %v2513_v11, %v2513_v11  ;;  %v1298_v26 = vmul.f32 %v2528_v20, %v2528_v20  ;;  %v2544_v28 = vadd.f32 %v2470_v42, %v757_v5  ;;  %v2559_v35 = vadd.f32 %v2470_v42, %v885_v6 }
 0x105   : > { %v1953_v7 = vpop.f32.mrf.mxu0  ;;  %v1985_v8 = vpop.f32.mrf.mxu1 }
 0x106   : > { %1389 = vadd.xlane.f32.xlu1 %v1292_v9  ;;  %1325 = vadd.xlane.f32.xlu0 %v1260_v10  ;;  %v1264_v33 = vmul.f32 %v2544_v28, %v2544_v28  ;;  %v2567_v38 = vadd.f32 %v1953_v7, %v2470_v42  ;;  %v1296_v44 = vmul.f32 %v2559_v35, %v2559_v35 }
 0x107   : > { %v770_v13 = vpop.f32.mrf.mxu0  ;;  %v2518_v14 = vpop.f32.mrf.mxu1  ;;  %v2581_v49 = vadd.f32 %v1985_v8, %v2470_v42 }
 0x108   : > { %v1269_v48 = vmul.f32 %v2567_v38, %v2567_v38  ;;  %v2601_v0 = vadd.f32 %v2470_v42, %v770_v13 }
 0x109   : > { %v1954_v15 = vpop.f32.mrf.mxu0  ;;  %v1986_v16 = vpop.f32.mrf.mxu1  ;;  %v1301_v6 = vmul.f32 %v2581_v49, %v2581_v49 }
 0x10a   : > { %1337 = vadd.xlane.f32.xlu1 %v1266_v18  ;;  %1335 = vadd.xlane.f32.xlu0 %v1265_v19  ;;  %v2572_v40 = vadd.f32 %v1954_v15, %v2470_v42  ;;  %v2586_v55 = vadd.f32 %v1986_v16, %v2470_v42  ;;  %3031 = vst [vmem:[#allocation5_spill] sm:$0xff] %v2601_v0 }
 0x10b   : > { %v773_v21 = vpop.f32.mrf.mxu0  ;;  %v2530_v22 = vpop.f32.mrf.mxu1  ;;  %v1267_v16 = vmul.f32 %v2601_v0, %v2601_v0  ;;  %v2623_v18 = vadd.f32 %v2470_v42, %v2518_v14 }
 0x10c   : > { %v1270_v52 = vmul.f32 %v2572_v40, %v2572_v40  ;;  %v2609_v7 = vadd.f32 %v2470_v42, %v773_v21  ;;  %v1302_v13 = vmul.f32 %v2586_v55, %v2586_v55 }
 0x10d   : > { %v2532_v23 = vpop.f32.mrf.mxu0  ;;  %v2537_v25 = vpop.f32.mrf.mxu1  ;;  %3032 = vst [vmem:[#allocation6_spill] sm:$0xff] %v2623_v18 }
 0x10e   : > { %1401 = vadd.xlane.f32.xlu1 %v1298_v26  ;;  %1399 = vadd.xlane.f32.xlu0 %v1297_v27  ;;  %v2630_v27 = vadd.f32 %v2470_v42, %v2530_v22  ;;  %v2648_v22 = vadd.f32 %v2532_v23, %v2470_v42 }
 0x10f   : > { %v2546_v29 = vpop.f32.mrf.mxu0  ;;  %v2548_v30 = vpop.f32.mrf.mxu1 }
 0x110   : > { %3033 = vst [vmem:[#allocation7_spill] sm:$0xff] %v2630_v27  ;;  %3034 = vst [vmem:[#allocation8_spill] sm:$0xff] %v2648_v22  ;;  %v1300_v23 = vmul.f32 %v2630_v27, %v2630_v27 }
 0x111   : > { %v2550_v31 = vpop.f32.mrf.mxu0  ;;  %v2552_v32 = vpop.f32.mrf.mxu1 }
 0x112   : > { %1333 = vadd.xlane.f32.xlu1 %v1264_v33  ;;  %1331 = vadd.xlane.f32.xlu0 %v1263_v34  ;;  %v1268_v33 = vmul.f32 %v2609_v7, %v2609_v7 }
 0x113   : > { %v2564_v37 = vpop.f32.mrf.mxu0  ;;  %v2569_v39 = vpop.f32.mrf.mxu1 }
 0x115   : > { %v1961_v41 = vpop.f32.mrf.mxu0  ;;  %v1993_v43 = vpop.f32.mrf.mxu1 }
 0x116   : > { %1397 = vadd.xlane.f32.xlu1 %v1296_v44  ;;  %1395 = vadd.xlane.f32.xlu0 %v1295_v47  ;;  %v2589_v59 = vadd.f32 %v1961_v41, %v2470_v42  ;;  %v2592_v61 = vadd.f32 %v1993_v43, %v2470_v42 }
 0x117   : > { %v802_v50 = vpop.f32.mrf.mxu0  ;;  %v930_v51 = vpop.f32.mrf.mxu1 }
 0x118   : > { %v2595_v62 = vadd.f32 %v2470_v42, %v802_v50  ;;  %v2598_v63 = vadd.f32 %v2470_v42, %v930_v51 }
 0x119   : > { %v1962_v56 = vpop.f32.mrf.mxu0  ;;  %v1994_v58 = vpop.f32.mrf.mxu1 }
 0x11a   : > { %1345 = vadd.xlane.f32.xlu1 %v1270_v52  ;;  %1343 = vadd.xlane.f32.xlu0 %v1269_v48  ;;  %v2604_v5 = vadd.f32 %v1962_v56, %v2470_v42  ;;  %v2612_v10 = vadd.f32 %v1994_v58, %v2470_v42  ;;  %v1299_v52 = vmul.f32 %v2623_v18, %v2623_v18 }
 0x11b   : > { %v805_v1 = vpop.f32.mrf.mxu0  ;;  %v933_v3 = vpop.f32.mrf.mxu1  ;;  %v2657_v56 = vadd.f32 %v2550_v31, %v2470_v42 }
 0x11c   : > { %v2617_v15 = vadd.f32 %v2470_v42, %v805_v1  ;;  %v2626_v26 = vadd.f32 %v2470_v42, %v933_v3 }
 0x11d   : > { %v1965_v8 = vpop.f32.mrf.mxu0  ;;  %v1997_v9 = vpop.f32.mrf.mxu1  ;;  %3035 = vst [vmem:[#allocation9_spill] sm:$0xff] %v2657_v56 }
 0x11e   : > { %1409 = vadd.xlane.f32.xlu1 %v1302_v13  ;;  %1407 = vadd.xlane.f32.xlu0 %v1301_v6  ;;  %v2635_v43 = vadd.f32 %v1965_v8, %v2470_v42  ;;  %v2638_v14 = vadd.f32 %v1997_v9, %v2470_v42  ;;  %v1273_v8 = vmul.f32 %v2648_v22, %v2648_v22 }
 0x11f   : > { %v818_v19 = vpop.f32.mrf.mxu0  ;;  %v946_v21 = vpop.f32.mrf.mxu1  ;;  %v2671_v9 = vadd.f32 %v2537_v25, %v2470_v42 }
 0x120   : > { %v2641_v44 = vadd.f32 %v2470_v42, %v818_v19  ;;  %v2644_v47 = vadd.f32 %v2470_v42, %v946_v21  ;;  %v1274_v19 = vmul.f32 %v2657_v56, %v2657_v56  ;;  %v2680_v21 = vadd.f32 %v2552_v32, %v2470_v42 }
 0x121   : > { %v1966_v34 = vpop.f32.mrf.mxu0  ;;  %v1998_v41 = vpop.f32.mrf.mxu1  ;;  %3036 = vst [vmem:[#allocation10_spill] sm:$0xff] %v2671_v9 }
 0x122   : > { %1341 = vadd.xlane.f32.xlu1 %v1268_v33  ;;  %1339 = vadd.xlane.f32.xlu0 %v1267_v16  ;;  %v2651_v51 = vadd.f32 %v1966_v34, %v2470_v42  ;;  %v2660_v3 = vadd.f32 %v1998_v41, %v2470_v42  ;;  %3037 = vst [vmem:[#allocation11_spill] sm:$0xff] %v2680_v21 }
 0x123   : > { %v821_v48 = vpop.f32.mrf.mxu0  ;;  %v949_v50 = vpop.f32.mrf.mxu1 }
 0x124   : > { %v2665_v6 = vadd.f32 %v2470_v42, %v821_v48  ;;  %v2674_v16 = vadd.f32 %v2470_v42, %v949_v50 }
 0x125   : > { %v1969_v58 = vpop.f32.mrf.mxu0  ;;  %v2001_v1 = vpop.f32.mrf.mxu1 }
 0x126   : > { %1405 = vadd.xlane.f32.xlu1 %v1300_v23  ;;  %1403 = vadd.xlane.f32.xlu0 %v1299_v52  ;;  %v2683_v41 = vadd.f32 %v1969_v58, %v2470_v42  ;;  %v2686_v25 = vadd.f32 %v2001_v1, %v2470_v42  ;;  %v2696_v52 = vadd.f32 %v2470_v42, %v2546_v29 }
 0x127   : > { %v834_v31 = vpop.f32.mrf.mxu0  ;;  %v962_v13 = vpop.f32.mrf.mxu1  ;;  %v1305_v1 = vmul.f32 %v2671_v9, %v2671_v9  ;;  %v1306_v29 = vmul.f32 %v2680_v21, %v2680_v21 }
 0x128   : > { %v2689_v48 = vadd.f32 %v2470_v42, %v834_v31  ;;  %v2692_v50 = vadd.f32 %v2470_v42, %v962_v13  ;;  %3038 = vst [vmem:[#allocation12_spill] sm:$0xff] %v2696_v52  ;;  %v2705_v31 = vadd.f32 %v2470_v42, %v2564_v37 }
 0x129   : > { %v1970_v33 = vpop.f32.mrf.mxu0  ;;  %v2002_v34 = vpop.f32.mrf.mxu1 }
 0x12a   : > { %1353 = vadd.xlane.f32.xlu1 %v1274_v19  ;;  %1351 = vadd.xlane.f32.xlu0 %v1273_v8  ;;  %v2699_v58 = vadd.f32 %v1970_v33, %v2470_v42  ;;  %3039 = vst [vmem:[#allocation13_spill] sm:$0xff] %v2705_v31  ;;  %v2708_v56 = vadd.f32 %v2002_v34, %v2470_v42 }
 0x12b   : > { %v837_v32 = vpop.f32.mrf.mxu0  ;;  %v965_v23 = vpop.f32.mrf.mxu1  ;;  %v2717_v19 = vadd.f32 %v2470_v42, %v2548_v30  ;;  %v1271_v34 = vmul.f32 %v2696_v52, %v2696_v52  ;;  %v1272_v21 = vmul.f32 %v2705_v31, %v2705_v31 }
 0x12c   : > { %v2713_v8 = vadd.f32 %v2470_v42, %v837_v32  ;;  %v2720_v37 = vadd.f32 %v2470_v42, %v965_v23  ;;  %v2728_v32 = vadd.f32 %v2470_v42, %v2569_v39 }
 0x12d   : > { %v1973_v13 = vpop.f32.mrf.mxu0  ;;  %v2005_v22 = vpop.f32.mrf.mxu1 }
 0x12e   : > { %1417 = vadd.xlane.f32.xlu1 %v1306_v29  ;;  %1415 = vadd.xlane.f32.xlu0 %v1305_v1  ;;  %v2731_v27 = vadd.f32 %v1973_v13, %v2470_v42  ;;  %v2734_v23 = vadd.f32 %v2005_v22, %v2470_v42  ;;  %v1304_v22 = vmul.f32 %v2728_v32, %v2728_v32 }
 0x12f   : > { %v850_v33 = vpop.f32.mrf.mxu0  ;;  %v978_v9 = vpop.f32.mrf.mxu1  ;;  %v1303_v13 = vmul.f32 %v2717_v19, %v2717_v19 }
 0x130   : > { %3040 = vst [vmem:[#allocation14_spill] sm:$0xff] %v2734_v23  ;;  %v2737_v1 = vadd.f32 %v2470_v42, %v850_v33  ;;  %v2740_v29 = vadd.f32 %v2470_v42, %v978_v9 }
 0x131   : > { %v1974_v18 = vpop.f32.mrf.mxu0  ;;  %v2006_v30 = vpop.f32.mrf.mxu1 }
 0x132   : > { %3041 = vst [vmem:[#allocation15_spill] sm:$0xff] %v2737_v1  ;;  %3042 = vst [vmem:[#allocation16_spill] sm:$0xff] %v2740_v29  ;;  %1349 = vadd.xlane.f32.xlu1 %v1272_v21  ;;  %1347 = vadd.xlane.f32.xlu0 %v1271_v34  ;;  %v2743_v39 = vadd.f32 %v1974_v18, %v2470_v42  ;;  %v2746_v0 = vadd.f32 %v2006_v30, %v2470_v42 }
 0x133   : > { %v853_v52 = vpop.f32.mrf.mxu0  ;;  %v981_v31 = vpop.f32.mrf.mxu1  ;;  %v1278_v18 = vmul.f32 %v2604_v5, %v2604_v5  ;;  %v1277_v21 = vmul.f32 %v2589_v59, %v2589_v59  ;;  %v1310_v34 = vmul.f32 %v2612_v10, %v2612_v10  ;;  %v1308_v30 = vmul.f32 %v2626_v26, %v2626_v26 }
 0x134   : > { %3043 = vst [vmem:[#allocation17_spill] sm:$0xff] %v2746_v0  ;;  %v2753_v33 = vadd.f32 %v2470_v42, %v853_v52  ;;  %v2756_v9 = vadd.f32 %v2470_v42, %v981_v31  ;;  %v1309_v52 = vmul.f32 %v2592_v61, %v2592_v61  ;;  %v1276_v42 = vmul.f32 %v2617_v15, %v2617_v15 }
 0x135   : > { %v1275_v31 = vmul.f32 %v2595_v62, %v2595_v62 }
 0x136   : > { %3044 = vst [vmem:[#allocation18_spill] sm:$0xff] %v2756_v9  ;;  %1413 = vadd.xlane.f32.xlu1 %v1304_v22  ;;  %1411 = vadd.xlane.f32.xlu0 %v1303_v13  ;;  %v1307_v22 = vmul.f32 %v2598_v63, %v2598_v63  ;;  %v1282_v13 = vmul.f32 %v2651_v51, %v2651_v51 }
 0x13a   : > { %1361 = vadd.xlane.f32.xlu1 %v1278_v18  ;;  %1359 = vadd.xlane.f32.xlu0 %v1277_v21  ;;  %v1281_v18 = vmul.f32 %v2635_v43, %v2635_v43  ;;  %v1314_v21 = vmul.f32 %v2660_v3, %v2660_v3 }
 0x13e   : > { %1425 = vadd.xlane.f32.xlu1 %v1310_v34  ;;  %1423 = vadd.xlane.f32.xlu0 %v1309_v52  ;;  %v1313_v34 = vmul.f32 %v2638_v14, %v2638_v14  ;;  %v1280_v52 = vmul.f32 %v2665_v6, %v2665_v6 }
 0x142   : > { %1357 = vadd.xlane.f32.xlu1 %v1276_v42  ;;  %1355 = vadd.xlane.f32.xlu0 %v1275_v31  ;;  %v1279_v42 = vmul.f32 %v2641_v44, %v2641_v44  ;;  %v1312_v31 = vmul.f32 %v2674_v16, %v2674_v16 }
 0x146   : > { %1421 = vadd.xlane.f32.xlu1 %v1308_v30  ;;  %1419 = vadd.xlane.f32.xlu0 %v1307_v22  ;;  %v1311_v30 = vmul.f32 %v2644_v47, %v2644_v47  ;;  %v1286_v22 = vmul.f32 %v2699_v58, %v2699_v58 }
 0x14a   : > { %1369 = vadd.xlane.f32.xlu1 %v1282_v13  ;;  %1367 = vadd.xlane.f32.xlu0 %v1281_v18  ;;  %v1285_v13 = vmul.f32 %v2683_v41, %v2683_v41  ;;  %v1318_v18 = vmul.f32 %v2708_v56, %v2708_v56 }
 0x14e   : > { %1433 = vadd.xlane.f32.xlu1 %v1314_v21  ;;  %1431 = vadd.xlane.f32.xlu0 %v1313_v34  ;;  %v1317_v21 = vmul.f32 %v2686_v25, %v2686_v25  ;;  %v1284_v34 = vmul.f32 %v2713_v8, %v2713_v8 }
 0x152   : > { %1365 = vadd.xlane.f32.xlu1 %v1280_v52  ;;  %1363 = vadd.xlane.f32.xlu0 %v1279_v42  ;;  %v1283_v52 = vmul.f32 %v2689_v48, %v2689_v48  ;;  %v1316_v42 = vmul.f32 %v2720_v37, %v2720_v37 }
 0x156   : > { %1429 = vadd.xlane.f32.xlu1 %v1312_v31  ;;  %1427 = vadd.xlane.f32.xlu0 %v1311_v30  ;;  %v1315_v31 = vmul.f32 %v2692_v50, %v2692_v50  ;;  %v1290_v30 = vmul.f32 %v2743_v39, %v2743_v39 }
 0x15a   : > { %1377 = vadd.xlane.f32.xlu1 %v1286_v22  ;;  %1375 = vadd.xlane.f32.xlu0 %v1285_v13  ;;  %v1289_v22 = vmul.f32 %v2731_v27, %v2731_v27  ;;  %v1288_v13 = vmul.f32 %v2753_v33, %v2753_v33 }
 0x15e   : > { %1441 = vadd.xlane.f32.xlu1 %v1318_v18  ;;  %1439 = vadd.xlane.f32.xlu0 %v1317_v21  ;;  %v1287_v18 = vmul.f32 %v2737_v1, %v2737_v1  ;;  %v1320_v21 = vmul.f32 %v2756_v9, %v2756_v9 }
 0x162   : > { %1373 = vadd.xlane.f32.xlu1 %v1284_v34  ;;  %1371 = vadd.xlane.f32.xlu0 %v1283_v52  ;;  %v1319_v34 = vmul.f32 %v2740_v29, %v2740_v29  ;;  %v1322_v52 = vmul.f32 %v2746_v0, %v2746_v0 }
 0x166   : > { %1437 = vadd.xlane.f32.xlu1 %v1316_v42  ;;  %1435 = vadd.xlane.f32.xlu0 %v1315_v31  ;;  %v1321_v42 = vmul.f32 %v2734_v23, %v2734_v23 }
 0x16a   : > { %1385 = vadd.xlane.f32.xlu1 %v1290_v30  ;;  %1383 = vadd.xlane.f32.xlu0 %v1289_v22 }
 0x16e   : > { %1381 = vadd.xlane.f32.xlu1 %v1288_v13  ;;  %1379 = vadd.xlane.f32.xlu0 %v1287_v18 }
 0x172   : > { %1445 = vadd.xlane.f32.xlu1 %v1320_v21  ;;  %1443 = vadd.xlane.f32.xlu0 %v1319_v34 }
 0x176   : > { %1449 = vadd.xlane.f32.xlu1 %v1322_v52  ;;  %1447 = vadd.xlane.f32.xlu0 %v1321_v42 }
 0x183   : > { %v1392_v31 = vpop.xlane.xlu0 %1391  ;;  %v1328_v30 = vpop.xlane.xlu1 %1327 }
 0x184   : > { %v1485_v22 = vmax.f32 %v1392_v31, 1e-24  ;;  %v1453_v13 = vmax.f32 %v1328_v30, 1e-24 }
 0x186   : > { %2121 = vrsqrt.f32 %v1485_v22 }
 0x187   : > { %2123 = vrsqrt.f32 %v1453_v13  ;;  %v1330_v18 = vpop.xlane.xlu1 %1329  ;;  %v1324_v29 = vpop.xlane.xlu0 %1323 }
 0x188   : > { %v1454_v21 = vmax.f32 %v1330_v18, 1e-24  ;;  %v1451_v34 = vmax.f32 %v1324_v29, 1e-24 }
 0x18a   : > { %2125 = vrsqrt.f32 %v1454_v21 }
 0x18b   : > { %2127 = vrsqrt.f32 %v1451_v34  ;;  %v1394_v0 = vpop.xlane.xlu1 %1393  ;;  %v1388_v9 = vpop.xlane.xlu0 %1387 }
 0x18c   : > { %v1486_v1 = vmax.f32 %v1394_v0, 1e-24  ;;  %v1483_v23 = vmax.f32 %v1388_v9, 1e-24 }
 0x18e   : > { %2129 = vrsqrt.f32 %v1486_v1 }
 0x18f   : > { %2131 = vrsqrt.f32 %v1483_v23  ;;  %v1390_v52 = vpop.xlane.xlu1 %1389  ;;  %v1326_v42 = vpop.xlane.xlu0 %1325 }
 0x190   : > { %v1484_v31 = vmax.f32 %v1390_v52, 1e-24  ;;  %v1452_v30 = vmax.f32 %v1326_v42, 1e-24 }
 0x192   : > { %2133 = vrsqrt.f32 %v1484_v31 }
 0x193   : > { %v2122_v22 = vpop.eup %2121  ;;  %2135 = vrsqrt.f32 %v1452_v30  ;;  %v1338_v13 = vpop.xlane.xlu1 %1337 }
 0x194   : > { %v1336_v29 = vpop.xlane.xlu0 %1335  ;;  %v2124_v18 = vpop.eup %2123  ;;  %v1613_v21 = vmul.f32 %v2122_v22, %v2473_v45  ;;  %v1458_v34 = vmax.f32 %v1338_v13, 1e-24 }
 0x195   : > { %v1457_v0 = vmax.f32 %v1336_v29, 1e-24  ;;  %v1581_v9 = vmul.f32 %v2124_v18, %v2476_v46 }
 0x196   : > { %1677 = vst [vmem:[%s2827_s7 + $0x110] sm:$0xff] %v1613_v21  ;;  %2137 = vrsqrt.f32 %v1458_v34 }
 0x197   : > { %v2126_v23 = vpop.eup %2125  ;;  %1645 = vst [vmem:[%s2827_s7 + $0x10] sm:$0xff] %v1581_v9  ;;  %2139 = vrsqrt.f32 %v1457_v0  ;;  %v1402_v1 = vpop.xlane.xlu1 %1401 }
 0x198   : > { %v1400_v52 = vpop.xlane.xlu0 %1399  ;;  %v2128_v42 = vpop.eup %2127  ;;  %v1582_v45 = vmul.f32 %v2126_v23, %v2486_v54  ;;  %v1490_v31 = vmax.f32 %v1402_v1, 1e-24 }
 0x199   : > { %v1489_v30 = vmax.f32 %v1400_v52, 1e-24  ;;  %v1579_v46 = vmul.f32 %v2128_v42, %v2483_v53 }
 0x19a   : > { %1646 = vst [vmem:[%s2827_s7 + $0x18] sm:$0xff] %v1582_v45  ;;  %2141 = vrsqrt.f32 %v1490_v31 }
 0x19b   : > { %v2130_v22 = vpop.eup %2129  ;;  %1643 = vst [vmem:[%s2827_s7] sm:$0xff] %v1579_v46  ;;  %2143 = vrsqrt.f32 %v1489_v30  ;;  %v1334_v13 = vpop.xlane.xlu1 %1333 }
 0x19c   : > { %v1332_v29 = vpop.xlane.xlu0 %1331  ;;  %v2132_v18 = vpop.eup %2131  ;;  %v1614_v21 = vmul.f32 %v2130_v22, %v2496_v60  ;;  %v1456_v34 = vmax.f32 %v1334_v13, 1e-24 }
 0x19d   : > { %v1455_v0 = vmax.f32 %v1332_v29, 1e-24  ;;  %v1611_v54 = vmul.f32 %v2132_v18, %v2489_v57 }
 0x19e   : > { %1678 = vst [vmem:[%s2827_s7 + $0x118] sm:$0xff] %v1614_v21  ;;  %2145 = vrsqrt.f32 %v1456_v34 }
 0x19f   : > { %v2134_v53 = vpop.eup %2133  ;;  %1675 = vst [vmem:[%s2827_s7 + $0x100] sm:$0xff] %v1611_v54  ;;  %2147 = vrsqrt.f32 %v1455_v0  ;;  %v1398_v9 = vpop.xlane.xlu1 %1397 }
 0x1a0   : > { %v1396_v23 = vpop.xlane.xlu0 %1395  ;;  %v2136_v1 = vpop.eup %2135  ;;  %v1612_v52 = vmul.f32 %v2134_v53, %v2501_v2  ;;  %v1488_v42 = vmax.f32 %v1398_v9, 1e-24 }
 0x1a1   : > { %v1487_v45 = vmax.f32 %v1396_v23, 1e-24  ;;  %v1580_v60 = vmul.f32 %v2136_v1, %v2506_v4 }
 0x1a2   : > { %1676 = vst [vmem:[%s2827_s7 + $0x108] sm:$0xff] %v1612_v52  ;;  %2149 = vrsqrt.f32 %v1488_v42 }
 0x1a3   : > { %v2138_v57 = vpop.eup %2137  ;;  %1644 = vst [vmem:[%s2827_s7 + $0x8] sm:$0xff] %v1580_v60  ;;  %2151 = vrsqrt.f32 %v1487_v45  ;;  %v1346_v31 = vpop.xlane.xlu1 %1345 }
 0x1a4   : > { %v1344_v30 = vpop.xlane.xlu0 %1343  ;;  %v2140_v46 = vpop.eup %2139  ;;  %v1586_v22 = vmul.f32 %v2138_v57, %v2513_v11  ;;  %v1462_v13 = vmax.f32 %v1346_v31, 1e-24 }
 0x1a5   : > { %v1461_v29 = vmax.f32 %v1344_v30, 1e-24  ;;  %v1585_v2 = vmul.f32 %v2140_v46, %v2516_v12 }
 0x1a6   : > { %1650 = vst [vmem:[%s2827_s7 + $0x38] sm:$0xff] %v1586_v22  ;;  %2153 = vrsqrt.f32 %v1462_v13 }
 0x1a7   : > { %v2142_v4 = vpop.eup %2141  ;;  %1649 = vst [vmem:[%s2827_s7 + $0x30] sm:$0xff] %v1585_v2  ;;  %2155 = vrsqrt.f32 %v1461_v29  ;;  %v1410_v18 = vpop.xlane.xlu1 %1409 }
 0x1a8   : > { %v1408_v21 = vpop.xlane.xlu0 %1407  ;;  %v2144_v34 = vpop.eup %2143  ;;  %v1618_v0 = vmul.f32 %v2142_v4, %v2528_v20  ;;  %v1494_v54 = vmax.f32 %v1410_v18, 1e-24 }
 0x1a9   : > { %v1493_v53 = vmax.f32 %v1408_v21, 1e-24  ;;  %v1617_v11 = vmul.f32 %v2144_v34, %v2521_v17 }
 0x1aa   : > { %1682 = vst [vmem:[%s2827_s7 + $0x138] sm:$0xff] %v1618_v0  ;;  %2157 = vrsqrt.f32 %v1494_v54 }
 0x1ab   : > { %v2146_v12 = vpop.eup %2145  ;;  %1681 = vst [vmem:[%s2827_s7 + $0x130] sm:$0xff] %v1617_v11  ;;  %2159 = vrsqrt.f32 %v1493_v53  ;;  %v1342_v9 = vpop.xlane.xlu1 %1341 }
 0x1ac   : > { %v1340_v23 = vpop.xlane.xlu0 %1339  ;;  %v2148_v1 = vpop.eup %2147  ;;  %v1584_v52 = vmul.f32 %v2146_v12, %v2544_v28  ;;  %v1460_v42 = vmax.f32 %v1342_v9, 1e-24 }
 0x1ad   : > { %v1459_v45 = vmax.f32 %v1340_v23, 1e-24  ;;  %v1583_v20 = vmul.f32 %v2148_v1, %v2535_v24 }
 0x1ae   : > { %1648 = vst [vmem:[%s2827_s7 + $0x28] sm:$0xff] %v1584_v52  ;;  %2161 = vrsqrt.f32 %v1460_v42 }
 0x1af   : > { %v2150_v17 = vpop.eup %2149  ;;  %1647 = vst [vmem:[%s2827_s7 + $0x20] sm:$0xff] %v1583_v20  ;;  %2163 = vrsqrt.f32 %v1459_v45  ;;  %v1406_v60 = vpop.xlane.xlu1 %1405 }
 0x1b0   : > { %v1404_v57 = vpop.xlane.xlu0 %1403  ;;  %v2152_v31 = vpop.eup %2151  ;;  %v1616_v30 = vmul.f32 %v2150_v17, %v2559_v35  ;;  %v1492_v46 = vmax.f32 %v1406_v60, 1e-24 }
 0x1b1   : > { %v1491_v22 = vmax.f32 %v1404_v57, 1e-24  ;;  %v1615_v28 = vmul.f32 %v2152_v31, %v2562_v36  ;;  %v3046_v31 = vld [vmem:[#allocation7_spill] sm:$0xff] }
 0x1b2   : > { %1680 = vst [vmem:[%s2827_s7 + $0x128] sm:$0xff] %v1616_v30  ;;  %2165 = vrsqrt.f32 %v1492_v46 }
 0x1b3   : > { %v2154_v24 = vpop.eup %2153  ;;  %1679 = vst [vmem:[%s2827_s7 + $0x120] sm:$0xff] %v1615_v28  ;;  %2167 = vrsqrt.f32 %v1491_v22  ;;  %v1354_v13 = vpop.xlane.xlu1 %1353 }
 0x1b4   : > { %v1352_v29 = vpop.xlane.xlu0 %1351  ;;  %v2156_v2 = vpop.eup %2155  ;;  %v1590_v4 = vmul.f32 %v2154_v24, %v2572_v40  ;;  %v1466_v18 = vmax.f32 %v1354_v13, 1e-24 }
 0x1b5   : > { %v1465_v21 = vmax.f32 %v1352_v29, 1e-24  ;;  %v1589_v35 = vmul.f32 %v2156_v2, %v2567_v38 }
 0x1b6   : > { %1654 = vst [vmem:[%s2827_s7 + $0x58] sm:$0xff] %v1590_v4  ;;  %2169 = vrsqrt.f32 %v1466_v18  ;;  %v3048_v4 = vld [vmem:[#allocation9_spill] sm:$0xff] }
 0x1b7   : > { %v2158_v36 = vpop.eup %2157  ;;  %1653 = vst [vmem:[%s2827_s7 + $0x50] sm:$0xff] %v1589_v35  ;;  %2171 = vrsqrt.f32 %v1465_v21  ;;  %v1418_v34 = vpop.xlane.xlu1 %1417 }
 0x1b8   : > { %v1416_v0 = vpop.xlane.xlu0 %1415  ;;  %v2160_v54 = vpop.eup %2159  ;;  %v1622_v53 = vmul.f32 %v2158_v36, %v2586_v55  ;;  %v1498_v11 = vmax.f32 %v1418_v34, 1e-24  ;;  %v3045_v55 = vld [vmem:[#allocation5_spill] sm:$0xff]  ;;  %v3049_v36 = vld [vmem:[#allocation8_spill] sm:$0xff] }
 0x1b9   : > { %v1497_v12 = vmax.f32 %v1416_v0, 1e-24  ;;  %v1621_v40 = vmul.f32 %v2160_v54, %v2581_v49 }
 0x1ba   : > { %1686 = vst [vmem:[%s2827_s7 + $0x158] sm:$0xff] %v1622_v53  ;;  %2173 = vrsqrt.f32 %v1498_v11 }
 0x1bb   : > { %v2162_v38 = vpop.eup %2161  ;;  %1685 = vst [vmem:[%s2827_s7 + $0x150] sm:$0xff] %v1621_v40  ;;  %2175 = vrsqrt.f32 %v1497_v12  ;;  %v1350_v9 = vpop.xlane.xlu1 %1349  ;;  %v3050_v12 = vld [vmem:[#allocation11_spill] sm:$0xff] }
 0x1bc   : > { %v1348_v23 = vpop.xlane.xlu0 %1347  ;;  %v2164_v1 = vpop.eup %2163  ;;  %v1588_v52 = vmul.f32 %v2162_v38, %v2609_v7  ;;  %v1464_v42 = vmax.f32 %v1350_v9, 1e-24  ;;  %v3047_v7 = vld [vmem:[#allocation6_spill] sm:$0xff] }
 0x1bd   : > { %v1463_v45 = vmax.f32 %v1348_v23, 1e-24  ;;  %v1587_v20 = vmul.f32 %v2164_v1, %v3045_v55  ;;  %v3051_v23 = vld [vmem:[#allocation10_spill] sm:$0xff] }
 0x1be   : > { %1652 = vst [vmem:[%s2827_s7 + $0x48] sm:$0xff] %v1588_v52  ;;  %2177 = vrsqrt.f32 %v1464_v42 }
 0x1bf   : > { %v2166_v49 = vpop.eup %2165  ;;  %1651 = vst [vmem:[%s2827_s7 + $0x40] sm:$0xff] %v1587_v20  ;;  %2179 = vrsqrt.f32 %v1463_v45  ;;  %v1414_v17 = vpop.xlane.xlu1 %1413  ;;  %v3052_v20 = vld [vmem:[#allocation13_spill] sm:$0xff] }
 0x1c0   : > { %v1412_v60 = vpop.xlane.xlu0 %1411  ;;  %v2168_v57 = vpop.eup %2167  ;;  %v1620_v30 = vmul.f32 %v2166_v49, %v3046_v31  ;;  %v1496_v46 = vmax.f32 %v1414_v17, 1e-24 }
 0x1c1   : > { %v1495_v22 = vmax.f32 %v1412_v60, 1e-24  ;;  %v1619_v28 = vmul.f32 %v2168_v57, %v3047_v7  ;;  %v3053_v57 = vld [vmem:[#allocation12_spill] sm:$0xff] }
 0x1c2   : > { %1684 = vst [vmem:[%s2827_s7 + $0x148] sm:$0xff] %v1620_v30  ;;  %2181 = vrsqrt.f32 %v1496_v46 }
 0x1c3   : > { %v2170_v24 = vpop.eup %2169  ;;  %1683 = vst [vmem:[%s2827_s7 + $0x140] sm:$0xff] %v1619_v28  ;;  %2183 = vrsqrt.f32 %v1495_v22  ;;  %v1362_v13 = vpop.xlane.xlu1 %1361 }
 0x1c4   : > { %v1360_v29 = vpop.xlane.xlu0 %1359  ;;  %v2172_v2 = vpop.eup %2171  ;;  %v1594_v18 = vmul.f32 %v2170_v24, %v3048_v4  ;;  %v1470_v21 = vmax.f32 %v1362_v13, 1e-24 }
 0x1c5   : > { %v1469_v35 = vmax.f32 %v1360_v29, 1e-24  ;;  %v1593_v34 = vmul.f32 %v2172_v2, %v3049_v36 }
 0x1c6   : > { %1658 = vst [vmem:[%s2827_s7 + $0x78] sm:$0xff] %v1594_v18  ;;  %2185 = vrsqrt.f32 %v1470_v21 }
 0x1c7   : > { %v2174_v0 = vpop.eup %2173  ;;  %1657 = vst [vmem:[%s2827_s7 + $0x70] sm:$0xff] %v1593_v34  ;;  %2187 = vrsqrt.f32 %v1469_v35  ;;  %v1426_v54 = vpop.xlane.xlu1 %1425 }
 0x1c8   : > { %v1424_v53 = vpop.xlane.xlu0 %1423  ;;  %v2176_v11 = vpop.eup %2175  ;;  %v1626_v40 = vmul.f32 %v2174_v0, %v3050_v12  ;;  %v1502_v38 = vmax.f32 %v1426_v54, 1e-24 }
 0x1c9   : > { %v1501_v9 = vmax.f32 %v1424_v53, 1e-24  ;;  %v1625_v1 = vmul.f32 %v2176_v11, %v3051_v23 }
 0x1ca   : > { %1690 = vst [vmem:[%s2827_s7 + $0x178] sm:$0xff] %v1626_v40  ;;  %2189 = vrsqrt.f32 %v1502_v38 }
 0x1cb   : > { %v2178_v52 = vpop.eup %2177  ;;  %1689 = vst [vmem:[%s2827_s7 + $0x170] sm:$0xff] %v1625_v1  ;;  %2191 = vrsqrt.f32 %v1501_v9  ;;  %v1358_v42 = vpop.xlane.xlu1 %1357 }
 0x1cc   : > { %v1356_v45 = vpop.xlane.xlu0 %1355  ;;  %v2180_v55 = vpop.eup %2179  ;;  %v1592_v49 = vmul.f32 %v2178_v52, %v3052_v20  ;;  %v1468_v17 = vmax.f32 %v1358_v42, 1e-24 }
 0x1cd   : > { %v1467_v60 = vmax.f32 %v1356_v45, 1e-24  ;;  %v1591_v31 = vmul.f32 %v2180_v55, %v3053_v57 }
 0x1ce   : > { %1656 = vst [vmem:[%s2827_s7 + $0x68] sm:$0xff] %v1592_v49  ;;  %2193 = vrsqrt.f32 %v1468_v17 }
 0x1cf   : > { %v2182_v30 = vpop.eup %2181  ;;  %1655 = vst [vmem:[%s2827_s7 + $0x60] sm:$0xff] %v1591_v31  ;;  %2195 = vrsqrt.f32 %v1467_v60  ;;  %v1422_v46 = vpop.xlane.xlu1 %1421 }
 0x1d0   : > { %v1420_v22 = vpop.xlane.xlu0 %1419  ;;  %v2184_v7 = vpop.eup %2183  ;;  %v1624_v28 = vmul.f32 %v2182_v30, %v2728_v32  ;;  %v1500_v24 = vmax.f32 %v1422_v46, 1e-24 }
 0x1d1   : > { %v1499_v13 = vmax.f32 %v1420_v22, 1e-24  ;;  %v1623_v29 = vmul.f32 %v2184_v7, %v2717_v19 }
 0x1d2   : > { %1688 = vst [vmem:[%s2827_s7 + $0x168] sm:$0xff] %v1624_v28  ;;  %2197 = vrsqrt.f32 %v1500_v24 }
 0x1d3   : > { %v2186_v2 = vpop.eup %2185  ;;  %1687 = vst [vmem:[%s2827_s7 + $0x160] sm:$0xff] %v1623_v29  ;;  %2199 = vrsqrt.f32 %v1499_v13  ;;  %v1370_v4 = vpop.xlane.xlu1 %1369 }
 0x1d4   : > { %v1368_v18 = vpop.xlane.xlu0 %1367  ;;  %v2188_v21 = vpop.eup %2187  ;;  %v1598_v35 = vmul.f32 %v2186_v2, %v2604_v5  ;;  %v1474_v36 = vmax.f32 %v1370_v4, 1e-24 }
 0x1d5   : > { %v1473_v34 = vmax.f32 %v1368_v18, 1e-24  ;;  %v1597_v32 = vmul.f32 %v2188_v21, %v2589_v59 }
 0x1d6   : > { %1662 = vst [vmem:[%s2827_s7 + $0x98] sm:$0xff] %v1598_v35  ;;  %2201 = vrsqrt.f32 %v1474_v36 }
 0x1d7   : > { %v2190_v19 = vpop.eup %2189  ;;  %1661 = vst [vmem:[%s2827_s7 + $0x90] sm:$0xff] %v1597_v32  ;;  %2203 = vrsqrt.f32 %v1473_v34  ;;  %v1434_v0 = vpop.xlane.xlu1 %1433 }
 0x1d8   : > { %v1432_v54 = vpop.xlane.xlu0 %1431  ;;  %v2192_v53 = vpop.eup %2191  ;;  %v1630_v11 = vmul.f32 %v2190_v19, %v2612_v10  ;;  %v1506_v12 = vmax.f32 %v1434_v0, 1e-24 }
 0x1d9   : > { %v1505_v40 = vmax.f32 %v1432_v54, 1e-24  ;;  %v1629_v5 = vmul.f32 %v2192_v53, %v2592_v61 }
 0x1da   : > { %1694 = vst [vmem:[%s2827_s7 + $0x198] sm:$0xff] %v1630_v11  ;;  %2205 = vrsqrt.f32 %v1506_v12 }
 0x1db   : > { %v2194_v59 = vpop.eup %2193  ;;  %1693 = vst [vmem:[%s2827_s7 + $0x190] sm:$0xff] %v1629_v5  ;;  %2207 = vrsqrt.f32 %v1505_v40  ;;  %v1366_v38 = vpop.xlane.xlu1 %1365 }
 0x1dc   : > { %v1364_v9 = vpop.xlane.xlu0 %1363  ;;  %v2196_v23 = vpop.eup %2195  ;;  %v1596_v1 = vmul.f32 %v2194_v59, %v2617_v15  ;;  %v1472_v52 = vmax.f32 %v1366_v38, 1e-24 }
 0x1dd   : > { %v1471_v42 = vmax.f32 %v1364_v9, 1e-24  ;;  %v1595_v10 = vmul.f32 %v2196_v23, %v2595_v62 }
 0x1de   : > { %1660 = vst [vmem:[%s2827_s7 + $0x88] sm:$0xff] %v1596_v1  ;;  %2209 = vrsqrt.f32 %v1472_v52 }
 0x1df   : > { %v2198_v61 = vpop.eup %2197  ;;  %1659 = vst [vmem:[%s2827_s7 + $0x80] sm:$0xff] %v1595_v10  ;;  %2211 = vrsqrt.f32 %v1471_v42  ;;  %v1430_v45 = vpop.xlane.xlu1 %1429 }
 0x1e0   : > { %v1428_v55 = vpop.xlane.xlu0 %1427  ;;  %v2200_v20 = vpop.eup %2199  ;;  %v1628_v49 = vmul.f32 %v2198_v61, %v2626_v26  ;;  %v1504_v17 = vmax.f32 %v1430_v45, 1e-24 }
 0x1e1   : > { %v1503_v60 = vmax.f32 %v1428_v55, 1e-24  ;;  %v1627_v15 = vmul.f32 %v2200_v20, %v2598_v63 }
 0x1e2   : > { %1692 = vst [vmem:[%s2827_s7 + $0x188] sm:$0xff] %v1628_v49  ;;  %2213 = vrsqrt.f32 %v1504_v17 }
 0x1e3   : > { %v2202_v62 = vpop.eup %2201  ;;  %1691 = vst [vmem:[%s2827_s7 + $0x180] sm:$0xff] %v1627_v15  ;;  %2215 = vrsqrt.f32 %v1503_v60  ;;  %v1378_v57 = vpop.xlane.xlu1 %1377 }
 0x1e4   : > { %v1376_v31 = vpop.xlane.xlu0 %1375  ;;  %v2204_v30 = vpop.eup %2203  ;;  %v1602_v46 = vmul.f32 %v2202_v62, %v2651_v51  ;;  %v1478_v22 = vmax.f32 %v1378_v57, 1e-24 }
 0x1e5   : > { %v1477_v7 = vmax.f32 %v1376_v31, 1e-24  ;;  %v1601_v26 = vmul.f32 %v2204_v30, %v2635_v43 }
 0x1e6   : > { %1666 = vst [vmem:[%s2827_s7 + $0xb8] sm:$0xff] %v1602_v46  ;;  %2217 = vrsqrt.f32 %v1478_v22 }
 0x1e7   : > { %v2206_v63 = vpop.eup %2205  ;;  %1665 = vst [vmem:[%s2827_s7 + $0xb0] sm:$0xff] %v1601_v26  ;;  %2219 = vrsqrt.f32 %v1477_v7  ;;  %v1442_v28 = vpop.xlane.xlu1 %1441 }
 0x1e8   : > { %v1440_v24 = vpop.xlane.xlu0 %1439  ;;  %v2208_v13 = vpop.eup %2207  ;;  %v1634_v29 = vmul.f32 %v2206_v63, %v2660_v3  ;;  %v1510_v2 = vmax.f32 %v1442_v28, 1e-24 }
 0x1e9   : > { %v1509_v4 = vmax.f32 %v1440_v24, 1e-24  ;;  %v1633_v51 = vmul.f32 %v2208_v13, %v2638_v14  ;;  %v3054_v24 = vld [vmem:[#allocation15_spill] sm:$0xff] }
 0x1ea   : > { %1698 = vst [vmem:[%s2827_s7 + $0x1b8] sm:$0xff] %v1634_v29  ;;  %2221 = vrsqrt.f32 %v1510_v2 }
 0x1eb   : > { %v2210_v43 = vpop.eup %2209  ;;  %1697 = vst [vmem:[%s2827_s7 + $0x1b0] sm:$0xff] %v1633_v51  ;;  %2223 = vrsqrt.f32 %v1509_v4  ;;  %v1374_v18 = vpop.xlane.xlu1 %1373  ;;  %v3056_v51 = vld [vmem:[#allocation16_spill] sm:$0xff] }
 0x1ec   : > { %v1372_v21 = vpop.xlane.xlu0 %1371  ;;  %v2212_v35 = vpop.eup %2211  ;;  %v1600_v36 = vmul.f32 %v2210_v43, %v2665_v6  ;;  %v1476_v34 = vmax.f32 %v1374_v18, 1e-24  ;;  %v3057_v18 = vld [vmem:[#allocation17_spill] sm:$0xff] }
 0x1ed   : > { %v1475_v32 = vmax.f32 %v1372_v21, 1e-24  ;;  %v1599_v3 = vmul.f32 %v2212_v35, %v2641_v44  ;;  %v3058_v35 = vld [vmem:[#allocation14_spill] sm:$0xff] }
 0x1ee   : > { %1664 = vst [vmem:[%s2827_s7 + $0xa8] sm:$0xff] %v1600_v36  ;;  %2225 = vrsqrt.f32 %v1476_v34 }
 0x1ef   : > { %v2214_v14 = vpop.eup %2213  ;;  %1663 = vst [vmem:[%s2827_s7 + $0xa0] sm:$0xff] %v1599_v3  ;;  %2227 = vrsqrt.f32 %v1475_v32  ;;  %v1438_v19 = vpop.xlane.xlu1 %1437 }
 0x1f0   : > { %v1436_v0 = vpop.xlane.xlu0 %1435  ;;  %v2216_v54 = vpop.eup %2215  ;;  %v1632_v53 = vmul.f32 %v2214_v14, %v2674_v16  ;;  %v1508_v11 = vmax.f32 %v1438_v19, 1e-24 }
 0x1f1   : > { %v1507_v12 = vmax.f32 %v1436_v0, 1e-24  ;;  %v1631_v6 = vmul.f32 %v2216_v54, %v2644_v47 }
 0x1f2   : > { %1696 = vst [vmem:[%s2827_s7 + $0x1a8] sm:$0xff] %v1632_v53  ;;  %2229 = vrsqrt.f32 %v1508_v11 }
 0x1f3   : > { %v2218_v44 = vpop.eup %2217  ;;  %1695 = vst [vmem:[%s2827_s7 + $0x1a0] sm:$0xff] %v1631_v6  ;;  %2231 = vrsqrt.f32 %v1507_v12  ;;  %v1386_v40 = vpop.xlane.xlu1 %1385 }
 0x1f4   : > { %v1384_v5 = vpop.xlane.xlu0 %1383  ;;  %v2220_v59 = vpop.eup %2219  ;;  %v1606_v38 = vmul.f32 %v2218_v44, %v2699_v58  ;;  %v1482_v9 = vmax.f32 %v1386_v40, 1e-24 }
 0x1f5   : > { %v1481_v23 = vmax.f32 %v1384_v5, 1e-24  ;;  %v1605_v16 = vmul.f32 %v2220_v59, %v2683_v41 }
 0x1f6   : > { %1670 = vst [vmem:[%s2827_s7 + $0xd8] sm:$0xff] %v1606_v38  ;;  %2233 = vrsqrt.f32 %v1482_v9 }
 0x1f7   : > { %v2222_v47 = vpop.eup %2221  ;;  %1669 = vst [vmem:[%s2827_s7 + $0xd0] sm:$0xff] %v1605_v16  ;;  %2235 = vrsqrt.f32 %v1481_v23  ;;  %v1382_v1 = vpop.xlane.xlu1 %1381 }
 0x1f8   : > { %v1380_v52 = vpop.xlane.xlu0 %1379  ;;  %v2224_v42 = vpop.eup %2223  ;;  %v1638_v10 = vmul.f32 %v2222_v47, %v2708_v56  ;;  %v1480_v61 = vmax.f32 %v1382_v1, 1e-24 }
 0x1f9   : > { %v1479_v45 = vmax.f32 %v1380_v52, 1e-24  ;;  %v1637_v58 = vmul.f32 %v2224_v42, %v2686_v25 }
 0x1fa   : > { %1702 = vst [vmem:[%s2827_s7 + $0x1d8] sm:$0xff] %v1638_v10  ;;  %2237 = vrsqrt.f32 %v1480_v61 }
 0x1fb   : > { %v2226_v41 = vpop.eup %2225  ;;  %1701 = vst [vmem:[%s2827_s7 + $0x1d0] sm:$0xff] %v1637_v58  ;;  %2239 = vrsqrt.f32 %v1479_v45  ;;  %v1446_v55 = vpop.xlane.xlu1 %1445 }
 0x1fc   : > { %v1444_v20 = vpop.xlane.xlu0 %1443  ;;  %v2228_v49 = vpop.eup %2227  ;;  %v1604_v17 = vmul.f32 %v2226_v41, %v2713_v8  ;;  %v1512_v60 = vmax.f32 %v1446_v55, 1e-24 }
 0x1fd   : > { %v1511_v15 = vmax.f32 %v1444_v20, 1e-24  ;;  %v1603_v56 = vmul.f32 %v2228_v49, %v2689_v48 }
 0x1fe   : > { %1668 = vst [vmem:[%s2827_s7 + $0xc8] sm:$0xff] %v1604_v17  ;;  %2241 = vrsqrt.f32 %v1512_v60 }
 0x1ff   : > { %v2230_v25 = vpop.eup %2229  ;;  %1667 = vst [vmem:[%s2827_s7 + $0xc0] sm:$0xff] %v1603_v56  ;;  %2243 = vrsqrt.f32 %v1511_v15  ;;  %v1450_v62 = vpop.xlane.xlu1 %1449 }
 0x200   : > { %v1448_v57 = vpop.xlane.xlu0 %1447  ;;  %v2232_v31 = vpop.eup %2231  ;;  %v1636_v30 = vmul.f32 %v2230_v25, %v2720_v37  ;;  %v1514_v46 = vmax.f32 %v1450_v62, 1e-24 }
 0x201   : > { %v1513_v8 = vmax.f32 %v1448_v57, 1e-24  ;;  %v1635_v22 = vmul.f32 %v2232_v31, %v2692_v50 }
 0x202   : > { %1700 = vst [vmem:[%s2827_s7 + $0x1c8] sm:$0xff] %v1636_v30  ;;  %2245 = vrsqrt.f32 %v1514_v46 }
 0x203   : > { %v2234_v48 = vpop.eup %2233  ;;  %1699 = vst [vmem:[%s2827_s7 + $0x1c0] sm:$0xff] %v1635_v22  ;;  %2247 = vrsqrt.f32 %v1513_v8 }
 0x204   : > { %v2236_v7 = vpop.eup %2235  ;;  %v1610_v26 = vmul.f32 %v2234_v48, %v2743_v39  ;;  %v3055_v39 = vld [vmem:[#allocation18_spill] sm:$0xff] }
 0x205   : > { %v1609_v63 = vmul.f32 %v2236_v7, %v2731_v27 }
 0x206   : > { %1674 = vst [vmem:[%s2827_s7 + $0xf8] sm:$0xff] %v1610_v26 }
 0x207   : > { %v2238_v37 = vpop.eup %2237  ;;  %1673 = vst [vmem:[%s2827_s7 + $0xf0] sm:$0xff] %v1609_v63 }
 0x208   : > { %v2240_v28 = vpop.eup %2239  ;;  %v1608_v50 = vmul.f32 %v2238_v37, %v2753_v33 }
 0x209   : > { %v1607_v13 = vmul.f32 %v2240_v28, %v3054_v24 }
 0x20a   : > { %1672 = vst [vmem:[%s2827_s7 + $0xe8] sm:$0xff] %v1608_v50 }
 0x20b   : > { %v2242_v29 = vpop.eup %2241  ;;  %1671 = vst [vmem:[%s2827_s7 + $0xe0] sm:$0xff] %v1607_v13 }
 0x20c   : > { %v2244_v2 = vpop.eup %2243  ;;  %v1640_v4 = vmul.f32 %v2242_v29, %v3055_v39 }
 0x20d   : > { %v1639_v27 = vmul.f32 %v2244_v2, %v3056_v51 }
 0x20e   : > { %1704 = vst [vmem:[%s2827_s7 + $0x1e8] sm:$0xff] %v1640_v4 }
 0x20f   : > { %v2246_v43 = vpop.eup %2245  ;;  %1703 = vst [vmem:[%s2827_s7 + $0x1e0] sm:$0xff] %v1639_v27 }
 0x210   : > { %v2248_v33 = vpop.eup %2247  ;;  %v1642_v21 = vmul.f32 %v2246_v43, %v3057_v18 }
 0x211   : > { %v1641_v36 = vmul.f32 %v2248_v33, %v3058_v35 }
 0x212   : > { %1706 = vst [vmem:[%s2827_s7 + $0x1f8] sm:$0xff] %v1642_v21 }
 0x213   : > { %1705 = vst [vmem:[%s2827_s7 + $0x1f0] sm:$0xff] %v1641_v36 }
 0x214   : > { %2262 = shalt.err (!%p2259_p5)
}
 0x215   : > { %s2263_s27 = scalar_lea.hbm %s2957_s18, 8192  ;;  %s2267_s30 = scalar_lea.hbm %s3014_s3, 16384 }
 0x216   : > { %p2264_p6 = scmp.ne.s32.totalorder %s2957_s18, %s2263_s27  ;;  %p2268_p10 = scmp.lt.s32.totalorder %s2957_s18, %s3014_s3 }
 0x217   : > { %p2269_p11 = scmp.lt.s32.totalorder %s2267_s30, %s2263_s27 }
 0x218   : > { %p2265_p7 = pnand %p2264_p6, %p2390_p4 }
 0x219   : > { %p2270_p12 = por %p2269_p11, %p2268_p10 }
 0x21a   : > { %p2266_p9 = pneg %p2265_p7 }
 0x21c   : > { %p2271_p13 = pnand %p2270_p12, %p2266_p9 }
 0x21e   : > { %2274 = shalt.err (!%p2271_p13)
}
 0x21f   : > { %s2328_s6 = smov 128   ;;  %s2329_s7 = smov 8  }
 0x220   : > { %2023 = dma.vmem_to_hbm [thread:$0]  (%p2390_p4), %s2959_s9, 8192, %s2957_s18, %s2966_s15, %s2328_s6, %s2328_s6, %s2329_s7  }
 0x221 PF: > { %p2029_p0 = scmp.ge.s32.totalorder %s2325_s17, 2  ;;  %s1737_s8 = sand.u32 1, %s2305_s12  }
 0x222   : > { %s1738_s10 = scalar_lea.sflag [#allocation3], %s1737_s8 }
 0x223   : > { %p2026_p1 = pnand %p2029_p0, %p2397_p8 }
 0x225   : > { %p2027_p2 = pneg %p2026_p1 }
 0x227   : > { %2300 = dma.done.wait (%p2027_p2), %s1738_s10, 8192  }
 0x228   : > { %2302 = vsyncadd (%p2027_p2), %s1738_s10, 4294959104  ;;  %s16_s17 = sadd.s32 1, %s2325_s17   ;;  %s3059_s12 = smov %s2309_s13 }
 0x229   : > { %p13_p3 = scmp.ge.s32.totalorder %s16_s17, 4   ;;  %s3060_s13 = smov %s2313_s14 }
 0x22a   : > { %s3061_s14 = smov %s2403_s25  ;;  %s3062_s15 = smov %s2321_s16 }
 0x22b   : > { %s3063_s16 = smov %s3065_s20  ;;  %15 = sbr.rel (!%p13_p3) target bundleno = 4 (0x4), region = 81 }
 0x230   :  { %1743 = vsyncpa [#allocation3], 1 }
 0x231   :  { %1745 = vsyncpa [#allocation3 + $0x1], 1 }

</bundles_post_ra>
